<compile_context>
chip_gen: v6e
topology: v6e:2x2x1
jax: 0.10.0
libtpu: 0.0.40
codegen_flags: <defaults>
</compile_context>

<pallas_src>
import numpy as np

import jax
import jax.numpy as jnp
from jax.experimental import pallas as pl
from jax.experimental.pallas import tpu as pltpu


C1, C2 = 16, 32            # conv1 / conv2 output channels
W1, W2 = 28, 14            # spatial widths at conv1 / conv2
NFC1, NOUT = 128, 10
LANES1 = W1 * C1           # 448  conv1 slab width (W-uncompacted)
LANES2 = W2 * C2           # 448  conv2 slab width


# ---------------------------------------------------------------------------
# The fused kernel: conv1+relu+pool1 -> conv2+relu+pool2 -> fc1+relu -> fc2
# ---------------------------------------------------------------------------
def _fused_cnn_kernel(xph_ref, w1t_ref, b1_ref, w2t_ref, b2_ref,
                      wfc1_ref, bfc1_ref, wfc2_ref, bfc2_ref,
                      out_ref, qe_scr, qo_scr):
    bt = xph_ref.shape[0]
    f32 = jnp.float32

    def mm(a, w):  # a: (bt, 7, K) value, w: (K, N) value -> (bt, 7, N)
        r = jnp.dot(a.reshape(bt * 7, a.shape[-1]), w,
                    preferred_element_type=f32)
        return r.reshape(bt, 7, w.shape[-1])

    def wpair_max(u, c):
        # max of adjacent c-wide lane blocks; result is valid at even blocks.
        n = u.shape[-1]
        return jnp.maximum(u, pltpu.roll(u, shift=n - c, axis=2))

    # ---- conv1 + ReLU, computed in 4 output-row phases (row = 4r + p) ------
    xph = xph_ref[...]                 # (bt, 4, 8, 30): [b, q, r, :] = xpad row 4r+q
    b1 = b1_ref[...]                   # (1, 448)

    def xrows(p, dy):                  # padded-input rows 4r + p + dy, r = 0..6
        q = p + dy
        if q <= 3:
            return xph[:, q, 0:7, :]
        return xph[:, q - 4, 1:8, :]

    c1 = []
    for p in range(4):
        acc = (mm(xrows(p, 0), w1t_ref[0]) +
               mm(xrows(p, 1), w1t_ref[1]) +
               mm(xrows(p, 2), w1t_ref[2]) + b1)
        c1.append(jnp.maximum(acc, 0.0))

    # ---- maxpool1: H-pair max is elementwise across phases; W-pair via roll -
    q1e = wpair_max(jnp.maximum(c1[0], c1[1]), C1)   # pool1 rows 0,2,...,12
    q1o = wpair_max(jnp.maximum(c1[2], c1[3]), C1)   # pool1 rows 1,3,...,13

    # Zero-padded row planes for conv2's 3-tap H window.
    zrow = jnp.zeros((bt, 1, LANES1), f32)
    qe_scr[:, 0:7, :] = q1e
    qe_scr[:, 7:8, :] = zrow
    qo_scr[:, 1:8, :] = q1o
    qo_scr[:, 0:1, :] = zrow
    qe0 = qe_scr[:, 0:7, :]
    qe1 = qe_scr[:, 1:8, :]
    qo0 = qo_scr[:, 0:7, :]
    qo1 = qo_scr[:, 1:8, :]

    # ---- conv2 + ReLU in even/odd output-row phases --------------------------
    b2 = b2_ref[...]                   # (1, 448)
    c2e = jnp.maximum(mm(qo0, w2t_ref[0]) + mm(qe0, w2t_ref[1]) +
                      mm(qo1, w2t_ref[2]) + b2, 0.0)
    c2o = jnp.maximum(mm(qe0, w2t_ref[0]) + mm(qo1, w2t_ref[1]) +
                      mm(qe1, w2t_ref[2]) + b2, 0.0)

    # ---- maxpool2 ------------------------------------------------------------
    p2 = wpair_max(jnp.maximum(c2e, c2o), C2)        # (bt, 7, 448), even blocks valid

    # ---- fc1 + ReLU: 7 per-row dots; W compaction folded into the weights ----
    acc = jnp.zeros((bt, NFC1), f32)
    for r in range(7):
        acc = acc + jnp.dot(p2[:, r, :], wfc1_ref[r], preferred_element_type=f32)
    hfc = jnp.maximum(acc + bfc1_ref[...], 0.0)

    # ---- fc2 (output padded to 128 lanes -> lane-dense store) ----------------
    out = jnp.dot(hfc, wfc2_ref[...], preferred_element_type=f32) + bfc2_ref[...]
    out_ref[...] = out.astype(out_ref.dtype)


# ---------------------------------------------------------------------------
# Host-side glue: input row-phase planes + one-time weight packing
# ---------------------------------------------------------------------------
def _preprocess(x_nchw):
    """(B,1,28,28) -> (B,4,8,30): [b, q, r, :] = zero-padded image row 4r+q."""
    b = x_nchw.shape[0]
    xp = jnp.pad(x_nchw[:, 0].astype(jnp.float32), ((0, 0), (1, 1), (1, 1)))
    xp = jnp.pad(xp, ((0, 0), (0, 2), (0, 0)))            # (B, 32, 30)
    return xp.reshape(b, 8, 4, 30).transpose(0, 2, 1, 3)


def pack_params(params):
    """One-time pre-packing of the PyTorch-layout weights into kernel layout."""
    w1 = np.asarray(params["conv1_w"], np.float32)   # (16, 1, 3, 3)
    b1 = np.asarray(params["conv1_b"], np.float32)
    w2 = np.asarray(params["conv2_w"], np.float32)   # (32, 16, 3, 3)
    b2 = np.asarray(params["conv2_b"], np.float32)
    f1 = np.asarray(params["fc1_w"], np.float32)     # (128, 1568)
    g1 = np.asarray(params["fc1_b"], np.float32)
    f2 = np.asarray(params["fc2_w"], np.float32)     # (10, 128)
    g2 = np.asarray(params["fc2_b"], np.float32)

    # conv1 banded weight: (3, 30, 448); out lane = w*16 + o, in lane wi = w + dx.
    w1t = np.zeros((3, 30, LANES1), np.float32)
    for dy in range(3):
        for dx in range(3):
            for w in range(W1):
                w1t[dy, w + dx, w * C1:(w + 1) * C1] = w1[:, 0, dy, dx]
    b1s = np.tile(b1, W1).reshape(1, LANES1)

    # conv2 banded weight: (3, 448, 448); in lane = (2*w2i)*16 + ci (valid pooled
    # values sit at even 16-lane blocks of the W-uncompacted slab), out lane =
    # w2o*32 + o.  Out-of-range taps (W "same" padding) and odd input blocks
    # are simply left zero.
    w2t = np.zeros((3, LANES1, LANES2), np.float32)
    for dy in range(3):
        for w2o in range(W2):
            for dx in range(3):
                w2i = w2o + dx - 1
                if 0 <= w2i < W2:
                    w2t[dy, (2 * w2i) * C1:(2 * w2i) * C1 + C1,
                        w2o * C2:(w2o + 1) * C2] = w2[:, :, dy, dx].T
    b2s = np.tile(b2, W2).reshape(1, LANES2)

    # fc1: (7, 448, 128), permuted to torch's NCHW flatten (o*49 + r*7 + w3);
    # only even 32-lane blocks of the pool2 slab are read (odd blocks zero).
    f1r = f1.reshape(NFC1, C2, 7, 7)                 # (n, o, r, w3)
    z = np.zeros((7, W2, C2, NFC1), np.float32)
    z[:, 0::2, :, :] = np.transpose(f1r, (2, 3, 1, 0))   # (r, w3, o, n)
    wfc1 = z.reshape(7, LANES2, NFC1)
    bfc1 = g1.reshape(1, NFC1)

    # fc2 padded to 128 output lanes (lane-dense store); sliced to 10 outside.
    wfc2 = np.zeros((NFC1, 128), np.float32)
    wfc2[:, :NOUT] = f2.T
    bfc2 = np.zeros((1, 128), np.float32)
    bfc2[0, :NOUT] = g2

    return {k: jnp.asarray(v) for k, v in dict(
        w1t=w1t, b1s=b1s, w2t=w2t, b2s=b2s,
        wfc1=wfc1, bfc1=bfc1, wfc2=wfc2, bfc2=bfc2).items()}


# ---------------------------------------------------------------------------
# Forward pass
# ---------------------------------------------------------------------------
def custom_model_forward(x_nchw, packed):
    b = x_nchw.shape[0]
    bt = b if b <= 8 else 8
    bp = ((b + bt - 1) // bt) * bt
    x = x_nchw.astype(jnp.float32)
    if bp != b:
        x = jnp.pad(x, ((0, bp - b), (0, 0), (0, 0), (0, 0)))
    xph = _preprocess(x)                              # (bp, 4, 8, 30)

    out = pl.pallas_call(
        _fused_cnn_kernel,
        out_shape=jax.ShapeDtypeStruct((bp, 128), jnp.float32),
        grid=(bp // bt,),
        in_specs=[
            pl.BlockSpec((bt, 4, 8, 30), lambda i: (i, 0, 0, 0)),
            pl.BlockSpec((3, 30, LANES1), lambda i: (0, 0, 0)),
            pl.BlockSpec((1, LANES1), lambda i: (0, 0)),
            pl.BlockSpec((3, LANES1, LANES2), lambda i: (0, 0, 0)),
            pl.BlockSpec((1, LANES2), lambda i: (0, 0)),
            pl.BlockSpec((7, LANES2, NFC1), lambda i: (0, 0, 0)),
            pl.BlockSpec((1, NFC1), lambda i: (0, 0)),
            pl.BlockSpec((NFC1, 128), lambda i: (0, 0)),
            pl.BlockSpec((1, 128), lambda i: (0, 0)),
        ],
        out_specs=pl.BlockSpec((bt, 128), lambda i: (i, 0)),
        scratch_shapes=[pltpu.VMEM((bt, 8, LANES1), jnp.float32),
                        pltpu.VMEM((bt, 8, LANES1), jnp.float32)],
        compiler_params=pltpu.CompilerParams(
            dimension_semantics=("parallel",),
            vmem_limit_bytes=32 * 1024 * 1024),
    )(xph, packed["w1t"], packed["b1s"], packed["w2t"], packed["b2s"],
      packed["wfc1"], packed["bfc1"], packed["wfc2"], packed["bfc2"])
    return out[:b, :NOUT]


# ---------------------------------------------------------------------------
# Pure-JAX reference (correctness check only)
# ---------------------------------------------------------------------------
def _reference_forward(x_nchw, params):
    hi = jax.lax.Precision.HIGHEST
    x = x_nchw.astype(jnp.float32)

    def conv(v, w, b):
        y = jax.lax.conv_general_dilated(
            v, w, window_strides=(1, 1), padding=((1, 1), (1, 1)),
            dimension_numbers=("NCHW", "OIHW", "NCHW"), precision=hi)
        return y + b.reshape(1, -1, 1, 1)

    def pool(v):
        return jax.lax.reduce_window(v, -jnp.inf, jax.lax.max,
                                     (1, 1, 2, 2), (1, 1, 2, 2), "VALID")

    x = pool(jnp.maximum(conv(x, params["conv1_w"], params["conv1_b"]), 0.0))
    x = pool(jnp.maximum(conv(x, params["conv2_w"], params["conv2_b"]), 0.0))
    x = x.reshape(x.shape[0], -1)
    x = jnp.maximum(jnp.dot(x, params["fc1_w"].T, precision=hi) + params["fc1_b"], 0.0)
    return jnp.dot(x, params["fc2_w"].T, precision=hi) + params["fc2_b"]


def init_params(key):
    ks = jax.random.split(key, 8)
    s = 0.05
    return {
        # PyTorch layouts: Conv2d (out_c, in_c, kh, kw); Linear (out, in).
        "conv1_w": s * jax.random.normal(ks[0], (C1, 1, 3, 3), jnp.float32),
        "conv1_b": s * jax.random.normal(ks[1], (C1,), jnp.float32),
        "conv2_w": s * jax.random.normal(ks[2], (C2, C1, 3, 3), jnp.float32),
        "conv2_b": s * jax.random.normal(ks[3], (C2,), jnp.float32),
        "fc1_w": s * jax.random.normal(ks[4], (NFC1, 7 * 7 * C2), jnp.float32),
        "fc1_b": s * jax.random.normal(ks[5], (NFC1,), jnp.float32),
        "fc2_w": s * jax.random.normal(ks[6], (NOUT, NFC1), jnp.float32),
        "fc2_b": s * jax.random.normal(ks[7], (NOUT,), jnp.float32),
    }


if __name__ == "__main__":
    key = jax.random.PRNGKey(0)
    pkey, xkey = jax.random.split(key)
    params = init_params(pkey)
    packed = pack_params(params)               # one-time weight packing
    # MNIST-shaped input (28x28 required by fc1 = 7*7*32); small batch of 2.
    x = jax.random.normal(xkey, (2, 1, 28, 28), jnp.float32)

    fwd = jax.jit(custom_model_forward)
    out = jax.block_until_ready(fwd(x, packed))
    assert out.shape == (2, NOUT), out.shape

    ref = jax.block_until_ready(_reference_forward(x, params))
    err = float(jnp.max(jnp.abs(out - ref)))
    assert jnp.allclose(out, ref, atol=3e-3, rtol=3e-3), err

    print("KERNEL_OK")
</pallas_src>

<mosaic_0001>
module attributes {stable_mosaic.version = 11 : i64} {
  func.func @_fused_cnn_kernel(%arg0: i32, %arg1: memref<2x4x8x30xf32, #tpu.memory_space<vmem>>, %arg2: memref<3x30x448xf32, #tpu.memory_space<vmem>>, %arg3: memref<1x448xf32, #tpu.memory_space<vmem>>, %arg4: memref<3x448x448xf32, #tpu.memory_space<vmem>>, %arg5: memref<1x448xf32, #tpu.memory_space<vmem>>, %arg6: memref<7x448x128xf32, #tpu.memory_space<vmem>>, %arg7: memref<1x128xf32, #tpu.memory_space<vmem>>, %arg8: memref<128x128xf32, #tpu.memory_space<vmem>>, %arg9: memref<1x128xf32, #tpu.memory_space<vmem>>, %arg10: memref<2x128xf32, #tpu.memory_space<vmem>>, %arg11: memref<2x8x448xf32, #tpu.memory_space<vmem>>, %arg12: memref<2x8x448xf32, #tpu.memory_space<vmem>>) attributes {dimension_semantics = [#tpu.dimension_semantics<parallel>], iteration_bounds = array<i64: 1>, scalar_prefetch = 0 : i64, scratch_operands = 2 : i64, tpu.core_type = #tpu.core_type<tc>, window_params = [{transform_indices = @transform_0, window_bounds = array<i64: 2, 4, 8, 30>}, {pipeline_mode = #tpu.pipeline_mode<synchronous>, transform_indices = @transform_1, window_bounds = array<i64: 3, 30, 448>}, {pipeline_mode = #tpu.pipeline_mode<synchronous>, transform_indices = @transform_2, window_bounds = array<i64: 1, 448>}, {pipeline_mode = #tpu.pipeline_mode<synchronous>, transform_indices = @transform_3, window_bounds = array<i64: 3, 448, 448>}, {pipeline_mode = #tpu.pipeline_mode<synchronous>, transform_indices = @transform_4, window_bounds = array<i64: 1, 448>}, {pipeline_mode = #tpu.pipeline_mode<synchronous>, transform_indices = @transform_5, window_bounds = array<i64: 7, 448, 128>}, {pipeline_mode = #tpu.pipeline_mode<synchronous>, transform_indices = @transform_6, window_bounds = array<i64: 1, 128>}, {pipeline_mode = #tpu.pipeline_mode<synchronous>, transform_indices = @transform_7, window_bounds = array<i64: 128, 128>}, {pipeline_mode = #tpu.pipeline_mode<synchronous>, transform_indices = @transform_8, window_bounds = array<i64: 1, 128>}, {transform_indices = @transform_9, window_bounds = array<i64: 2, 128>}]} {
    %c0 = arith.constant 0 : index
    %c0_0 = arith.constant 0 : index
    %c0_1 = arith.constant 0 : index
    %c0_2 = arith.constant 0 : index
    %0 = vector.load %arg1[%c0, %c0_0, %c0_1, %c0_2] : memref<2x4x8x30xf32, #tpu.memory_space<vmem>>, vector<2x4x8x30xf32>
    %c0_3 = arith.constant 0 : index
    %c0_4 = arith.constant 0 : index
    %1 = vector.load %arg3[%c0_3, %c0_4] : memref<1x448xf32, #tpu.memory_space<vmem>>, vector<1x448xf32>
    %2 = vector.extract_strided_slice %0 {offsets = [0, 0, 0, 0], sizes = [2, 1, 7, 30], strides = [1, 1, 1, 1]} : vector<2x4x8x30xf32> to vector<2x1x7x30xf32>
    %3 = vector.shape_cast %2 : vector<2x1x7x30xf32> to vector<2x7x30xf32>
    %c0_5 = arith.constant 0 : index
    %c0_6 = arith.constant 0 : index
    %c0_7 = arith.constant 0 : index
    %4 = vector.load %arg2[%c0_5, %c0_6, %c0_7] : memref<3x30x448xf32, #tpu.memory_space<vmem>>, vector<1x30x448xf32>
    %5 = vector.shape_cast %4 : vector<1x30x448xf32> to vector<30x448xf32>
    %6 = vector.shape_cast %3 : vector<2x7x30xf32> to vector<14x30xf32>
    %cst = arith.constant dense<0.000000e+00> : vector<14x448xf32>
    %7 = tpu.matmul %6, %5, %cst {dimension_numbers = #tpu.dot_dimension_numbers<[1], [0], [0], [1], [0, 0, 1, 1], [], []>} : vector<14x30xf32>, vector<30x448xf32>, vector<14x448xf32> -> vector<14x448xf32>
    %8 = vector.shape_cast %7 : vector<14x448xf32> to vector<2x7x448xf32>
    %9 = vector.extract_strided_slice %0 {offsets = [0, 1, 0, 0], sizes = [2, 1, 7, 30], strides = [1, 1, 1, 1]} : vector<2x4x8x30xf32> to vector<2x1x7x30xf32>
    %10 = vector.shape_cast %9 : vector<2x1x7x30xf32> to vector<2x7x30xf32>
    %c1 = arith.constant 1 : index
    %c0_8 = arith.constant 0 : index
    %c0_9 = arith.constant 0 : index
    %11 = vector.load %arg2[%c1, %c0_8, %c0_9] : memref<3x30x448xf32, #tpu.memory_space<vmem>>, vector<1x30x448xf32>
    %12 = vector.shape_cast %11 : vector<1x30x448xf32> to vector<30x448xf32>
    %13 = vector.shape_cast %10 : vector<2x7x30xf32> to vector<14x30xf32>
    %cst_10 = arith.constant dense<0.000000e+00> : vector<14x448xf32>
    %14 = tpu.matmul %13, %12, %cst_10 {dimension_numbers = #tpu.dot_dimension_numbers<[1], [0], [0], [1], [0, 0, 1, 1], [], []>} : vector<14x30xf32>, vector<30x448xf32>, vector<14x448xf32> -> vector<14x448xf32>
    %15 = vector.shape_cast %14 : vector<14x448xf32> to vector<2x7x448xf32>
    %16 = arith.addf %8, %15 : vector<2x7x448xf32>
    %17 = vector.extract_strided_slice %0 {offsets = [0, 2, 0, 0], sizes = [2, 1, 7, 30], strides = [1, 1, 1, 1]} : vector<2x4x8x30xf32> to vector<2x1x7x30xf32>
    %18 = vector.shape_cast %17 : vector<2x1x7x30xf32> to vector<2x7x30xf32>
    %c2 = arith.constant 2 : index
    %c0_11 = arith.constant 0 : index
    %c0_12 = arith.constant 0 : index
    %19 = vector.load %arg2[%c2, %c0_11, %c0_12] : memref<3x30x448xf32, #tpu.memory_space<vmem>>, vector<1x30x448xf32>
    %20 = vector.shape_cast %19 : vector<1x30x448xf32> to vector<30x448xf32>
    %21 = vector.shape_cast %18 : vector<2x7x30xf32> to vector<14x30xf32>
    %cst_13 = arith.constant dense<0.000000e+00> : vector<14x448xf32>
    %22 = tpu.matmul %21, %20, %cst_13 {dimension_numbers = #tpu.dot_dimension_numbers<[1], [0], [0], [1], [0, 0, 1, 1], [], []>} : vector<14x30xf32>, vector<30x448xf32>, vector<14x448xf32> -> vector<14x448xf32>
    %23 = vector.shape_cast %22 : vector<14x448xf32> to vector<2x7x448xf32>
    %24 = arith.addf %16, %23 : vector<2x7x448xf32>
    %25 = vector.shape_cast %1 : vector<1x448xf32> to vector<1x1x448xf32>
    %26 = vector.broadcast %25 : vector<1x1x448xf32> to vector<2x7x448xf32>
    %27 = arith.addf %24, %26 : vector<2x7x448xf32>
    %cst_14 = arith.constant 0.000000e+00 : f32
    %28 = vector.broadcast %cst_14 : f32 to vector<2x7x448xf32>
    %29 = arith.maximumf %27, %28 : vector<2x7x448xf32>
    %30 = vector.extract_strided_slice %0 {offsets = [0, 1, 0, 0], sizes = [2, 1, 7, 30], strides = [1, 1, 1, 1]} : vector<2x4x8x30xf32> to vector<2x1x7x30xf32>
    %31 = vector.shape_cast %30 : vector<2x1x7x30xf32> to vector<2x7x30xf32>
    %c0_15 = arith.constant 0 : index
    %c0_16 = arith.constant 0 : index
    %c0_17 = arith.constant 0 : index
    %32 = vector.load %arg2[%c0_15, %c0_16, %c0_17] : memref<3x30x448xf32, #tpu.memory_space<vmem>>, vector<1x30x448xf32>
    %33 = vector.shape_cast %32 : vector<1x30x448xf32> to vector<30x448xf32>
    %34 = vector.shape_cast %31 : vector<2x7x30xf32> to vector<14x30xf32>
    %cst_18 = arith.constant dense<0.000000e+00> : vector<14x448xf32>
    %35 = tpu.matmul %34, %33, %cst_18 {dimension_numbers = #tpu.dot_dimension_numbers<[1], [0], [0], [1], [0, 0, 1, 1], [], []>} : vector<14x30xf32>, vector<30x448xf32>, vector<14x448xf32> -> vector<14x448xf32>
    %36 = vector.shape_cast %35 : vector<14x448xf32> to vector<2x7x448xf32>
    %37 = vector.extract_strided_slice %0 {offsets = [0, 2, 0, 0], sizes = [2, 1, 7, 30], strides = [1, 1, 1, 1]} : vector<2x4x8x30xf32> to vector<2x1x7x30xf32>
    %38 = vector.shape_cast %37 : vector<2x1x7x30xf32> to vector<2x7x30xf32>
    %c1_19 = arith.constant 1 : index
    %c0_20 = arith.constant 0 : index
    %c0_21 = arith.constant 0 : index
    %39 = vector.load %arg2[%c1_19, %c0_20, %c0_21] : memref<3x30x448xf32, #tpu.memory_space<vmem>>, vector<1x30x448xf32>
    %40 = vector.shape_cast %39 : vector<1x30x448xf32> to vector<30x448xf32>
    %41 = vector.shape_cast %38 : vector<2x7x30xf32> to vector<14x30xf32>
    %cst_22 = arith.constant dense<0.000000e+00> : vector<14x448xf32>
    %42 = tpu.matmul %41, %40, %cst_22 {dimension_numbers = #tpu.dot_dimension_numbers<[1], [0], [0], [1], [0, 0, 1, 1], [], []>} : vector<14x30xf32>, vector<30x448xf32>, vector<14x448xf32> -> vector<14x448xf32>
    %43 = vector.shape_cast %42 : vector<14x448xf32> to vector<2x7x448xf32>
    %44 = arith.addf %36, %43 : vector<2x7x448xf32>
    %45 = vector.extract_strided_slice %0 {offsets = [0, 3, 0, 0], sizes = [2, 1, 7, 30], strides = [1, 1, 1, 1]} : vector<2x4x8x30xf32> to vector<2x1x7x30xf32>
    %46 = vector.shape_cast %45 : vector<2x1x7x30xf32> to vector<2x7x30xf32>
    %c2_23 = arith.constant 2 : index
    %c0_24 = arith.constant 0 : index
    %c0_25 = arith.constant 0 : index
    %47 = vector.load %arg2[%c2_23, %c0_24, %c0_25] : memref<3x30x448xf32, #tpu.memory_space<vmem>>, vector<1x30x448xf32>
    %48 = vector.shape_cast %47 : vector<1x30x448xf32> to vector<30x448xf32>
    %49 = vector.shape_cast %46 : vector<2x7x30xf32> to vector<14x30xf32>
    %cst_26 = arith.constant dense<0.000000e+00> : vector<14x448xf32>
    %50 = tpu.matmul %49, %48, %cst_26 {dimension_numbers = #tpu.dot_dimension_numbers<[1], [0], [0], [1], [0, 0, 1, 1], [], []>} : vector<14x30xf32>, vector<30x448xf32>, vector<14x448xf32> -> vector<14x448xf32>
    %51 = vector.shape_cast %50 : vector<14x448xf32> to vector<2x7x448xf32>
    %52 = arith.addf %44, %51 : vector<2x7x448xf32>
    %53 = vector.shape_cast %1 : vector<1x448xf32> to vector<1x1x448xf32>
    %54 = vector.broadcast %53 : vector<1x1x448xf32> to vector<2x7x448xf32>
    %55 = arith.addf %52, %54 : vector<2x7x448xf32>
    %cst_27 = arith.constant 0.000000e+00 : f32
    %56 = vector.broadcast %cst_27 : f32 to vector<2x7x448xf32>
    %57 = arith.maximumf %55, %56 : vector<2x7x448xf32>
    %58 = vector.extract_strided_slice %0 {offsets = [0, 2, 0, 0], sizes = [2, 1, 7, 30], strides = [1, 1, 1, 1]} : vector<2x4x8x30xf32> to vector<2x1x7x30xf32>
    %59 = vector.shape_cast %58 : vector<2x1x7x30xf32> to vector<2x7x30xf32>
    %c0_28 = arith.constant 0 : index
    %c0_29 = arith.constant 0 : index
    %c0_30 = arith.constant 0 : index
    %60 = vector.load %arg2[%c0_28, %c0_29, %c0_30] : memref<3x30x448xf32, #tpu.memory_space<vmem>>, vector<1x30x448xf32>
    %61 = vector.shape_cast %60 : vector<1x30x448xf32> to vector<30x448xf32>
    %62 = vector.shape_cast %59 : vector<2x7x30xf32> to vector<14x30xf32>
    %cst_31 = arith.constant dense<0.000000e+00> : vector<14x448xf32>
    %63 = tpu.matmul %62, %61, %cst_31 {dimension_numbers = #tpu.dot_dimension_numbers<[1], [0], [0], [1], [0, 0, 1, 1], [], []>} : vector<14x30xf32>, vector<30x448xf32>, vector<14x448xf32> -> vector<14x448xf32>
    %64 = vector.shape_cast %63 : vector<14x448xf32> to vector<2x7x448xf32>
    %65 = vector.extract_strided_slice %0 {offsets = [0, 3, 0, 0], sizes = [2, 1, 7, 30], strides = [1, 1, 1, 1]} : vector<2x4x8x30xf32> to vector<2x1x7x30xf32>
    %66 = vector.shape_cast %65 : vector<2x1x7x30xf32> to vector<2x7x30xf32>
    %c1_32 = arith.constant 1 : index
    %c0_33 = arith.constant 0 : index
    %c0_34 = arith.constant 0 : index
    %67 = vector.load %arg2[%c1_32, %c0_33, %c0_34] : memref<3x30x448xf32, #tpu.memory_space<vmem>>, vector<1x30x448xf32>
    %68 = vector.shape_cast %67 : vector<1x30x448xf32> to vector<30x448xf32>
    %69 = vector.shape_cast %66 : vector<2x7x30xf32> to vector<14x30xf32>
    %cst_35 = arith.constant dense<0.000000e+00> : vector<14x448xf32>
    %70 = tpu.matmul %69, %68, %cst_35 {dimension_numbers = #tpu.dot_dimension_numbers<[1], [0], [0], [1], [0, 0, 1, 1], [], []>} : vector<14x30xf32>, vector<30x448xf32>, vector<14x448xf32> -> vector<14x448xf32>
    %71 = vector.shape_cast %70 : vector<14x448xf32> to vector<2x7x448xf32>
    %72 = arith.addf %64, %71 : vector<2x7x448xf32>
    %73 = vector.extract_strided_slice %0 {offsets = [0, 0, 1, 0], sizes = [2, 1, 7, 30], strides = [1, 1, 1, 1]} : vector<2x4x8x30xf32> to vector<2x1x7x30xf32>
    %74 = vector.shape_cast %73 : vector<2x1x7x30xf32> to vector<2x7x30xf32>
    %c2_36 = arith.constant 2 : index
    %c0_37 = arith.constant 0 : index
    %c0_38 = arith.constant 0 : index
    %75 = vector.load %arg2[%c2_36, %c0_37, %c0_38] : memref<3x30x448xf32, #tpu.memory_space<vmem>>, vector<1x30x448xf32>
    %76 = vector.shape_cast %75 : vector<1x30x448xf32> to vector<30x448xf32>
    %77 = vector.shape_cast %74 : vector<2x7x30xf32> to vector<14x30xf32>
    %cst_39 = arith.constant dense<0.000000e+00> : vector<14x448xf32>
    %78 = tpu.matmul %77, %76, %cst_39 {dimension_numbers = #tpu.dot_dimension_numbers<[1], [0], [0], [1], [0, 0, 1, 1], [], []>} : vector<14x30xf32>, vector<30x448xf32>, vector<14x448xf32> -> vector<14x448xf32>
    %79 = vector.shape_cast %78 : vector<14x448xf32> to vector<2x7x448xf32>
    %80 = arith.addf %72, %79 : vector<2x7x448xf32>
    %81 = vector.shape_cast %1 : vector<1x448xf32> to vector<1x1x448xf32>
    %82 = vector.broadcast %81 : vector<1x1x448xf32> to vector<2x7x448xf32>
    %83 = arith.addf %80, %82 : vector<2x7x448xf32>
    %cst_40 = arith.constant 0.000000e+00 : f32
    %84 = vector.broadcast %cst_40 : f32 to vector<2x7x448xf32>
    %85 = arith.maximumf %83, %84 : vector<2x7x448xf32>
    %86 = vector.extract_strided_slice %0 {offsets = [0, 3, 0, 0], sizes = [2, 1, 7, 30], strides = [1, 1, 1, 1]} : vector<2x4x8x30xf32> to vector<2x1x7x30xf32>
    %87 = vector.shape_cast %86 : vector<2x1x7x30xf32> to vector<2x7x30xf32>
    %c0_41 = arith.constant 0 : index
    %c0_42 = arith.constant 0 : index
    %c0_43 = arith.constant 0 : index
    %88 = vector.load %arg2[%c0_41, %c0_42, %c0_43] : memref<3x30x448xf32, #tpu.memory_space<vmem>>, vector<1x30x448xf32>
    %89 = vector.shape_cast %88 : vector<1x30x448xf32> to vector<30x448xf32>
    %90 = vector.shape_cast %87 : vector<2x7x30xf32> to vector<14x30xf32>
    %cst_44 = arith.constant dense<0.000000e+00> : vector<14x448xf32>
    %91 = tpu.matmul %90, %89, %cst_44 {dimension_numbers = #tpu.dot_dimension_numbers<[1], [0], [0], [1], [0, 0, 1, 1], [], []>} : vector<14x30xf32>, vector<30x448xf32>, vector<14x448xf32> -> vector<14x448xf32>
    %92 = vector.shape_cast %91 : vector<14x448xf32> to vector<2x7x448xf32>
    %93 = vector.extract_strided_slice %0 {offsets = [0, 0, 1, 0], sizes = [2, 1, 7, 30], strides = [1, 1, 1, 1]} : vector<2x4x8x30xf32> to vector<2x1x7x30xf32>
    %94 = vector.shape_cast %93 : vector<2x1x7x30xf32> to vector<2x7x30xf32>
    %c1_45 = arith.constant 1 : index
    %c0_46 = arith.constant 0 : index
    %c0_47 = arith.constant 0 : index
    %95 = vector.load %arg2[%c1_45, %c0_46, %c0_47] : memref<3x30x448xf32, #tpu.memory_space<vmem>>, vector<1x30x448xf32>
    %96 = vector.shape_cast %95 : vector<1x30x448xf32> to vector<30x448xf32>
    %97 = vector.shape_cast %94 : vector<2x7x30xf32> to vector<14x30xf32>
    %cst_48 = arith.constant dense<0.000000e+00> : vector<14x448xf32>
    %98 = tpu.matmul %97, %96, %cst_48 {dimension_numbers = #tpu.dot_dimension_numbers<[1], [0], [0], [1], [0, 0, 1, 1], [], []>} : vector<14x30xf32>, vector<30x448xf32>, vector<14x448xf32> -> vector<14x448xf32>
    %99 = vector.shape_cast %98 : vector<14x448xf32> to vector<2x7x448xf32>
    %100 = arith.addf %92, %99 : vector<2x7x448xf32>
    %101 = vector.extract_strided_slice %0 {offsets = [0, 1, 1, 0], sizes = [2, 1, 7, 30], strides = [1, 1, 1, 1]} : vector<2x4x8x30xf32> to vector<2x1x7x30xf32>
    %102 = vector.shape_cast %101 : vector<2x1x7x30xf32> to vector<2x7x30xf32>
    %c2_49 = arith.constant 2 : index
    %c0_50 = arith.constant 0 : index
    %c0_51 = arith.constant 0 : index
    %103 = vector.load %arg2[%c2_49, %c0_50, %c0_51] : memref<3x30x448xf32, #tpu.memory_space<vmem>>, vector<1x30x448xf32>
    %104 = vector.shape_cast %103 : vector<1x30x448xf32> to vector<30x448xf32>
    %105 = vector.shape_cast %102 : vector<2x7x30xf32> to vector<14x30xf32>
    %cst_52 = arith.constant dense<0.000000e+00> : vector<14x448xf32>
    %106 = tpu.matmul %105, %104, %cst_52 {dimension_numbers = #tpu.dot_dimension_numbers<[1], [0], [0], [1], [0, 0, 1, 1], [], []>} : vector<14x30xf32>, vector<30x448xf32>, vector<14x448xf32> -> vector<14x448xf32>
    %107 = vector.shape_cast %106 : vector<14x448xf32> to vector<2x7x448xf32>
    %108 = arith.addf %100, %107 : vector<2x7x448xf32>
    %109 = vector.shape_cast %1 : vector<1x448xf32> to vector<1x1x448xf32>
    %110 = vector.broadcast %109 : vector<1x1x448xf32> to vector<2x7x448xf32>
    %111 = arith.addf %108, %110 : vector<2x7x448xf32>
    %cst_53 = arith.constant 0.000000e+00 : f32
    %112 = vector.broadcast %cst_53 : f32 to vector<2x7x448xf32>
    %113 = arith.maximumf %111, %112 : vector<2x7x448xf32>
    %114 = arith.maximumf %29, %57 : vector<2x7x448xf32>
    %c432_i32 = arith.constant 432 : i32
    %115 = tpu.dynamic_rotate %114 by %c432_i32 dim 2 : vector<2x7x448xf32>, i32 -> vector<2x7x448xf32>
    %116 = arith.maximumf %114, %115 : vector<2x7x448xf32>
    %117 = arith.maximumf %85, %113 : vector<2x7x448xf32>
    %c432_i32_54 = arith.constant 432 : i32
    %118 = tpu.dynamic_rotate %117 by %c432_i32_54 dim 2 : vector<2x7x448xf32>, i32 -> vector<2x7x448xf32>
    %119 = arith.maximumf %117, %118 : vector<2x7x448xf32>
    %cst_55 = arith.constant 0.000000e+00 : f32
    %120 = vector.broadcast %cst_55 : f32 to vector<2x1x448xf32>
    %c0_56 = arith.constant 0 : index
    %c0_57 = arith.constant 0 : index
    %c0_58 = arith.constant 0 : index
    %121 = vector.load %arg11[%c0_56, %c0_57, %c0_58] : memref<2x8x448xf32, #tpu.memory_space<vmem>>, vector<2x7x448xf32>
    tpu.vector_store %arg11[%c0_56, %c0_57, %c0_58], %116 {strides = array<i32>} : memref<2x8x448xf32, #tpu.memory_space<vmem>>, vector<2x7x448xf32>,
    %c0_59 = arith.constant 0 : index
    %c7 = arith.constant 7 : index
    %c0_60 = arith.constant 0 : index
    %122 = vector.load %arg11[%c0_59, %c7, %c0_60] : memref<2x8x448xf32, #tpu.memory_space<vmem>>, vector<2x1x448xf32>
    tpu.vector_store %arg11[%c0_59, %c7, %c0_60], %120 {strides = array<i32>} : memref<2x8x448xf32, #tpu.memory_space<vmem>>, vector<2x1x448xf32>,
    %c0_61 = arith.constant 0 : index
    %c1_62 = arith.constant 1 : index
    %c0_63 = arith.constant 0 : index
    %123 = vector.load %arg12[%c0_61, %c1_62, %c0_63] : memref<2x8x448xf32, #tpu.memory_space<vmem>>, vector<2x7x448xf32>
    tpu.vector_store %arg12[%c0_61, %c1_62, %c0_63], %119 {strides = array<i32>} : memref<2x8x448xf32, #tpu.memory_space<vmem>>, vector<2x7x448xf32>,
    %c0_64 = arith.constant 0 : index
    %c0_65 = arith.constant 0 : index
    %c0_66 = arith.constant 0 : index
    %124 = vector.load %arg12[%c0_64, %c0_65, %c0_66] : memref<2x8x448xf32, #tpu.memory_space<vmem>>, vector<2x1x448xf32>
    tpu.vector_store %arg12[%c0_64, %c0_65, %c0_66], %120 {strides = array<i32>} : memref<2x8x448xf32, #tpu.memory_space<vmem>>, vector<2x1x448xf32>,
    %c0_67 = arith.constant 0 : index
    %c0_68 = arith.constant 0 : index
    %c0_69 = arith.constant 0 : index
    %125 = vector.load %arg11[%c0_67, %c0_68, %c0_69] : memref<2x8x448xf32, #tpu.memory_space<vmem>>, vector<2x7x448xf32>
    %c0_70 = arith.constant 0 : index
    %c1_71 = arith.constant 1 : index
    %c0_72 = arith.constant 0 : index
    %126 = vector.load %arg11[%c0_70, %c1_71, %c0_72] : memref<2x8x448xf32, #tpu.memory_space<vmem>>, vector<2x7x448xf32>
    %c0_73 = arith.constant 0 : index
    %c0_74 = arith.constant 0 : index
    %c0_75 = arith.constant 0 : index
    %127 = vector.load %arg12[%c0_73, %c0_74, %c0_75] : memref<2x8x448xf32, #tpu.memory_space<vmem>>, vector<2x7x448xf32>
    %c0_76 = arith.constant 0 : index
    %c1_77 = arith.constant 1 : index
    %c0_78 = arith.constant 0 : index
    %128 = vector.load %arg12[%c0_76, %c1_77, %c0_78] : memref<2x8x448xf32, #tpu.memory_space<vmem>>, vector<2x7x448xf32>
    %c0_79 = arith.constant 0 : index
    %c0_80 = arith.constant 0 : index
    %129 = vector.load %arg5[%c0_79, %c0_80] : memref<1x448xf32, #tpu.memory_space<vmem>>, vector<1x448xf32>
    %c0_81 = arith.constant 0 : index
    %c0_82 = arith.constant 0 : index
    %c0_83 = arith.constant 0 : index
    %130 = vector.load %arg4[%c0_81, %c0_82, %c0_83] : memref<3x448x448xf32, #tpu.memory_space<vmem>>, vector<1x448x448xf32>
    %131 = vector.shape_cast %130 : vector<1x448x448xf32> to vector<448x448xf32>
    %132 = vector.shape_cast %127 : vector<2x7x448xf32> to vector<14x448xf32>
    %cst_84 = arith.constant dense<0.000000e+00> : vector<14x448xf32>
    %133 = tpu.matmul %132, %131, %cst_84 {dimension_numbers = #tpu.dot_dimension_numbers<[1], [0], [0], [1], [0, 0, 1, 1], [], []>} : vector<14x448xf32>, vector<448x448xf32>, vector<14x448xf32> -> vector<14x448xf32>
    %134 = vector.shape_cast %133 : vector<14x448xf32> to vector<2x7x448xf32>
    %c1_85 = arith.constant 1 : index
    %c0_86 = arith.constant 0 : index
    %c0_87 = arith.constant 0 : index
    %135 = vector.load %arg4[%c1_85, %c0_86, %c0_87] : memref<3x448x448xf32, #tpu.memory_space<vmem>>, vector<1x448x448xf32>
    %136 = vector.shape_cast %135 : vector<1x448x448xf32> to vector<448x448xf32>
    %137 = vector.shape_cast %125 : vector<2x7x448xf32> to vector<14x448xf32>
    %cst_88 = arith.constant dense<0.000000e+00> : vector<14x448xf32>
    %138 = tpu.matmul %137, %136, %cst_88 {dimension_numbers = #tpu.dot_dimension_numbers<[1], [0], [0], [1], [0, 0, 1, 1], [], []>} : vector<14x448xf32>, vector<448x448xf32>, vector<14x448xf32> -> vector<14x448xf32>
    %139 = vector.shape_cast %138 : vector<14x448xf32> to vector<2x7x448xf32>
    %140 = arith.addf %134, %139 : vector<2x7x448xf32>
    %c2_89 = arith.constant 2 : index
    %c0_90 = arith.constant 0 : index
    %c0_91 = arith.constant 0 : index
    %141 = vector.load %arg4[%c2_89, %c0_90, %c0_91] : memref<3x448x448xf32, #tpu.memory_space<vmem>>, vector<1x448x448xf32>
    %142 = vector.shape_cast %141 : vector<1x448x448xf32> to vector<448x448xf32>
    %143 = vector.shape_cast %128 : vector<2x7x448xf32> to vector<14x448xf32>
    %cst_92 = arith.constant dense<0.000000e+00> : vector<14x448xf32>
    %144 = tpu.matmul %143, %142, %cst_92 {dimension_numbers = #tpu.dot_dimension_numbers<[1], [0], [0], [1], [0, 0, 1, 1], [], []>} : vector<14x448xf32>, vector<448x448xf32>, vector<14x448xf32> -> vector<14x448xf32>
    %145 = vector.shape_cast %144 : vector<14x448xf32> to vector<2x7x448xf32>
    %146 = arith.addf %140, %145 : vector<2x7x448xf32>
    %147 = vector.shape_cast %129 : vector<1x448xf32> to vector<1x1x448xf32>
    %148 = vector.broadcast %147 : vector<1x1x448xf32> to vector<2x7x448xf32>
    %149 = arith.addf %146, %148 : vector<2x7x448xf32>
    %cst_93 = arith.constant 0.000000e+00 : f32
    %150 = vector.broadcast %cst_93 : f32 to vector<2x7x448xf32>
    %151 = arith.maximumf %149, %150 : vector<2x7x448xf32>
    %c0_94 = arith.constant 0 : index
    %c0_95 = arith.constant 0 : index
    %c0_96 = arith.constant 0 : index
    %152 = vector.load %arg4[%c0_94, %c0_95, %c0_96] : memref<3x448x448xf32, #tpu.memory_space<vmem>>, vector<1x448x448xf32>
    %153 = vector.shape_cast %152 : vector<1x448x448xf32> to vector<448x448xf32>
    %154 = vector.shape_cast %125 : vector<2x7x448xf32> to vector<14x448xf32>
    %cst_97 = arith.constant dense<0.000000e+00> : vector<14x448xf32>
    %155 = tpu.matmul %154, %153, %cst_97 {dimension_numbers = #tpu.dot_dimension_numbers<[1], [0], [0], [1], [0, 0, 1, 1], [], []>} : vector<14x448xf32>, vector<448x448xf32>, vector<14x448xf32> -> vector<14x448xf32>
    %156 = vector.shape_cast %155 : vector<14x448xf32> to vector<2x7x448xf32>
    %c1_98 = arith.constant 1 : index
    %c0_99 = arith.constant 0 : index
    %c0_100 = arith.constant 0 : index
    %157 = vector.load %arg4[%c1_98, %c0_99, %c0_100] : memref<3x448x448xf32, #tpu.memory_space<vmem>>, vector<1x448x448xf32>
    %158 = vector.shape_cast %157 : vector<1x448x448xf32> to vector<448x448xf32>
    %159 = vector.shape_cast %128 : vector<2x7x448xf32> to vector<14x448xf32>
    %cst_101 = arith.constant dense<0.000000e+00> : vector<14x448xf32>
    %160 = tpu.matmul %159, %158, %cst_101 {dimension_numbers = #tpu.dot_dimension_numbers<[1], [0], [0], [1], [0, 0, 1, 1], [], []>} : vector<14x448xf32>, vector<448x448xf32>, vector<14x448xf32> -> vector<14x448xf32>
    %161 = vector.shape_cast %160 : vector<14x448xf32> to vector<2x7x448xf32>
    %162 = arith.addf %156, %161 : vector<2x7x448xf32>
    %c2_102 = arith.constant 2 : index
    %c0_103 = arith.constant 0 : index
    %c0_104 = arith.constant 0 : index
    %163 = vector.load %arg4[%c2_102, %c0_103, %c0_104] : memref<3x448x448xf32, #tpu.memory_space<vmem>>, vector<1x448x448xf32>
    %164 = vector.shape_cast %163 : vector<1x448x448xf32> to vector<448x448xf32>
    %165 = vector.shape_cast %126 : vector<2x7x448xf32> to vector<14x448xf32>
    %cst_105 = arith.constant dense<0.000000e+00> : vector<14x448xf32>
    %166 = tpu.matmul %165, %164, %cst_105 {dimension_numbers = #tpu.dot_dimension_numbers<[1], [0], [0], [1], [0, 0, 1, 1], [], []>} : vector<14x448xf32>, vector<448x448xf32>, vector<14x448xf32> -> vector<14x448xf32>
    %167 = vector.shape_cast %166 : vector<14x448xf32> to vector<2x7x448xf32>
    %168 = arith.addf %162, %167 : vector<2x7x448xf32>
    %169 = vector.shape_cast %129 : vector<1x448xf32> to vector<1x1x448xf32>
    %170 = vector.broadcast %169 : vector<1x1x448xf32> to vector<2x7x448xf32>
    %171 = arith.addf %168, %170 : vector<2x7x448xf32>
    %cst_106 = arith.constant 0.000000e+00 : f32
    %172 = vector.broadcast %cst_106 : f32 to vector<2x7x448xf32>
    %173 = arith.maximumf %171, %172 : vector<2x7x448xf32>
    %174 = arith.maximumf %151, %173 : vector<2x7x448xf32>
    %c416_i32 = arith.constant 416 : i32
    %175 = tpu.dynamic_rotate %174 by %c416_i32 dim 2 : vector<2x7x448xf32>, i32 -> vector<2x7x448xf32>
    %176 = arith.maximumf %174, %175 : vector<2x7x448xf32>
    %cst_107 = arith.constant 0.000000e+00 : f32
    %177 = vector.broadcast %cst_107 : f32 to vector<2x128xf32>
    %178 = vector.extract_strided_slice %176 {offsets = [0, 0, 0], sizes = [2, 1, 448], strides = [1, 1, 1]} : vector<2x7x448xf32> to vector<2x1x448xf32>
    %179 = vector.shape_cast %178 : vector<2x1x448xf32> to vector<2x448xf32>
    %c0_108 = arith.constant 0 : index
    %c0_109 = arith.constant 0 : index
    %c0_110 = arith.constant 0 : index
    %180 = vector.load %arg6[%c0_108, %c0_109, %c0_110] : memref<7x448x128xf32, #tpu.memory_space<vmem>>, vector<1x448x128xf32>
    %181 = vector.shape_cast %180 : vector<1x448x128xf32> to vector<448x128xf32>
    %cst_111 = arith.constant dense<0.000000e+00> : vector<2x128xf32>
    %182 = tpu.matmul %179, %181, %cst_111 {dimension_numbers = #tpu.dot_dimension_numbers<[1], [0], [0], [1], [0, 0, 1, 1], [], []>} : vector<2x448xf32>, vector<448x128xf32>, vector<2x128xf32> -> vector<2x128xf32>
    %183 = arith.addf %177, %182 : vector<2x128xf32>
    %184 = vector.extract_strided_slice %176 {offsets = [0, 1, 0], sizes = [2, 1, 448], strides = [1, 1, 1]} : vector<2x7x448xf32> to vector<2x1x448xf32>
    %185 = vector.shape_cast %184 : vector<2x1x448xf32> to vector<2x448xf32>
    %c1_112 = arith.constant 1 : index
    %c0_113 = arith.constant 0 : index
    %c0_114 = arith.constant 0 : index
    %186 = vector.load %arg6[%c1_112, %c0_113, %c0_114] : memref<7x448x128xf32, #tpu.memory_space<vmem>>, vector<1x448x128xf32>
    %187 = vector.shape_cast %186 : vector<1x448x128xf32> to vector<448x128xf32>
    %cst_115 = arith.constant dense<0.000000e+00> : vector<2x128xf32>
    %188 = tpu.matmul %185, %187, %cst_115 {dimension_numbers = #tpu.dot_dimension_numbers<[1], [0], [0], [1], [0, 0, 1, 1], [], []>} : vector<2x448xf32>, vector<448x128xf32>, vector<2x128xf32> -> vector<2x128xf32>
    %189 = arith.addf %183, %188 : vector<2x128xf32>
    %190 = vector.extract_strided_slice %176 {offsets = [0, 2, 0], sizes = [2, 1, 448], strides = [1, 1, 1]} : vector<2x7x448xf32> to vector<2x1x448xf32>
    %191 = vector.shape_cast %190 : vector<2x1x448xf32> to vector<2x448xf32>
    %c2_116 = arith.constant 2 : index
    %c0_117 = arith.constant 0 : index
    %c0_118 = arith.constant 0 : index
    %192 = vector.load %arg6[%c2_116, %c0_117, %c0_118] : memref<7x448x128xf32, #tpu.memory_space<vmem>>, vector<1x448x128xf32>
    %193 = vector.shape_cast %192 : vector<1x448x128xf32> to vector<448x128xf32>
    %cst_119 = arith.constant dense<0.000000e+00> : vector<2x128xf32>
    %194 = tpu.matmul %191, %193, %cst_119 {dimension_numbers = #tpu.dot_dimension_numbers<[1], [0], [0], [1], [0, 0, 1, 1], [], []>} : vector<2x448xf32>, vector<448x128xf32>, vector<2x128xf32> -> vector<2x128xf32>
    %195 = arith.addf %189, %194 : vector<2x128xf32>
    %196 = vector.extract_strided_slice %176 {offsets = [0, 3, 0], sizes = [2, 1, 448], strides = [1, 1, 1]} : vector<2x7x448xf32> to vector<2x1x448xf32>
    %197 = vector.shape_cast %196 : vector<2x1x448xf32> to vector<2x448xf32>
    %c3 = arith.constant 3 : index
    %c0_120 = arith.constant 0 : index
    %c0_121 = arith.constant 0 : index
    %198 = vector.load %arg6[%c3, %c0_120, %c0_121] : memref<7x448x128xf32, #tpu.memory_space<vmem>>, vector<1x448x128xf32>
    %199 = vector.shape_cast %198 : vector<1x448x128xf32> to vector<448x128xf32>
    %cst_122 = arith.constant dense<0.000000e+00> : vector<2x128xf32>
    %200 = tpu.matmul %197, %199, %cst_122 {dimension_numbers = #tpu.dot_dimension_numbers<[1], [0], [0], [1], [0, 0, 1, 1], [], []>} : vector<2x448xf32>, vector<448x128xf32>, vector<2x128xf32> -> vector<2x128xf32>
    %201 = arith.addf %195, %200 : vector<2x128xf32>
    %202 = vector.extract_strided_slice %176 {offsets = [0, 4, 0], sizes = [2, 1, 448], strides = [1, 1, 1]} : vector<2x7x448xf32> to vector<2x1x448xf32>
    %203 = vector.shape_cast %202 : vector<2x1x448xf32> to vector<2x448xf32>
    %c4 = arith.constant 4 : index
    %c0_123 = arith.constant 0 : index
    %c0_124 = arith.constant 0 : index
    %204 = vector.load %arg6[%c4, %c0_123, %c0_124] : memref<7x448x128xf32, #tpu.memory_space<vmem>>, vector<1x448x128xf32>
    %205 = vector.shape_cast %204 : vector<1x448x128xf32> to vector<448x128xf32>
    %cst_125 = arith.constant dense<0.000000e+00> : vector<2x128xf32>
    %206 = tpu.matmul %203, %205, %cst_125 {dimension_numbers = #tpu.dot_dimension_numbers<[1], [0], [0], [1], [0, 0, 1, 1], [], []>} : vector<2x448xf32>, vector<448x128xf32>, vector<2x128xf32> -> vector<2x128xf32>
    %207 = arith.addf %201, %206 : vector<2x128xf32>
    %208 = vector.extract_strided_slice %176 {offsets = [0, 5, 0], sizes = [2, 1, 448], strides = [1, 1, 1]} : vector<2x7x448xf32> to vector<2x1x448xf32>
    %209 = vector.shape_cast %208 : vector<2x1x448xf32> to vector<2x448xf32>
    %c5 = arith.constant 5 : index
    %c0_126 = arith.constant 0 : index
    %c0_127 = arith.constant 0 : index
    %210 = vector.load %arg6[%c5, %c0_126, %c0_127] : memref<7x448x128xf32, #tpu.memory_space<vmem>>, vector<1x448x128xf32>
    %211 = vector.shape_cast %210 : vector<1x448x128xf32> to vector<448x128xf32>
    %cst_128 = arith.constant dense<0.000000e+00> : vector<2x128xf32>
    %212 = tpu.matmul %209, %211, %cst_128 {dimension_numbers = #tpu.dot_dimension_numbers<[1], [0], [0], [1], [0, 0, 1, 1], [], []>} : vector<2x448xf32>, vector<448x128xf32>, vector<2x128xf32> -> vector<2x128xf32>
    %213 = arith.addf %207, %212 : vector<2x128xf32>
    %214 = vector.extract_strided_slice %176 {offsets = [0, 6, 0], sizes = [2, 1, 448], strides = [1, 1, 1]} : vector<2x7x448xf32> to vector<2x1x448xf32>
    %215 = vector.shape_cast %214 : vector<2x1x448xf32> to vector<2x448xf32>
    %c6 = arith.constant 6 : index
    %c0_129 = arith.constant 0 : index
    %c0_130 = arith.constant 0 : index
    %216 = vector.load %arg6[%c6, %c0_129, %c0_130] : memref<7x448x128xf32, #tpu.memory_space<vmem>>, vector<1x448x128xf32>
    %217 = vector.shape_cast %216 : vector<1x448x128xf32> to vector<448x128xf32>
    %cst_131 = arith.constant dense<0.000000e+00> : vector<2x128xf32>
    %218 = tpu.matmul %215, %217, %cst_131 {dimension_numbers = #tpu.dot_dimension_numbers<[1], [0], [0], [1], [0, 0, 1, 1], [], []>} : vector<2x448xf32>, vector<448x128xf32>, vector<2x128xf32> -> vector<2x128xf32>
    %219 = arith.addf %213, %218 : vector<2x128xf32>
    %c0_132 = arith.constant 0 : index
    %c0_133 = arith.constant 0 : index
    %220 = vector.load %arg7[%c0_132, %c0_133] : memref<1x128xf32, #tpu.memory_space<vmem>>, vector<1x128xf32>
    %221 = vector.broadcast %220 : vector<1x128xf32> to vector<2x128xf32>
    %222 = arith.addf %219, %221 : vector<2x128xf32>
    %cst_134 = arith.constant 0.000000e+00 : f32
    %223 = vector.broadcast %cst_134 : f32 to vector<2x128xf32>
    %224 = arith.maximumf %222, %223 : vector<2x128xf32>
    %c0_135 = arith.constant 0 : index
    %c0_136 = arith.constant 0 : index
    %225 = vector.load %arg8[%c0_135, %c0_136] : memref<128x128xf32, #tpu.memory_space<vmem>>, vector<128x128xf32>
    %cst_137 = arith.constant dense<0.000000e+00> : vector<2x128xf32>
    %226 = tpu.matmul %224, %225, %cst_137 {dimension_numbers = #tpu.dot_dimension_numbers<[1], [0], [0], [1], [0, 0, 1, 1], [], []>} : vector<2x128xf32>, vector<128x128xf32>, vector<2x128xf32> -> vector<2x128xf32>
    %c0_138 = arith.constant 0 : index
    %c0_139 = arith.constant 0 : index
    %227 = vector.load %arg9[%c0_138, %c0_139] : memref<1x128xf32, #tpu.memory_space<vmem>>, vector<1x128xf32>
    %228 = vector.broadcast %227 : vector<1x128xf32> to vector<2x128xf32>
    %229 = arith.addf %226, %228 : vector<2x128xf32>
    %c0_140 = arith.constant 0 : index
    %c0_141 = arith.constant 0 : index
    %230 = vector.load %arg10[%c0_140, %c0_141] : memref<2x128xf32, #tpu.memory_space<vmem>>, vector<2x128xf32>
    tpu.vector_store %arg10[%c0_140, %c0_141], %229 {strides = array<i32>} : memref<2x128xf32, #tpu.memory_space<vmem>>, vector<2x128xf32>,
    return
  }
  func.func @transform_0(%arg0: i32) -> (i32, i32, i32, i32) {
    %c0_i32 = arith.constant 0 : i32
    %c0_i32_0 = arith.constant 0 : i32
    %c0_i32_1 = arith.constant 0 : i32
    %c0_i32_2 = arith.constant 0 : i32
    return %arg0, %c0_i32, %c0_i32_0, %c0_i32_1 : i32, i32, i32, i32
  }
  func.func @transform_1(%arg0: i32) -> (i32, i32, i32) {
    %c0_i32 = arith.constant 0 : i32
    %c0_i32_0 = arith.constant 0 : i32
    %c0_i32_1 = arith.constant 0 : i32
    %c0_i32_2 = arith.constant 0 : i32
    return %c0_i32, %c0_i32_0, %c0_i32_1 : i32, i32, i32
  }
  func.func @transform_2(%arg0: i32) -> (i32, i32) {
    %c0_i32 = arith.constant 0 : i32
    %c0_i32_0 = arith.constant 0 : i32
    %c0_i32_1 = arith.constant 0 : i32
    return %c0_i32, %c0_i32_0 : i32, i32
  }
  func.func @transform_3(%arg0: i32) -> (i32, i32, i32) {
    %c0_i32 = arith.constant 0 : i32
    %c0_i32_0 = arith.constant 0 : i32
    %c0_i32_1 = arith.constant 0 : i32
    %c0_i32_2 = arith.constant 0 : i32
    return %c0_i32, %c0_i32_0, %c0_i32_1 : i32, i32, i32
  }
  func.func @transform_4(%arg0: i32) -> (i32, i32) {
    %c0_i32 = arith.constant 0 : i32
    %c0_i32_0 = arith.constant 0 : i32
    %c0_i32_1 = arith.constant 0 : i32
    return %c0_i32, %c0_i32_0 : i32, i32
  }
  func.func @transform_5(%arg0: i32) -> (i32, i32, i32) {
    %c0_i32 = arith.constant 0 : i32
    %c0_i32_0 = arith.constant 0 : i32
    %c0_i32_1 = arith.constant 0 : i32
    %c0_i32_2 = arith.constant 0 : i32
    return %c0_i32, %c0_i32_0, %c0_i32_1 : i32, i32, i32
  }
  func.func @transform_6(%arg0: i32) -> (i32, i32) {
    %c0_i32 = arith.constant 0 : i32
    %c0_i32_0 = arith.constant 0 : i32
    %c0_i32_1 = arith.constant 0 : i32
    return %c0_i32, %c0_i32_0 : i32, i32
  }
  func.func @transform_7(%arg0: i32) -> (i32, i32) {
    %c0_i32 = arith.constant 0 : i32
    %c0_i32_0 = arith.constant 0 : i32
    %c0_i32_1 = arith.constant 0 : i32
    return %c0_i32, %c0_i32_0 : i32, i32
  }
  func.func @transform_8(%arg0: i32) -> (i32, i32) {
    %c0_i32 = arith.constant 0 : i32
    %c0_i32_0 = arith.constant 0 : i32
    %c0_i32_1 = arith.constant 0 : i32
    return %c0_i32, %c0_i32_0 : i32, i32
  }
  func.func @transform_9(%arg0: i32) -> (i32, i32) {
    %c0_i32 = arith.constant 0 : i32
    %c0_i32_0 = arith.constant 0 : i32
    return %arg0, %c0_i32 : i32, i32
  }
}

</mosaic_0001>

<bundles_post_ra>
// kernel: custom_model_forward.1
= control target key start
LH: loop header
LB: loop body
LE: loop exit
PB: predicated region body
PF: predicated region fallthrough
CT: control target
= control target key end

     0   :  { %14 = vsyncpa [#allocation5], 0  ;;  %s18267_s0 = inlined_call_operand.vmem [shape: f32[2,4,8,30], index: 0, kind: input, shape index: {}]   ;;  %s18268_s1 = inlined_call_operand.hbm [shape: f32[3,30,448], index: 1, kind: input, shape index: {}]   ;;  %s18269_s2 = inlined_call_operand.hbm [shape: f32[1,448], index: 2, kind: input, shape index: {}]   ;;  %s18270_s3 = inlined_call_operand.hbm [shape: f32[3,448,448], index: 3, kind: input, shape index: {}]   ;;  %s18271_s4 = inlined_call_operand.hbm [shape: f32[1,448], index: 4, kind: input, shape index: {}]   ;;  %s18272_s5 = inlined_call_operand.hbm [shape: f32[7,448,128], index: 5, kind: input, shape index: {}]   ;;  %s18273_s6 = inlined_call_operand.hbm [shape: f32[1,128], index: 6, kind: input, shape index: {}]   ;;  %s18274_s7 = inlined_call_operand.hbm [shape: f32[128,128], index: 7, kind: input, shape index: {}]   ;;  %s18275_s8 = inlined_call_operand.hbm [shape: f32[1,128], index: 8, kind: input, shape index: {}]   ;;  %s18276_s9 = inlined_call_operand.hbm [shape: f32[2,128], index: 9, kind: output, shape index: {}]  }
   0x1   :  { %15 = vsyncpa [#allocation8], 0 }
   0x2   :  { %16 = vsyncpa [#allocation11], 0 }
   0x3   :  { %17 = vsyncpa [#allocation14], 0 }
   0x4   :  { %18 = vsyncpa [#allocation17], 0 }
   0x5   :  { %19 = vsyncpa [#allocation6], 0  ;;  %s14685_s30 = smov [#allocation7]   ;;  %s14686_s11 = smov [#allocation10]  }
   0x6   :  { %s40_s10 = sshll.u32 %s14685_s30, 4  ;;  %s62_s12 = sshll.u32 %s14686_s11, 4  ;;  %s41_s10 = int_to_ptr.vmem [resolvable:$true] %s40_s10  ;;  %s63_s12 = int_to_ptr.vmem [resolvable:$true] %s62_s12 }
   0x7   :  { %s14501_s13 = scalar_lea.vmem %s41_s10, 64  ;;  %p14506_p1 = scmp.lt.s32.totalorder %s41_s10, %s41_s10 }
   0x8   :  { %p14502_p0 = scmp.ne.s32.totalorder %s41_s10, %s14501_s13  ;;  %p14507_p2 = scmp.lt.s32.totalorder %s14501_s13, %s14501_s13 }
   0xa   :  { %p14508_p3 = por %p14507_p2, %p14506_p1 }
   0xc   :  { %p14509_p4 = pnand %p14508_p3, %p14502_p0 }
   0xe   :  { %14512 = shalt.err (!%p14509_p4)
}
   0xf   :  { %43 = dma.hbm_to_vmem [thread:$0]  %s18269_s2, 64, %s41_s10, [#allocation8]  }
  0x10   :  { %s14521_s16 = scalar_lea.vmem %s63_s12, 64  ;;  %p14526_p6 = scmp.lt.s32.totalorder %s63_s12, %s63_s12 }
  0x11   :  { %p14522_p5 = scmp.ne.s32.totalorder %s63_s12, %s14521_s16  ;;  %p14527_p7 = scmp.lt.s32.totalorder %s14521_s16, %s14521_s16 }
  0x13   :  { %p14528_p8 = por %p14527_p7, %p14526_p6 }
  0x15   :  { %p14529_p9 = pnand %p14528_p8, %p14522_p5 }
  0x17   :  { %14532 = shalt.err (!%p14529_p9)
}
  0x18   :  { %65 = dma.hbm_to_vmem [thread:$0]  %s18271_s4, 64, %s63_s12, [#allocation11]  }
  0x19   :  { %s14687_s19 = smov [#allocation13]   ;;  %s14688_s21 = smov [#allocation4]  }
  0x1a   :  { %s84_s20 = sshll.u32 %s14687_s19, 4  ;;  %s27_s22 = sshll.u32 %s14688_s21, 4  ;;  %s85_s20 = int_to_ptr.vmem [resolvable:$true] %s84_s20  ;;  %s28_s22 = int_to_ptr.vmem [resolvable:$true] %s27_s22 }
  0x1b   :  { %s14541_s23 = scalar_lea.vmem %s85_s20, 16  ;;  %s14545_s2 = scalar_lea.vmem %s85_s20, 32 }
  0x1c   :  { %p14542_p10 = scmp.ne.s32.totalorder %s85_s20, %s14541_s23  ;;  %p14546_p11 = scmp.lt.s32.totalorder %s85_s20, %s85_s20 }
  0x1d   :  { %p14547_p12 = scmp.lt.s32.totalorder %s14545_s2, %s14541_s23 }
  0x1f   :  { %p14548_p13 = por %p14547_p12, %p14546_p11 }
  0x21   :  { %p14549_p0 = pnand %p14548_p13, %p14542_p10 }
  0x23   :  { %14552 = shalt.err (!%p14549_p0)
}
  0x24   :  { %87 = dma.hbm_to_vmem [thread:$0]  %s18273_s6, 16, %s85_s20, [#allocation14]  }
  0x25   :  { %s14561_s26 = scalar_lea.vmem %s28_s22, 6144  ;;  %p14566_p2 = scmp.lt.s32.totalorder %s28_s22, %s28_s22 }
  0x26   :  { %p14562_p1 = scmp.ne.s32.totalorder %s28_s22, %s14561_s26  ;;  %p14567_p3 = scmp.lt.s32.totalorder %s14561_s26, %s14561_s26 }
  0x28   :  { %p14568_p4 = por %p14567_p3, %p14566_p2 }
  0x2a   :  { %p14569_p5 = pnand %p14568_p4, %p14562_p1 }
  0x2c   :  { %14572 = shalt.err (!%p14569_p5)
}
  0x2d   :  { %s14689_s4 = smov 512   ;;  %s14690_s27 = smov 32  }
  0x2e   :  { %33 = dma.hbm_to_vmem [thread:$0]  %s18268_s1, 6144, %s28_s22, [#allocation5], %s14689_s4, %s14689_s4, %s14690_s27  }
  0x2f   :  { %s14691_s30 = smov [#allocation9]   ;;  %s14692_s11 = smov [#allocation12]  }
  0x30   :  { %s49_s10 = sshll.u32 %s14691_s30, 4  ;;  %s71_s12 = sshll.u32 %s14692_s11, 4  ;;  %s50_s10 = int_to_ptr.vmem [resolvable:$true] %s49_s10  ;;  %s72_s12 = int_to_ptr.vmem [resolvable:$true] %s71_s12 }
  0x31   :  { %s14581_s6 = scalar_lea.vmem %s50_s10, 86016  ;;  %p14586_p7 = scmp.lt.s32.totalorder %s50_s10, %s50_s10 }
  0x32   :  { %p14582_p6 = scmp.ne.s32.totalorder %s50_s10, %s14581_s6  ;;  %p14587_p8 = scmp.lt.s32.totalorder %s14581_s6, %s14581_s6 }
  0x34   :  { %p14588_p9 = por %p14587_p8, %p14586_p7 }
  0x36   :  { %p14589_p10 = pnand %p14588_p9, %p14582_p6 }
  0x38   :  { %14592 = shalt.err (!%p14589_p10)
}
  0x39   :  { %55 = dma.hbm_to_vmem [thread:$0]  %s18270_s3, 86016, %s50_s10, [#allocation8], %s14689_s4, %s14689_s4, %s14690_s27  }
  0x3a   :  { %s14601_s15 = scalar_lea.vmem %s72_s12, 50176  ;;  %p14606_p12 = scmp.lt.s32.totalorder %s72_s12, %s72_s12 }
  0x3b   :  { %p14602_p11 = scmp.ne.s32.totalorder %s72_s12, %s14601_s15  ;;  %p14607_p13 = scmp.lt.s32.totalorder %s14601_s15, %s14601_s15 }
  0x3d   :  { %p14608_p0 = por %p14607_p13, %p14606_p12 }
  0x3f   :  { %p14609_p1 = pnand %p14608_p0, %p14602_p11 }
  0x41   :  { %14612 = shalt.err (!%p14609_p1)
}
  0x42   :  { %s14693_s1 = smov 128   ;;  %s14694_s16 = smov 8  }
  0x43   :  { %77 = dma.hbm_to_vmem [thread:$0]  %s18272_s5, 50176, %s72_s12, [#allocation11], %s14693_s1, %s14693_s1, %s14694_s16  }
  0x44   :  { %s14695_s19 = smov [#allocation15]   ;;  %s14696_s21 = smov [#allocation16]  }
  0x45   :  { %s93_s20 = sshll.u32 %s14695_s19, 4  ;;  %s106_s22 = sshll.u32 %s14696_s21, 4  ;;  %s94_s20 = int_to_ptr.vmem [resolvable:$true] %s93_s20  ;;  %s107_s22 = int_to_ptr.vmem [resolvable:$true] %s106_s22 }
  0x46   :  { %s14621_s3 = scalar_lea.vmem %s94_s20, 2048  ;;  %p14626_p3 = scmp.lt.s32.totalorder %s94_s20, %s94_s20 }
  0x47   :  { %p14622_p2 = scmp.ne.s32.totalorder %s94_s20, %s14621_s3  ;;  %p14627_p4 = scmp.lt.s32.totalorder %s14621_s3, %s14621_s3 }
  0x49   :  { %p14628_p5 = por %p14627_p4, %p14626_p3 }
  0x4b   :  { %p14629_p6 = pnand %p14628_p5, %p14622_p2 }
  0x4d   :  { %14632 = shalt.err (!%p14629_p6)
}
  0x4e   :  { %99 = dma.hbm_to_vmem [thread:$0]  %s18274_s7, 2048, %s94_s20, [#allocation14], %s14693_s1, %s14693_s1, %s14694_s16  }
  0x4f   :  { %s14641_s24 = scalar_lea.vmem %s107_s22, 16  ;;  %s14645_s5 = scalar_lea.vmem %s107_s22, 32 }
  0x50   :  { %p14642_p7 = scmp.ne.s32.totalorder %s107_s22, %s14641_s24  ;;  %p14646_p8 = scmp.lt.s32.totalorder %s107_s22, %s107_s22 }
  0x51   :  { %p14647_p9 = scmp.lt.s32.totalorder %s14645_s5, %s14641_s24 }
  0x53   :  { %p14648_p10 = por %p14647_p9, %p14646_p8 }
  0x55   :  { %p14649_p11 = pnand %p14648_p10, %p14642_p7 }
  0x57   :  { %14652 = shalt.err (!%p14649_p11)
}
  0x58   :  { %109 = dma.hbm_to_vmem [thread:$0]  %s18275_s8, 16, %s107_s22, [#allocation17]  }
  0x59   :  { %14673 = dma.done.wait [#allocation5], 6144  }
  0x5a   :  { %14674 = vsyncadd [#allocation5], 4294961152 }
  0x5b   :  { %14675 = dma.done.wait [#allocation8], 86080  }
  0x5c   :  { %14676 = vsyncadd [#allocation8], 4294881216 }
  0x5d   :  { %14677 = dma.done.wait [#allocation11], 50240  }
  0x5e   :  { %14678 = vsyncadd [#allocation11], 4294917056 }
  0x5f   :  { %14679 = dma.done.wait [#allocation14], 2064  }
  0x60   :  { %14680 = vsyncadd [#allocation14], 4294965232 }
  0x61   :  { %14681 = dma.done.wait [#allocation17], 16  }
  0x62   :  { %14682 = vsyncadd [#allocation17], 4294967280  ;;  %v18277_v0 = vlaneseq  ;;  %v18278_v1 = vmov 0.0   ;;  %v14698_v2 = vmov 1966171168   ;;  %vm351_vm0 = vcmask 1045504  }
  0x63   :  { %428 = vmatprep.mubr.f32.mxu1 %v18278_v1  ;;  %v163_v3 = vunpack.c.l.s4 %v14698_v2  ;;  %958 = vmatprep.mubr.f32.mxu0 %v18278_v1  ;;  %v14783_v6 = vld [vmem:[#allocation4 + $0x68] sm:$0x3f]  ;;  %v14785_v7 = vld [vmem:[#allocation4 + $0x60] sm:$0x3f]  ;;  %v14818_v21 = vld [vmem:[#allocation4 + $0x78] sm:$0x3f] }
  0x64   :  { %v14781_v5 = vshrl.u32 %v18277_v0, 7  ;;  %v14787_v8 = vld [vmem:[#allocation4 + $0x48] sm:$0xff]  ;;  %13291 = vmatprep.subr.msk.mxu1 %vm351_vm0, %v14783_v6  ;;  %v14794_v10 = vld [vmem:[#allocation4 + $0x40] sm:$0xff]  ;;  %18362 = vst [vmem:[#allocation27_spill] sm:$0xff] %v14818_v21  ;;  %vm346_vm1 = vcmask 244736   ;;  %v15024_v56 = vld [vmem:[#allocation4 + $0xd0] sm:$0xff] }
  0x65   :  { %v164_v4 = vunpack.c.0.s8 %v163_v3  ;;  %18361 = vst [vmem:[#allocation26_spill] sm:$0xff] %v14787_v8  ;;  %13292 = vmatpush1.msk.msra.mxu1 %vm351_vm0, %v14785_v7  ;;  %v14798_v11 = vld [vmem:[#allocation4 + $0x28] sm:$0xff]  ;;  %v14801_v12 = vld [vmem:[#allocation4 + $0x20] sm:$0xff]  ;;  %vm5386_vm2 = vcmask 1048064   ;;  %s14700_s17 = smov 112   ;;  %vm5571_vm4 = vcmask 916480  }
  0x66   :  { %18360 = vst [vmem:[#allocation25_spill] sm:$0xff] %v14781_v5  ;;  %390 = vmatprep.subr.mxu1 %v14787_v8  ;;  %v134_v13 = vld [vmem:[%s18267_s0] sm:$0xff]  ;;  %v14810_v15 = vld [vmem:[#allocation4 + $0x8] sm:$0xff]  ;;  %vm6342_vm5 = vcmask 523265   ;;  %vm6885_vm6 = vcmask 523264   ;;  %vm6165_vm7 = vcmask 522240  }
  0x67   :  { %v14790_v9 = vsub.s32 %v164_v4, %v14781_v5  ;;  %v138_v14 = vld [vmem:[%s18267_s0 + $0x20] sm:$0xff]  ;;  %391 = vmatpush1.msra.mxu1 %v14794_v10  ;;  %v161_v16 = vcombine.high %v134_v13, %v134_v13  ;;  %v14824_v26 = vld [vmem:[#allocation4 + $0xe8] sm:$0x3f]  ;;  %s14701_s18 = smov 96   ;;  %vm11518_vm8 = vcmask 785408   ;;  %vm14702_vm9 = vmmov 0  }
  0x68   :  { %v209_v19 = vcombine.high %v138_v14, %v138_v14  ;;  %392 = vmatprep.subr.mxu1 %v14798_v11  ;;  %v14815_v20 = vld [vmem:[#allocation4] sm:$0xff]  ;;  %13300 = vmatprep.subr.msk.mxu0 %vm351_vm0, %v14824_v26  ;;  %v14840_v33 = vld [vmem:[#allocation4 + $0xc8] sm:$0xff]  ;;  %s14703_s19 = smov [#allocation18]  }
  0x69   :  { %v168_v17 = vrot.slane %v134_v13, %v14790_v9  ;;  %v216_v18 = vrot.slane %v138_v14, %v14790_v9  ;;  %393 = vmatpush1.msra.mxu1 %v14801_v12  ;;  %v175_v22 = vrot.slane %v161_v16, %v14790_v9  ;;  %v14833_v29 = vld [vmem:[#allocation4 + $0xe0] sm:$0x3f]  ;;  %v14865_v43 = vld [vmem:[#allocation4 + $0xa8] sm:$0xff]  ;;  %s13277_s20 = sshll.u32 %s14703_s19, 4  ;;  %s13278_s20 = int_to_ptr.vmem [resolvable:$true] %s13277_s20 }
  0x6a   :  { %394 = vmatprep.subr.mxu1 %v14810_v15  ;;  %v223_v28 = vrot.slane %v209_v19, %v14790_v9  ;;  %v14852_v38 = vld [vmem:[#allocation4 + $0xc0] sm:$0xff]  ;;  %13301 = vmatpush1.msk.msra.mxu0 %vm351_vm0, %v14833_v29  ;;  %v14884_v52 = vld [vmem:[#allocation4 + $0x88] sm:$0xff]  ;;  %s14653_s21 = scalar_lea.vmem %s13278_s20, 32  ;;  %p14658_p13 = scmp.lt.s32.totalorder %s13278_s20, %s13278_s20 }
  0x6b   :  { %v176_v23 = vcombine.high %v168_v17, %v168_v17  ;;  %v14822_v24 = vrot.slane %v168_v17, %v14790_v9  ;;  %v224_v25 = vcombine.high %v216_v18, %v216_v18  ;;  %v14828_v27 = vrot.slane %v216_v18, %v14790_v9  ;;  %395 = vmatpush1.msra.mxu1 %v14815_v20  ;;  %v14877_v48 = vld [vmem:[#allocation4 + $0xa0] sm:$0xff]  ;;  %v135_v53 = vld [vmem:[%s18267_s0 + $0x8] sm:$0xff]  ;;  %p14654_p12 = scmp.ne.s32.totalorder %s13278_s20, %s14653_s21  ;;  %p14659_p0 = scmp.lt.s32.totalorder %s14653_s21, %s14653_s21 }
  0x6c   :  { %v177_v30 = vcombine.high %v175_v22, %v175_v22  ;;  %v191_v31 = vrot.slane %v175_v22, %v14790_v9  ;;  %13295 = vmatprep.subr.msk.mxu1 %vm351_vm0, %v14818_v21  ;;  %v225_v34 = vcombine.high %v223_v28, %v223_v28  ;;  %v14845_v35 = vrot.slane %v223_v28, %v14790_v9  ;;  %v14896_v58 = vld [vmem:[#allocation4 + $0x80] sm:$0xff]  ;;  %v139_v63 = vld [vmem:[%s18267_s0 + $0x28] sm:$0xff] }
  0x6d   :  { %v14838_v32 = vrot.slane %v176_v23, %v14790_v9  ;;  %v14848_v36 = vrot.slane %v224_v25, %v14790_v9  ;;  %v254_v37 = vcombine.high %v14828_v27, %v14828_v27  ;;  %920 = vmatprep.subr.mxu0 %v14840_v33  ;;  %18363 = vst [vmem:[#allocation28_spill] sm:$0xff] %v14877_v48  ;;  %18364 = vst [vmem:[#allocation29_spill] sm:$0xff] %v14884_v52  ;;  %v14906_v2 = vld [vmem:[#allocation4 + $0x168] sm:$0x3f]  ;;  %p14660_p1 = por %p14659_p0, %p14658_p13 }
  0x6e   :  { %v14855_v39 = vrot.slane %v177_v30, %v14790_v9  ;;  %v14857_v40 = vcombine.high %v191_v31, %v191_v31  ;;  %v14870_v45 = vrot.slane %v225_v34, %v14790_v9  ;;  %v255_v46 = vcombine.high %v14845_v35, %v14845_v35  ;;  %921 = vmatpush1.msra.mxu0 %v14852_v38 }
  0x6f   :  { %v208_v41 = vcombine.high %v14838_v32, %v14838_v32  ;;  %v257_v42 = vcombine.low %v14822_v24, %v14838_v32  ;;  %v13290_v44 = vcombine.high %v14822_v24, %v14838_v32  ;;  %v256_v47 = vcombine.high %v14848_v36, %v14848_v36  ;;  %922 = vmatprep.subr.mxu0 %v14865_v43  ;;  %p14661_p2 = pnand %p14660_p1, %p14654_p12 }
  0x70   :  { %v259_v49 = vcombine.low %v191_v31, %v14855_v39  ;;  %v260_v50 = vcombine.low %v14857_v40, %v14828_v27  ;;  %v306_v57 = vcombine.low %v14848_v36, %v254_v37  ;;  %18365 = vst [vmem:[#allocation30_spill] sm:$0xff] %v14896_v58  ;;  %v308_v62 = vcombine.low %v14870_v45, %v255_v46  ;;  %v14925_v46 = vld [vmem:[#allocation4 + $0x70] sm:$0x3f] }
  0x71   :  { %v267_v51 = vrot.slane %v257_v42, %v14790_v9  ;;  %v274_v54 = vrot.slane %v13290_v44, %v14790_v9  ;;  %v14890_v55 = vcombine.low %v208_v41, %v191_v31  ;;  %v307_v61 = vcombine.low %v256_v47, %v14845_v35  ;;  %923 = vmatpush1.msra.mxu0 %v14877_v48 }
  0x72   :  { %v281_v59 = vrot.slane %v259_v49, %v14790_v9  ;;  %v288_v60 = vrot.slane %v260_v50, %v14790_v9  ;;  %18366 = vst [vmem:[#allocation31_spill] sm:$0xff] %v14906_v2  ;;  %v315_v4 = vrot.slane %v306_v57, %v14790_v9  ;;  %924 = vmatprep.subr.mxu0 %v14884_v52  ;;  %18367 = vst [vmem:[#allocation32_spill] sm:$0xff] %v14925_v46 }
  0x73   :  { %v289_v3 = vcombine.low %v267_v51, %v274_v54  ;;  %v693_v13 = vcombine.high %v135_v53, %v135_v53  ;;  %v322_v16 = vrot.slane %v307_v61, %v14790_v9  ;;  %v329_v17 = vrot.slane %v308_v62, %v14790_v9  ;;  %925 = vmatpush1.msra.mxu0 %v14896_v58  ;;  %v14934_v51 = vld [vmem:[#allocation4 + $0x58] sm:$0xff] }
  0x74   :  { %v290_v14 = vcombine.low %v281_v59, %v288_v60  ;;  %v700_v18 = vrot.slane %v135_v53, %v14790_v9  ;;  %v748_v23 = vrot.slane %v139_v63, %v14790_v9  ;;  %13309 = vmatprep.subr.msk.mxu0 %vm351_vm0, %v14906_v2  ;;  %v741_v25 = vcombine.high %v139_v63, %v139_v63  ;;  %v14943_v60 = vld [vmem:[#allocation4 + $0x50] sm:$0xff] }
  0x75   :  { %v297_v19 = vrot.slane %v289_v3, %v14790_v9  ;;  %v707_v22 = vrot.slane %v693_v13, %v14790_v9  ;;  %v330_v30 = vcombine.low %v315_v4, %v322_v16  ;;  %v344_v31 = vrot.slane %v329_v17, %v14790_v9  ;;  %v14956_v4 = vld [vmem:[#allocation4 + $0x38] sm:$0xff]  ;;  %v14962_v16 = vld [vmem:[#allocation4 + $0x30] sm:$0xff] }
  0x76   :  { %v304_v28 = vrot.slane %v290_v14, %v14790_v9  ;;  %v708_v34 = vcombine.high %v700_v18, %v700_v18  ;;  %v14922_v41 = vrot.slane %v700_v18, %v14790_v9  ;;  %v14932_v50 = vrot.slane %v748_v23, %v14790_v9 }
  0x77   :  { %v709_v37 = vcombine.high %v707_v22, %v707_v22  ;;  %v723_v42 = vrot.slane %v707_v22, %v14790_v9  ;;  %v337_v47 = vrot.slane %v330_v30, %v14790_v9  ;;  %v756_v57 = vcombine.high %v748_v23, %v748_v23  ;;  %v14971_v23 = vld [vmem:[#allocation4 + $0x18] sm:$0xff] }
  0x78   :  { %v305_v44 = vcombine.low %v297_v19, %v304_v28  ;;  %v14929_v49 = vrot.slane %v708_v34, %v14790_v9  ;;  %18368 = vst [vmem:[#allocation33_spill] sm:$0xff] %v14932_v50  ;;  %v755_v59 = vrot.slane %v741_v25, %v14790_v9  ;;  %v136_v34 = vld [vmem:[%s18267_s0 + $0x10] sm:$0xff] }
  0x79   :  { %v14937_v53 = vrot.slane %v709_v37, %v14790_v9  ;;  %v14939_v54 = vcombine.high %v723_v42, %v723_v42  ;;  %v14945_v61 = vcombine.low %v337_v47, %v344_v31  ;;  %v14984_v37 = vld [vmem:[#allocation4 + $0x10] sm:$0xff]  ;;  %v14987_v47 = vrot.slane %v756_v57, %v14790_v9 }
  0x7a   :  { %13293 = vmatmul.mubr.msk.f32.vlgmr.msra.gmra.mxu1 %vm346_vm1, %v305_v44  ;;  %v740_v62 = vcombine.high %v14929_v49, %v14929_v49  ;;  %v789_v63 = vcombine.low %v14922_v41, %v14929_v49  ;;  %v13299_v3 = vcombine.high %v14922_v41, %v14929_v49  ;;  %v757_v30 = vcombine.high %v755_v59, %v755_v59  ;;  %v15004_v57 = vld [vmem:[#allocation4 + $0xf0] sm:$0x3f] }
  0x7b   :  { %13296 = vmatpush1.msk.msra.mxu1 %vm351_vm0, %v14925_v46  ;;  %434 = vmatprep.mubr.f32.mxu1 %v18278_v1  ;;  %v791_v13 = vcombine.low %v723_v42, %v14937_v53  ;;  %v792_v14 = vcombine.low %v14939_v54, %v14932_v50  ;;  %v14976_v31 = vrot.slane %v755_v59, %v14790_v9  ;;  %v14992_v59 = vld [vmem:[%s18267_s0 + $0x30] sm:$0xff] }
  0x7c   :  { %467 = vmatprep.subr.mxu1 %v14934_v51  ;;  %v799_v17 = vrot.slane %v789_v63, %v14790_v9  ;;  %v806_v18 = vrot.slane %v13299_v3, %v14790_v9  ;;  %v14966_v19 = vcombine.low %v740_v62, %v723_v42  ;;  %18371 = vst [vmem:[#allocation36_spill] sm:$0xff] %v14987_v47  ;;  %v14996_v62 = vld [vmem:[#allocation4 + $0xf8] sm:$0x3f] }
  0x7d   :  { %468 = vmatpush1.msra.mxu1 %v14943_v60  ;;  %v813_v25 = vrot.slane %v791_v13, %v14790_v9  ;;  %v820_v28 = vrot.slane %v792_v14, %v14790_v9  ;;  %18370 = vst [vmem:[#allocation35_spill] sm:$0xff] %v14976_v31  ;;  %v14999_v3 = vrot.slane %v757_v30, %v14790_v9 }
  0x7e   :  { %18369 = vst [vmem:[#allocation34_spill] sm:$0xff] %v14966_v19  ;;  %469 = vmatprep.subr.mxu1 %v14956_v4  ;;  %13294 = vmatmul.mubr.msk.f32.gmra.mxu1 %vm346_vm1, %v14945_v61  ;;  %v821_v42 = vcombine.low %v799_v17, %v806_v18  ;;  %v786_v13 = vcombine.high %v14932_v50, %v14932_v50  ;;  %v15038_v19 = vld [vmem:[#allocation4 + $0xb0] sm:$0xff] }
  0x7f   :  { %470 = vmatpush1.msra.mxu1 %v14962_v16  ;;  %505 = vmatprep.mubr.f32.mxu1 %v18278_v1  ;;  %v822_v63 = vcombine.low %v813_v25, %v820_v28  ;;  %18372 = vst [vmem:[#allocation37_spill] sm:$0xff] %v14999_v3  ;;  %v787_v17 = vcombine.high %v14976_v31, %v14976_v31  ;;  %v15012_v25 = vld [vmem:[#allocation4 + $0xd8] sm:$0xff] }
  0x80   :  { %471 = vmatprep.subr.mxu1 %v14971_v23  ;;  %v829_v14 = vrot.slane %v821_v42, %v14790_v9  ;;  %v788_v18 = vcombine.high %v14987_v47, %v14987_v47  ;;  %v1237_v0 = vcombine.high %v136_v34, %v136_v34  ;;  %v838_v30 = vcombine.low %v14987_v47, %v786_v13  ;;  %v15032_v13 = vld [vmem:[#allocation4 + $0xb8] sm:$0xff] }
  0x81   :  { %472 = vmatpush1.msra.mxu1 %v14984_v37  ;;  %v836_v28 = vrot.slane %v822_v63, %v14790_v9  ;;  %v1244_v22 = vrot.slane %v136_v34, %v14790_v9  ;;  %v15019_v42 = vrot.slane %v14992_v59, %v14790_v9  ;;  %v840_v5 = vcombine.low %v14999_v3, %v787_v17  ;;  %v15044_v3 = vld [vmem:[#allocation4 + $0x98] sm:$0xff] }
  0x82   :  { %13304 = vmatprep.subr.msk.mxu1 %vm351_vm0, %v14996_v62  ;;  %13297 = vmatmul.mubr.msk.f32.vlgmr.msra.gmra.mxu1 %vm346_vm1, %v305_v44  ;;  %v839_v1 = vcombine.low %v788_v18, %v14976_v31  ;;  %v1251_v63 = vrot.slane %v1237_v0, %v14790_v9  ;;  %v18373_v34 = vmov 0.0   ;;  %18374 = vst [vmem:[#allocation38_spill] sm:$0xff] %v15032_v13  ;;  %18375 = vst [vmem:[#allocation39_spill] sm:$0xff] %v15044_v3 }
  0x83   :  { %13305 = vmatpush1.msk.msra.mxu1 %vm351_vm0, %v15004_v57  ;;  %511 = vmatprep.mubr.f32.mxu1 %v18373_v34  ;;  %v15034_v2 = vcombine.low %v829_v14, %v836_v28  ;;  %v847_v50 = vrot.slane %v838_v30, %v14790_v9  ;;  %v1252_v44 = vcombine.high %v1244_v22, %v1244_v22  ;;  %v15048_v14 = vld [vmem:[#allocation4 + $0x160] sm:$0x3f] }
  0x84   :  { %997 = vmatprep.subr.mxu1 %v15012_v25  ;;  %v854_v17 = vrot.slane %v839_v1, %v14790_v9  ;;  %v861_v0 = vrot.slane %v840_v5, %v14790_v9  ;;  %v1253_v18 = vcombine.high %v1251_v63, %v1251_v63  ;;  %v1260_v31 = vrot.slane %v1244_v22, %v14790_v9  ;;  %v15059_v5 = vld [vmem:[#allocation4 + $0x90] sm:$0xff]  ;;  %v15061_v22 = vld [vmem:[#allocation4 + $0x148] sm:$0xff] }
  0x85   :  { %998 = vmatpush1.msra.mxu1 %v15024_v56  ;;  %13302 = vmatmul.mubr.msk.f32.vlgmr.msra.gmra.mxu0 %vm346_vm1, %v15034_v2  ;;  %18376 = vst [vmem:[#allocation40_spill] sm:$0xff] %v15048_v14  ;;  %v1267_v28 = vrot.slane %v1251_v63, %v14790_v9  ;;  %v1274_v30 = vrot.slane %v1252_v44, %v14790_v9  ;;  %18377 = vst [vmem:[#allocation41_spill] sm:$0xff] %v15059_v5  ;;  %v15067_v44 = vld [vmem:[#allocation4 + $0x178] sm:$0x3f] }
  0x86   :  { %v15054_v1 = vrot.slane %v15019_v42, %v14790_v9  ;;  %999 = vmatprep.subr.mxu1 %v15032_v13  ;;  %13298 = vmatmul.mubr.msk.f32.gmra.mxu1 %vm346_vm1, %v14945_v61  ;;  %18378 = vst [vmem:[#allocation42_spill] sm:$0xff] %v15061_v22  ;;  %v862_v58 = vcombine.low %v847_v50, %v854_v17  ;;  %18379 = vst [vmem:[#allocation43_spill] sm:$0xff] %v15067_v44  ;;  %v15072_v61 = vld [vmem:[#allocation4 + $0x170] sm:$0x3f] }
  0x87   :  { %v876_v52 = vrot.slane %v861_v0, %v14790_v9  ;;  %v1281_v63 = vrot.slane %v1253_v18, %v14790_v9  ;;  %1000 = vmatpush1.msra.mxu1 %v15038_v19  ;;  %1035 = vmatprep.mubr.f32.mxu1 %v18373_v34  ;;  %v1283_v47 = vcombine.high %v1267_v28, %v1267_v28  ;;  %v15079_v18 = vld [vmem:[#allocation4 + $0x140] sm:$0xff] }
  0x88   :  { %v1333_v13 = vcombine.low %v1260_v31, %v1274_v30  ;;  %v13308_v48 = vcombine.high %v1260_v31, %v1274_v30  ;;  %1001 = vmatprep.subr.mxu1 %v15044_v3  ;;  %13310 = vmatpush1.msk.msra.mxu0 %vm351_vm0, %v15048_v14  ;;  %18380 = vst [vmem:[#allocation44_spill] sm:$0xff] %v15072_v61  ;;  %18381 = vst [vmem:[#allocation45_spill] sm:$0xff] %v15079_v18  ;;  %v15081_v31 = vld [vmem:[#allocation4 + $0x158] sm:$0xff] }
  0x89   :  { %v869_v50 = vrot.slane %v862_v58, %v14790_v9  ;;  %v1335_v17 = vcombine.low %v1267_v28, %v1281_v63  ;;  %v1285_v0 = vcombine.high %v14992_v59, %v14992_v59  ;;  %1002 = vmatpush1.msra.mxu1 %v15059_v5  ;;  %1464 = vmatprep.subr.mxu0 %v15061_v22  ;;  %v15092_v59 = vld [vmem:[#allocation4 + $0x128] sm:$0xff] }
  0x8a   :  { %18382 = vst [vmem:[#allocation46_spill] sm:$0xff] %v15081_v31  ;;  %v1336_v30 = vcombine.low %v1283_v47, %v15054_v1  ;;  %v1343_v14 = vrot.slane %v1333_v13, %v14790_v9  ;;  %v1350_v3 = vrot.slane %v13308_v48, %v14790_v9  ;;  %13313 = vmatprep.subr.msk.mxu1 %vm351_vm0, %v15067_v44  ;;  %18383 = vst [vmem:[#allocation47_spill] sm:$0xff] %v15092_v59  ;;  %v15099_v48 = vld [vmem:[#allocation4 + $0x150] sm:$0xff] }
  0x8b   :  { %13306 = vmatmul.mubr.msk.f32.vlgmr.msra.gmra.mxu1 %vm346_vm1, %v15034_v2  ;;  %v15090_v58 = vcombine.low %v869_v50, %v876_v52  ;;  %v1357_v28 = vrot.slane %v1335_v17, %v14790_v9  ;;  %v1299_v63 = vrot.slane %v1285_v0, %v14790_v9  ;;  %964 = vmatprep.mubr.f32.mxu0 %v18373_v34  ;;  %v137_v50 = vld [vmem:[%s18267_s0 + $0x18] sm:$0xff]  ;;  %v15109_v17 = vld [vmem:[#allocation4 + $0x120] sm:$0xff] }
  0x8c   :  { %13314 = vmatpush1.msk.msra.mxu1 %vm351_vm0, %v15072_v61  ;;  %18384 = vst [vmem:[#allocation48_spill] sm:$0xff] %v15099_v48  ;;  %v1364_v47 = vrot.slane %v1336_v30, %v14790_v9  ;;  %v1365_v13 = vcombine.low %v1343_v14, %v1350_v3  ;;  %v1300_v52 = vcombine.high %v15019_v42, %v15019_v42  ;;  %18385 = vst [vmem:[#allocation49_spill] sm:$0xff] %v15109_v17  ;;  %v15111_v0 = vld [vmem:[#allocation4 + $0x138] sm:$0xff]  ;;  %v15119_v42 = vld [vmem:[#allocation4 + $0x108] sm:$0xff] }
  0x8d   :  { %1465 = vmatpush1.msra.mxu0 %v15079_v18  ;;  %1541 = vmatprep.subr.mxu1 %v15081_v31  ;;  %18386 = vst [vmem:[#allocation50_spill] sm:$0xff] %v15111_v0  ;;  %v1301_v61 = vcombine.high %v1299_v63, %v1299_v63  ;;  %v1315_v22 = vrot.slane %v1299_v63, %v14790_v9  ;;  %v15125_v63 = vld [vmem:[#allocation4 + $0x130] sm:$0xff]  ;;  %v15127_v18 = vld [vmem:[#allocation4 + $0x100] sm:$0xff] }
  0x8e   :  { %v1330_v3 = vcombine.high %v15054_v1, %v15054_v1  ;;  %13303 = vmatmul.mubr.msk.f32.gmra.mxu0 %vm346_vm1, %v15090_v58  ;;  %1466 = vmatprep.subr.mxu0 %v15092_v59  ;;  %v1366_v14 = vcombine.low %v1357_v28, %v1364_v47  ;;  %v1373_v30 = vrot.slane %v1365_v13, %v14790_v9  ;;  %v15132_v28 = vld [vmem:[#allocation4 + $0x118] sm:$0xff] }
  0x8f   :  { %v1322_v31 = vrot.slane %v1300_v52, %v14790_v9  ;;  %1542 = vmatpush1.msra.mxu1 %v15099_v48  ;;  %1041 = vmatprep.mubr.f32.mxu1 %v18373_v34  ;;  %v1329_v1 = vrot.slane %v1301_v61, %v14790_v9  ;;  %v1331_v44 = vcombine.high %v1315_v22, %v1315_v22  ;;  %v15138_v48 = vld [vmem:[#allocation4 + $0x110] sm:$0xff] }
  0x90   :  { %v2517_v5 = vcombine.high %v137_v50, %v137_v50  ;;  %1467 = vmatpush1.msra.mxu0 %v15109_v17  ;;  %1543 = vmatprep.subr.mxu1 %v15111_v0  ;;  %v1380_v47 = vrot.slane %v1366_v14, %v14790_v9  ;;  %v2524_v59 = vrot.slane %v137_v50, %v14790_v9 }
  0x91   :  { %v1332_v13 = vcombine.high %v1322_v31, %v1322_v31  ;;  %v1382_v52 = vcombine.low %v1322_v31, %v1330_v3  ;;  %13307 = vmatmul.mubr.msk.f32.gmra.mxu1 %vm346_vm1, %v15090_v58  ;;  %1468 = vmatprep.subr.mxu0 %v15119_v42  ;;  %v1384_v61 = vcombine.low %v1329_v1, %v1331_v44  ;;  %v141_v44 = vld [vmem:[%s18267_s0 + $0x38] sm:$0xff]  ;;  %s14699_s0 = smov 64  }
  0x92   :  { %v2531_v17 = vrot.slane %v2517_v5, %v14790_v9  ;;  %1544 = vmatpush1.msra.mxu1 %v15125_v63  ;;  %1469 = vmatpush1.msra.mxu0 %v15127_v18  ;;  %v15144_v0 = vcombine.low %v1373_v30, %v1380_v47  ;;  %v2532_v5 = vcombine.high %v2524_v59, %v2524_v59 }
  0x93   :  { %v1383_v14 = vcombine.low %v1332_v13, %v1315_v22  ;;  %v1391_v31 = vrot.slane %v1382_v52, %v14790_v9  ;;  %1502 = vmatprep.mubr.f32.mxu0 %v18373_v34  ;;  %1545 = vmatprep.subr.mxu1 %v15132_v28  ;;  %v1405_v3 = vrot.slane %v1384_v61, %v14790_v9 }
  0x94   :  { %v2533_v50 = vcombine.high %v2531_v17, %v2531_v17  ;;  %13311 = vmatmul.mubr.msk.f32.vlgmr.msra.gmra.mxu0 %vm346_vm1, %v15144_v0  ;;  %1546 = vmatpush1.msra.mxu1 %v15138_v48  ;;  %v2540_v30 = vrot.slane %v2524_v59, %v14790_v9  ;;  %v2547_v1 = vrot.slane %v2531_v17, %v14790_v9 }
  0x95   :  { %v1398_v22 = vrot.slane %v1383_v14, %v14790_v9  ;;  %13317 = vmatprep.subr.msk.mxu0 %vm351_vm0, %v14783_v6  ;;  %1579 = vmatprep.mubr.f32.mxu1 %v18373_v34  ;;  %v1420_v47 = vrot.slane %v1405_v3, %v14790_v9  ;;  %v2554_v13 = vrot.slane %v2532_v5, %v14790_v9 }
  0x96   :  { %v2561_v52 = vrot.slane %v2533_v50, %v14790_v9  ;;  %13318 = vmatpush1.msk.msra.mxu0 %vm351_vm0, %v14785_v7  ;;  %13321 = vmatprep.subr.msk.mxu1 %vm351_vm0, %v14818_v21  ;;  %v2563_v61 = vcombine.high %v2547_v1, %v2547_v1  ;;  %v2572_v17 = vrot.slane %v141_v44, %v14790_v9 }
  0x97   :  { %v1406_v59 = vcombine.low %v1391_v31, %v1398_v22  ;;  %13315 = vmatmul.mubr.msk.f32.vlgmr.msra.gmra.mxu1 %vm346_vm1, %v15144_v0  ;;  %1907 = vmatprep.subr.mxu0 %v14787_v8  ;;  %v2613_v14 = vcombine.low %v2540_v30, %v2554_v13  ;;  %v2565_v50 = vcombine.high %v141_v44, %v141_v44 }
  0x98   :  { %13322 = vmatpush1.msk.msra.mxu1 %vm351_vm0, %v14925_v46  ;;  %1508 = vmatprep.mubr.f32.mxu0 %v18373_v34  ;;  %v2588_v5 = vrot.slane %v2572_v17, %v14790_v9  ;;  %v206_v31 = vcombine.high %v14822_v24, %v14822_v24  ;;  %v13333_v22 = vcombine.high %v2540_v30, %v2554_v13 }
  0x99   :  { %v1413_v3 = vrot.slane %v1406_v59, %v14790_v9  ;;  %1908 = vmatpush1.msra.mxu0 %v14794_v10  ;;  %1984 = vmatprep.subr.mxu1 %v14934_v51  ;;  %v2615_v8 = vcombine.low %v2547_v1, %v2561_v52  ;;  %v2579_v59 = vrot.slane %v2565_v50, %v14790_v9 }
  0x9a   :  { %1909 = vmatprep.subr.mxu0 %v14798_v11  ;;  %1985 = vmatpush1.msra.mxu1 %v14943_v60  ;;  %v2616_v46 = vcombine.low %v2563_v61, %v2588_v5  ;;  %v3692_v44 = vcombine.high %v14855_v39, %v14855_v39  ;;  %v2580_v24 = vcombine.high %v2572_v17, %v2572_v17 }
  0x9b   :  { %v15182_v21 = vcombine.low %v1413_v3, %v1420_v47  ;;  %1585 = vmatprep.mubr.f32.mxu1 %v18373_v34  ;;  %1910 = vmatpush1.msra.mxu0 %v14801_v12  ;;  %v18387_v30 = vcombine.low %v14855_v39, %v14857_v40  ;;  %v738_v47 = vcombine.high %v14922_v41, %v14922_v41 }
  0x9c   :  { %1986 = vmatprep.subr.mxu1 %v14956_v4  ;;  %v15201_v13 = vrot.slane %v2613_v14, %v14790_v9  ;;  %1911 = vmatprep.subr.mxu0 %v14810_v15  ;;  %v2581_v52 = vcombine.high %v2579_v59, %v2579_v59  ;;  %v2595_v39 = vrot.slane %v2579_v59, %v14790_v9 }
  0x9d   :  { %v3718_v1 = vrot.slane %v18387_v30, %v14790_v9  ;;  %13312 = vmatmul.mubr.msk.f32.gmra.mxu0 %vm346_vm1, %v15182_v21  ;;  %13316 = vmatmul.mubr.msk.f32.gmra.mxu1 %vm346_vm1, %v15182_v21  ;;  %v3694_v40 = vcombine.low %v14838_v32, %v206_v31  ;;  %v15211_v41 = vrot.slane %v13333_v22, %v14790_v9 }
  0x9e   :  { %1987 = vmatpush1.msra.mxu1 %v14962_v16  ;;  %1912 = vmatpush1.msra.mxu0 %v14815_v20  ;;  %v2637_v61 = vrot.slane %v2615_v8, %v14790_v9  ;;  %v2644_v17 = vrot.slane %v2616_v46, %v14790_v9  ;;  %v4773_v14 = vcombine.high %v14937_v53, %v14937_v53 }
  0x9f   :  { %1945 = vmatprep.mubr.f32.mxu0 %v18373_v34  ;;  %1988 = vmatprep.subr.mxu1 %v14971_v23  ;;  %v2602_v32 = vrot.slane %v2580_v24, %v14790_v9  ;;  %v3697_v3 = vcombine.low %v3692_v44, %v14848_v36  ;;  %v18388_v50 = vcombine.low %v14937_v53, %v14939_v54 }
  0xa0   :  { %1989 = vmatpush1.msra.mxu1 %v14984_v37  ;;  %v2610_v8 = vcombine.high %v2588_v5, %v2588_v5  ;;  %v3704_v46 = vrot.slane %v3694_v40, %v14790_v9  ;;  %13325 = vmatprep.subr.msk.mxu0 %vm351_vm0, %v14824_v26  ;;  %v2609_v22 = vrot.slane %v2581_v52, %v14790_v9 }
  0xa1   :  { %v15225_v31 = vrot.slane %v18388_v50, %v14790_v9  ;;  %13319 = vmatmul.mubr.msk.f32.vlgmr.msra.gmra.mxu0 %vm346_vm1, %v15034_v2  ;;  %2022 = vmatprep.mubr.f32.mxu1 %v18373_v34  ;;  %v2611_v59 = vcombine.high %v2595_v39, %v2595_v39  ;;  %v3711_v53 = vrot.slane %v14890_v55, %v14790_v9 }
  0xa2   :  { %13326 = vmatpush1.msk.msra.mxu0 %vm351_vm0, %v14833_v29  ;;  %13329 = vmatprep.subr.msk.mxu1 %vm351_vm0, %v14996_v62  ;;  %v2645_v54 = vcombine.low %v15201_v13, %v15211_v41  ;;  %v15243_v5 = vcombine.low %v2637_v61, %v2644_v17  ;;  %v3725_v44 = vrot.slane %v3697_v3, %v14790_v9 }
  0xa3   :  { %13323 = vmatmul.mubr.msk.f32.vlgmr.msra.gmra.mxu1 %vm346_vm1, %v15034_v2  ;;  %2217 = vmatprep.subr.mxu0 %v14840_v33  ;;  %v2612_v24 = vcombine.high %v2602_v32, %v2602_v32  ;;  %v3726_v55 = vcombine.low %v3704_v46, %v3711_v53  ;;  %v13358_v30 = vcombine.high %v14828_v27, %v14848_v36 }
  0xa4   :  { %13330 = vmatpush1.msk.msra.mxu1 %vm351_vm0, %v15004_v57  ;;  %1951 = vmatprep.mubr.f32.mxu0 %v18373_v34  ;;  %v15254_v52 = vcombine.low %v2602_v32, %v2610_v8  ;;  %v3727_v40 = vcombine.low %v3718_v1, %v3725_v44  ;;  %v3744_v61 = vcombine.low %v14845_v35, %v14870_v45  ;;  %v18390_v8 = vld [vmem:[#allocation38_spill] sm:$0xff]  ;;  %v18392_v44 = vld [vmem:[#allocation29_spill] sm:$0xff] }
  0xa5   :  { %2218 = vmatpush1.msra.mxu0 %v14852_v38  ;;  %2294 = vmatprep.subr.mxu1 %v15012_v25  ;;  %v15260_v2 = vcombine.low %v2609_v22, %v2611_v59  ;;  %v3734_v17 = vrot.slane %v3726_v55, %v14790_v9  ;;  %v13359_v27 = vcombine.high %v14845_v35, %v14870_v45  ;;  %v18389_v45 = vld [vmem:[#allocation28_spill] sm:$0xff] }
  0xa6   :  { %13320 = vmatmul.mubr.msk.f32.gmra.mxu0 %vm346_vm1, %v15090_v58  ;;  %2219 = vmatprep.subr.mxu0 %v14865_v43  ;;  %v3741_v36 = vrot.slane %v3727_v40, %v14790_v9  ;;  %v3752_v1 = vrot.slane %v13358_v30, %v14790_v9  ;;  %v3759_v32 = vrot.slane %v3744_v61, %v14790_v9  ;;  %v18391_v59 = vld [vmem:[#allocation36_spill] sm:$0xff]  ;;  %v18395_v40 = vld [vmem:[#allocation39_spill] sm:$0xff] }
  0xa7   :  { %2295 = vmatpush1.msra.mxu1 %v15024_v56  ;;  %2028 = vmatprep.mubr.f32.mxu1 %v18373_v34  ;;  %v2663_v3 = vcombine.low %v2612_v24, %v2595_v39  ;;  %v3766_v50 = vrot.slane %v13359_v27, %v14790_v9  ;;  %v4775_v35 = vcombine.low %v14929_v49, %v738_v47  ;;  %v18393_v47 = vld [vmem:[#allocation30_spill] sm:$0xff]  ;;  %v18398_v27 = vld [vmem:[#allocation35_spill] sm:$0xff] }
  0xa8   :  { %2220 = vmatpush1.msra.mxu0 %v18389_v45  ;;  %2296 = vmatprep.subr.mxu1 %v18390_v8  ;;  %v15277_v46 = vcombine.low %v3734_v17, %v3741_v36  ;;  %v3767_v22 = vcombine.low %v3752_v1, %v3759_v32  ;;  %v4778_v53 = vcombine.low %v4773_v14, %v18391_v59  ;;  %v18394_v14 = vld [vmem:[#allocation34_spill] sm:$0xff]  ;;  %v18397_v17 = vld [vmem:[#allocation37_spill] sm:$0xff] }
  0xa9   :  { %13324 = vmatmul.mubr.msk.f32.gmra.mxu1 %vm346_vm1, %v15090_v58  ;;  %2221 = vmatprep.subr.mxu0 %v18392_v44  ;;  %v2671_v39 = vrot.slane %v15254_v52, %v14790_v9  ;;  %v3781_v24 = vrot.slane %v3766_v50, %v14790_v9  ;;  %v4785_v49 = vrot.slane %v4775_v35, %v14790_v9  ;;  %v18396_v52 = vld [vmem:[#allocation33_spill] sm:$0xff] }
  0xaa   :  { %2297 = vmatpush1.msra.mxu1 %v15038_v19  ;;  %2222 = vmatpush1.msra.mxu0 %v18393_v47  ;;  %v3774_v55 = vrot.slane %v3767_v22, %v14790_v9  ;;  %v4792_v30 = vrot.slane %v18394_v14, %v14790_v9  ;;  %v4806_v58 = vrot.slane %v4778_v53, %v14790_v9  ;;  %v18399_v32 = vld [vmem:[#allocation41_spill] sm:$0xff]  ;;  %v18400_v53 = vld [vmem:[#allocation31_spill] sm:$0xff] }
  0xab   :  { %2255 = vmatprep.mubr.f32.mxu0 %v18373_v34  ;;  %2298 = vmatprep.subr.mxu1 %v18395_v40  ;;  %v13384_v61 = vcombine.high %v18396_v52, %v18391_v59  ;;  %v4825_v36 = vcombine.low %v18398_v27, %v18397_v17  ;;  %v13385_v1 = vcombine.high %v18398_v27, %v18397_v17  ;;  %v18401_v17 = vld [vmem:[#allocation40_spill] sm:$0xff]  ;;  %v18402_v27 = vld [vmem:[#allocation43_spill] sm:$0xff] }
  0xac   :  { %13327 = vmatmul.mubr.msk.f32.vlgmr.msra.gmra.mxu0 %vm346_vm1, %v15144_v0  ;;  %2299 = vmatpush1.msra.mxu1 %v18399_v32  ;;  %v15304_v50 = vcombine.low %v3774_v55, %v3781_v24  ;;  %v4807_v35 = vcombine.low %v4785_v49, %v4792_v30  ;;  %v4808_v22 = vcombine.low %v15225_v31, %v4806_v58  ;;  %v18403_v55 = vld [vmem:[#allocation42_spill] sm:$0xff] }
  0xad   :  { %13334 = vmatprep.subr.msk.mxu0 %vm351_vm0, %v18400_v53  ;;  %2332 = vmatprep.mubr.f32.mxu1 %v18373_v34  ;;  %v4833_v59 = vrot.slane %v13384_v61, %v14790_v9  ;;  %v4840_v14 = vrot.slane %v4825_v36, %v14790_v9  ;;  %v4847_v52 = vrot.slane %v13385_v1, %v14790_v9  ;;  %v18404_v61 = vld [vmem:[#allocation44_spill] sm:$0xff] }
  0xae   :  { %13335 = vmatpush1.msk.msra.mxu0 %vm351_vm0, %v18401_v17  ;;  %13338 = vmatprep.subr.msk.mxu1 %vm351_vm0, %v18402_v27  ;;  %v2678_v24 = vrot.slane %v2663_v3, %v14790_v9  ;;  %v4815_v31 = vrot.slane %v4807_v35, %v14790_v9  ;;  %v4822_v49 = vrot.slane %v4808_v22, %v14790_v9  ;;  %v18405_v35 = vld [vmem:[#allocation45_spill] sm:$0xff]  ;;  %v18406_v22 = vld [vmem:[#allocation46_spill] sm:$0xff] }
  0xaf   :  { %13331 = vmatmul.mubr.msk.f32.vlgmr.msra.gmra.mxu1 %vm346_vm1, %v15144_v0  ;;  %2732 = vmatprep.subr.mxu0 %v18403_v55  ;;  %v4848_v30 = vcombine.low %v4833_v59, %v4840_v14  ;;  %v4862_v58 = vrot.slane %v4847_v52, %v14790_v9  ;;  %v2653_v3 = vrot.slane %v2645_v54, %v14790_v9  ;;  %v18407_v14 = vld [vmem:[#allocation47_spill] sm:$0xff]  ;;  %v18408_v54 = vld [vmem:[#allocation48_spill] sm:$0xff]  ;;  %v18409_v52 = vld [vmem:[#allocation49_spill] sm:$0xff] }
  0xb0   :  { %13339 = vmatpush1.msk.msra.mxu1 %vm351_vm0, %v18404_v61  ;;  %2261 = vmatprep.mubr.f32.mxu0 %v18373_v34  ;;  %v2660_v36 = vrot.slane %v15243_v5, %v14790_v9  ;;  %v15333_v1 = vcombine.low %v4815_v31, %v4822_v49  ;;  %v2685_v13 = vrot.slane %v15260_v2, %v14790_v9  ;;  %v18410_v31 = vld [vmem:[#allocation50_spill] sm:$0xff] }
  0xb1   :  { %2733 = vmatpush1.msra.mxu0 %v18405_v35  ;;  %2809 = vmatprep.subr.mxu1 %v18406_v22  ;;  %v4855_v59 = vrot.slane %v4848_v30, %v14790_v9  ;;  %v2686_v41 = vcombine.low %v2671_v39, %v2678_v24  ;;  %v18411_v24 = vld [vmem:[#allocation27_spill] sm:$0xff] }
  0xb2   :  { %13328 = vmatmul.mubr.msk.f32.gmra.mxu0 %vm346_vm1, %v15182_v21  ;;  %2734 = vmatprep.subr.mxu0 %v18407_v14  ;;  %v15349_v49 = vcombine.low %v2653_v3, %v2660_v36  ;;  %v2700_v39 = vrot.slane %v2685_v13, %v14790_v9  ;;  %v18413_v3 = vld [vmem:[#allocation32_spill] sm:$0xff] }
  0xb3   :  { %2810 = vmatpush1.msra.mxu1 %v18408_v54  ;;  %2338 = vmatprep.mubr.f32.mxu1 %v18373_v34  ;;  %v15345_v5 = vcombine.low %v4855_v59, %v4862_v58  ;;  %v2693_v2 = vrot.slane %v2686_v41, %v14790_v9  ;;  %v18412_v58 = vld [vmem:[#allocation26_spill] sm:$0xff] }
  0xb4   :  { %2735 = vmatpush1.msra.mxu0 %v18409_v52  ;;  %2811 = vmatprep.subr.mxu1 %v18410_v31 }
  0xb5   :  { %13332 = vmatmul.mubr.msk.f32.gmra.mxu1 %vm346_vm1, %v15182_v21  ;;  %2736 = vmatprep.subr.mxu0 %v15119_v42  ;;  %v15370_v30 = vcombine.low %v2693_v2, %v2700_v39 }
  0xb6   :  { %2812 = vmatpush1.msra.mxu1 %v15125_v63  ;;  %2737 = vmatpush1.msra.mxu0 %v15127_v18 }
  0xb7   :  { %2770 = vmatprep.mubr.f32.mxu0 %v18373_v34  ;;  %2813 = vmatprep.subr.mxu1 %v15132_v28 }
  0xb8   :  { %13336 = vmatmul.mubr.msk.f32.vlgmr.msra.gmra.mxu0 %vm346_vm1, %v15349_v49  ;;  %2814 = vmatpush1.msra.mxu1 %v15138_v48 }
  0xb9   :  { %13342 = vmatprep.subr.msk.mxu0 %vm351_vm0, %v14783_v6  ;;  %2847 = vmatprep.mubr.f32.mxu1 %v18373_v34 }
  0xba   :  { %13343 = vmatpush1.msk.msra.mxu0 %vm351_vm0, %v14785_v7  ;;  %13346 = vmatprep.subr.msk.mxu1 %vm351_vm0, %v18411_v24 }
  0xbb   :  { %13340 = vmatmul.mubr.msk.f32.vlgmr.msra.gmra.mxu1 %vm346_vm1, %v15349_v49  ;;  %3084 = vmatprep.subr.mxu0 %v18412_v58 }
  0xbc   :  { %13347 = vmatpush1.msk.msra.mxu1 %vm351_vm0, %v18413_v3  ;;  %2776 = vmatprep.mubr.f32.mxu0 %v18373_v34 }
  0xbd   :  { %3085 = vmatpush1.msra.mxu0 %v14794_v10  ;;  %3161 = vmatprep.subr.mxu1 %v14934_v51 }
  0xbe   :  { %13337 = vmatmul.mubr.msk.f32.gmra.mxu0 %vm346_vm1, %v15370_v30  ;;  %3086 = vmatprep.subr.mxu0 %v14798_v11 }
  0xbf   :  { %3162 = vmatpush1.msra.mxu1 %v14943_v60  ;;  %2853 = vmatprep.mubr.f32.mxu1 %v18373_v34 }
  0xc0   :  { %3087 = vmatpush1.msra.mxu0 %v14801_v12  ;;  %3163 = vmatprep.subr.mxu1 %v14956_v4 }
  0xc1   :  { %13341 = vmatmul.mubr.msk.f32.gmra.mxu1 %vm346_vm1, %v15370_v30  ;;  %3088 = vmatprep.subr.mxu0 %v14810_v15 }
  0xc2   :  { %3164 = vmatpush1.msra.mxu1 %v14962_v16  ;;  %3089 = vmatpush1.msra.mxu0 %v14815_v20 }
  0xc3   :  { %3122 = vmatprep.mubr.f32.mxu0 %v18373_v34  ;;  %3165 = vmatprep.subr.mxu1 %v14971_v23 }
  0xc4   :  { %13344 = vmatmul.mubr.msk.f32.vlgmr.msra.gmra.mxu0 %vm346_vm1, %v15144_v0  ;;  %3166 = vmatpush1.msra.mxu1 %v14984_v37 }
  0xc5   :  { %13350 = vmatprep.subr.msk.mxu0 %vm351_vm0, %v14824_v26  ;;  %3199 = vmatprep.mubr.f32.mxu1 %v18373_v34 }
  0xc6   :  { %13351 = vmatpush1.msk.msra.mxu0 %vm351_vm0, %v14833_v29  ;;  %13354 = vmatprep.subr.msk.mxu1 %vm351_vm0, %v14996_v62 }
  0xc7   :  { %13348 = vmatmul.mubr.msk.f32.vlgmr.msra.gmra.mxu1 %vm346_vm1, %v15144_v0  ;;  %3394 = vmatprep.subr.mxu0 %v14840_v33 }
  0xc8   :  { %13355 = vmatpush1.msk.msra.mxu1 %vm351_vm0, %v15004_v57  ;;  %3128 = vmatprep.mubr.f32.mxu0 %v18373_v34 }
  0xc9   :  { %3395 = vmatpush1.msra.mxu0 %v14852_v38  ;;  %3471 = vmatprep.subr.mxu1 %v15012_v25 }
  0xca   :  { %13345 = vmatmul.mubr.msk.f32.gmra.mxu0 %vm346_vm1, %v15182_v21  ;;  %3396 = vmatprep.subr.mxu0 %v14865_v43 }
  0xcb   :  { %3472 = vmatpush1.msra.mxu1 %v15024_v56  ;;  %3205 = vmatprep.mubr.f32.mxu1 %v18373_v34 }
  0xcc   :  { %3397 = vmatpush1.msra.mxu0 %v18389_v45  ;;  %3473 = vmatprep.subr.mxu1 %v18390_v8 }
  0xcd   :  { %13349 = vmatmul.mubr.msk.f32.gmra.mxu1 %vm346_vm1, %v15182_v21  ;;  %3398 = vmatprep.subr.mxu0 %v18392_v44 }
  0xce   :  { %3474 = vmatpush1.msra.mxu1 %v15038_v19  ;;  %3399 = vmatpush1.msra.mxu0 %v18393_v47 }
  0xcf   :  { %3432 = vmatprep.mubr.f32.mxu0 %v18373_v34  ;;  %3475 = vmatprep.subr.mxu1 %v18395_v40 }
  0xd0   :  { %13352 = vmatmul.mubr.msk.f32.vlgmr.msra.gmra.mxu0 %vm346_vm1, %v15349_v49  ;;  %3476 = vmatpush1.msra.mxu1 %v18399_v32 }
  0xd1   :  { %13360 = vmatprep.subr.msk.mxu0 %vm351_vm0, %v18400_v53  ;;  %3509 = vmatprep.mubr.f32.mxu1 %v18373_v34 }
  0xd2   :  { %13361 = vmatpush1.msk.msra.mxu0 %vm351_vm0, %v18401_v17  ;;  %13364 = vmatprep.subr.msk.mxu1 %vm351_vm0, %v18402_v27 }
  0xd3   :  { %13356 = vmatmul.mubr.msk.f32.vlgmr.msra.gmra.mxu1 %vm346_vm1, %v15349_v49  ;;  %3813 = vmatprep.subr.mxu0 %v18403_v55 }
  0xd4   :  { %13365 = vmatpush1.msk.msra.mxu1 %vm351_vm0, %v18404_v61  ;;  %3438 = vmatprep.mubr.f32.mxu0 %v18373_v34 }
  0xd5   :  { %3814 = vmatpush1.msra.mxu0 %v18405_v35  ;;  %3890 = vmatprep.subr.mxu1 %v18406_v22 }
  0xd6   :  { %13353 = vmatmul.mubr.msk.f32.gmra.mxu0 %vm346_vm1, %v15370_v30  ;;  %3815 = vmatprep.subr.mxu0 %v18407_v14 }
  0xd7   :  { %3891 = vmatpush1.msra.mxu1 %v18408_v54  ;;  %3515 = vmatprep.mubr.f32.mxu1 %v18373_v34 }
  0xd8   :  { %3816 = vmatpush1.msra.mxu0 %v18409_v52  ;;  %3892 = vmatprep.subr.mxu1 %v18410_v31 }
  0xd9   :  { %13357 = vmatmul.mubr.msk.f32.gmra.mxu1 %vm346_vm1, %v15370_v30  ;;  %3817 = vmatprep.subr.mxu0 %v15119_v42 }
  0xda   :  { %3893 = vmatpush1.msra.mxu1 %v15125_v63  ;;  %3818 = vmatpush1.msra.mxu0 %v15127_v18 }
  0xdb   :  { %3851 = vmatprep.mubr.f32.mxu0 %v18373_v34  ;;  %3894 = vmatprep.subr.mxu1 %v15132_v28 }
  0xdc   :  { %13362 = vmatmul.mubr.msk.f32.vlgmr.msra.gmra.mxu0 %vm346_vm1, %v15277_v46  ;;  %3895 = vmatpush1.msra.mxu1 %v15138_v48 }
  0xdd   :  { %13368 = vmatprep.subr.msk.mxu0 %vm351_vm0, %v14783_v6  ;;  %3928 = vmatprep.mubr.f32.mxu1 %v18373_v34  ;;  %v18414_v6 = vld [vmem:[#allocation25_spill] sm:$0xff] }
  0xde   :  { %13369 = vmatpush1.msk.msra.mxu0 %vm351_vm0, %v14785_v7  ;;  %13372 = vmatprep.subr.msk.mxu1 %vm351_vm0, %v18411_v24  ;;  %v18332_v7 = vsub.s32 0, %v18414_v6 }
  0xdf   :  { %13366 = vmatmul.mubr.msk.f32.vlgmr.msra.gmra.mxu1 %vm346_vm1, %v15277_v46  ;;  %4165 = vmatprep.subr.mxu0 %v18412_v58 }
  0xe0   :  { %13373 = vmatpush1.msk.msra.mxu1 %vm351_vm0, %v18413_v3  ;;  %3857 = vmatprep.mubr.f32.mxu0 %v18373_v34 }
  0xe1   :  { %4166 = vmatpush1.msra.mxu0 %v14794_v10  ;;  %4242 = vmatprep.subr.mxu1 %v14934_v51  ;;  %v18331_v10 = vsub.s32 1, %v18414_v6 }
  0xe2   :  { %13363 = vmatmul.mubr.msk.f32.gmra.mxu0 %vm346_vm1, %v15304_v50  ;;  %4167 = vmatprep.subr.mxu0 %v14798_v11  ;;  %v18330_v11 = vsub.s32 2, %v18414_v6 }
  0xe3   :  { %4243 = vmatpush1.msra.mxu1 %v14943_v60  ;;  %3934 = vmatprep.mubr.f32.mxu1 %v18373_v34 }
  0xe4   :  { %4168 = vmatpush1.msra.mxu0 %v14801_v12  ;;  %4244 = vmatprep.subr.mxu1 %v14956_v4  ;;  %v18329_v12 = vsub.s32 3, %v18414_v6 }
  0xe5   :  { %13367 = vmatmul.mubr.msk.f32.gmra.mxu1 %vm346_vm1, %v15304_v50  ;;  %4169 = vmatprep.subr.mxu0 %v14810_v15  ;;  %v142_v15 = vld [vmem:[#allocation7] sm:$0xf] }
  0xe6   :  { %4245 = vmatpush1.msra.mxu1 %v14962_v16  ;;  %4170 = vmatpush1.msra.mxu0 %v14815_v20  ;;  %v1766_v20 = vrot.slane %v142_v15, %v18332_v7  ;;  %v1770_v21 = vrot.slane %v142_v15, %v18331_v10 }
  0xe7   :  { %4203 = vmatprep.mubr.f32.mxu0 %v18373_v34  ;;  %4246 = vmatprep.subr.mxu1 %v14971_v23 }
  0xe8   :  { %13370 = vmatmul.mubr.msk.f32.vlgmr.msra.gmra.mxu0 %vm346_vm1, %v15349_v49  ;;  %4247 = vmatpush1.msra.mxu1 %v14984_v37  ;;  %v1780_v51 = vcombine.high %v1766_v20, %v1770_v21 }
  0xe9   :  { %13376 = vmatprep.subr.msk.mxu0 %vm351_vm0, %v14824_v26  ;;  %4280 = vmatprep.mubr.f32.mxu1 %v18373_v34  ;;  %v1774_v26 = vrot.slane %v142_v15, %v18330_v11 }
  0xea   :  { %13377 = vmatpush1.msk.msra.mxu0 %vm351_vm0, %v14833_v29  ;;  %13380 = vmatprep.subr.msk.mxu1 %vm351_vm0, %v14996_v62  ;;  %v1778_v29 = vrot.slane %v142_v15, %v18329_v12  ;;  %v1796_v37 = vrot.slane %v1780_v51, %v14790_v9 }
  0xeb   :  { %13374 = vmatmul.mubr.msk.f32.vlgmr.msra.gmra.mxu1 %vm346_vm1, %v15349_v49  ;;  %4475 = vmatprep.subr.mxu0 %v14840_v33 }
  0xec   :  { %13381 = vmatpush1.msk.msra.mxu1 %vm351_vm0, %v15004_v57  ;;  %4209 = vmatprep.mubr.f32.mxu0 %v18373_v34  ;;  %v1782_v60 = vcombine.high %v1774_v26, %v1778_v29 }
  0xed   :  { %4476 = vmatpush1.msra.mxu0 %v14852_v38  ;;  %4552 = vmatprep.subr.mxu1 %v15012_v25  ;;  %v1779_v38 = vcombine.low %v1766_v20, %v1770_v21 }
  0xee   :  { %13371 = vmatmul.mubr.msk.f32.gmra.mxu0 %vm346_vm1, %v15370_v30  ;;  %4477 = vmatprep.subr.mxu0 %v14865_v43  ;;  %v1781_v43 = vcombine.low %v1774_v26, %v1778_v29  ;;  %v1810_v62 = vrot.slane %v1782_v60, %v14790_v9 }
  0xef   :  { %4553 = vmatpush1.msra.mxu1 %v15024_v56  ;;  %4286 = vmatprep.mubr.f32.mxu1 %v18373_v34  ;;  %v1789_v16 = vrot.slane %v1779_v38, %v14790_v9 }
  0xf0   :  { %4478 = vmatpush1.msra.mxu0 %v18389_v45  ;;  %4554 = vmatprep.subr.mxu1 %v18390_v8  ;;  %v1813_v45 = vcombine.low %v1796_v37, %v1810_v62 }
  0xf1   :  { %13375 = vmatmul.mubr.msk.f32.gmra.mxu1 %vm346_vm1, %v15370_v30  ;;  %4479 = vmatprep.subr.mxu0 %v18392_v44 }
  0xf2   :  { %4555 = vmatpush1.msra.mxu1 %v15038_v19  ;;  %4480 = vmatpush1.msra.mxu0 %v18393_v47  ;;  %v1803_v19 = vrot.slane %v1781_v43, %v14790_v9 }
  0xf3   :  { %4513 = vmatprep.mubr.f32.mxu0 %v18373_v34  ;;  %4556 = vmatprep.subr.mxu1 %v18395_v40  ;;  %v1814_v40 = vcombine.high %v1796_v37, %v1810_v62 }
  0xf4   :  { %13378 = vmatmul.mubr.msk.f32.vlgmr.msra.gmra.mxu0 %vm346_vm1, %v15277_v46  ;;  %4557 = vmatpush1.msra.mxu1 %v18399_v32 }
  0xf5   :  { %13386 = vmatprep.subr.msk.mxu0 %vm351_vm0, %v18400_v53  ;;  %4590 = vmatprep.mubr.f32.mxu1 %v18373_v34  ;;  %v15612_v21 = vrot.slane %v1814_v40, %v14790_v9 }
  0xf6   :  { %13387 = vmatpush1.msk.msra.mxu0 %vm351_vm0, %v18401_v17  ;;  %13390 = vmatprep.subr.msk.mxu1 %vm351_vm0, %v18402_v27 }
  0xf7   :  { %13382 = vmatmul.mubr.msk.f32.vlgmr.msra.gmra.mxu1 %vm346_vm1, %v15277_v46  ;;  %4894 = vmatprep.subr.mxu0 %v18403_v55 }
  0xf8   :  { %13391 = vmatpush1.msk.msra.mxu1 %vm351_vm0, %v18404_v61  ;;  %4519 = vmatprep.mubr.f32.mxu0 %v18373_v34 }
  0xf9   :  { %4895 = vmatpush1.msra.mxu0 %v18405_v35  ;;  %4971 = vmatprep.subr.mxu1 %v18406_v22  ;;  %v15590_v35 = vrot.slane %v1813_v45, %v14790_v9 }
  0xfa   :  { %13379 = vmatmul.mubr.msk.f32.gmra.mxu0 %vm346_vm1, %v15304_v50  ;;  %4896 = vmatprep.subr.mxu0 %v18407_v14 }
  0xfb   :  { %4972 = vmatpush1.msra.mxu1 %v18408_v54  ;;  %4596 = vmatprep.mubr.f32.mxu1 %v18373_v34  ;;  %v15620_v29 = vcombine.high %v15590_v35, %v15590_v35 }
  0xfc   :  { %4897 = vmatpush1.msra.mxu0 %v18409_v52  ;;  %4973 = vmatprep.subr.mxu1 %v18410_v31 }
  0xfd   :  { %13383 = vmatmul.mubr.msk.f32.gmra.mxu1 %vm346_vm1, %v15304_v50  ;;  %4898 = vmatprep.subr.mxu0 %v15119_v42 }
  0xfe   :  { %4974 = vmatpush1.msra.mxu1 %v15125_v63  ;;  %4899 = vmatpush1.msra.mxu0 %v15127_v18 }
  0xff   :  { %4932 = vmatprep.mubr.f32.mxu0 %v18373_v34  ;;  %4975 = vmatprep.subr.mxu1 %v15132_v28  ;;  %v1812_v28 = vcombine.high %v1789_v16, %v1803_v19 }
 0x100   :  { %13388 = vmatmul.mubr.msk.f32.vlgmr.msra.gmra.mxu0 %vm346_vm1, %v15333_v1  ;;  %4976 = vmatpush1.msra.mxu1 %v15138_v48  ;;  %v1811_v48 = vcombine.low %v1789_v16, %v1803_v19 }
 0x101   :  { %5009 = vmatprep.mubr.f32.mxu1 %v18373_v34  ;;  %4938 = vmatprep.mubr.f32.mxu0 %v18373_v34  ;;  %v15593_v22 = vrot.slane %v1812_v28, %v14790_v9 }
 0x102   :  { %13392 = vmatmul.mubr.msk.f32.vlgmr.msra.gmra.mxu1 %vm346_vm1, %v15333_v1  ;;  %v15583_v32 = vrot.slane %v1811_v48, %v14790_v9 }
 0x103   :  { %5015 = vmatprep.mubr.f32.mxu1 %v18373_v34 }
 0x104   :  { %13389 = vmatmul.mubr.msk.f32.gmra.mxu0 %vm346_vm1, %v15345_v5  ;;  %v15616_v26 = vcombine.high %v15583_v32, %v15583_v32 }
 0x106   :  { %13393 = vmatmul.mubr.msk.f32.gmra.mxu1 %vm346_vm1, %v15345_v5 }
 0x13a   :  { %v430_v33 = vpop.f32.mrf.mxu1 }
 0x13c   :  { %v432_v56 = vpop.f32.mrf.mxu1 }
 0x13d   :  { %v526_v0 = vcombine.low %v430_v33, %v432_v56  ;;  %v527_v42 = vcombine.high %v430_v33, %v432_v56  ;;  %v15624_v33 = vcombine.high %v15593_v22, %v15593_v22 }
 0x13e   :  { %v436_v4 = vpop.f32.mrf.mxu1 }
 0x13f   :  { %v536_v50 = vrot.slane %v526_v0, %v14790_v9  ;;  %v543_v53 = vrot.slane %v527_v42, %v14790_v9 }
 0x140   :  { %v438_v23 = vpop.f32.mrf.mxu1 }
 0x141   :  { %v594_v57 = vcombine.low %v436_v4, %v438_v23  ;;  %v595_v25 = vcombine.high %v436_v4, %v438_v23 }
 0x142   :  { %v507_v18 = vpop.f32.mrf.mxu1 }
 0x143   :  { %v604_v31 = vrot.slane %v594_v57, %v14790_v9  ;;  %v611_v49 = vrot.slane %v595_v25, %v14790_v9 }
 0x144   :  { %v509_v63 = vpop.f32.mrf.mxu1 }
 0x145   :  { %v528_v8 = vcombine.low %v507_v18, %v509_v63  ;;  %v529_v46 = vcombine.high %v507_v18, %v509_v63  ;;  %v960_v44 = vpop.f32.mrf.mxu0 }
 0x146   :  { %v513_v47 = vpop.f32.mrf.mxu1 }
 0x147   :  { %v550_v17 = vrot.slane %v528_v8, %v14790_v9  ;;  %v557_v27 = vrot.slane %v529_v46, %v14790_v9  ;;  %v962_v55 = vpop.f32.mrf.mxu0 }
 0x148   :  { %v515_v61 = vpop.f32.mrf.mxu1  ;;  %v1056_v36 = vcombine.low %v960_v44, %v962_v55  ;;  %v1057_v1 = vcombine.high %v960_v44, %v962_v55 }
 0x149   :  { %v558_v59 = vcombine.low %v536_v50, %v550_v17  ;;  %v559_v14 = vcombine.high %v536_v50, %v550_v17  ;;  %v560_v13 = vcombine.low %v543_v53, %v557_v27  ;;  %v561_v41 = vcombine.high %v543_v53, %v557_v27 }
 0x14a   :  { %v596_v54 = vcombine.low %v513_v47, %v515_v61  ;;  %v597_v5 = vcombine.high %v513_v47, %v515_v61  ;;  %v1066_v60 = vrot.slane %v1056_v36, %v14790_v9  ;;  %v1073_v4 = vrot.slane %v1057_v1, %v14790_v9 }
 0x14b   :  { %v1037_v52 = vpop.f32.mrf.mxu1  ;;  %v15598_v2 = vrot.slane %v558_v59, %v14790_v9  ;;  %v15601_v39 = vrot.slane %v560_v13, %v14790_v9  ;;  %v15604_v24 = vrot.slane %v559_v14, %v14790_v9  ;;  %v15607_v30 = vrot.slane %v561_v41, %v14790_v9 }
 0x14c   :  { %v618_v58 = vrot.slane %v596_v54, %v14790_v9  ;;  %v625_v3 = vrot.slane %v597_v5, %v14790_v9 }
 0x14d   :  { %v1039_v15 = vpop.f32.mrf.mxu1  ;;  %v590_v37 = vcombine.high %v15598_v2, %v15598_v2  ;;  %v591_v62 = vcombine.high %v15601_v39, %v15601_v39  ;;  %v592_v57 = vcombine.high %v15604_v24, %v15604_v24  ;;  %v593_v25 = vcombine.high %v15607_v30, %v15607_v30 }
 0x14e   :  { %v966_v20 = vpop.f32.mrf.mxu0  ;;  %v626_v38 = vcombine.low %v604_v31, %v618_v58  ;;  %v627_v43 = vcombine.high %v604_v31, %v618_v58  ;;  %v628_v56 = vcombine.low %v611_v49, %v625_v3  ;;  %v629_v51 = vcombine.high %v611_v49, %v625_v3 }
 0x14f   :  { %v1058_v16 = vcombine.low %v1037_v52, %v1039_v15  ;;  %v1059_v19 = vcombine.high %v1037_v52, %v1039_v15 }
 0x150   :  { %v968_v23 = vpop.f32.mrf.mxu0  ;;  %v15639_v28 = vrot.slane %v626_v38, %v14790_v9  ;;  %v643_v45 = vrot.slane %v628_v56, %v14790_v9  ;;  %v15643_v8 = vrot.slane %v627_v43, %v14790_v9  ;;  %v657_v46 = vrot.slane %v629_v51, %v14790_v9 }
 0x151   :  { %v1043_v18 = vpop.f32.mrf.mxu1  ;;  %v1080_v48 = vrot.slane %v1058_v16, %v14790_v9  ;;  %v1087_v0 = vrot.slane %v1059_v19, %v14790_v9  ;;  %v1124_v42 = vcombine.low %v966_v20, %v968_v23  ;;  %v1125_v63 = vcombine.high %v966_v20, %v968_v23 }
 0x153   :  { %v1045_v44 = vpop.f32.mrf.mxu1  ;;  %v1088_v47 = vcombine.low %v1066_v60, %v1080_v48  ;;  %v1089_v40 = vcombine.high %v1066_v60, %v1080_v48  ;;  %v1090_v50 = vcombine.low %v1073_v4, %v1087_v0  ;;  %v1091_v53 = vcombine.high %v1073_v4, %v1087_v0 }
 0x154   :  { %v1504_v17 = vpop.f32.mrf.mxu0  ;;  %v1134_v27 = vrot.slane %v1124_v42, %v14790_v9  ;;  %v1141_v55 = vrot.slane %v1125_v63, %v14790_v9  ;;  %v1126_v61 = vcombine.low %v1043_v18, %v1045_v44  ;;  %v1127_v36 = vcombine.high %v1043_v18, %v1045_v44 }
 0x155   :  { %v1098_v1 = vrot.slane %v1088_v47, %v14790_v9  ;;  %v1105_v59 = vrot.slane %v1090_v50, %v14790_v9  ;;  %v1112_v14 = vrot.slane %v1089_v40, %v14790_v9  ;;  %v1119_v13 = vrot.slane %v1091_v53, %v14790_v9 }
 0x156   :  { %v1506_v41 = vpop.f32.mrf.mxu0  ;;  %v1148_v54 = vrot.slane %v1126_v61, %v14790_v9  ;;  %v1155_v5 = vrot.slane %v1127_v36, %v14790_v9  ;;  %v658_v63 = vcombine.high %v15639_v28, %v15639_v28 }
 0x157   :  { %v1600_v52 = vcombine.low %v1504_v17, %v1506_v41  ;;  %v1601_v31 = vcombine.high %v1504_v17, %v1506_v41  ;;  %v1581_v49 = vpop.f32.mrf.mxu1  ;;  %v1120_v58 = vcombine.high %v1098_v1, %v1098_v1  ;;  %v1121_v3 = vcombine.high %v1105_v59, %v1105_v59 }
 0x158   :  { %v1122_v15 = vcombine.high %v1112_v14, %v1112_v14  ;;  %v1123_v20 = vcombine.high %v1119_v13, %v1119_v13  ;;  %v1204_v38 = vadd.f32 %v1098_v1, %v15598_v2  ;;  %v1205_v43 = vadd.f32 %v1112_v14, %v15604_v24 }
 0x159   :  { %v1208_v56 = vadd.f32 %v1105_v59, %v15601_v39  ;;  %v1209_v51 = vadd.f32 %v1119_v13, %v15607_v30  ;;  %v1583_v60 = vpop.f32.mrf.mxu1  ;;  %v1206_v4 = vadd.f32 %v1120_v58, %v590_v37  ;;  %v1210_v19 = vadd.f32 %v1121_v3, %v591_v62 }
 0x15a   :  { %v1207_v16 = vadd.f32 %v1122_v15, %v592_v57  ;;  %v1211_v23 = vadd.f32 %v1123_v20, %v593_v25  ;;  %v1156_v18 = vcombine.low %v1134_v27, %v1148_v54  ;;  %v1157_v48 = vcombine.high %v1134_v27, %v1148_v54 }
 0x15b   :  { %v1158_v0 = vcombine.low %v1141_v55, %v1155_v5  ;;  %v1159_v42 = vcombine.high %v1141_v55, %v1155_v5  ;;  %v659_v2 = vcombine.high %v15643_v8, %v15643_v8  ;;  %v1602_v39 = vcombine.low %v1581_v49, %v1583_v60 }
 0x15c   :  { %v1603_v44 = vcombine.high %v1581_v49, %v1583_v60  ;;  %v1166_v30 = vrot.slane %v1156_v18, %v14790_v9  ;;  %v1180_v62 = vrot.slane %v1157_v48, %v14790_v9  ;;  %v1610_v47 = vrot.slane %v1600_v52, %v14790_v9 }
 0x15d   :  { %v15662_v24 = vpop.f32.mrf.mxu0  ;;  %v1173_v37 = vrot.slane %v1158_v0, %v14790_v9  ;;  %v1187_v57 = vrot.slane %v1159_v42, %v14790_v9  ;;  %v1587_v25 = vpop.f32.mrf.mxu1  ;;  %v1617_v40 = vrot.slane %v1601_v31, %v14790_v9  ;;  %v1624_v50 = vrot.slane %v1602_v39, %v14790_v9 }
 0x15e   :  { %v1631_v53 = vrot.slane %v1603_v44, %v14790_v9  ;;  %v1188_v27 = vcombine.high %v1166_v30, %v1166_v30  ;;  %v1189_v55 = vcombine.high %v1180_v62, %v1180_v62  ;;  %v15673_v61 = vadd.f32 %v1166_v30, %v15639_v28 }
 0x15f   :  { %v1512_v17 = vpop.f32.mrf.mxu0  ;;  %v15676_v36 = vadd.f32 %v1180_v62, %v15643_v8  ;;  %v1589_v1 = vpop.f32.mrf.mxu1  ;;  %v15678_v59 = vadd.f32 %v1173_v37, %v643_v45  ;;  %v15680_v14 = vadd.f32 %v1187_v57, %v657_v46  ;;  %v1632_v13 = vcombine.low %v1610_v47, %v1624_v50 }
 0x160   :  { %v1633_v41 = vcombine.high %v1610_v47, %v1624_v50  ;;  %v15682_v5 = vadd.f32 %v1188_v27, %v658_v63  ;;  %v15684_v52 = vadd.f32 %v1189_v55, %v659_v2  ;;  %v1634_v31 = vcombine.low %v1617_v40, %v1631_v53 }
 0x161   :  { %v1947_v54 = vpop.f32.mrf.mxu0  ;;  %v1635_v49 = vcombine.high %v1617_v40, %v1631_v53  ;;  %v1642_v28 = vrot.slane %v1632_v13, %v14790_v9  ;;  %v1668_v8 = vcombine.low %v15662_v24, %v1512_v17  ;;  %v1669_v45 = vcombine.high %v15662_v24, %v1512_v17 }
 0x162   :  { %v1656_v58 = vrot.slane %v1633_v41, %v14790_v9  ;;  %v1649_v46 = vrot.slane %v1634_v31, %v14790_v9  ;;  %v1670_v20 = vcombine.low %v1587_v25, %v1589_v1  ;;  %v1671_v60 = vcombine.high %v1587_v25, %v1589_v1 }
 0x163   :  { %v1949_v3 = vpop.f32.mrf.mxu0  ;;  %v1663_v15 = vrot.slane %v1635_v49, %v14790_v9  ;;  %v2024_v18 = vpop.f32.mrf.mxu1  ;;  %v1664_v48 = vcombine.high %v1642_v28, %v1642_v28  ;;  %v1748_v42 = vadd.f32 %v1642_v28, %v1204_v38  ;;  %v1678_v55 = vrot.slane %v1668_v8, %v14790_v9 }
 0x164   :  { %v1666_v0 = vcombine.high %v1656_v58, %v1656_v58  ;;  %v1749_v63 = vadd.f32 %v1656_v58, %v1205_v43  ;;  %v1665_v2 = vcombine.high %v1649_v46, %v1649_v46  ;;  %v1752_v44 = vadd.f32 %v1649_v46, %v1208_v56 }
 0x165   :  { %v1667_v39 = vcombine.high %v1663_v15, %v1663_v15  ;;  %v1753_v30 = vadd.f32 %v1663_v15, %v1209_v51  ;;  %v2026_v37 = vpop.f32.mrf.mxu1  ;;  %v1750_v62 = vadd.f32 %v1664_v48, %v1206_v4  ;;  %v15693_v24 = vadd.f32 %v15583_v32, %v1748_v42 }
 0x166   :  { %v1751_v57 = vadd.f32 %v1666_v0, %v1207_v16  ;;  %v15696_v47 = vadd.f32 %v15593_v22, %v1749_v63  ;;  %v15698_v40 = vpop.f32.mrf.mxu0  ;;  %v1754_v25 = vadd.f32 %v1665_v2, %v1210_v19  ;;  %v15701_v38 = vadd.f32 %v15590_v35, %v1752_v44 }
 0x167   :  { %v1755_v50 = vadd.f32 %v1667_v39, %v1211_v23  ;;  %v15706_v56 = vadd.f32 %v15616_v26, %v1750_v62  ;;  %v15712_v4 = vadd.f32 %v15612_v21, %v1753_v30  ;;  %v1685_v1 = vrot.slane %v1669_v45, %v14790_v9 }
 0x168   :  { %v15703_v43 = vpop.f32.mrf.mxu0  ;;  %v15709_v51 = vadd.f32 %v15624_v33, %v1751_v57  ;;  %v15718_v19 = vadd.f32 %v15620_v29, %v1754_v25  ;;  %v1692_v13 = vrot.slane %v1670_v20, %v14790_v9  ;;  %v1699_v41 = vrot.slane %v1671_v60, %v14790_v9 }
 0x169   :  { %v15715_v53 = vpop.f32.mrf.mxu1  ;;  %v15721_v23 = vadd.f32 %v15583_v32, %v1755_v50  ;;  %v2043_v49 = vcombine.low %v1947_v54, %v1949_v3  ;;  %v2044_v28 = vcombine.high %v1947_v54, %v1949_v3  ;;  %v2045_v58 = vcombine.low %v2024_v18, %v2026_v37 }
 0x16a   :  { %v2046_v46 = vcombine.high %v2024_v18, %v2026_v37  ;;  %v1700_v48 = vcombine.low %v1678_v55, %v1692_v13  ;;  %v1701_v0 = vcombine.high %v1678_v55, %v1692_v13  ;;  %v1702_v42 = vcombine.low %v1685_v1, %v1699_v41 }
 0x16b   :  { %v15729_v31 = vpop.f32.mrf.mxu1  ;;  %v1703_v63 = vcombine.high %v1685_v1, %v1699_v41  ;;  %v2053_v8 = vrot.slane %v2043_v49, %v14790_v9  ;;  %v2060_v45 = vrot.slane %v2044_v28, %v14790_v9  ;;  %v2067_v20 = vrot.slane %v2045_v58, %v14790_v9 }
 0x16c   :  { %v15731_v15 = vpop.f32.mrf.mxu0  ;;  %v2074_v60 = vrot.slane %v2046_v46, %v14790_v9  ;;  %v1710_v39 = vrot.slane %v1700_v48, %v14790_v9  ;;  %v1717_v54 = vrot.slane %v1702_v42, %v14790_v9  ;;  %v1724_v3 = vrot.slane %v1701_v0, %v14790_v9 }
 0x16d   :  { %v1731_v18 = vrot.slane %v1703_v63, %v14790_v9  ;;  %v2075_v30 = vcombine.low %v2053_v8, %v2067_v20  ;;  %v2076_v37 = vcombine.high %v2053_v8, %v2067_v20 }
 0x16e   :  { %v2259_v2 = vpop.f32.mrf.mxu0  ;;  %v2077_v62 = vcombine.low %v2060_v45, %v2074_v60  ;;  %v2078_v57 = vcombine.high %v2060_v45, %v2074_v60  ;;  %v1732_v25 = vcombine.high %v1710_v39, %v1710_v39  ;;  %v1733_v50 = vcombine.high %v1724_v3, %v1724_v3 }
 0x16f   :  { %v2334_v44 = vpop.f32.mrf.mxu1  ;;  %v1756_v55 = vadd.f32 %v1710_v39, %v15673_v61  ;;  %v1757_v1 = vadd.f32 %v1724_v3, %v15676_v36  ;;  %v1760_v49 = vadd.f32 %v1717_v54, %v15678_v59  ;;  %v1761_v28 = vadd.f32 %v1731_v18, %v15680_v14 }
 0x170   :  { %v15747_v58 = vrot.slane %v2075_v30, %v14790_v9  ;;  %v1758_v48 = vadd.f32 %v1732_v25, %v15682_v5  ;;  %v1759_v0 = vadd.f32 %v1733_v50, %v15684_v52  ;;  %v15757_v36 = vrot.slane %v2077_v62, %v14790_v9 }
 0x171   :  { %v2336_v13 = vpop.f32.mrf.mxu1  ;;  %v15754_v61 = vadd.f32 %v15593_v22, %v1756_v55  ;;  %v15762_v14 = vrot.slane %v2076_v37, %v14790_v9  ;;  %v15765_v63 = vrot.slane %v2078_v57, %v14790_v9  ;;  %v15772_v45 = vadd.f32 %v15616_v26, %v1757_v1 }
 0x172   :  { %v15749_v46 = vpop.f32.mrf.mxu0  ;;  %v15775_v20 = vadd.f32 %v15612_v21, %v1760_v49  ;;  %v15780_v39 = vadd.f32 %v15624_v33, %v1758_v48  ;;  %v15783_v54 = vadd.f32 %v15590_v35, %v1759_v0  ;;  %v15786_v3 = vadd.f32 %v15620_v29, %v1761_v28 }
 0x173   :  { %18415 = vst [vmem:[#allocation28_spill] sm:$0xff] %v15754_v61  ;;  %v2107_v30 = vcombine.high %v15747_v58, %v15747_v58  ;;  %v2108_v37 = vcombine.high %v15757_v36, %v15757_v36  ;;  %v2109_v62 = vcombine.high %v15762_v14, %v15762_v14  ;;  %v2110_v57 = vcombine.high %v15765_v63, %v15765_v63 }
 0x174   :  { %v15767_v8 = vpop.f32.mrf.mxu0  ;;  %v2111_v50 = vcombine.low %v15698_v40, %v15703_v43  ;;  %v2112_v55 = vcombine.high %v15698_v40, %v15703_v43  ;;  %v2113_v1 = vcombine.low %v15715_v53, %v15729_v31  ;;  %v2114_v49 = vcombine.high %v15715_v53, %v15729_v31 }
 0x175   :  { %v15777_v60 = vpop.f32.mrf.mxu1  ;;  %v2353_v48 = vcombine.low %v15731_v15, %v2259_v2  ;;  %v2354_v0 = vcombine.high %v15731_v15, %v2259_v2  ;;  %v2355_v12 = vcombine.low %v2334_v44, %v2336_v13  ;;  %v2356_v11 = vcombine.high %v2334_v44, %v2336_v13 }
 0x176   :  { %v2121_v10 = vrot.slane %v2111_v50, %v14790_v9  ;;  %v2128_v7 = vrot.slane %v2112_v55, %v14790_v9  ;;  %v2135_v40 = vrot.slane %v2113_v1, %v14790_v9  ;;  %v2142_v43 = vrot.slane %v2114_v49, %v14790_v9 }
 0x177   :  { %v15797_v25 = vpop.f32.mrf.mxu1  ;;  %v2363_v52 = vrot.slane %v2353_v48, %v14790_v9  ;;  %v2370_v53 = vrot.slane %v2354_v0, %v14790_v9  ;;  %v2377_v31 = vrot.slane %v2355_v12, %v14790_v9  ;;  %v2384_v5 = vrot.slane %v2356_v11, %v14790_v9 }
 0x178   :  { %v15807_v28 = vpop.f32.mrf.mxu0  ;;  %v2143_v2 = vcombine.low %v2121_v10, %v2135_v40  ;;  %v2144_v44 = vcombine.high %v2121_v10, %v2135_v40  ;;  %v2145_v13 = vcombine.low %v2128_v7, %v2142_v43  ;;  %v2146_v50 = vcombine.high %v2128_v7, %v2142_v43 }
 0x179   :  { %v2385_v41 = vcombine.low %v2363_v52, %v2377_v31  ;;  %v2386_v55 = vcombine.high %v2363_v52, %v2377_v31  ;;  %v2387_v59 = vcombine.low %v2370_v53, %v2384_v5  ;;  %v2388_v1 = vcombine.high %v2370_v53, %v2384_v5 }
 0x17a   :  { %v2774_v18 = vpop.f32.mrf.mxu0  ;;  %v15820_v49 = vrot.slane %v2143_v2, %v14790_v9  ;;  %v15823_v48 = vrot.slane %v2145_v13, %v14790_v9  ;;  %v15826_v12 = vrot.slane %v2144_v44, %v14790_v9  ;;  %v15829_v11 = vrot.slane %v2146_v50, %v14790_v9 }
 0x17b   :  { %v2849_v15 = vpop.f32.mrf.mxu1  ;;  %v2395_v7 = vrot.slane %v2385_v41, %v14790_v9  ;;  %v2402_v52 = vrot.slane %v2387_v59, %v14790_v9  ;;  %v2409_v5 = vrot.slane %v2386_v55, %v14790_v9  ;;  %v2416_v0 = vrot.slane %v2388_v1, %v14790_v9 }
 0x17c   :  { %v2421_v53 = vcombine.low %v15749_v46, %v15767_v8  ;;  %v2422_v31 = vcombine.high %v15749_v46, %v15767_v8  ;;  %v2423_v34 = vcombine.low %v15777_v60, %v15797_v25 }
 0x17d   :  { %v2851_v27 = vpop.f32.mrf.mxu1  ;;  %v2417_v2 = vcombine.high %v2395_v7, %v2395_v7  ;;  %v2418_v41 = vcombine.high %v2402_v52, %v2402_v52  ;;  %v2419_v44 = vcombine.high %v2409_v5, %v2409_v5  ;;  %v2420_v59 = vcombine.high %v2416_v0, %v2416_v0 }
 0x17e   :  { %v15831_v10 = vpop.f32.mrf.mxu0  ;;  %v2501_v55 = vadd.f32 %v2395_v7, %v15747_v58  ;;  %v2502_v1 = vadd.f32 %v2409_v5, %v15762_v14  ;;  %v2505_v42 = vadd.f32 %v2402_v52, %v15757_v36  ;;  %v2506_v17 = vadd.f32 %v2416_v0, %v15765_v63 }
 0x17f   :  { %v2503_v16 = vadd.f32 %v2417_v2, %v2107_v30  ;;  %v2504_v43 = vadd.f32 %v2419_v44, %v2109_v62  ;;  %v2507_v40 = vadd.f32 %v2418_v41, %v2108_v37  ;;  %v2508_v46 = vadd.f32 %v2420_v59, %v2110_v57 }
 0x180   :  { %v15845_v13 = vpop.f32.mrf.mxu0  ;;  %v2431_v8 = vrot.slane %v2421_v53, %v14790_v9  ;;  %v2438_v6 = vrot.slane %v2422_v31, %v14790_v9  ;;  %v2424_v58 = vcombine.high %v15777_v60, %v15797_v25  ;;  %v2868_v36 = vcombine.low %v15807_v28, %v2774_v18 }
 0x181   :  { %v15847_v50 = vpop.f32.mrf.mxu1  ;;  %v2869_v14 = vcombine.high %v15807_v28, %v2774_v18  ;;  %v2870_v63 = vcombine.low %v2849_v15, %v2851_v27  ;;  %v2871_v30 = vcombine.high %v2849_v15, %v2851_v27  ;;  %v2445_v62 = vrot.slane %v2423_v34, %v14790_v9 }
 0x182   :  { %v2452_v57 = vrot.slane %v2424_v58, %v14790_v9  ;;  %v2878_v25 = vrot.slane %v2868_v36, %v14790_v9 }
 0x183   :  { %v15859_v7 = vpop.f32.mrf.mxu1  ;;  %v2885_v5 = vrot.slane %v2869_v14, %v14790_v9  ;;  %v2892_v18 = vrot.slane %v2870_v63, %v14790_v9  ;;  %v2899_v27 = vrot.slane %v2871_v30, %v14790_v9  ;;  %v2453_v28 = vcombine.low %v2431_v8, %v2445_v62 }
 0x184   :  { %v15863_v37 = vpop.f32.mrf.mxu0  ;;  %v2454_v15 = vcombine.high %v2431_v8, %v2445_v62  ;;  %v2455_v0 = vcombine.low %v2438_v6, %v2452_v57  ;;  %v2456_v34 = vcombine.high %v2438_v6, %v2452_v57 }
 0x185   :  { %v2900_v31 = vcombine.low %v2878_v25, %v2892_v18  ;;  %v2901_v2 = vcombine.high %v2878_v25, %v2892_v18  ;;  %v2902_v41 = vcombine.low %v2885_v5, %v2899_v27  ;;  %v2903_v44 = vcombine.high %v2885_v5, %v2899_v27 }
 0x186   :  { %v15877_v59 = vpop.f32.mrf.mxu0  ;;  %v2463_v58 = vrot.slane %v2453_v28, %v14790_v9  ;;  %v2470_v36 = vrot.slane %v2455_v0, %v14790_v9  ;;  %v2477_v14 = vrot.slane %v2454_v15, %v14790_v9  ;;  %v2484_v63 = vrot.slane %v2456_v34, %v14790_v9 }
 0x187   :  { %v15875_v53 = vpop.f32.mrf.mxu1  ;;  %v2910_v8 = vrot.slane %v2900_v31, %v14790_v9  ;;  %v2917_v6 = vrot.slane %v2902_v41, %v14790_v9  ;;  %v2924_v30 = vrot.slane %v2901_v2, %v14790_v9  ;;  %v2931_v62 = vrot.slane %v2903_v44, %v14790_v9 }
 0x188   :  { %v2485_v57 = vcombine.high %v2463_v58, %v2463_v58  ;;  %v2486_v25 = vcombine.high %v2477_v14, %v2477_v14  ;;  %v15888_v5 = vadd.f32 %v2463_v58, %v15820_v49  ;;  %v15891_v18 = vadd.f32 %v2477_v14, %v15826_v12 }
 0x189   :  { %v15893_v27 = vpop.f32.mrf.mxu1  ;;  %v15896_v28 = vadd.f32 %v2470_v36, %v15823_v48  ;;  %v15899_v15 = vadd.f32 %v2484_v63, %v15829_v11  ;;  %v2932_v0 = vcombine.high %v2910_v8, %v2910_v8  ;;  %v2933_v34 = vcombine.high %v2917_v6, %v2917_v6 }
 0x18a   :  { %18416 = vst [vmem:[#allocation38_spill] sm:$0xff] %v15891_v18  ;;  %v15901_v31 = vpop.f32.mrf.mxu0  ;;  %v18419_v2 = vcombine.high %v15820_v49, %v15820_v49  ;;  %v18420_v44 = vcombine.high %v15826_v12, %v15826_v12  ;;  %v2934_v14 = vcombine.high %v2924_v30, %v2924_v30  ;;  %v2935_v48 = vcombine.high %v2931_v62, %v2931_v62 }
 0x18b   :  { %18417 = vst [vmem:[#allocation36_spill] sm:$0xff] %v15896_v28  ;;  %18418 = vst [vmem:[#allocation29_spill] sm:$0xff] %v15899_v15  ;;  %v3016_v36 = vadd.f32 %v2910_v8, %v2501_v55  ;;  %v3017_v60 = vadd.f32 %v2924_v30, %v2502_v1  ;;  %v3018_v11 = vadd.f32 %v2932_v0, %v2503_v16  ;;  %v18421_v0 = vmax.f32 %v15693_v24, 0.0 }
 0x18c   :  { %v15906_v41 = vadd.f32 %v2485_v57, %v18419_v2  ;;  %v15911_v58 = vadd.f32 %v2486_v25, %v18420_v44  ;;  %v3020_v63 = vadd.f32 %v2917_v6, %v2505_v42  ;;  %v3019_v52 = vadd.f32 %v2934_v14, %v2504_v43  ;;  %v15919_v2 = vpop.f32.mrf.mxu0 }
 0x18d   :  { %v3021_v61 = vadd.f32 %v2931_v62, %v2506_v17  ;;  %v3022_v15 = vadd.f32 %v2933_v34, %v2507_v40  ;;  %v3023_v28 = vadd.f32 %v2935_v48, %v2508_v46  ;;  %v15913_v18 = vpop.f32.mrf.mxu1  ;;  %v3030_v49 = vadd.f32 %v3016_v36, %v15583_v32 }
 0x18e   :  { %v3031_v57 = vadd.f32 %v3017_v60, %v15593_v22  ;;  %v3032_v12 = vadd.f32 %v3018_v11, %v15616_v26  ;;  %v3034_v25 = vadd.f32 %v3020_v63, %v15590_v35  ;;  %v3033_v55 = vadd.f32 %v3019_v52, %v15624_v33 }
 0x18f   :  { %v3035_v16 = vadd.f32 %v3021_v61, %v15612_v21  ;;  %v3036_v17 = vadd.f32 %v3022_v15, %v15620_v29  ;;  %v3037_v42 = vadd.f32 %v3023_v28, %v15583_v32  ;;  %v3044_v40 = vmax.f32 %v3030_v49, 0.0  ;;  %v15925_v62 = vpop.f32.mrf.mxu1 }
 0x190   :  { %v3045_v43 = vmax.f32 %v3031_v57, 0.0  ;;  %v3046_v1 = vmax.f32 %v3032_v12, 0.0  ;;  %v3048_v46 = vmax.f32 %v3034_v25, 0.0  ;;  %v3047_v8 = vmax.f32 %v3033_v55, 0.0  ;;  %v15943_v48 = vpop.f32.mrf.mxu0 }
 0x191   :  { %v3049_v60 = vmax.f32 %v3035_v16, 0.0  ;;  %v3050_v6 = vmax.f32 %v3036_v17, 0.0  ;;  %v3051_v30 = vmax.f32 %v3037_v42, 0.0  ;;  %v15929_v34 = vmax.f32 %v18421_v0, %v3044_v40 }
 0x192   :  { %v18422_v61 = vmax.f32 %v15696_v47, 0.0  ;;  %v18423_v28 = vmax.f32 %v15706_v56, 0.0  ;;  %v18424_v44 = vmax.f32 %v15701_v38, 0.0  ;;  %v18426_v36 = vmax.f32 %v15709_v51, 0.0 }
 0x193   :  { %v18427_v24 = vmax.f32 %v15712_v4, 0.0  ;;  %v18429_v47 = vmax.f32 %v15718_v19, 0.0  ;;  %v18431_v56 = vmax.f32 %v15721_v23, 0.0  ;;  %v1876_v38 = vmax.f32 %v15772_v45, 0.0  ;;  %v15977_v17 = vpop.f32.mrf.mxu1 }
 0x194   :  { %v15933_v52 = vmax.f32 %v18422_v61, %v3045_v43  ;;  %v15937_v15 = vmax.f32 %v18423_v28, %v3046_v1  ;;  %v15941_v14 = vmax.f32 %v18424_v44, %v3048_v46  ;;  %v15947_v11 = vmax.f32 %v18426_v36, %v3047_v8  ;;  %v15987_v1 = vpop.f32.mrf.mxu0 }
 0x195   :  { %v15951_v63 = vmax.f32 %v18427_v24, %v3049_v60  ;;  %v15955_v49 = vmax.f32 %v18429_v47, %v3050_v6  ;;  %v15959_v57 = vmax.f32 %v18431_v56, %v3051_v30  ;;  %v1879_v12 = vmax.f32 %v15775_v20, 0.0 }
 0x196   :  { %18425 = vst [vmem:[#allocation30_spill] sm:$0xff] %v15941_v14  ;;  %v2938_v51 = vcombine.low %v15847_v50, %v15859_v7  ;;  %v2939_v4 = vcombine.high %v15847_v50, %v15859_v7  ;;  %v18433_v19 = vcombine.low %v15831_v10, %v15845_v13  ;;  %v3220_v23 = vcombine.low %v15863_v37, %v15877_v59  ;;  %v16004_v36 = vpop.f32.mrf.mxu0 }
 0x197   :  { %18428 = vst [vmem:[#allocation34_spill] sm:$0xff] %v15951_v63  ;;  %18430 = vst [vmem:[#allocation39_spill] sm:$0xff] %v15955_v49  ;;  %v3221_v55 = vcombine.high %v15863_v37, %v15877_v59  ;;  %v3222_v16 = vcombine.low %v15875_v53, %v15893_v27  ;;  %v18434_v50 = vcombine.high %v15831_v10, %v15845_v13  ;;  %v1877_v37 = vmax.f32 %v15780_v39, 0.0  ;;  %v15998_v39 = vpop.f32.mrf.mxu1 }
 0x198   :  { %18432 = vst [vmem:[#allocation33_spill] sm:$0xff] %v15959_v57  ;;  %v2946_v25 = vrot.slane %v18433_v19, %v14790_v9  ;;  %v2960_v42 = vrot.slane %v2938_v51, %v14790_v9  ;;  %v2967_v40 = vrot.slane %v2939_v4, %v14790_v9  ;;  %v3223_v43 = vcombine.high %v15875_v53, %v15893_v27 }
 0x199   :  { %v2953_v7 = vrot.slane %v18434_v50, %v14790_v9  ;;  %v1880_v59 = vmax.f32 %v15786_v3, 0.0  ;;  %v3244_v46 = vrot.slane %v3222_v16, %v14790_v9  ;;  %v3288_v8 = vcombine.low %v15901_v31, %v15919_v2  ;;  %v18437_v50 = vld [vmem:[#allocation29_spill] sm:$0xff] }
 0x19a   :  { %v2968_v10 = vcombine.low %v2946_v25, %v2960_v42  ;;  %v2969_v13 = vcombine.high %v2946_v25, %v2960_v42  ;;  %v1878_v30 = vmax.f32 %v15783_v54, 0.0  ;;  %v3230_v0 = vrot.slane %v3220_v23, %v14790_v9  ;;  %v18435_v25 = vld [vmem:[#allocation38_spill] sm:$0xff] }
 0x19b   :  { %v2970_v60 = vcombine.low %v2953_v7, %v2967_v40  ;;  %v2971_v6 = vcombine.high %v2953_v7, %v2967_v40  ;;  %v3237_v53 = vrot.slane %v3221_v55, %v14790_v9  ;;  %v3251_v27 = vrot.slane %v3223_v43, %v14790_v9  ;;  %v18436_v55 = vld [vmem:[#allocation36_spill] sm:$0xff]  ;;  %v16013_v43 = vpop.f32.mrf.mxu1 }
 0x19c   :  { %v2978_v3 = vrot.slane %v2968_v10, %v14790_v9  ;;  %v2992_v28 = vrot.slane %v2969_v13, %v14790_v9  ;;  %v3252_v24 = vcombine.low %v3230_v0, %v3244_v46  ;;  %v3253_v54 = vcombine.high %v3230_v0, %v3244_v46  ;;  %v16019_v10 = vpop.f32.mrf.mxu0 }
 0x19d   :  { %v2985_v61 = vrot.slane %v2970_v60, %v14790_v9  ;;  %v2999_v44 = vrot.slane %v2971_v6, %v14790_v9  ;;  %v3289_v47 = vcombine.high %v15901_v31, %v15919_v2  ;;  %v3298_v56 = vrot.slane %v3288_v8, %v14790_v9 }
 0x19e   :  { %v3000_v51 = vcombine.high %v2978_v3, %v2978_v3  ;;  %v3001_v4 = vcombine.high %v2992_v28, %v2992_v28  ;;  %v3024_v19 = vadd.f32 %v2978_v3, %v15888_v5  ;;  %v3025_v23 = vadd.f32 %v2992_v28, %v18435_v25 }
 0x19f   :  { %v3028_v16 = vadd.f32 %v2985_v61, %v18436_v55  ;;  %v3029_v7 = vadd.f32 %v2999_v44, %v18437_v50  ;;  %v3254_v42 = vcombine.low %v3237_v53, %v3251_v27  ;;  %v3255_v40 = vcombine.high %v3237_v53, %v3251_v27  ;;  %v16037_v44 = vpop.f32.mrf.mxu1 }
 0x1a0   :  { %v3026_v46 = vadd.f32 %v3000_v51, %v15906_v41  ;;  %v3027_v31 = vadd.f32 %v3001_v4, %v15911_v58  ;;  %v3038_v2 = vadd.f32 %v3024_v19, %v15593_v22  ;;  %v3039_v8 = vadd.f32 %v3025_v23, %v15616_v26  ;;  %v16047_v23 = vpop.f32.mrf.mxu0 }
 0x1a1   :  { %v3042_v5 = vadd.f32 %v3028_v16, %v15612_v21  ;;  %v3043_v13 = vadd.f32 %v3029_v7, %v15620_v29  ;;  %v16024_v60 = vrot.slane %v3252_v24, %v14790_v9  ;;  %v16027_v6 = vrot.slane %v3253_v54, %v14790_v9  ;;  %v18438_v54 = vld [vmem:[#allocation28_spill] sm:$0xff] }
 0x1a2   :  { %v3040_v41 = vadd.f32 %v3026_v46, %v15624_v33  ;;  %v3041_v58 = vadd.f32 %v3027_v31, %v15590_v35  ;;  %v3052_v0 = vmax.f32 %v3038_v2, 0.0  ;;  %v3053_v53 = vmax.f32 %v3039_v8, 0.0  ;;  %v16074_v46 = vpop.f32.mrf.mxu1  ;;  %v3855_v2 = vpop.f32.mrf.mxu0 }
 0x1a3   :  { %v3056_v27 = vmax.f32 %v3042_v5, 0.0  ;;  %v3057_v3 = vmax.f32 %v3043_v13, 0.0  ;;  %v16032_v61 = vrot.slane %v3254_v42, %v14790_v9  ;;  %v16035_v28 = vrot.slane %v3255_v40, %v14790_v9 }
 0x1a4   :  { %v3054_v24 = vmax.f32 %v3040_v41, 0.0  ;;  %v3055_v51 = vmax.f32 %v3041_v58, 0.0  ;;  %v18439_v4 = vmax.f32 %v18438_v54, 0.0  ;;  %v16045_v25 = vmax.f32 %v1876_v38, %v3053_v53  ;;  %v3859_v54 = vpop.f32.mrf.mxu0 }
 0x1a5   :  { %v16051_v55 = vmax.f32 %v1879_v12, %v3056_v27  ;;  %v16053_v16 = vmax.f32 %v1880_v59, %v3057_v3  ;;  %v3284_v50 = vcombine.high %v16024_v60, %v16024_v60  ;;  %v3290_v7 = vcombine.low %v15913_v18, %v15925_v62 }
 0x1a6   :  { %v16041_v19 = vmax.f32 %v18439_v4, %v3052_v0  ;;  %18441 = vst [vmem:[#allocation35_spill] sm:$0xff] %v16045_v25  ;;  %v16059_v42 = vmax.f32 %v1877_v37, %v3054_v24  ;;  %v16061_v40 = vmax.f32 %v1878_v30, %v3055_v51  ;;  %v3291_v45 = vcombine.high %v15913_v18, %v15925_v62 }
 0x1a7   :  { %18442 = vst [vmem:[#allocation41_spill] sm:$0xff] %v16051_v55  ;;  %18443 = vst [vmem:[#allocation31_spill] sm:$0xff] %v16053_v16  ;;  %v3530_v20 = vcombine.low %v15943_v48, %v15987_v1  ;;  %v3312_v38 = vrot.slane %v3290_v7, %v14790_v9  ;;  %v3531_v12 = vcombine.high %v15943_v48, %v15987_v1 }
 0x1a8   :  { %18440 = vst [vmem:[#allocation37_spill] sm:$0xff] %v16041_v19  ;;  %18444 = vst [vmem:[#allocation40_spill] sm:$0xff] %v16059_v42  ;;  %v3532_v59 = vcombine.low %v15977_v17, %v15998_v39  ;;  %v3533_v37 = vcombine.high %v15977_v17, %v15998_v39  ;;  %v3305_v30 = vrot.slane %v3289_v47, %v14790_v9 }
 0x1a9   :  { %18445 = vst [vmem:[#allocation43_spill] sm:$0xff] %v16061_v40  ;;  %v3319_v18 = vrot.slane %v3291_v45, %v14790_v9  ;;  %v3540_v62 = vrot.slane %v3530_v20, %v14790_v9  ;;  %v3598_v31 = vcombine.low %v16004_v36, %v16019_v10  ;;  %v3320_v8 = vcombine.low %v3298_v56, %v3312_v38 }
 0x1aa   :  { %v3321_v48 = vcombine.high %v3298_v56, %v3312_v38  ;;  %v3547_v1 = vrot.slane %v3531_v12, %v14790_v9  ;;  %v3554_v5 = vrot.slane %v3532_v59, %v14790_v9  ;;  %v3561_v39 = vrot.slane %v3533_v37, %v14790_v9  ;;  %v3932_v56 = vpop.f32.mrf.mxu1 }
 0x1ab   :  { %v3322_v13 = vcombine.low %v3305_v30, %v3319_v18  ;;  %v3323_v17 = vcombine.high %v3305_v30, %v3319_v18  ;;  %v3599_v47 = vcombine.high %v16004_v36, %v16019_v10  ;;  %v16087_v41 = vrot.slane %v3320_v8, %v14790_v9 }
 0x1ac   :  { %v16090_v58 = vrot.slane %v3321_v48, %v14790_v9  ;;  %v3562_v0 = vcombine.low %v3540_v62, %v3554_v5  ;;  %v3563_v53 = vcombine.high %v3540_v62, %v3554_v5  ;;  %v3285_v27 = vcombine.high %v16032_v61, %v16032_v61  ;;  %v16112_v62 = vpop.f32.mrf.mxu1 }
 0x1ad   :  { %v3286_v3 = vcombine.high %v16027_v6, %v16027_v6  ;;  %v3564_v24 = vcombine.low %v3547_v1, %v3561_v39  ;;  %v3565_v51 = vcombine.high %v3547_v1, %v3561_v39  ;;  %v3287_v36 = vcombine.high %v16035_v28, %v16035_v28 }
 0x1ae   :  { %v3337_v10 = vrot.slane %v3322_v13, %v14790_v9  ;;  %v3572_v4 = vrot.slane %v3562_v0, %v14790_v9  ;;  %v3586_v7 = vrot.slane %v3563_v53, %v14790_v9  ;;  %v16102_v45 = vrot.slane %v3323_v17, %v14790_v9  ;;  %v3861_v13 = vpop.f32.mrf.mxu0 }
 0x1af   :  { %v3579_v38 = vrot.slane %v3564_v24, %v14790_v9  ;;  %v3593_v12 = vrot.slane %v3565_v51, %v14790_v9  ;;  %v3608_v30 = vrot.slane %v3598_v31, %v14790_v9  ;;  %v3615_v18 = vrot.slane %v3599_v47, %v14790_v9 }
 0x1b0   :  { %v3594_v37 = vcombine.high %v3572_v4, %v3572_v4  ;;  %v3596_v48 = vcombine.high %v3586_v7, %v3586_v7  ;;  %v3678_v1 = vadd.f32 %v3572_v4, %v16024_v60  ;;  %v3679_v5 = vadd.f32 %v3586_v7, %v16027_v6  ;;  %v16128_v7 = vpop.f32.mrf.mxu1 }
 0x1b1   :  { %v3595_v8 = vcombine.high %v3579_v38, %v3579_v38  ;;  %v3597_v17 = vcombine.high %v3593_v12, %v3593_v12  ;;  %v3682_v39 = vadd.f32 %v3579_v38, %v16032_v61  ;;  %v3600_v0 = vcombine.low %v16013_v43, %v16037_v44 }
 0x1b2   :  { %v3601_v31 = vcombine.high %v16013_v43, %v16037_v44  ;;  %v3680_v53 = vadd.f32 %v3594_v37, %v3284_v50  ;;  %v3683_v47 = vadd.f32 %v3593_v12, %v16035_v28  ;;  %v3949_v24 = vcombine.low %v16047_v23, %v3855_v2  ;;  %v16130_v50 = vpop.f32.mrf.mxu0 }
 0x1b3   :  { %v3950_v51 = vcombine.high %v16047_v23, %v3855_v2  ;;  %v3622_v60 = vrot.slane %v3600_v0, %v14790_v9  ;;  %v3951_v4 = vcombine.low %v16074_v46, %v3932_v56  ;;  %v3952_v61 = vcombine.high %v16074_v46, %v3932_v56 }
 0x1b4   :  { %v3629_v6 = vrot.slane %v3601_v31, %v14790_v9  ;;  %v3681_v38 = vadd.f32 %v3596_v48, %v3286_v3  ;;  %v3684_v59 = vadd.f32 %v3595_v8, %v3285_v27  ;;  %v4017_v43 = vcombine.low %v3859_v54, %v3861_v13  ;;  %v16139_v8 = vpop.f32.mrf.mxu1 }
 0x1b5   :  { %v4018_v44 = vcombine.high %v3859_v54, %v3861_v13  ;;  %v3630_v28 = vcombine.low %v3608_v30, %v3622_v60  ;;  %v3631_v12 = vcombine.high %v3608_v30, %v3622_v60  ;;  %v3959_v2 = vrot.slane %v3949_v24, %v14790_v9  ;;  %v4207_v24 = vpop.f32.mrf.mxu0 }
 0x1b6   :  { %v3632_v37 = vcombine.low %v3615_v18, %v3629_v6  ;;  %v3633_v23 = vcombine.high %v3615_v18, %v3629_v6  ;;  %v3966_v0 = vrot.slane %v3950_v51, %v14790_v9  ;;  %v3973_v31 = vrot.slane %v3951_v4, %v14790_v9 }
 0x1b7   :  { %v3980_v46 = vrot.slane %v3952_v61, %v14790_v9  ;;  %v3685_v56 = vadd.f32 %v3597_v17, %v3287_v36  ;;  %v3640_v3 = vrot.slane %v3630_v28, %v14790_v9  ;;  %v3654_v54 = vrot.slane %v3631_v12, %v14790_v9 }
 0x1b8   :  { %v3647_v27 = vrot.slane %v3632_v37, %v14790_v9  ;;  %v3981_v30 = vcombine.low %v3959_v2, %v3973_v31  ;;  %v3982_v48 = vcombine.high %v3959_v2, %v3973_v31  ;;  %v3661_v51 = vrot.slane %v3633_v23, %v14790_v9  ;;  %v4284_v2 = vpop.f32.mrf.mxu1 }
 0x1b9   :  { %v3983_v18 = vcombine.low %v3966_v0, %v3980_v46  ;;  %v3984_v13 = vcombine.high %v3966_v0, %v3980_v46  ;;  %v3662_v60 = vcombine.high %v3640_v3, %v3640_v3  ;;  %v16143_v6 = vrot.slane %v4017_v43, %v14790_v9 }
 0x1ba   :  { %v16146_v36 = vrot.slane %v4018_v44, %v14790_v9  ;;  %v3663_v17 = vcombine.high %v3654_v54, %v3654_v54  ;;  %v16149_v4 = vadd.f32 %v3640_v3, %v16087_v41  ;;  %v3991_v61 = vrot.slane %v3981_v30, %v14790_v9  ;;  %v16160_v3 = vpop.f32.mrf.mxu0 }
 0x1bb   :  { %v3998_v28 = vrot.slane %v3983_v18, %v14790_v9  ;;  %v16154_v12 = vadd.f32 %v3654_v54, %v16090_v58  ;;  %v16156_v37 = vadd.f32 %v3647_v27, %v3337_v10  ;;  %v4005_v23 = vrot.slane %v3982_v48, %v14790_v9 }
 0x1bc   :  { %v4012_v43 = vrot.slane %v3984_v13, %v14790_v9  ;;  %v4013_v44 = vcombine.high %v3991_v61, %v3991_v61  ;;  %v4097_v31 = vadd.f32 %v3991_v61, %v3678_v1  ;;  %v3691_v61 = vadd.f32 %v3661_v51, %v16102_v45 }
 0x1bd   :  { %v4014_v0 = vcombine.high %v3998_v28, %v3998_v28  ;;  %v4101_v46 = vadd.f32 %v3998_v28, %v3682_v39  ;;  %v4015_v20 = vcombine.high %v4005_v23, %v4005_v23  ;;  %v4098_v16 = vadd.f32 %v4005_v23, %v3679_v5  ;;  %v16174_v39 = vpop.f32.mrf.mxu1 }
 0x1be   :  { %v4016_v30 = vcombine.high %v4012_v43, %v4012_v43  ;;  %v4102_v18 = vadd.f32 %v4012_v43, %v3683_v47  ;;  %v4099_v49 = vadd.f32 %v4013_v44, %v3680_v53  ;;  %v16163_v10 = vadd.f32 %v4097_v31, %v15583_v32 }
 0x1bf   :  { %v4103_v54 = vadd.f32 %v4014_v0, %v3684_v59  ;;  %v16166_v27 = vadd.f32 %v4101_v46, %v15590_v35  ;;  %v4100_v48 = vadd.f32 %v4015_v20, %v3681_v38  ;;  %v16169_v25 = vadd.f32 %v4098_v16, %v15593_v22  ;;  %v16186_v16 = vpop.f32.mrf.mxu0  ;;  %v16208_v44 = vpop.f32.mrf.mxu1 }
 0x1c0   :  { %v4104_v13 = vadd.f32 %v4016_v30, %v3685_v56  ;;  %v16172_v1 = vadd.f32 %v4102_v18, %v15612_v21  ;;  %v18446_v5 = vcombine.high %v16087_v41, %v16087_v41  ;;  %v18447_v53 = vcombine.high %v16090_v58, %v16090_v58 }
 0x1c1   :  { %v16184_v20 = vadd.f32 %v4099_v49, %v15616_v26  ;;  %v16189_v38 = vadd.f32 %v4100_v48, %v15624_v33  ;;  %v16192_v56 = vadd.f32 %v4103_v54, %v15620_v29  ;;  %v4019_v49 = vcombine.low %v16112_v62, %v16128_v7  ;;  %v16214_v18 = vpop.f32.mrf.mxu0 }
 0x1c2   :  { %v3688_v59 = vadd.f32 %v3662_v60, %v18446_v5  ;;  %v3689_v47 = vadd.f32 %v3663_v17, %v18447_v53  ;;  %v16197_v58 = vadd.f32 %v4104_v13, %v15583_v32  ;;  %v4020_v51 = vcombine.high %v16112_v62, %v16128_v7 }
 0x1c3   :  { %v4301_v23 = vcombine.low %v16130_v50, %v4207_v24  ;;  %v4302_v43 = vcombine.high %v16130_v50, %v4207_v24  ;;  %v4041_v0 = vrot.slane %v4019_v49, %v14790_v9  ;;  %v4303_v46 = vcombine.low %v16139_v8, %v4284_v2 }
 0x1c4   :  { %v4048_v31 = vrot.slane %v4020_v51, %v14790_v9  ;;  %v4304_v30 = vcombine.high %v16139_v8, %v4284_v2  ;;  %v4369_v53 = vcombine.low %v16160_v3, %v16186_v16  ;;  %v4370_v49 = vcombine.high %v16160_v3, %v16186_v16  ;;  %v4592_v51 = vpop.f32.mrf.mxu1 }
 0x1c5   :  { %v4311_v54 = vrot.slane %v4301_v23, %v14790_v9  ;;  %v4318_v50 = vrot.slane %v4302_v43, %v14790_v9  ;;  %v4049_v24 = vcombine.low %v16143_v6, %v4041_v0  ;;  %v4050_v48 = vcombine.high %v16143_v6, %v4041_v0 }
 0x1c6   :  { %v4051_v13 = vcombine.low %v16146_v36, %v4048_v31  ;;  %v4052_v5 = vcombine.high %v16146_v36, %v4048_v31  ;;  %v4325_v8 = vrot.slane %v4303_v46, %v14790_v9  ;;  %v4332_v2 = vrot.slane %v4304_v30, %v14790_v9  ;;  %v4517_v36 = vpop.f32.mrf.mxu0 }
 0x1c7   :  { %v4059_v23 = vrot.slane %v4049_v24, %v14790_v9  ;;  %v4073_v6 = vrot.slane %v4050_v48, %v14790_v9 }
 0x1c8   :  { %v4066_v43 = vrot.slane %v4051_v13, %v14790_v9  ;;  %v4080_v0 = vrot.slane %v4052_v5, %v14790_v9  ;;  %v4333_v31 = vcombine.low %v4311_v54, %v4325_v8  ;;  %v4334_v46 = vcombine.high %v4311_v54, %v4325_v8  ;;  %v4594_v5 = vpop.f32.mrf.mxu1 }
 0x1c9   :  { %v4335_v7 = vcombine.low %v4318_v50, %v4332_v2  ;;  %v4336_v30 = vcombine.high %v4318_v50, %v4332_v2  ;;  %v4081_v62 = vcombine.high %v4059_v23, %v4059_v23  ;;  %v4082_v17 = vcombine.high %v4073_v6, %v4073_v6 }
 0x1ca   :  { %v4105_v45 = vadd.f32 %v4059_v23, %v16149_v4  ;;  %v4106_v3 = vadd.f32 %v4073_v6, %v16154_v12  ;;  %v4109_v16 = vadd.f32 %v4066_v43, %v16156_v37  ;;  %v4110_v24 = vadd.f32 %v4080_v0, %v3691_v61  ;;  %v4521_v4 = vpop.f32.mrf.mxu0 }
 0x1cb   :  { %v16238_v13 = vrot.slane %v4333_v31, %v14790_v9  ;;  %v16241_v48 = vrot.slane %v4335_v7, %v14790_v9  ;;  %v4107_v41 = vadd.f32 %v4081_v62, %v3688_v59  ;;  %v4108_v54 = vadd.f32 %v4082_v17, %v3689_v47 }
 0x1cc   :  { %v16244_v50 = vadd.f32 %v4105_v45, %v15593_v22  ;;  %v16247_v8 = vadd.f32 %v4106_v3, %v15616_v26  ;;  %v16251_v37 = vadd.f32 %v4109_v16, %v15612_v21  ;;  %v16254_v61 = vadd.f32 %v4110_v24, %v15620_v29  ;;  %v4523_v31 = vpop.f32.mrf.mxu0 }
 0x1cd   :  { %v4379_v7 = vrot.slane %v4369_v53, %v14790_v9  ;;  %v16258_v59 = vadd.f32 %v4107_v41, %v15624_v33  ;;  %v16261_v47 = vadd.f32 %v4108_v54, %v15590_v35  ;;  %v16264_v45 = vrot.slane %v4334_v46, %v14790_v9  ;;  %v4598_v53 = vpop.f32.mrf.mxu1 }
 0x1ce   :  { %18448 = vst [vmem:[#allocation42_spill] sm:$0xff] %v16251_v37  ;;  %18449 = vst [vmem:[#allocation44_spill] sm:$0xff] %v16254_v61  ;;  %v4386_v17 = vrot.slane %v4370_v49, %v14790_v9  ;;  %v16271_v43 = vrot.slane %v4336_v30, %v14790_v9  ;;  %v4365_v0 = vcombine.high %v16238_v13, %v16238_v13 }
 0x1cf   :  { %18450 = vst [vmem:[#allocation45_spill] sm:$0xff] %v16258_v59  ;;  %18451 = vst [vmem:[#allocation46_spill] sm:$0xff] %v16261_v47  ;;  %v4366_v49 = vcombine.high %v16241_v48, %v16241_v48  ;;  %v4371_v46 = vcombine.low %v16174_v39, %v16208_v44  ;;  %v4372_v3 = vcombine.high %v16174_v39, %v16208_v44  ;;  %v4600_v28 = vpop.f32.mrf.mxu1 }
 0x1d0   :  { %v4611_v30 = vcombine.low %v16214_v18, %v4517_v36  ;;  %v4612_v16 = vcombine.high %v16214_v18, %v4517_v36  ;;  %v4367_v54 = vcombine.high %v16264_v45, %v16264_v45  ;;  %v4613_v23 = vcombine.low %v4592_v51, %v4594_v5 }
 0x1d1   :  { %v4614_v41 = vcombine.high %v4592_v51, %v4594_v5  ;;  %v4393_v6 = vrot.slane %v4371_v46, %v14790_v9  ;;  %v4400_v2 = vrot.slane %v4372_v3, %v14790_v9  ;;  %v4679_v62 = vcombine.low %v4521_v4, %v4523_v31  ;;  %v4934_v3 = vpop.f32.mrf.mxu0 }
 0x1d2   :  { %v4680_v12 = vcombine.high %v4521_v4, %v4523_v31  ;;  %v4621_v39 = vrot.slane %v4611_v30, %v14790_v9  ;;  %v4628_v44 = vrot.slane %v4612_v16, %v14790_v9  ;;  %v4635_v18 = vrot.slane %v4613_v23, %v14790_v9 }
 0x1d3   :  { %v4642_v36 = vrot.slane %v4614_v41, %v14790_v9  ;;  %v4401_v24 = vcombine.low %v4379_v7, %v4393_v6  ;;  %v4402_v60 = vcombine.high %v4379_v7, %v4393_v6  ;;  %v4403_v42 = vcombine.low %v4386_v17, %v4400_v2  ;;  %v5011_v41 = vpop.f32.mrf.mxu1  ;;  %v4936_v40 = vpop.f32.mrf.mxu0 }
 0x1d4   :  { %v4404_v57 = vcombine.high %v4386_v17, %v4400_v2  ;;  %v4643_v51 = vcombine.low %v4621_v39, %v4635_v18  ;;  %v4644_v5 = vcombine.high %v4621_v39, %v4635_v18  ;;  %v4368_v4 = vcombine.high %v16271_v43, %v16271_v43 }
 0x1d5   :  { %v4645_v46 = vcombine.low %v4628_v44, %v4642_v36  ;;  %v4646_v19 = vcombine.high %v4628_v44, %v4642_v36  ;;  %v16297_v31 = vrot.slane %v4401_v24, %v14790_v9  ;;  %v16300_v30 = vrot.slane %v4402_v60, %v14790_v9  ;;  %v16320_v55 = vpop.f32.mrf.mxu0 }
 0x1d6   :  { %v4689_v23 = vrot.slane %v4679_v62, %v14790_v9  ;;  %v4653_v7 = vrot.slane %v4643_v51, %v14790_v9  ;;  %v4667_v2 = vrot.slane %v4644_v5, %v14790_v9  ;;  %v4418_v16 = vrot.slane %v4403_v42, %v14790_v9 }
 0x1d7   :  { %v4660_v17 = vrot.slane %v4645_v46, %v14790_v9  ;;  %v4674_v6 = vrot.slane %v4646_v19, %v14790_v9  ;;  %v4696_v39 = vrot.slane %v4680_v12, %v14790_v9  ;;  %v4681_v24 = vcombine.low %v4598_v53, %v4600_v28  ;;  %v5013_v46 = vpop.f32.mrf.mxu1 }
 0x1d8   :  { %v4682_v44 = vcombine.high %v4598_v53, %v4600_v28  ;;  %v16310_v60 = vrot.slane %v4404_v57, %v14790_v9  ;;  %v4675_v18 = vcombine.high %v4653_v7, %v4653_v7  ;;  %v4677_v36 = vcombine.high %v4667_v2, %v4667_v2 }
 0x1d9   :  { %v4676_v62 = vcombine.high %v4660_v17, %v4660_v17  ;;  %v4678_v19 = vcombine.high %v4674_v6, %v4674_v6  ;;  %v4759_v42 = vadd.f32 %v4653_v7, %v16238_v13  ;;  %v4760_v12 = vadd.f32 %v4667_v2, %v16264_v45 }
 0x1da   :  { %v4761_v28 = vadd.f32 %v4675_v18, %v4365_v0  ;;  %v4763_v57 = vadd.f32 %v4660_v17, %v16241_v48  ;;  %v4764_v53 = vadd.f32 %v4674_v6, %v16271_v43  ;;  %v4703_v14 = vrot.slane %v4681_v24, %v14790_v9  ;;  %v4942_v6 = vpop.f32.mrf.mxu0 }
 0x1db   :  { %v4710_v51 = vrot.slane %v4682_v44, %v14790_v9  ;;  %v5030_v63 = vcombine.low %v4934_v3, %v4936_v40  ;;  %v5031_v37 = vcombine.high %v4934_v3, %v4936_v40  ;;  %v4762_v5 = vadd.f32 %v4677_v36, %v4367_v54 }
 0x1dc   :  { %v4765_v47 = vadd.f32 %v4676_v62, %v4366_v49  ;;  %v5032_v59 = vcombine.low %v5011_v41, %v5013_v46  ;;  %v5033_v13 = vcombine.high %v5011_v41, %v5013_v46  ;;  %v4711_v7 = vcombine.low %v4689_v23, %v4703_v14 }
 0x1dd   :  { %v4712_v61 = vcombine.high %v4689_v23, %v4703_v14  ;;  %v4713_v45 = vcombine.low %v4696_v39, %v4710_v51  ;;  %v4714_v0 = vcombine.high %v4696_v39, %v4710_v51  ;;  %v5040_v48 = vrot.slane %v5030_v63, %v14790_v9 }
 0x1de   :  { %v5047_v43 = vrot.slane %v5031_v37, %v14790_v9  ;;  %v5054_v17 = vrot.slane %v5032_v59, %v14790_v9  ;;  %v5061_v2 = vrot.slane %v5033_v13, %v14790_v9  ;;  %v4766_v24 = vadd.f32 %v4678_v19, %v4368_v4 }
 0x1df   :  { %v16329_v40 = vrot.slane %v4711_v7, %v14790_v9  ;;  %v4728_v49 = vrot.slane %v4713_v45, %v14790_v9  ;;  %v16333_v54 = vrot.slane %v4712_v61, %v14790_v9  ;;  %v4742_v37 = vrot.slane %v4714_v0, %v14790_v9 }
 0x1e0   :  { %v5062_v14 = vcombine.low %v5040_v48, %v5054_v17  ;;  %v5063_v3 = vcombine.high %v5040_v48, %v5054_v17  ;;  %v5064_v23 = vcombine.low %v5047_v43, %v5061_v2  ;;  %v5065_v63 = vcombine.high %v5047_v43, %v5061_v2  ;;  %v5017_v17 = vpop.f32.mrf.mxu1 }
 0x1e1   :  { %v4743_v59 = vcombine.high %v16329_v40, %v16329_v40  ;;  %v5098_v41 = vcombine.low %v16320_v55, %v4942_v6  ;;  %v5099_v4 = vcombine.high %v16320_v55, %v4942_v6  ;;  %v4744_v39 = vcombine.high %v16333_v54, %v16333_v54 }
 0x1e2   :  { %v16344_v61 = vadd.f32 %v16329_v40, %v16297_v31  ;;  %v5072_v44 = vrot.slane %v5062_v14, %v14790_v9  ;;  %v5079_v18 = vrot.slane %v5064_v23, %v14790_v9  ;;  %v16350_v62 = vadd.f32 %v16333_v54, %v16300_v30 }
 0x1e3   :  { %v16352_v36 = vadd.f32 %v4728_v49, %v4418_v16  ;;  %v5086_v51 = vrot.slane %v5063_v3, %v14790_v9  ;;  %v5093_v55 = vrot.slane %v5065_v63, %v14790_v9 }
 0x1e4   :  { %v5094_v19 = vcombine.high %v5072_v44, %v5072_v44  ;;  %v5095_v46 = vcombine.high %v5079_v18, %v5079_v18  ;;  %v5178_v13 = vadd.f32 %v5072_v44, %v4759_v42  ;;  %v5182_v7 = vadd.f32 %v5079_v18, %v4763_v57  ;;  %v5019_v44 = vpop.f32.mrf.mxu1 }
 0x1e5   :  { %v5096_v45 = vcombine.high %v5086_v51, %v5086_v51  ;;  %v5097_v0 = vcombine.high %v5093_v55, %v5093_v55  ;;  %v5179_v48 = vadd.f32 %v5086_v51, %v4760_v12  ;;  %v5183_v43 = vadd.f32 %v5093_v55, %v4764_v53 }
 0x1e6   :  { %v5180_v2 = vadd.f32 %v5094_v19, %v4761_v28  ;;  %v5184_v6 = vadd.f32 %v5095_v46, %v4765_v47  ;;  %v5192_v40 = vadd.f32 %v5178_v13, %v15583_v32  ;;  %v5196_v16 = vadd.f32 %v5182_v7, %v15590_v35 }
 0x1e7   :  { %v5181_v49 = vadd.f32 %v5096_v45, %v4762_v5  ;;  %v5185_v54 = vadd.f32 %v5097_v0, %v4766_v24  ;;  %v5193_v14 = vadd.f32 %v5179_v48, %v15593_v22  ;;  %v5197_v3 = vadd.f32 %v5183_v43, %v15612_v21 }
 0x1e8   :  { %v5194_v42 = vadd.f32 %v5180_v2, %v15616_v26  ;;  %v5198_v57 = vadd.f32 %v5184_v6, %v15620_v29  ;;  %v5206_v23 = vmax.f32 %v5192_v40, 0.0  ;;  %v5210_v12 = vmax.f32 %v5196_v16, 0.0 }
 0x1e9   :  { %v5195_v53 = vadd.f32 %v5181_v49, %v15624_v33  ;;  %v5199_v47 = vadd.f32 %v5185_v54, %v15583_v32  ;;  %v5207_v28 = vmax.f32 %v5193_v14, 0.0  ;;  %v5211_v63 = vmax.f32 %v5197_v3, 0.0 }
 0x1ea   :  { %v4772_v5 = vadd.f32 %v4742_v37, %v16310_v60  ;;  %v5208_v24 = vmax.f32 %v5194_v42, 0.0  ;;  %v5212_v18 = vmax.f32 %v5198_v57, 0.0  ;;  %v18452_v51 = vmax.f32 %v16166_v27, 0.0 }
 0x1eb   :  { %v5209_v19 = vmax.f32 %v5195_v53, 0.0  ;;  %v18453_v46 = vmax.f32 %v16172_v1, 0.0  ;;  %v5108_v7 = vrot.slane %v5098_v41, %v14790_v9  ;;  %v5115_v32 = vrot.slane %v5099_v4, %v14790_v9 }
 0x1ec   :  { %v16367_v55 = vmax.f32 %v18452_v51, %v5210_v12  ;;  %v5100_v45 = vcombine.low %v5017_v17, %v5019_v44  ;;  %v5101_v0 = vcombine.high %v5017_v17, %v5019_v44  ;;  %v18454_v48 = vmax.f32 %v16163_v10, 0.0 }
 0x1ed   :  { %v16371_v13 = vmax.f32 %v18453_v46, %v5211_v63  ;;  %v18455_v37 = vmax.f32 %v16169_v25, 0.0  ;;  %v5213_v43 = vmax.f32 %v5199_v47, 0.0  ;;  %v18456_v2 = vmax.f32 %v16184_v20, 0.0 }
 0x1ee   :  { %v16377_v60 = vmax.f32 %v18454_v48, %v5206_v23  ;;  %v18457_v6 = vmax.f32 %v16189_v38, 0.0  ;;  %v18458_v4 = vmax.f32 %v16192_v56, 0.0  ;;  %v5122_v10 = vrot.slane %v5100_v45, %v14790_v9 }
 0x1ef   :  { %v16381_v27 = vmax.f32 %v18455_v37, %v5207_v28  ;;  %v16385_v1 = vmax.f32 %v18456_v2, %v5208_v24  ;;  %v5129_v40 = vrot.slane %v5101_v0, %v14790_v9  ;;  %v5644_v20 = vcombine.low %v16367_v55, %v16371_v13 }
 0x1f0   :  { %v16389_v41 = vmax.f32 %v18457_v6, %v5209_v19  ;;  %v16393_v17 = vmax.f32 %v18458_v4, %v5212_v18  ;;  %v18459_v16 = vcombine.high %v16297_v31, %v16297_v31  ;;  %v18460_v49 = vcombine.high %v16300_v30, %v16300_v30 }
 0x1f1   :  { %v5642_v25 = vcombine.low %v16377_v60, %v16381_v27  ;;  %v5130_v3 = vcombine.low %v5108_v7, %v5122_v10  ;;  %v5131_v42 = vcombine.high %v5108_v7, %v5122_v10  ;;  %v5132_v57 = vcombine.low %v5115_v32, %v5129_v40 }
 0x1f2   :  { %v4769_v38 = vadd.f32 %v4743_v59, %v18459_v16  ;;  %v4770_v56 = vadd.f32 %v4744_v39, %v18460_v49  ;;  %v5643_v54 = vcombine.low %v16385_v1, %v16389_v41  ;;  %v5672_v14 = vrot.slane %v16393_v17, %v14790_v9 }
 0x1f3   :  { %v5133_v23 = vcombine.high %v5115_v32, %v5129_v40  ;;  %v18461_v12 = vmax.f32 %v16197_v58, 0.0  ;;  %v5651_v31 = vrot.slane %v5642_v25, %v14790_v9  ;;  %v5665_v30 = vrot.slane %v5644_v20, %v14790_v9 }
 0x1f4   :  { %v5658_v59 = vrot.slane %v5643_v54, %v14790_v9  ;;  %v5140_v39 = vrot.slane %v5130_v3, %v14790_v9  ;;  %v5147_v47 = vrot.slane %v5132_v57, %v14790_v9  ;;  %v5154_v28 = vrot.slane %v5131_v42, %v14790_v9  ;;  %v18464_v54 = vld [vmem:[#allocation44_spill] sm:$0xff] }
 0x1f5   :  { %v16413_v53 = vmax.f32 %v18461_v12, %v5213_v43  ;;  %v5161_v63 = vrot.slane %v5133_v23, %v14790_v9  ;;  %v5675_v24 = vcombine.low %v5665_v30, %v5672_v14  ;;  %v5676_v58 = vcombine.high %v5665_v30, %v5672_v14 }
 0x1f6   :  { %v5673_v44 = vcombine.low %v5651_v31, %v5658_v59  ;;  %v5674_v18 = vcombine.high %v5651_v31, %v5658_v59  ;;  %v5162_v51 = vcombine.high %v5140_v39, %v5140_v39  ;;  %v5163_v19 = vcombine.high %v5154_v28, %v5154_v28  ;;  %v18468_v31 = vld [vmem:[#allocation46_spill] sm:$0xff] }
 0x1f7   :  { %v5186_v46 = vadd.f32 %v5140_v39, %v16344_v61  ;;  %v5187_v7 = vadd.f32 %v5154_v28, %v16350_v62  ;;  %v5190_v32 = vadd.f32 %v5147_v47, %v16352_v36  ;;  %v5191_v45 = vadd.f32 %v5161_v63, %v4772_v5  ;;  %v18472_v63 = vld [vmem:[#allocation34_spill] sm:$0xff] }
 0x1f8   :  { %v16426_v0 = vrot.slane %v5673_v44, %v14790_v9  ;;  %v16429_v48 = vrot.slane %v5675_v24, %v14790_v9  ;;  %v5188_v37 = vadd.f32 %v5162_v51, %v4769_v38  ;;  %v5189_v43 = vadd.f32 %v5163_v19, %v4770_v56  ;;  %v18473_v44 = vld [vmem:[#allocation30_spill] sm:$0xff]  ;;  %v18474_v19 = vld [vmem:[#allocation41_spill] sm:$0xff] }
 0x1f9   :  { %v5200_v2 = vadd.f32 %v5186_v46, %v15593_v22  ;;  %v5201_v6 = vadd.f32 %v5187_v7, %v15616_v26  ;;  %v5204_v4 = vadd.f32 %v5190_v32, %v15612_v21  ;;  %v5205_v61 = vadd.f32 %v5191_v45, %v15620_v29  ;;  %v18475_v46 = vld [vmem:[#allocation43_spill] sm:$0xff] }
 0x1fa   :  { %v5705_v62 = vcombine.low %v16426_v0, %v16429_v48  ;;  %v16438_v36 = vrot.slane %v5674_v18, %v14790_v9  ;;  %v5202_v5 = vadd.f32 %v5188_v37, %v15624_v33  ;;  %v5203_v10 = vadd.f32 %v5189_v43, %v15590_v35  ;;  %v18476_v37 = vld [vmem:[#allocation37_spill] sm:$0xff] }
 0x1fb   :  { %v5214_v40 = vmax.f32 %v5200_v2, 0.0  ;;  %v5215_v25 = vmax.f32 %v5201_v6, 0.0  ;;  %v5218_v20 = vmax.f32 %v5204_v4, 0.0  ;;  %v5219_v22 = vmax.f32 %v5205_v61, 0.0  ;;  %v18477_v43 = vld [vmem:[#allocation33_spill] sm:$0xff] }
 0x1fc   :  { %5780 = vrot.lane.b32.xlu0 %v5705_v62, %s14699_s0  ;;  %v16444_v21 = vrot.slane %v5676_v58, %v14790_v9  ;;  %v5249_v26 = vcombine.low %v15937_v15, %v15947_v11  ;;  %v5216_v29 = vmax.f32 %v5202_v5, 0.0  ;;  %v5217_v16 = vmax.f32 %v5203_v10, 0.0  ;;  %v18478_v62 = vld [vmem:[#allocation40_spill] sm:$0xff] }
 0x1fd   :  { %v18462_v38 = vmax.f32 %v16244_v50, 0.0  ;;  %v5248_v35 = vcombine.low %v15929_v34, %v15933_v52  ;;  %v18463_v49 = vmax.f32 %v16247_v8, 0.0  ;;  %v18465_v14 = vmax.f32 %v18464_v54, 0.0  ;;  %v18466_v50 = vld [vmem:[#allocation45_spill] sm:$0xff]  ;;  %v18470_v8 = vld [vmem:[#allocation42_spill] sm:$0xff] }
 0x1fe   :  { %v5708_v42 = vcombine.high %v16438_v36, %v16444_v21  ;;  %v13400_v57 = vcombine.low %v16426_v0, %v16438_v36  ;;  %v18467_v23 = vmax.f32 %v18466_v50, 0.0  ;;  %v18469_v59 = vmax.f32 %v18468_v31, 0.0  ;;  %v18479_v36 = vld [vmem:[#allocation35_spill] sm:$0xff] }
 0x1ff   :  { %v16450_v33 = vmax.f32 %v18462_v38, %v5214_v40  ;;  %v16456_v56 = vmax.f32 %v18463_v49, %v5215_v25  ;;  %v16460_v3 = vmax.f32 %v18465_v14, %v5219_v22  ;;  %v18471_v39 = vmax.f32 %v18470_v8, 0.0  ;;  %v18480_v40 = vld [vmem:[#allocation39_spill] sm:$0xff] }
 0x200   :  { %v16468_v12 = vmax.f32 %v18467_v23, %v5216_v29  ;;  %v16472_v30 = vmax.f32 %v18469_v59, %v5217_v16  ;;  %v5250_v24 = vcombine.low %v18473_v44, %v18472_v63  ;;  %v5264_v18 = vrot.slane %v5249_v26, %v14790_v9 }
 0x201   :  { %v16476_v47 = vmax.f32 %v18471_v39, %v5218_v20  ;;  %v5709_v28 = vcombine.low %v16413_v53, %v16450_v33  ;;  %v5317_v7 = vcombine.low %v18475_v46, %v18474_v19  ;;  %v5739_v32 = vrot.slane %v16460_v3, %v14790_v9 }
 0x202   :  { %v5710_v51 = vcombine.low %v16456_v56, %v16468_v12  ;;  %v5257_v45 = vrot.slane %v5248_v35, %v14790_v9  ;;  %v5315_v2 = vcombine.low %v18477_v43, %v18476_v37  ;;  %v5316_v5 = vcombine.low %v18479_v36, %v18478_v62 }
 0x203   :  { %v5711_v58 = vcombine.low %v16472_v30, %v16476_v47  ;;  %v5718_v6 = vrot.slane %v5709_v28, %v14790_v9  ;;  %v16500_v10 = vrot.slane %v5250_v24, %v14790_v9  ;;  %v16504_v25 = vrot.slane %v18480_v40, %v14790_v9 }
 0x204   :  { %v5725_v4 = vrot.slane %v5710_v51, %v14790_v9  ;;  %v5279_v20 = vcombine.low %v5257_v45, %v5264_v18  ;;  %v5324_v38 = vrot.slane %v5315_v2, %v14790_v9  ;;  %v5331_v35 = vrot.slane %v5316_v5, %v14790_v9 }
 0x205   :  { %v5732_v61 = vrot.slane %v5711_v58, %v14790_v9  ;;  %v16509_v49 = vrot.slane %v5317_v7, %v14790_v9  ;;  %v5280_v54 = vcombine.high %v5257_v45, %v5264_v18  ;;  %v5282_v39 = vcombine.high %v16500_v10, %v16504_v25  ;;  %v18481_v58 = vld [vmem:[#allocation31_spill] sm:$0xff] }
 0x206   :  { %v5740_v22 = vcombine.low %v5718_v6, %v5725_v4  ;;  %v5741_v29 = vcombine.high %v5718_v6, %v5725_v4  ;;  %v16524_v59 = vrot.slane %v5279_v20, %v14790_v9  ;;  %v5346_v8 = vcombine.low %v5324_v38, %v5331_v35 }
 0x207   :  { %v5742_v26 = vcombine.low %v5732_v61, %v5739_v32  ;;  %v5743_v16 = vcombine.high %v5732_v61, %v5739_v32  ;;  %v16536_v51 = vrot.slane %v18481_v58, %v14790_v9  ;;  %v16539_v7 = vrot.slane %v5280_v54, %v14790_v9 }
 0x208   :  { %v16512_v14 = vrot.slane %v5740_v22, %v14790_v9  ;;  %v16518_v23 = vrot.slane %v5741_v29, %v14790_v9  ;;  %v16542_v32 = vrot.slane %v5282_v39, %v14790_v9  ;;  %v16546_v45 = vrot.slane %v5346_v8, %v14790_v9 }
 0x209   :  { %v16515_v50 = vrot.slane %v5742_v26, %v14790_v9  ;;  %v16521_v31 = vrot.slane %v5743_v16, %v14790_v9  ;;  %v5347_v2 = vcombine.high %v5324_v38, %v5331_v35  ;;  %v5349_v6 = vcombine.high %v16509_v49, %v16536_v51 }
 0x20a   :  { %v13403_v18 = vcombine.low %v16512_v14, %v16518_v23  ;;  %v5314_v4 = vcombine.high %v16539_v7, %v16542_v32  ;;  %v5706_v29 = vcombine.high %v16426_v0, %v16429_v48  ;;  %v13401_v38 = vcombine.low %v16429_v48, %v16444_v21 }
 0x20b   :  { %v5772_v28 = vcombine.low %v16512_v14, %v16515_v50  ;;  %v5775_v24 = vcombine.high %v16518_v23, %v16521_v31  ;;  %v16553_v61 = vrot.slane %v5347_v2, %v14790_v9  ;;  %v16556_v5 = vrot.slane %v5349_v6, %v14790_v9 }
 0x20c   :  { %v5805_v2 = vrot.slane %v13401_v38, %v14790_v9  ;;  %v6442_v38 = vld [vmem:[#allocation9 + $0x1c0] sm:$0xff] }
 0x20d   :  { %5782 = vrot.lane.b32.xlu0 %v5772_v28, %s14699_s0  ;;  %v5798_v28 = vrot.slane %v13400_v57, %v14790_v9  ;;  %v6446_v57 = vld [vmem:[#allocation9 + $0x1e0] sm:$0xff] }
 0x26e   :  { %v5781_v16 = vpop.permute.xlu0 %5780 }
 0x26f   :  { %v5784_v35 = vsel %vm5386_vm2, %v5781_v16, %v5708_v42  ;;  %v6443_v16 = vld [vmem:[#allocation9 + $0x1c8] sm:$0xff] }
 0x270   :  { %v5790_v54 = vcombine.low %v5706_v29, %v5784_v35  ;;  %v13402_v23 = vcombine.high %v16429_v48, %v5784_v35  ;;  %v6447_v29 = vld [vmem:[#allocation9 + $0x1e8] sm:$0xff] }
 0x271   :  { %6890 = vmatprep.subr.mxu0 %v6447_v29 }
 0x272   :  { %v5812_v8 = vrot.slane %v5790_v54, %v14790_v9  ;;  %v5819_v39 = vrot.slane %v13402_v23, %v14790_v9  ;;  %v13404_v54 = vcombine.low %v16515_v50, %v16521_v31  ;;  %6891 = vmatpush1.msra.mxu0 %v6446_v57 }
 0x273   :  { %6892 = vmatprep.subr.mxu0 %v6443_v16 }
 0x274   :  { %v5820_v6 = vcombine.low %v5798_v28, %v5812_v8  ;;  %v5822_v26 = vcombine.low %v5805_v2, %v5819_v39  ;;  %v5821_v0 = vcombine.high %v5798_v28, %v5812_v8  ;;  %v5823_v22 = vcombine.high %v5805_v2, %v5819_v39  ;;  %v6439_v39 = vld [vmem:[#allocation9 + $0x1a8] sm:$0xff]  ;;  %6893 = vmatpush1.msra.mxu0 %v6442_v38 }
 0x275   :  { %6894 = vmatprep.subr.mxu0 %v6439_v39 }
 0x276   :  { %v5830_v20 = vrot.slane %v5820_v6, %v14790_v9  ;;  %v5837_v21 = vrot.slane %v5822_v26, %v14790_v9  ;;  %v5844_v42 = vrot.slane %v5821_v0, %v14790_v9  ;;  %v5773_v26 = vcombine.high %v16512_v14, %v16515_v50  ;;  %v6438_v6 = vld [vmem:[#allocation9 + $0x1a0] sm:$0xff]  ;;  %v6435_v14 = vld [vmem:[#allocation9 + $0x188] sm:$0xff] }
 0x277   :  { %v5851_v23 = vrot.slane %v5823_v22, %v14790_v9  ;;  %v5872_v22 = vrot.slane %v13404_v54, %v14790_v9  ;;  %6895 = vmatpush1.msra.mxu0 %v6438_v6  ;;  %v5281_v6 = vcombine.low %v16500_v10, %v16504_v25  ;;  %v6570_v10 = vld [vmem:[#allocation9 + $0x5c0] sm:$0xff] }
 0x278   :  { %5922 = vrot.lane.b32.xlu1 %v5830_v20, %s14700_s17  ;;  %5930 = vrot.lane.b32.xlu0 %v5837_v21, %s14700_s17  ;;  %v5852_v48 = vcombine.high %v5830_v20, %v5830_v20  ;;  %v5853_v8 = vcombine.high %v5837_v21, %v5837_v21  ;;  %v5854_v21 = vcombine.high %v5844_v42, %v5844_v42 }
 0x279   :  { %6896 = vmatprep.subr.mxu0 %v6435_v14  ;;  %v6419_v14 = vld [vmem:[#allocation9 + $0x108] sm:$0xff]  ;;  %v16609_v25 = vrot.slane %v5281_v6, %v14790_v9  ;;  %v6558_v6 = vld [vmem:[#allocation9 + $0x560] sm:$0xff] }
 0x27c   :  { %5924 = vrot.lane.b32.xlu1 %v5844_v42, %s14700_s17  ;;  %5926 = vrot.lane.b32.xlu0 %v5852_v48, %s14700_s17  ;;  %v6426_v42 = vld [vmem:[#allocation9 + $0x140] sm:$0xff] }
 0x27f   :  { %v5783_v35 = vpop.permute.xlu0 %5782 }
 0x280   :  { %v5785_v20 = vsel %vm5386_vm2, %v5783_v35, %v5775_v24  ;;  %5932 = vrot.lane.b32.xlu1 %v5851_v23, %s14700_s17  ;;  %5934 = vrot.lane.b32.xlu0 %v5853_v8, %s14700_s17  ;;  %v5865_v24 = vrot.slane %v13403_v18, %v14790_v9  ;;  %v6431_v35 = vld [vmem:[#allocation9 + $0x168] sm:$0xff] }
 0x281   :  { %v5857_v28 = vcombine.low %v5773_v26, %v5785_v20  ;;  %v13405_v2 = vcombine.high %v16515_v50, %v5785_v20  ;;  %v6434_v26 = vld [vmem:[#allocation9 + $0x180] sm:$0xff]  ;;  %v6427_v18 = vld [vmem:[#allocation9 + $0x148] sm:$0xff] }
 0x282   :  { %v6430_v20 = vld [vmem:[#allocation9 + $0x160] sm:$0xff]  ;;  %6897 = vmatpush1.msra.mxu0 %v6434_v26  ;;  %v6423_v23 = vld [vmem:[#allocation9 + $0x128] sm:$0xff] }
 0x283   :  { %v5879_v31 = vrot.slane %v5857_v28, %v14790_v9  ;;  %v5886_v0 = vrot.slane %v13405_v2, %v14790_v9  ;;  %6898 = vmatprep.subr.mxu0 %v6431_v35  ;;  %v6575_v8 = vld [vmem:[#allocation9 + $0x5e8] sm:$0xff]  ;;  %v6422_v28 = vld [vmem:[#allocation9 + $0x120] sm:$0xff] }
 0x284   :  { %5928 = vrot.lane.b32.xlu1 %v5854_v21, %s14700_s17  ;;  %6899 = vmatpush1.msra.mxu0 %v6430_v20  ;;  %v6574_v2 = vld [vmem:[#allocation9 + $0x5e0] sm:$0xff] }
 0x285   :  { %v5888_v48 = vcombine.high %v5865_v24, %v5879_v31  ;;  %v5887_v50 = vcombine.low %v5865_v24, %v5879_v31  ;;  %v5890_v29 = vcombine.high %v5872_v22, %v5886_v0  ;;  %v5889_v57 = vcombine.low %v5872_v22, %v5886_v0  ;;  %6900 = vmatprep.subr.mxu0 %v6427_v18  ;;  %v6571_v31 = vld [vmem:[#allocation9 + $0x5c8] sm:$0xff]  ;;  %v6418_v0 = vld [vmem:[#allocation9 + $0x100] sm:$0xff] }
 0x286   :  { %6967 = vmatprep.subr.mxu1 %v6575_v8  ;;  %6901 = vmatpush1.msra.mxu0 %v6426_v42  ;;  %v6415_v22 = vld [vmem:[#allocation9 + $0xe8] sm:$0xff]  ;;  %v6406_v35 = vld [vmem:[#allocation9 + $0xa0] sm:$0xff] }
 0x287   :  { %v5911_v16 = vrot.slane %v5888_v48, %v14790_v9  ;;  %v5897_v38 = vrot.slane %v5887_v50, %v14790_v9  ;;  %v5904_v39 = vrot.slane %v5889_v57, %v14790_v9  ;;  %6902 = vmatprep.subr.mxu0 %v6423_v23  ;;  %v5918_v24 = vrot.slane %v5890_v29, %v14790_v9  ;;  %v6414_v50 = vld [vmem:[#allocation9 + $0xe0] sm:$0xff]  ;;  %v6411_v57 = vld [vmem:[#allocation9 + $0xc8] sm:$0xff] }
 0x288   :  { %6903 = vmatpush1.msra.mxu0 %v6422_v28  ;;  %6968 = vmatpush1.msra.mxu1 %v6574_v2  ;;  %v5348_v48 = vcombine.low %v16509_v49, %v16536_v51  ;;  %v6410_v29 = vld [vmem:[#allocation9 + $0xc0] sm:$0xff]  ;;  %v6407_v49 = vld [vmem:[#allocation9 + $0xa8] sm:$0xff] }
 0x289   :  { %5938 = vrot.lane.b32.xlu0 %v5911_v16, %s14700_s17  ;;  %5936 = vrot.lane.b32.xlu1 %v5897_v38, %s14700_s17  ;;  %v5921_v54 = vcombine.high %v5911_v16, %v5911_v16  ;;  %v5919_v21 = vcombine.high %v5897_v38, %v5897_v38  ;;  %v6567_v16 = vld [vmem:[#allocation9 + $0x5a8] sm:$0xff]  ;;  %v5311_v38 = vcombine.low %v16524_v59, %v16609_v25  ;;  %v6566_v20 = vld [vmem:[#allocation9 + $0x5a0] sm:$0xff] }
 0x28a   :  { %6904 = vmatprep.subr.mxu0 %v6419_v14  ;;  %6969 = vmatprep.subr.mxu1 %v6571_v31  ;;  %v5920_v51 = vcombine.high %v5904_v39, %v5904_v39  ;;  %v16615_v26 = vrot.slane %v5348_v48, %v14790_v9  ;;  %v6403_v18 = vld [vmem:[#allocation9 + $0x88] sm:$0xff]  ;;  %v6402_v23 = vld [vmem:[#allocation9 + $0x80] sm:$0xff] }
 0x28b   :  { %6905 = vmatpush1.msra.mxu0 %v6418_v0  ;;  %6970 = vmatpush1.msra.mxu1 %v6570_v10  ;;  %v6563_v42 = vld [vmem:[#allocation9 + $0x588] sm:$0xff]  ;;  %v6562_v8 = vld [vmem:[#allocation9 + $0x580] sm:$0xff] }
 0x28c   :  { %6906 = vmatprep.subr.mxu0 %v6415_v22  ;;  %6971 = vmatprep.subr.mxu1 %v6567_v16  ;;  %v6559_v28 = vld [vmem:[#allocation9 + $0x568] sm:$0xff]  ;;  %v6398_v2 = vld [vmem:[#allocation9 + $0x60] sm:$0xff] }
 0x28d   :  { %5942 = vrot.lane.b32.xlu0 %v5921_v54, %s14700_s17  ;;  %5944 = vrot.lane.b32.xlu1 %v5904_v39, %s14700_s17  ;;  %v5378_v54 = vcombine.low %v16546_v45, %v16615_v26  ;;  %v6399_v39 = vld [vmem:[#allocation9 + $0x68] sm:$0xff]  ;;  %v6394_v0 = vld [vmem:[#allocation9 + $0x40] sm:$0xff] }
 0x28e   :  { %6907 = vmatpush1.msra.mxu0 %v6414_v50  ;;  %6972 = vmatpush1.msra.mxu1 %v6566_v20  ;;  %v6395_v14 = vld [vmem:[#allocation9 + $0x48] sm:$0xff]  ;;  %v6390_v48 = vld [vmem:[#allocation9 + $0x20] sm:$0xff] }
 0x28f   :  { %6908 = vmatprep.subr.mxu0 %v6411_v57  ;;  %6973 = vmatprep.subr.mxu1 %v6563_v42  ;;  %v6555_v31 = vld [vmem:[#allocation9 + $0x548] sm:$0xff]  ;;  %v6550_v50 = vld [vmem:[#allocation9 + $0x520] sm:$0xff] }
 0x290   :  { %6909 = vmatpush1.msra.mxu0 %v6410_v29  ;;  %6974 = vmatpush1.msra.mxu1 %v6562_v8  ;;  %v6391_v22 = vld [vmem:[#allocation9 + $0x28] sm:$0xff]  ;;  %v6386_v16 = vld [vmem:[#allocation9] sm:$0xff] }
 0x291   :  { %5946 = vrot.lane.b32.xlu0 %v5918_v24, %s14700_s17  ;;  %5940 = vrot.lane.b32.xlu1 %v5919_v21, %s14700_s17  ;;  %v6554_v24 = vld [vmem:[#allocation9 + $0x540] sm:$0xff]  ;;  %v6551_v21 = vld [vmem:[#allocation9 + $0x528] sm:$0xff] }
 0x292   :  { %6910 = vmatprep.subr.mxu0 %v6407_v49  ;;  %6975 = vmatprep.subr.mxu1 %v6559_v28  ;;  %v6387_v10 = vld [vmem:[#allocation9 + $0x8] sm:$0xff]  ;;  %v6546_v29 = vld [vmem:[#allocation9 + $0x500] sm:$0xff] }
 0x293   :  { %6911 = vmatpush1.msra.mxu0 %v6406_v35  ;;  %6976 = vmatpush1.msra.mxu1 %v6558_v6  ;;  %v6547_v57 = vld [vmem:[#allocation9 + $0x508] sm:$0xff]  ;;  %v6542_v35 = vld [vmem:[#allocation9 + $0x4e0] sm:$0xff] }
 0x294   :  { %6912 = vmatprep.subr.mxu0 %v6403_v18  ;;  %6977 = vmatprep.subr.mxu1 %v6555_v31  ;;  %v6543_v49 = vld [vmem:[#allocation9 + $0x4e8] sm:$0xff]  ;;  %v6506_v42 = vld [vmem:[#allocation9 + $0x3c0] sm:$0xff] }
 0x295   :  { %5387 = vrot.lane.b32.xlu0 %v5311_v38, %s14699_s0  ;;  %5948 = vrot.lane.b32.xlu1 %v5920_v51, %s14700_s17  ;;  %v6511_v38 = vld [vmem:[#allocation9 + $0x3e8] sm:$0xff]  ;;  %v6510_v51 = vld [vmem:[#allocation9 + $0x3e0] sm:$0xff] }
 0x296   :  { %6913 = vmatpush1.msra.mxu0 %v6402_v23  ;;  %6978 = vmatpush1.msra.mxu1 %v6554_v24  ;;  %v6507_v20 = vld [vmem:[#allocation9 + $0x3c8] sm:$0xff]  ;;  %v6534_v28 = vld [vmem:[#allocation9 + $0x4a0] sm:$0xff] }
 0x297   :  { %6914 = vmatprep.subr.mxu0 %v6399_v39  ;;  %6979 = vmatprep.subr.mxu1 %v6551_v21  ;;  %v6539_v18 = vld [vmem:[#allocation9 + $0x4c8] sm:$0xff]  ;;  %v6502_v39 = vld [vmem:[#allocation9 + $0x3a0] sm:$0xff] }
 0x298   :  { %6915 = vmatpush1.msra.mxu0 %v6398_v2  ;;  %6980 = vmatpush1.msra.mxu1 %v6550_v50  ;;  %v6503_v23 = vld [vmem:[#allocation9 + $0x3a8] sm:$0xff]  ;;  %v6530_v31 = vld [vmem:[#allocation9 + $0x480] sm:$0xff]  ;;  %v18482_v50 = vlaneseq }
 0x299   :  { %5389 = vrot.lane.b32.xlu1 %v5378_v54, %s14699_s0  ;;  %6916 = vmatprep.subr.mxu0 %v6395_v14  ;;  %v6538_v54 = vld [vmem:[#allocation9 + $0x4c0] sm:$0xff]  ;;  %v6535_v8 = vld [vmem:[#allocation9 + $0x4a8] sm:$0xff] }
 0x29a   :  { %6917 = vmatpush1.msra.mxu0 %v6394_v0  ;;  %6981 = vmatprep.subr.mxu1 %v6547_v57  ;;  %v6499_v2 = vld [vmem:[#allocation9 + $0x388] sm:$0xff]  ;;  %v6498_v14 = vld [vmem:[#allocation9 + $0x380] sm:$0xff]  ;;  %vm6173_vm3 = vcmp.lt.s32.totalorder %v18482_v50, 448 }
 0x29b   :  { %6918 = vmatprep.subr.mxu0 %v6391_v22  ;;  %6982 = vmatpush1.msra.mxu1 %v6546_v29  ;;  %v6531_v6 = vld [vmem:[#allocation9 + $0x488] sm:$0xff]  ;;  %v6494_v22 = vld [vmem:[#allocation9 + $0x360] sm:$0xff] }
 0x29c   :  { %6919 = vmatpush1.msra.mxu0 %v6390_v48  ;;  %6983 = vmatprep.subr.mxu1 %v6543_v49  ;;  %v6495_v0 = vld [vmem:[#allocation9 + $0x368] sm:$0xff]  ;;  %v6526_v21 = vld [vmem:[#allocation9 + $0x460] sm:$0xff] }
 0x29d   :  { %6920 = vmatprep.subr.mxu0 %v6387_v10  ;;  %6984 = vmatpush1.msra.mxu1 %v6542_v35  ;;  %v6527_v24 = vld [vmem:[#allocation9 + $0x468] sm:$0xff]  ;;  %v6490_v57 = vld [vmem:[#allocation9 + $0x340] sm:$0xff] }
 0x29e   :  { %6921 = vmatpush1.msra.mxu0 %v6386_v16  ;;  %6985 = vmatprep.subr.mxu1 %v6539_v18  ;;  %v6491_v48 = vld [vmem:[#allocation9 + $0x348] sm:$0xff]  ;;  %v18483_v16 = vmov 0.0   ;;  %v6522_v29 = vld [vmem:[#allocation9 + $0x440] sm:$0xff] }
 0x29f   :  { %6922 = vmatprep.subr.mxu0 %v6511_v38  ;;  %6986 = vmatpush1.msra.mxu1 %v6538_v54  ;;  %v6523_v10 = vld [vmem:[#allocation9 + $0x448] sm:$0xff]  ;;  %6348 = vst.msk [vmem:[#allocation3] ss:$8 sm:$0xf] %vm6173_vm3, %v18483_v16  ;;  %v6518_v35 = vld [vmem:[#allocation9 + $0x420] sm:$0xff] }
 0x2a0   :  { %6923 = vmatpush2.msra.mxu0 %v6510_v51  ;;  %6987 = vmatprep.subr.mxu1 %v6535_v8  ;;  %6351 = vst.msk [vmem:[#allocation3 + $0x20] ss:$8 sm:$0xf] %vm6173_vm3, %v18483_v16  ;;  %6176 = vst.msk [vmem:[#allocation2 + $0x7] ss:$8 sm:$0xf] %vm6173_vm3, %v18483_v16 }
 0x2a1   :  { %6924 = vmatprep.subr.mxu0 %v6507_v20  ;;  %6988 = vmatpush1.msra.mxu1 %v6534_v28  ;;  %6179 = vst.msk [vmem:[#allocation2 + $0x27] ss:$8 sm:$0xf] %vm6173_vm3, %v18483_v16  ;;  %v6487_v38 = vld [vmem:[#allocation9 + $0x328] sm:$0xff]  ;;  %v6486_v51 = vld [vmem:[#allocation9 + $0x320] sm:$0xff] }
 0x2a2   :  { %6925 = vmatpush2.msra.mxu0 %v6506_v42  ;;  %6989 = vmatprep.subr.mxu1 %v6531_v6  ;;  %v6519_v49 = vld [vmem:[#allocation9 + $0x428] sm:$0xff]  ;;  %v6482_v42 = vld [vmem:[#allocation9 + $0x300] sm:$0xff] }
 0x2a3   :  { %6926 = vmatprep.subr.mxu0 %v6503_v23  ;;  %6990 = vmatpush1.msra.mxu1 %v6530_v31  ;;  %v6483_v20 = vld [vmem:[#allocation9 + $0x308] sm:$0xff]  ;;  %v6514_v54 = vld [vmem:[#allocation9 + $0x400] sm:$0xff] }
 0x2a4   :  { %6927 = vmatpush2.msra.mxu0 %v6502_v39  ;;  %6991 = vmatprep.subr.mxu1 %v6527_v24  ;;  %v6515_v18 = vld [vmem:[#allocation9 + $0x408] sm:$0xff]  ;;  %v6478_v39 = vld [vmem:[#allocation9 + $0x2e0] sm:$0xff] }
 0x2a5   :  { %6928 = vmatprep.subr.mxu0 %v6499_v2  ;;  %6992 = vmatpush1.msra.mxu1 %v6526_v21  ;;  %v6479_v23 = vld [vmem:[#allocation9 + $0x2e8] sm:$0xff]  ;;  %v6606_v28 = vld [vmem:[#allocation9 + $0x6e0] sm:$0xff] }
 0x2a6   :  { %6929 = vmatpush2.msra.mxu0 %v6498_v14  ;;  %6993 = vmatprep.subr.mxu1 %v6523_v10  ;;  %v6607_v8 = vld [vmem:[#allocation9 + $0x6e8] sm:$0xff]  ;;  %v6474_v14 = vld [vmem:[#allocation9 + $0x2c0] sm:$0xff] }
 0x2a7   :  { %6930 = vmatprep.subr.mxu0 %v6495_v0  ;;  %6994 = vmatpush1.msra.mxu1 %v6522_v29  ;;  %v6475_v2 = vld [vmem:[#allocation9 + $0x2c8] sm:$0xff]  ;;  %v6602_v31 = vld [vmem:[#allocation9 + $0x6c0] sm:$0xff] }
 0x2a8   :  { %6931 = vmatpush2.msra.mxu0 %v6494_v22  ;;  %6995 = vmatprep.subr.mxu1 %v6519_v49  ;;  %v6603_v6 = vld [vmem:[#allocation9 + $0x6c8] sm:$0xff]  ;;  %v6470_v22 = vld [vmem:[#allocation9 + $0x2a0] sm:$0xff] }
 0x2a9   :  { %6932 = vmatprep.subr.mxu0 %v6491_v48  ;;  %6996 = vmatpush1.msra.mxu1 %v6518_v35  ;;  %v6471_v0 = vld [vmem:[#allocation9 + $0x2a8] sm:$0xff]  ;;  %v6598_v21 = vld [vmem:[#allocation9 + $0x6a0] sm:$0xff] }
 0x2aa   :  { %6933 = vmatpush2.msra.mxu0 %v6490_v57  ;;  %6997 = vmatprep.subr.mxu1 %v6515_v18  ;;  %v6599_v24 = vld [vmem:[#allocation9 + $0x6a8] sm:$0xff]  ;;  %v6466_v10 = vld [vmem:[#allocation9 + $0x280] sm:$0xff] }
 0x2ab   :  { %6934 = vmatprep.subr.mxu0 %v6487_v38  ;;  %6998 = vmatpush1.msra.mxu1 %v6514_v54  ;;  %v6467_v48 = vld [vmem:[#allocation9 + $0x288] sm:$0xff]  ;;  %v6594_v57 = vld [vmem:[#allocation9 + $0x680] sm:$0xff] }
 0x2ac   :  { %6935 = vmatpush2.msra.mxu0 %v6486_v51  ;;  %7015 = vmatprep.subr.mxu1 %v6607_v8  ;;  %v6595_v50 = vld [vmem:[#allocation9 + $0x688] sm:$0xff]  ;;  %v6462_v49 = vld [vmem:[#allocation9 + $0x260] sm:$0xff] }
 0x2ad   :  { %6936 = vmatprep.subr.mxu0 %v6483_v20  ;;  %7016 = vmatpush2.msra.mxu1 %v6606_v28  ;;  %v6463_v29 = vld [vmem:[#allocation9 + $0x268] sm:$0xff]  ;;  %v6590_v51 = vld [vmem:[#allocation9 + $0x660] sm:$0xff] }
 0x2ae   :  { %6937 = vmatpush2.msra.mxu0 %v6482_v42  ;;  %7017 = vmatprep.subr.mxu1 %v6603_v6  ;;  %v6591_v38 = vld [vmem:[#allocation9 + $0x668] sm:$0xff]  ;;  %v6458_v18 = vld [vmem:[#allocation9 + $0x240] sm:$0xff] }
 0x2af   :  { %6938 = vmatprep.subr.mxu0 %v6479_v23  ;;  %7018 = vmatpush2.msra.mxu1 %v6602_v31  ;;  %v6459_v35 = vld [vmem:[#allocation9 + $0x248] sm:$0xff]  ;;  %v6586_v42 = vld [vmem:[#allocation9 + $0x640] sm:$0xff]  ;;  %v6577_v31 = vld [vmem:[#allocation9 + $0x5f8] sm:$0xff] }
 0x2b0   :  { %6939 = vmatpush2.msra.mxu0 %v6478_v39  ;;  %7019 = vmatprep.subr.mxu1 %v6599_v24  ;;  %v6587_v20 = vld [vmem:[#allocation9 + $0x648] sm:$0xff]  ;;  %v6454_v8 = vld [vmem:[#allocation9 + $0x220] sm:$0xff] }
 0x2b1   :  { %6940 = vmatprep.subr.mxu0 %v6475_v2  ;;  %7020 = vmatpush2.msra.mxu1 %v6598_v21  ;;  %v6455_v54 = vld [vmem:[#allocation9 + $0x228] sm:$0xff]  ;;  %v6582_v39 = vld [vmem:[#allocation9 + $0x620] sm:$0xff] }
 0x2b2   :  { %6941 = vmatpush2.msra.mxu0 %v6474_v14  ;;  %7021 = vmatprep.subr.mxu1 %v6595_v50  ;;  %v6583_v23 = vld [vmem:[#allocation9 + $0x628] sm:$0xff]  ;;  %v6450_v6 = vld [vmem:[#allocation9 + $0x200] sm:$0xff] }
 0x2b3   :  { %6942 = vmatprep.subr.mxu0 %v6471_v0  ;;  %7022 = vmatpush2.msra.mxu1 %v6594_v57  ;;  %v6451_v28 = vld [vmem:[#allocation9 + $0x208] sm:$0xff]  ;;  %v6578_v14 = vld [vmem:[#allocation9 + $0x600] sm:$0xff]  ;;  %v6449_v0 = vld [vmem:[#allocation9 + $0x1f8] sm:$0xff] }
 0x2b4   :  { %6943 = vmatpush2.msra.mxu0 %v6470_v22  ;;  %7023 = vmatprep.subr.mxu1 %v6591_v38  ;;  %v6579_v2 = vld [vmem:[#allocation9 + $0x608] sm:$0xff] }
 0x2b5   :  { %6944 = vmatprep.subr.mxu0 %v6467_v48  ;;  %7024 = vmatpush2.msra.mxu1 %v6590_v51 }
 0x2b6   :  { %6945 = vmatpush2.msra.mxu0 %v6466_v10  ;;  %7025 = vmatprep.subr.mxu1 %v6587_v20 }
 0x2b7   :  { %6946 = vmatprep.subr.mxu0 %v6463_v29  ;;  %7026 = vmatpush2.msra.mxu1 %v6586_v42 }
 0x2b8   :  { %6947 = vmatpush2.msra.mxu0 %v6462_v49  ;;  %7027 = vmatprep.subr.mxu1 %v6583_v23 }
 0x2b9   :  { %6948 = vmatprep.subr.mxu0 %v6459_v35  ;;  %7028 = vmatpush2.msra.mxu1 %v6582_v39 }
 0x2ba   :  { %6949 = vmatpush2.msra.mxu0 %v6458_v18  ;;  %7029 = vmatprep.subr.mxu1 %v6579_v2 }
 0x2bb   :  { %6950 = vmatprep.subr.mxu0 %v6455_v54  ;;  %7030 = vmatpush2.msra.mxu1 %v6578_v14 }
 0x2bc   :  { %6951 = vmatpush2.msra.mxu0 %v6454_v8  ;;  %7044 = vmatprep.subr.mxu1 %v6449_v0 }
 0x2bd   :  { %6952 = vmatprep.subr.mxu0 %v6451_v28 }
 0x2be   :  { %6953 = vmatpush2.msra.mxu0 %v6450_v6 }
 0x2bf   :  { %7121 = vmatprep.subr.mxu0 %v6577_v31 }
 0x2ea   :  { %v5923_v24 = vpop.permute.xlu1 %5922  ;;  %v5931_v22 = vpop.permute.xlu0 %5930 }
 0x2eb   :  { %v5950_v21 = vrot.slane %v5923_v24, 1  ;;  %v5954_v54 = vrot.slane %v5931_v22, 1 }
 0x2ed   :  { %v5964_v29 = vsel %vm5571_vm4, %v5923_v24, %v5950_v21 }
 0x2ee   :  { %v5925_v48 = vpop.permute.xlu1 %5924  ;;  %v5927_v50 = vpop.permute.xlu0 %5926  ;;  %v5992_v42 = vmax.f32 %v16377_v60, %v5964_v29 }
 0x2ef   :  { %v5951_v10 = vrot.slane %v5925_v48, 1  ;;  %v5952_v57 = vrot.slane %v5927_v50, 1 }
 0x2f1   :  { %v5965_v38 = vsel %vm5571_vm4, %v5925_v48, %v5951_v10  ;;  %v5966_v49 = vsel %vm5571_vm4, %v5927_v50, %v5952_v57 }
 0x2f2   :  { %v5993_v51 = vmax.f32 %v16381_v27, %v5965_v38  ;;  %v5994_v35 = vmax.f32 %v16385_v1, %v5966_v49  ;;  %v5933_v20 = vpop.permute.xlu1 %5932  ;;  %v5935_v18 = vpop.permute.xlu0 %5934  ;;  %v6195_v27 = vcombine.low %v5992_v42, %v5992_v42  ;;  %v5968_v1 = vsel %vm5571_vm4, %v5931_v22, %v5954_v54 }
 0x2f3   :  { %v5955_v23 = vrot.slane %v5933_v20, 1  ;;  %v5956_v8 = vrot.slane %v5935_v18, 1  ;;  %v5996_v48 = vmax.f32 %v16367_v55, %v5968_v1 }
 0x2f4   :  { %v6196_v39 = vcombine.low %v5993_v51, %v5994_v35 }
 0x2f5   :  { %v5969_v28 = vsel %vm5571_vm4, %v5933_v20, %v5955_v23  ;;  %v5970_v2 = vsel %vm5571_vm4, %v5935_v18, %v5956_v8 }
 0x2f6   :  { %v5997_v6 = vmax.f32 %v16371_v13, %v5969_v28  ;;  %v5998_v14 = vmax.f32 %v16393_v17, %v5970_v2  ;;  %v5929_v31 = vpop.permute.xlu1 %5928  ;;  %v6212_v24 = vrot.slane %v6196_v39, %v14790_v9  ;;  %v6205_v13 = vrot.slane %v6195_v27, %v14790_v9 }
 0x2f7   :  { %v5953_v0 = vrot.slane %v5929_v31, 1  ;;  %v13395_v2 = vcombine.low %v16609_v25, %v16542_v32 }
 0x2f8   :  { %v6198_v50 = vcombine.low %v5997_v6, %v5998_v14  ;;  %v6227_v38 = vcombine.low %v6205_v13, %v6212_v24  ;;  %v6228_v49 = vcombine.high %v6205_v13, %v6212_v24 }
 0x2f9   :  { %v5967_v60 = vsel %vm5571_vm4, %v5929_v31, %v5953_v0 }
 0x2fa   :  { %v5995_v10 = vmax.f32 %v16389_v41, %v5967_v60  ;;  %v6226_v22 = vrot.slane %v6198_v50, %v14790_v9  ;;  %v6237_v8 = vrot.slane %v6227_v38, %v14790_v9  ;;  %v6244_v39 = vrot.slane %v6228_v49, %v14790_v9 }
 0x2fb   :  { %v5939_v21 = vpop.permute.xlu0 %5938  ;;  %v5937_v57 = vpop.permute.xlu1 %5936  ;;  %v5379_v49 = vcombine.high %v16546_v45, %v16615_v26 }
 0x2fc   :  { %v6197_v29 = vcombine.low %v5995_v10, %v5996_v48  ;;  %v5957_v17 = vrot.slane %v5937_v57, 1  ;;  %v5958_v20 = vrot.slane %v5939_v21, 1 }
 0x2fe   :  { %v6219_v35 = vrot.slane %v6197_v29, %v14790_v9  ;;  %v5971_v41 = vsel %vm5571_vm4, %v5937_v57, %v5957_v17  ;;  %v5972_v31 = vsel %vm5571_vm4, %v5939_v21, %v5958_v20  ;;  %v5312_v21 = vcombine.high %v16524_v59, %v16609_v25 }
 0x2ff   :  { %v5943_v51 = vpop.permute.xlu0 %5942  ;;  %v5945_v18 = vpop.permute.xlu1 %5944  ;;  %v5999_v0 = vmax.f32 %v16413_v53, %v5971_v41  ;;  %v6000_v53 = vmax.f32 %v16450_v33, %v5972_v31  ;;  %v18484_v33 = vcombine.low %v16524_v59, %v16539_v7  ;;  %v13398_v59 = vcombine.low %v16615_v26, %v16556_v5 }
 0x300   :  { %v5960_v42 = vrot.slane %v5943_v51, 1  ;;  %v5961_v54 = vrot.slane %v5945_v18, 1  ;;  %v6229_v55 = vcombine.low %v6219_v35, %v6226_v22  ;;  %v6230_v23 = vcombine.high %v6219_v35, %v6226_v22 }
 0x301   :  { %v18485_v7 = vcombine.high %v16553_v61, %v16556_v5 }
 0x302   :  { %v6251_v6 = vrot.slane %v6229_v55, %v14790_v9  ;;  %v6258_v14 = vrot.slane %v6230_v23, %v14790_v9  ;;  %v5975_v27 = vsel %vm5571_vm4, %v5945_v18, %v5961_v54  ;;  %v5974_v24 = vsel %vm5571_vm4, %v5943_v51, %v5960_v42 }
 0x303   :  { %v5947_v28 = vpop.permute.xlu0 %5946  ;;  %v5941_v1 = vpop.permute.xlu1 %5940  ;;  %v6003_v29 = vmax.f32 %v16472_v30, %v5975_v27  ;;  %v6002_v51 = vmax.f32 %v16468_v12, %v5974_v24  ;;  %v6263_v55 = vcombine.low %v5999_v0, %v5999_v0  ;;  %v5405_v12 = vrot.slane %v18484_v33, %v14790_v9 }
 0x304   :  { %v5962_v60 = vrot.slane %v5947_v28, 1  ;;  %v5959_v48 = vrot.slane %v5941_v1, 1  ;;  %v6259_v50 = vcombine.low %v6237_v8, %v6251_v6  ;;  %v6260_v10 = vcombine.high %v6237_v8, %v6251_v6 }
 0x305   :  { %v6261_v57 = vcombine.low %v6244_v39, %v6258_v14  ;;  %v6262_v13 = vcombine.high %v6244_v39, %v6258_v14  ;;  %v6265_v41 = vcombine.low %v6002_v51, %v6003_v29 }
 0x306   :  { %v5973_v17 = vsel %vm5571_vm4, %v5941_v1, %v5959_v48  ;;  %6339 = vst [vmem:[#allocation3] sm:$0xfe] %v6259_v50  ;;  %6341 = vst [vmem:[#allocation3 + $0x10] sm:$0xfe] %v6260_v10  ;;  %v5976_v20 = vsel %vm5571_vm4, %v5947_v28, %v5962_v60  ;;  %v6273_v1 = vrot.slane %v6263_v55, %v14790_v9 }
 0x307   :  { %v5388_v38 = vpop.permute.xlu0 %5387  ;;  %6340 = vst [vmem:[#allocation3 + $0x8] sm:$0xfe] %v6261_v57  ;;  %6343 = vst.msk [vmem:[#allocation3 + $0x18] sm:$0xfe] %vm6342_vm5, %v6262_v13  ;;  %v6001_v30 = vmax.f32 %v16456_v56, %v5973_v17  ;;  %v5949_v35 = vpop.permute.xlu1 %5948  ;;  %v5412_v56 = vrot.slane %v13395_v2, %v14790_v9  ;;  %v6004_v39 = vmax.f32 %v16476_v47, %v5976_v20 }
 0x308   :  { %v5391_v22 = vsel %vm5386_vm2, %v5388_v38, %v5314_v4  ;;  %v5963_v54 = vrot.slane %v5949_v35, 1  ;;  %v6287_v60 = vrot.slane %v6265_v41, %v14790_v9 }
 0x309   :  { %v5397_v18 = vcombine.low %v5312_v21, %v5391_v22  ;;  %v13396_v42 = vcombine.high %v16609_v25, %v5391_v22  ;;  %v6264_v23 = vcombine.low %v6000_v53, %v6001_v30 }
 0x30a   :  { %v5977_v8 = vsel %vm5571_vm4, %v5949_v35, %v5963_v54 }
 0x30b   :  { %v5419_v32 = vrot.slane %v5397_v18, %v14790_v9  ;;  %v5426_v4 = vrot.slane %v13396_v42, %v14790_v9  ;;  %v6280_v25 = vrot.slane %v6264_v23, %v14790_v9  ;;  %v6005_v28 = vmax.f32 %v16460_v3, %v5977_v8  ;;  %v5390_v6 = vpop.permute.xlu1 %5389 }
 0x30c   :  { %v5392_v2 = vsel %vm5386_vm2, %v5390_v6, %v18485_v7  ;;  %v18486_v3 = vcombine.low %v16546_v45, %v16553_v61  ;;  %v16706_v61 = vrot.slane %v13398_v59, %v14790_v9 }
 0x30d   :  { %v5427_v14 = vcombine.low %v5405_v12, %v5419_v32  ;;  %v5428_v31 = vcombine.high %v5405_v12, %v5419_v32  ;;  %v5429_v27 = vcombine.low %v5412_v56, %v5426_v4  ;;  %v6266_v0 = vcombine.low %v6004_v39, %v6005_v28 }
 0x30e   :  { %v5464_v47 = vcombine.low %v5379_v49, %v5392_v2  ;;  %v5472_v24 = vrot.slane %v18486_v3, %v14790_v9  ;;  %v13399_v48 = vcombine.high %v16615_v26, %v5392_v2  ;;  %v6295_v10 = vcombine.low %v6273_v1, %v6280_v25  ;;  %v13775_v26 = vld [vmem:[#allocation3] ss:$8 sps:$4 sm:$0xff]   ;;  %v13778_v20 = vld [vmem:[#allocation3 + $0x10] ss:$8 sps:$4 sm:$0xff]  }
 0x30f   :  { %v5437_v5 = vrot.slane %v5427_v14, %v14790_v9  ;;  %v5451_v50 = vrot.slane %v5428_v31, %v14790_v9  ;;  %v6296_v57 = vcombine.high %v6273_v1, %v6280_v25  ;;  %v6294_v13 = vrot.slane %v6266_v0, %v14790_v9  ;;  %v13777_v23 = vld [vmem:[#allocation3 + $0x4] ss:$8 sps:$4 sm:$0x77]   ;;  %v13780_v33 = vld [vmem:[#allocation3 + $0x14] ss:$8 sps:$4 sm:$0x77]  }
 0x310   :  { %v5486_v29 = vrot.slane %v5464_v47, %v14790_v9  ;;  %v16701_v17 = vrot.slane %v13399_v48, %v14790_v9  ;;  %v5430_v53 = vcombine.high %v5412_v56, %v5426_v4  ;;  %v6305_v18 = vrot.slane %v6295_v10, %v14790_v9 }
 0x311   :  { %5529 = vrot.lane.b32.xlu0 %v5437_v5, %s14700_s17  ;;  %5531 = vrot.lane.b32.xlu1 %v5451_v50, %s14700_s17  ;;  %v5459_v45 = vcombine.high %v5437_v5, %v5437_v5  ;;  %v6297_v21 = vcombine.low %v6287_v60, %v6294_v13  ;;  %v6298_v38 = vcombine.high %v6287_v60, %v6294_v13 }
 0x312   :  { %v5461_v49 = vcombine.high %v5451_v50, %v5451_v50  ;;  %v5494_v51 = vcombine.low %v5472_v24, %v5486_v29  ;;  %v5495_v30 = vcombine.high %v5472_v24, %v5486_v29  ;;  %v5496_v22 = vcombine.low %v16706_v61, %v16701_v17 }
 0x313   :  { %v5497_v35 = vcombine.high %v16706_v61, %v16701_v17  ;;  %v6312_v42 = vrot.slane %v6296_v57, %v14790_v9  ;;  %v6319_v54 = vrot.slane %v6297_v21, %v14790_v9  ;;  %v6326_v55 = vrot.slane %v6298_v38, %v14790_v9 }
 0x314   :  { %v6628_v12 = vrot.slane %v13775_v26, %v14790_v9  ;;  %v5444_v8 = vrot.slane %v5429_v27, %v14790_v9  ;;  %v5458_v39 = vrot.slane %v5430_v53, %v14790_v9  ;;  %v6635_v25 = vrot.slane %v13777_v23, %v14790_v9 }
 0x315   :  { %5533 = vrot.lane.b32.xlu0 %v5459_v45, %s14700_s17  ;;  %5535 = vrot.lane.b32.xlu1 %v5461_v49, %s14700_s17  ;;  %v6327_v56 = vcombine.low %v6305_v18, %v6319_v54  ;;  %v6328_v41 = vcombine.high %v6305_v18, %v6319_v54  ;;  %v6329_v32 = vcombine.low %v6312_v42, %v6326_v55 }
 0x316   :  { %v6330_v4 = vcombine.high %v6312_v42, %v6326_v55  ;;  %v6642_v28 = vrot.slane %v13778_v20, %v14790_v9  ;;  %v6649_v6 = vrot.slane %v13780_v33, %v14790_v9  ;;  %v5460_v31 = vcombine.high %v5444_v8, %v5444_v8 }
 0x317   :  { %6344 = vst [vmem:[#allocation3 + $0x20] sm:$0xfe] %v6327_v56  ;;  %6345 = vst [vmem:[#allocation3 + $0x28] sm:$0xfe] %v6329_v32  ;;  %v5504_v27 = vrot.slane %v5494_v51, %v14790_v9  ;;  %v5518_v47 = vrot.slane %v5495_v30, %v14790_v9  ;;  %v5511_v21 = vrot.slane %v5496_v22, %v14790_v9 }
 0x318   :  { %6346 = vst [vmem:[#allocation3 + $0x30] sm:$0xfe] %v6328_v41  ;;  %6347 = vst.msk [vmem:[#allocation3 + $0x38] sm:$0xfe] %vm6342_vm5, %v6330_v4  ;;  %v6650_v59 = vcombine.low %v6628_v12, %v6642_v28  ;;  %v6651_v7 = vcombine.high %v6628_v12, %v6642_v28  ;;  %v6652_v2 = vcombine.low %v6635_v25, %v6649_v6 }
 0x319   :  { %5537 = vrot.lane.b32.xlu0 %v5444_v8, %s14700_s17  ;;  %5539 = vrot.lane.b32.xlu1 %v5458_v39, %s14700_s17  ;;  %v6653_v14 = vcombine.high %v6635_v25, %v6649_v6  ;;  %v5526_v60 = vcombine.high %v5504_v27, %v5504_v27  ;;  %v5528_v49 = vcombine.high %v5518_v47, %v5518_v47 }
 0x31a   :  { %v6660_v1 = vrot.slane %v6650_v59, %v14790_v9  ;;  %v6674_v0 = vrot.slane %v6651_v7, %v14790_v9  ;;  %v6667_v3 = vrot.slane %v6652_v2, %v14790_v9  ;;  %v5525_v12 = vrot.slane %v5497_v35, %v14790_v9 }
 0x31b   :  { %v6681_v24 = vrot.slane %v6653_v14, %v14790_v9  ;;  %v5527_v8 = vcombine.high %v5511_v21, %v5511_v21 }
 0x31c   :  { %v6752_v10 = vcombine.low %v6660_v1, %v6674_v0  ;;  %v13406_v57 = vcombine.high %v6660_v1, %v6674_v0  ;;  %v6683_v56 = vcombine.high %v6667_v3, %v6667_v3 }
 0x31d   :  { %5541 = vrot.lane.b32.xlu0 %v5460_v31, %s14700_s17  ;;  %5543 = vrot.lane.b32.xlu1 %v5504_v27, %s14700_s17  ;;  %v6754_v30 = vcombine.low %v6667_v3, %v6681_v24 }
 0x31e   :  { %v6373_v48 = vld [vmem:[#allocation3 + $0x20] sm:$0x7f]  ;;  %v6374_v5 = vld [vmem:[#allocation3 + $0x28] sm:$0x7f]  ;;  %v6762_v20 = vrot.slane %v6752_v10, %v14790_v9  ;;  %v6769_v18 = vrot.slane %v13406_v57, %v14790_v9 }
 0x31f   :  { %v6375_v50 = vld [vmem:[#allocation3 + $0x30] sm:$0x7f]  ;;  %v6376_v13 = vld [vmem:[#allocation3 + $0x38] sm:$0x7f]  ;;  %v13781_v29 = vld [vmem:[#allocation3 + $0x20] ss:$8 sps:$4 sm:$0xff]   ;;  %v6686_v26 = vcombine.high %v6373_v48, %v6374_v5  ;;  %v6776_v39 = vrot.slane %v6754_v30, %v14790_v9 }
 0x320   :  { %v13783_v45 = vld [vmem:[#allocation3 + $0x30] ss:$8 sps:$4 sm:$0xff]   ;;  %v6688_v38 = vcombine.high %v6375_v50, %v6376_v13  ;;  %v6695_v53 = vrot.slane %v13781_v29, %v14790_v9  ;;  %v13803_v4 = vld [vmem:[#allocation3 + $0x20] ss:$8 sps:$4 sm:$0xee]   ;;  %v6785_v25 = vcombine.high %v6762_v20, %v6769_v18  ;;  %v6784_v27 = vcombine.low %v6762_v20, %v6769_v18 }
 0x321   :  { %5545 = vrot.lane.b32.xlu0 %v5518_v47, %s14700_s17  ;;  %5547 = vrot.lane.b32.xlu1 %v5526_v60, %s14700_s17  ;;  %v6709_v51 = vrot.slane %v13783_v45, %v14790_v9  ;;  %v6702_v42 = vrot.slane %v6686_v26, %v14790_v9  ;;  %v13805_v6 = vld [vmem:[#allocation3 + $0x30] ss:$8 sps:$4 sm:$0xee]   ;;  %v8647_v61 = vrot.slane %v13803_v4, %v14790_v9 }
 0x322   :  { %v6716_v54 = vrot.slane %v6688_v38, %v14790_v9  ;;  %v8661_v35 = vrot.slane %v13805_v6, %v14790_v9  ;;  %v6801_v5 = vrot.slane %v6785_v25, %v14790_v9  ;;  %v6794_v13 = vrot.slane %v6784_v27, %v14790_v9  ;;  %v6448_v20 = vld [vmem:[#allocation9 + $0x1f0] sm:$0xff]  ;;  %v6569_v25 = vld [vmem:[#allocation9 + $0x5b8] sm:$0xff] }
 0x323   :  { %v6717_v55 = vcombine.low %v6695_v53, %v6709_v51  ;;  %v6718_v23 = vcombine.high %v6695_v53, %v6709_v51  ;;  %v6576_v18 = vld [vmem:[#allocation9 + $0x5f0] sm:$0xff]  ;;  %v6561_v27 = vld [vmem:[#allocation9 + $0x578] sm:$0xff] }
 0x324   :  { %v6719_v22 = vcombine.low %v6702_v42, %v6716_v54  ;;  %v6720_v33 = vcombine.high %v6702_v42, %v6716_v54  ;;  %v8670_v10 = vcombine.high %v8647_v61, %v8661_v35  ;;  %v8669_v38 = vcombine.low %v8647_v61, %v8661_v35  ;;  %v6444_v4 = vld [vmem:[#allocation9 + $0x1d0] sm:$0xff] }
 0x325   :  { %5549 = vrot.lane.b32.xlu0 %v5528_v49, %s14700_s17  ;;  %5551 = vrot.lane.b32.xlu1 %v5511_v21, %s14700_s17  ;;  %v6727_v41 = vrot.slane %v6717_v55, %v14790_v9  ;;  %v6741_v32 = vrot.slane %v6718_v23, %v14790_v9  ;;  %v6436_v61 = vld [vmem:[#allocation9 + $0x190] sm:$0xff] }
 0x326   :  { %v6734_v28 = vrot.slane %v6719_v22, %v14790_v9  ;;  %v6748_v7 = vrot.slane %v6720_v33, %v14790_v9  ;;  %v16774_v55 = vrot.slane %v8670_v10, %v14790_v9  ;;  %v16779_v22 = vrot.slane %v8669_v38, %v14790_v9  ;;  %v6564_v35 = vld [vmem:[#allocation9 + $0x590] sm:$0xff] }
 0x327   :  { %v6755_v59 = vcombine.low %v6683_v56, %v6727_v41  ;;  %v6749_v2 = vcombine.high %v6727_v41, %v6727_v41  ;;  %v6751_v14 = vcombine.high %v6741_v32, %v6741_v32  ;;  %v6445_v56 = vld [vmem:[#allocation9 + $0x1d8] sm:$0xff]  ;;  %v6552_v10 = vld [vmem:[#allocation9 + $0x530] sm:$0xff] }
 0x328   :  { %v6750_v17 = vcombine.high %v6734_v28, %v6734_v28  ;;  %v6573_v41 = vld [vmem:[#allocation9 + $0x5d8] sm:$0xff]  ;;  %v6416_v38 = vld [vmem:[#allocation9 + $0xf0] sm:$0xff] }
 0x329   :  { %5553 = vrot.lane.b32.xlu0 %v5525_v12, %s14700_s17  ;;  %5555 = vrot.lane.b32.xlu1 %v5527_v8, %s14700_s17  ;;  %v6783_v31 = vrot.slane %v6755_v59, %v14790_v9  ;;  %v6820_v1 = vcombine.low %v6741_v32, %v6749_v2  ;;  %v6821_v0 = vcombine.low %v6751_v14, %v6734_v28  ;;  %v6572_v8 = vld [vmem:[#allocation9 + $0x5d0] sm:$0xff]  ;;  %v6437_v14 = vld [vmem:[#allocation9 + $0x198] sm:$0xff] }
 0x32a   :  { %v6822_v47 = vcombine.low %v6748_v7, %v6750_v17  ;;  %v13416_v28 = vcombine.high %v16779_v22, %v16774_v55  ;;  %v6440_v7 = vld [vmem:[#allocation9 + $0x1b0] sm:$0xff]  ;;  %v6565_v17 = vld [vmem:[#allocation9 + $0x598] sm:$0xff]  ;;  %v8417_v22 = vld [vmem:[#allocation9 + $0x1080] sm:$0xff] }
 0x32b   :  { %v6786_v3 = vcombine.low %v6776_v39, %v6783_v31  ;;  %v6787_v24 = vcombine.high %v6776_v39, %v6783_v31  ;;  %v6829_v60 = vrot.slane %v6820_v1, %v14790_v9  ;;  %v6836_v48 = vrot.slane %v6821_v0, %v14790_v9  ;;  %v6441_v39 = vld [vmem:[#allocation9 + $0x1b8] sm:$0xff]  ;;  %v6568_v2 = vld [vmem:[#allocation9 + $0x5b0] sm:$0xff] }
 0x32c   :  { %v6843_v50 = vrot.slane %v6822_v47, %v14790_v9  ;;  %v6433_v31 = vld [vmem:[#allocation9 + $0x178] sm:$0xff]  ;;  %v6432_v1 = vld [vmem:[#allocation9 + $0x170] sm:$0xff] }
 0x32d   :  { %v6815_v57 = vrot.slane %v6787_v24, %v14790_v9  ;;  %v6808_v29 = vrot.slane %v6786_v3, %v14790_v9  ;;  %v6845_v45 = vcombine.high %v6829_v60, %v6836_v48  ;;  %v6844_v21 = vcombine.low %v6829_v60, %v6836_v48  ;;  %v6560_v0 = vld [vmem:[#allocation9 + $0x570] sm:$0xff]  ;;  %v6429_v47 = vld [vmem:[#allocation9 + $0x158] sm:$0xff] }
 0x32e   :  { %v6846_v26 = vcombine.high %v6843_v50, %v6843_v50  ;;  %v6867_v23 = vrot.slane %v6843_v50, %v14790_v9  ;;  %v6557_v3 = vld [vmem:[#allocation9 + $0x558] sm:$0xff]  ;;  %v6428_v24 = vld [vmem:[#allocation9 + $0x150] sm:$0xff] }
 0x32f   :  { %v6818_v49 = vcombine.low %v6801_v5, %v6815_v57  ;;  %v6819_v53 = vcombine.high %v6801_v5, %v6815_v57  ;;  %v16767_v51 = vcombine.low %v6794_v13, %v6808_v29  ;;  %v16769_v30 = vcombine.high %v6794_v13, %v6808_v29  ;;  %v6556_v60 = vld [vmem:[#allocation9 + $0x550] sm:$0xff]  ;;  %v6425_v48 = vld [vmem:[#allocation9 + $0x138] sm:$0xff] }
 0x330   :  { %v6860_v42 = vrot.slane %v6845_v45, %v14790_v9  ;;  %v6874_v54 = vrot.slane %v6846_v26, %v14790_v9  ;;  %v6853_v32 = vrot.slane %v6844_v21, %v14790_v9  ;;  %v6553_v5 = vld [vmem:[#allocation9 + $0x538] sm:$0xff]  ;;  %v6424_v50 = vld [vmem:[#allocation9 + $0x130] sm:$0xff] }
 0x331   :  { %6954 = vmatprep.mubr.f32.mxu0 %v6818_v49  ;;  %13407 = vmatprep.mubr.msk.f32.mxu1 %vm6885_vm6, %v6819_v53  ;;  %v6421_v57 = vld [vmem:[#allocation9 + $0x118] sm:$0xff]  ;;  %v6420_v29 = vld [vmem:[#allocation9 + $0x110] sm:$0xff] }
 0x332   :  { %6955 = vmatmul.mubr.f32.vlgmr.msra.gmra.mxu0 %v16767_v51  ;;  %7032 = vmatmul.mubr.f32.vlgmr.msra.gmra.mxu1 %v16769_v30  ;;  %v16783_v33 = vcombine.low %v6860_v42, %v6874_v54  ;;  %v16785_v12 = vcombine.high %v6860_v42, %v6874_v54  ;;  %v16793_v6 = vcombine.low %v6853_v32, %v6867_v23  ;;  %v6549_v13 = vld [vmem:[#allocation9 + $0x518] sm:$0xff]  ;;  %v6548_v45 = vld [vmem:[#allocation9 + $0x510] sm:$0xff] }
 0x333   :  { %7045 = vmatpush1.msra.mxu1 %v6448_v20  ;;  %7122 = vmatpush1.msra.mxu0 %v6576_v18  ;;  %v16795_v59 = vcombine.high %v6853_v32, %v6867_v23  ;;  %v6417_v26 = vld [vmem:[#allocation9 + $0xf8] sm:$0xff]  ;;  %v6412_v18 = vld [vmem:[#allocation9 + $0xd0] sm:$0xff] }
 0x334   :  { %6960 = vmatprep.mubr.f32.mxu0 %v16783_v33  ;;  %13408 = vmatprep.mubr.msk.f32.mxu1 %vm6885_vm6, %v16785_v12  ;;  %v6545_v21 = vld [vmem:[#allocation9 + $0x4f8] sm:$0xff]  ;;  %v6540_v42 = vld [vmem:[#allocation9 + $0x4d0] sm:$0xff] }
 0x335   :  { %7046 = vmatprep.subr.mxu1 %v6445_v56  ;;  %7123 = vmatprep.subr.mxu0 %v6573_v41  ;;  %v6541_v20 = vld [vmem:[#allocation9 + $0x4d8] sm:$0xff]  ;;  %v6408_v56 = vld [vmem:[#allocation9 + $0xb0] sm:$0xff] }
 0x336   :  { %7047 = vmatpush1.msra.mxu1 %v6444_v4  ;;  %7124 = vmatpush1.msra.mxu0 %v6572_v8  ;;  %v6409_v54 = vld [vmem:[#allocation9 + $0xb8] sm:$0xff]  ;;  %v6536_v41 = vld [vmem:[#allocation9 + $0x4b0] sm:$0xff] }
 0x337   :  { %7048 = vmatprep.subr.mxu1 %v6441_v39  ;;  %7125 = vmatprep.subr.mxu0 %v6569_v25  ;;  %v6537_v23 = vld [vmem:[#allocation9 + $0x4b8] sm:$0xff]  ;;  %v6404_v8 = vld [vmem:[#allocation9 + $0x90] sm:$0xff] }
 0x338   :  { %6961 = vmatmul.mubr.f32.gmra.mxu0 %v16793_v6  ;;  %7038 = vmatmul.mubr.f32.gmra.mxu1 %v16795_v59  ;;  %v6405_v32 = vld [vmem:[#allocation9 + $0x98] sm:$0xff]  ;;  %v6532_v39 = vld [vmem:[#allocation9 + $0x490] sm:$0xff] }
 0x339   :  { %7049 = vmatpush1.msra.mxu1 %v6440_v7  ;;  %7126 = vmatpush1.msra.mxu0 %v6568_v2  ;;  %v6533_v4 = vld [vmem:[#allocation9 + $0x498] sm:$0xff]  ;;  %v6400_v2 = vld [vmem:[#allocation9 + $0x70] sm:$0xff] }
 0x33a   :  { %7050 = vmatprep.subr.mxu1 %v6437_v14  ;;  %7108 = vmatprep.mubr.f32.mxu1 %v6818_v49  ;;  %v6544_v49 = vld [vmem:[#allocation9 + $0x4f0] sm:$0xff]  ;;  %v6401_v25 = vld [vmem:[#allocation9 + $0x78] sm:$0xff] }
 0x33b   :  { %7127 = vmatprep.subr.mxu0 %v6565_v17  ;;  %13409 = vmatprep.mubr.msk.f32.mxu0 %vm6885_vm6, %v6819_v53  ;;  %v6413_v53 = vld [vmem:[#allocation9 + $0xd8] sm:$0xff]  ;;  %v6528_v14 = vld [vmem:[#allocation9 + $0x470] sm:$0xff] }
 0x33c   :  { %7051 = vmatpush1.msra.mxu1 %v6436_v61  ;;  %7128 = vmatpush1.msra.mxu0 %v6564_v35  ;;  %v6529_v7 = vld [vmem:[#allocation9 + $0x478] sm:$0xff]  ;;  %v6396_v35 = vld [vmem:[#allocation9 + $0x50] sm:$0xff] }
 0x33d   :  { %7052 = vmatprep.subr.mxu1 %v6433_v31  ;;  %7129 = vmatprep.subr.mxu0 %v6561_v27  ;;  %v6397_v17 = vld [vmem:[#allocation9 + $0x58] sm:$0xff]  ;;  %v6524_v31 = vld [vmem:[#allocation9 + $0x450] sm:$0xff] }
 0x33e   :  { %7053 = vmatpush1.msra.mxu1 %v6432_v1  ;;  %7130 = vmatpush1.msra.mxu0 %v6560_v0  ;;  %v6525_v61 = vld [vmem:[#allocation9 + $0x458] sm:$0xff]  ;;  %v6392_v0 = vld [vmem:[#allocation9 + $0x30] sm:$0xff] }
 0x33f   :  { %7054 = vmatprep.subr.mxu1 %v6429_v47  ;;  %7131 = vmatprep.subr.mxu0 %v6557_v3  ;;  %v6393_v27 = vld [vmem:[#allocation9 + $0x38] sm:$0xff]  ;;  %v6520_v47 = vld [vmem:[#allocation9 + $0x430] sm:$0xff] }
 0x340   :  { %7055 = vmatpush1.msra.mxu1 %v6428_v24  ;;  %7132 = vmatpush1.msra.mxu0 %v6556_v60  ;;  %v6521_v1 = vld [vmem:[#allocation9 + $0x438] sm:$0xff]  ;;  %v6388_v60 = vld [vmem:[#allocation9 + $0x10] sm:$0xff] }
 0x341   :  { %7056 = vmatprep.subr.mxu1 %v6425_v48  ;;  %7133 = vmatprep.subr.mxu0 %v6553_v5  ;;  %v6389_v3 = vld [vmem:[#allocation9 + $0x18] sm:$0xff]  ;;  %v6516_v48 = vld [vmem:[#allocation9 + $0x410] sm:$0xff] }
 0x342   :  { %7057 = vmatpush1.msra.mxu1 %v6424_v50  ;;  %7134 = vmatpush1.msra.mxu0 %v6552_v10  ;;  %v6517_v24 = vld [vmem:[#allocation9 + $0x418] sm:$0xff]  ;;  %v6512_v10 = vld [vmem:[#allocation9 + $0x3f0] sm:$0xff] }
 0x343   :  { %7058 = vmatprep.subr.mxu1 %v6421_v57  ;;  %7135 = vmatprep.subr.mxu0 %v6549_v13  ;;  %v6513_v5 = vld [vmem:[#allocation9 + $0x3f8] sm:$0xff]  ;;  %v6608_v57 = vld [vmem:[#allocation9 + $0x6f0] sm:$0xff] }
 0x344   :  { %7059 = vmatpush1.msra.mxu1 %v6420_v29  ;;  %7136 = vmatpush1.msra.mxu0 %v6548_v45  ;;  %v6609_v50 = vld [vmem:[#allocation9 + $0x6f8] sm:$0xff]  ;;  %v6508_v45 = vld [vmem:[#allocation9 + $0x3d0] sm:$0xff] }
 0x345   :  { %7060 = vmatprep.subr.mxu1 %v6417_v26  ;;  %7137 = vmatprep.subr.mxu0 %v6545_v21  ;;  %v6509_v13 = vld [vmem:[#allocation9 + $0x3d8] sm:$0xff]  ;;  %v6604_v26 = vld [vmem:[#allocation9 + $0x6d0] sm:$0xff] }
 0x346   :  { %7061 = vmatpush1.msra.mxu1 %v6416_v38  ;;  %7138 = vmatpush1.msra.mxu0 %v6544_v49  ;;  %v6605_v29 = vld [vmem:[#allocation9 + $0x6d8] sm:$0xff]  ;;  %v6504_v49 = vld [vmem:[#allocation9 + $0x3b0] sm:$0xff] }
 0x347   :  { %7062 = vmatprep.subr.mxu1 %v6413_v53  ;;  %7139 = vmatprep.subr.mxu0 %v6541_v20  ;;  %v6505_v21 = vld [vmem:[#allocation9 + $0x3b8] sm:$0xff]  ;;  %v6600_v53 = vld [vmem:[#allocation9 + $0x6b0] sm:$0xff] }
 0x348   :  { %7063 = vmatpush1.msra.mxu1 %v6412_v18  ;;  %7140 = vmatpush1.msra.mxu0 %v6540_v42  ;;  %v6601_v38 = vld [vmem:[#allocation9 + $0x6b8] sm:$0xff]  ;;  %v6500_v42 = vld [vmem:[#allocation9 + $0x390] sm:$0xff] }
 0x349   :  { %7064 = vmatprep.subr.mxu1 %v6409_v54  ;;  %7141 = vmatprep.subr.mxu0 %v6537_v23  ;;  %v6501_v20 = vld [vmem:[#allocation9 + $0x398] sm:$0xff]  ;;  %v6596_v54 = vld [vmem:[#allocation9 + $0x690] sm:$0xff] }
 0x34a   :  { %7065 = vmatpush1.msra.mxu1 %v6408_v56  ;;  %7142 = vmatpush1.msra.mxu0 %v6536_v41  ;;  %v6597_v18 = vld [vmem:[#allocation9 + $0x698] sm:$0xff]  ;;  %v6496_v41 = vld [vmem:[#allocation9 + $0x370] sm:$0xff] }
 0x34b   :  { %7066 = vmatprep.subr.mxu1 %v6405_v32  ;;  %7143 = vmatprep.subr.mxu0 %v6533_v4  ;;  %v6497_v23 = vld [vmem:[#allocation9 + $0x378] sm:$0xff]  ;;  %v6592_v32 = vld [vmem:[#allocation9 + $0x670] sm:$0xff] }
 0x34c   :  { %7067 = vmatpush1.msra.mxu1 %v6404_v8  ;;  %7144 = vmatpush1.msra.mxu0 %v6532_v39  ;;  %v6593_v56 = vld [vmem:[#allocation9 + $0x678] sm:$0xff]  ;;  %v6492_v39 = vld [vmem:[#allocation9 + $0x350] sm:$0xff] }
 0x34d   :  { %7068 = vmatprep.subr.mxu1 %v6401_v25  ;;  %7145 = vmatprep.subr.mxu0 %v6529_v7  ;;  %v6493_v4 = vld [vmem:[#allocation9 + $0x358] sm:$0xff]  ;;  %v6588_v25 = vld [vmem:[#allocation9 + $0x650] sm:$0xff] }
 0x34e   :  { %7069 = vmatpush1.msra.mxu1 %v6400_v2  ;;  %7146 = vmatpush1.msra.mxu0 %v6528_v14  ;;  %v6589_v8 = vld [vmem:[#allocation9 + $0x658] sm:$0xff]  ;;  %v6488_v14 = vld [vmem:[#allocation9 + $0x330] sm:$0xff] }
 0x34f   :  { %7070 = vmatprep.subr.mxu1 %v6397_v17  ;;  %7147 = vmatprep.subr.mxu0 %v6525_v61  ;;  %v6489_v7 = vld [vmem:[#allocation9 + $0x338] sm:$0xff]  ;;  %v6584_v17 = vld [vmem:[#allocation9 + $0x630] sm:$0xff] }
 0x350   :  { %7071 = vmatpush1.msra.mxu1 %v6396_v35  ;;  %7148 = vmatpush1.msra.mxu0 %v6524_v31  ;;  %v6585_v2 = vld [vmem:[#allocation9 + $0x638] sm:$0xff]  ;;  %v6484_v31 = vld [vmem:[#allocation9 + $0x310] sm:$0xff] }
 0x351   :  { %7072 = vmatprep.subr.mxu1 %v6393_v27  ;;  %7149 = vmatprep.subr.mxu0 %v6521_v1  ;;  %v6485_v61 = vld [vmem:[#allocation9 + $0x318] sm:$0xff]  ;;  %v6580_v27 = vld [vmem:[#allocation9 + $0x610] sm:$0xff] }
 0x352   :  { %7073 = vmatpush1.msra.mxu1 %v6392_v0  ;;  %7150 = vmatpush1.msra.mxu0 %v6520_v47  ;;  %v6581_v35 = vld [vmem:[#allocation9 + $0x618] sm:$0xff]  ;;  %v6480_v0 = vld [vmem:[#allocation9 + $0x2f0] sm:$0xff] }
 0x353   :  { %7074 = vmatprep.subr.mxu1 %v6389_v3  ;;  %7151 = vmatprep.subr.mxu0 %v6517_v24  ;;  %v6481_v1 = vld [vmem:[#allocation9 + $0x2f8] sm:$0xff]  ;;  %v7416_v3 = vld [vmem:[#allocation9 + $0x8e8] sm:$0xff]  ;;  %v6476_v24 = vld [vmem:[#allocation9 + $0x2d0] sm:$0xff] }
 0x354   :  { %7075 = vmatpush1.msra.mxu1 %v6388_v60  ;;  %7152 = vmatpush1.msra.mxu0 %v6516_v48  ;;  %v6477_v47 = vld [vmem:[#allocation9 + $0x2d8] sm:$0xff]  ;;  %v7415_v60 = vld [vmem:[#allocation9 + $0x8e0] sm:$0xff] }
 0x355   :  { %7076 = vmatprep.subr.mxu1 %v6513_v5  ;;  %7169 = vmatprep.subr.mxu0 %v6609_v50  ;;  %v6473_v48 = vld [vmem:[#allocation9 + $0x2b8] sm:$0xff]  ;;  %v6472_v5 = vld [vmem:[#allocation9 + $0x2b0] sm:$0xff]  ;;  %v7412_v50 = vld [vmem:[#allocation9 + $0x8c8] sm:$0xff] }
 0x356   :  { %7077 = vmatpush2.msra.mxu1 %v6512_v10  ;;  %7170 = vmatpush2.msra.mxu0 %v6608_v57  ;;  %v6469_v10 = vld [vmem:[#allocation9 + $0x298] sm:$0xff]  ;;  %v7411_v57 = vld [vmem:[#allocation9 + $0x8c0] sm:$0xff] }
 0x357   :  { %7078 = vmatprep.subr.mxu1 %v6509_v13  ;;  %7171 = vmatprep.subr.mxu0 %v6605_v29  ;;  %v6468_v13 = vld [vmem:[#allocation9 + $0x290] sm:$0xff]  ;;  %v6465_v29 = vld [vmem:[#allocation9 + $0x278] sm:$0xff] }
 0x358   :  { %7079 = vmatpush2.msra.mxu1 %v6508_v45  ;;  %7172 = vmatpush2.msra.mxu0 %v6604_v26  ;;  %v7407_v45 = vld [vmem:[#allocation9 + $0x8a0] sm:$0xff]  ;;  %v7404_v26 = vld [vmem:[#allocation9 + $0x888] sm:$0xff] }
 0x359   :  { %7080 = vmatprep.subr.mxu1 %v6505_v21  ;;  %7173 = vmatprep.subr.mxu0 %v6601_v38  ;;  %v6461_v21 = vld [vmem:[#allocation9 + $0x258] sm:$0xff]  ;;  %v7403_v38 = vld [vmem:[#allocation9 + $0x880] sm:$0xff] }
 0x35a   :  { %7081 = vmatpush2.msra.mxu1 %v6504_v49  ;;  %7174 = vmatpush2.msra.mxu0 %v6600_v53  ;;  %v6460_v49 = vld [vmem:[#allocation9 + $0x250] sm:$0xff]  ;;  %v7400_v53 = vld [vmem:[#allocation9 + $0x868] sm:$0xff] }
 0x35b   :  { %7082 = vmatprep.subr.mxu1 %v6501_v20  ;;  %7175 = vmatprep.subr.mxu0 %v6597_v18  ;;  %v7399_v20 = vld [vmem:[#allocation9 + $0x860] sm:$0xff]  ;;  %v6456_v18 = vld [vmem:[#allocation9 + $0x230] sm:$0xff] }
 0x35c   :  { %7083 = vmatpush2.msra.mxu1 %v6500_v42  ;;  %7176 = vmatpush2.msra.mxu0 %v6596_v54  ;;  %v7396_v42 = vld [vmem:[#allocation9 + $0x848] sm:$0xff]  ;;  %v6453_v54 = vld [vmem:[#allocation9 + $0x218] sm:$0xff] }
 0x35d   :  { %7084 = vmatprep.subr.mxu1 %v6497_v23  ;;  %7177 = vmatprep.subr.mxu0 %v6593_v56  ;;  %v7395_v23 = vld [vmem:[#allocation9 + $0x840] sm:$0xff]  ;;  %v6452_v56 = vld [vmem:[#allocation9 + $0x210] sm:$0xff] }
 0x35e   :  { %7085 = vmatpush2.msra.mxu1 %v6496_v41  ;;  %7178 = vmatpush2.msra.mxu0 %v6592_v32  ;;  %v7392_v41 = vld [vmem:[#allocation9 + $0x828] sm:$0xff]  ;;  %v7391_v32 = vld [vmem:[#allocation9 + $0x820] sm:$0xff] }
 0x35f   :  { %7086 = vmatprep.subr.mxu1 %v6493_v4  ;;  %7179 = vmatprep.subr.mxu0 %v6589_v8  ;;  %v7388_v4 = vld [vmem:[#allocation9 + $0x808] sm:$0xff]  ;;  %v7387_v8 = vld [vmem:[#allocation9 + $0x800] sm:$0xff] }
 0x360   :  { %7087 = vmatpush2.msra.mxu1 %v6492_v39  ;;  %7180 = vmatpush2.msra.mxu0 %v6588_v25  ;;  %v7544_v39 = vld [vmem:[#allocation9 + $0xce8] sm:$0xff] }
 0x361   :  { %7088 = vmatprep.subr.mxu1 %v6489_v7  ;;  %7181 = vmatprep.subr.mxu0 %v6585_v2  ;;  %v7384_v25 = vld [vmem:[#allocation9 + $0x7e8] sm:$0xff]  ;;  %v7543_v7 = vld [vmem:[#allocation9 + $0xce0] sm:$0xff] }
 0x362   :  { %7089 = vmatpush2.msra.mxu1 %v6488_v14  ;;  %7182 = vmatpush2.msra.mxu0 %v6584_v17  ;;  %v7383_v2 = vld [vmem:[#allocation9 + $0x7e0] sm:$0xff]  ;;  %v7380_v14 = vld [vmem:[#allocation9 + $0x7c8] sm:$0xff] }
 0x363   :  { %7090 = vmatprep.subr.mxu1 %v6485_v61  ;;  %7183 = vmatprep.subr.mxu0 %v6581_v35  ;;  %v7540_v17 = vld [vmem:[#allocation9 + $0xcc8] sm:$0xff]  ;;  %v7379_v61 = vld [vmem:[#allocation9 + $0x7c0] sm:$0xff] }
 0x364   :  { %7091 = vmatpush2.msra.mxu1 %v6484_v31  ;;  %7184 = vmatpush2.msra.mxu0 %v6580_v27  ;;  %v7539_v35 = vld [vmem:[#allocation9 + $0xcc0] sm:$0xff]  ;;  %v7376_v31 = vld [vmem:[#allocation9 + $0x7a8] sm:$0xff] }
 0x365   :  { %7092 = vmatprep.subr.mxu1 %v6481_v1  ;;  %7186 = vmatmul.mubr.f32.vlgmr.msra.gmra.mxu0 %v16769_v30  ;;  %v7408_v30 = vld [vmem:[#allocation9 + $0x8a8] sm:$0xff]  ;;  %v7375_v27 = vld [vmem:[#allocation9 + $0x7a0] sm:$0xff] }
 0x366   :  { %7093 = vmatpush2.msra.mxu1 %v6480_v0  ;;  %13410 = vmatprep.mubr.msk.f32.mxu0 %vm6885_vm6, %v16785_v12  ;;  %v6464_v12 = vld [vmem:[#allocation9 + $0x270] sm:$0xff]  ;;  %v7535_v1 = vld [vmem:[#allocation9 + $0xca0] sm:$0xff]  ;;  %v7532_v0 = vld [vmem:[#allocation9 + $0xc88] sm:$0xff] }
 0x367   :  { %7094 = vmatprep.subr.mxu1 %v6477_v47  ;;  %7858 = vmatprep.subr.mxu0 %v7416_v3  ;;  %v7371_v47 = vld [vmem:[#allocation9 + $0x780] sm:$0xff] }
 0x368   :  { %7095 = vmatpush2.msra.mxu1 %v6476_v24  ;;  %7859 = vmatpush1.msra.mxu0 %v7415_v60  ;;  %v7531_v3 = vld [vmem:[#allocation9 + $0xc80] sm:$0xff]  ;;  %v7368_v24 = vld [vmem:[#allocation9 + $0x768] sm:$0xff] }
 0x369   :  { %7096 = vmatprep.subr.mxu1 %v6473_v48  ;;  %7192 = vmatmul.mubr.f32.gmra.mxu0 %v16795_v59  ;;  %v6457_v59 = vld [vmem:[#allocation9 + $0x238] sm:$0xff]  ;;  %v7528_v60 = vld [vmem:[#allocation9 + $0xc68] sm:$0xff]  ;;  %v7527_v48 = vld [vmem:[#allocation9 + $0xc60] sm:$0xff] }
 0x36a   :  { %7097 = vmatpush2.msra.mxu1 %v6472_v5  ;;  %7860 = vmatprep.subr.mxu0 %v7412_v50  ;;  %v7364_v5 = vld [vmem:[#allocation9 + $0x748] sm:$0xff] }
 0x36b   :  { %7098 = vmatprep.subr.mxu1 %v6469_v10  ;;  %7861 = vmatpush1.msra.mxu0 %v7411_v57  ;;  %v7524_v50 = vld [vmem:[#allocation9 + $0xc48] sm:$0xff]  ;;  %v7363_v10 = vld [vmem:[#allocation9 + $0x740] sm:$0xff] }
 0x36c   :  { %7099 = vmatpush2.msra.mxu1 %v6468_v13  ;;  %7862 = vmatprep.subr.mxu0 %v7408_v30  ;;  %v7523_v57 = vld [vmem:[#allocation9 + $0xc40] sm:$0xff]  ;;  %v7360_v13 = vld [vmem:[#allocation9 + $0x728] sm:$0xff] }
 0x36d   :  { %7100 = vmatprep.subr.mxu1 %v6465_v29  ;;  %7863 = vmatpush1.msra.mxu0 %v7407_v45  ;;  %v7520_v30 = vld [vmem:[#allocation9 + $0xc28] sm:$0xff] }
 0x36e   :  { %7101 = vmatpush2.msra.mxu1 %v6464_v12  ;;  %7864 = vmatprep.subr.mxu0 %v7404_v26  ;;  %v7359_v12 = vld [vmem:[#allocation9 + $0x720] sm:$0xff] }
 0x36f   :  { %7102 = vmatprep.subr.mxu1 %v6461_v21  ;;  %7865 = vmatpush1.msra.mxu0 %v7403_v38  ;;  %v7519_v26 = vld [vmem:[#allocation9 + $0xc20] sm:$0xff] }
 0x370   :  { %7103 = vmatpush2.msra.mxu1 %v6460_v49  ;;  %7866 = vmatprep.subr.mxu0 %v7400_v53  ;;  %v7356_v49 = vld [vmem:[#allocation9 + $0x708] sm:$0xff] }
 0x371   :  { %7104 = vmatprep.subr.mxu1 %v6457_v59  ;;  %7867 = vmatpush1.msra.mxu0 %v7399_v20  ;;  %v7516_v53 = vld [vmem:[#allocation9 + $0xc08] sm:$0xff]  ;;  %v7355_v59 = vld [vmem:[#allocation9 + $0x700] sm:$0xff] }
 0x372   :  { %7105 = vmatpush2.msra.mxu1 %v6456_v18  ;;  %7868 = vmatprep.subr.mxu0 %v7396_v42  ;;  %v7515_v20 = vld [vmem:[#allocation9 + $0xc00] sm:$0xff]  ;;  %v7480_v42 = vld [vmem:[#allocation9 + $0xae8] sm:$0xff] }
 0x373   :  { %7106 = vmatprep.subr.mxu1 %v6453_v54  ;;  %7869 = vmatpush1.msra.mxu0 %v7395_v23  ;;  %v7512_v54 = vld [vmem:[#allocation9 + $0xbe8] sm:$0xff] }
 0x374   :  { %7107 = vmatpush2.msra.mxu1 %v6452_v56  ;;  %7870 = vmatprep.subr.mxu0 %v7392_v41 }
 0x375   :  { %7109 = vmatmul.mubr.f32.vlgmr.msra.gmra.mxu1 %v16767_v51  ;;  %7871 = vmatpush1.msra.mxu0 %v7391_v32  ;;  %v7536_v51 = vld [vmem:[#allocation9 + $0xca8] sm:$0xff]  ;;  %v7479_v32 = vld [vmem:[#allocation9 + $0xae0] sm:$0xff] }
 0x376   :  { %7114 = vmatprep.mubr.f32.mxu1 %v16783_v33  ;;  %7872 = vmatprep.subr.mxu0 %v7388_v4  ;;  %v7372_v33 = vld [vmem:[#allocation9 + $0x788] sm:$0xff]  ;;  %v7511_v4 = vld [vmem:[#allocation9 + $0xbe0] sm:$0xff] }
 0x377   :  { %7873 = vmatpush1.msra.mxu0 %v7387_v8  ;;  %7935 = vmatprep.subr.mxu1 %v7544_v39 }
 0x378   :  { %7874 = vmatprep.subr.mxu0 %v7384_v25  ;;  %7936 = vmatpush1.msra.mxu1 %v7543_v7  ;;  %v7476_v25 = vld [vmem:[#allocation9 + $0xac8] sm:$0xff] }
 0x379   :  { %7115 = vmatmul.mubr.f32.gmra.mxu1 %v16793_v6  ;;  %7875 = vmatpush1.msra.mxu0 %v7383_v2  ;;  %v7367_v6 = vld [vmem:[#allocation9 + $0x760] sm:$0xff]  ;;  %v7508_v7 = vld [vmem:[#allocation9 + $0xbc8] sm:$0xff] }
 0x37a   :  { %7876 = vmatprep.subr.mxu0 %v7380_v14  ;;  %7937 = vmatprep.subr.mxu1 %v7540_v17  ;;  %v7475_v14 = vld [vmem:[#allocation9 + $0xac0] sm:$0xff] }
 0x37b   :  { %7877 = vmatpush1.msra.mxu0 %v7379_v61  ;;  %7938 = vmatpush1.msra.mxu1 %v7539_v35  ;;  %v7507_v17 = vld [vmem:[#allocation9 + $0xbc0] sm:$0xff] }
 0x37c   :  { %7878 = vmatprep.subr.mxu0 %v7376_v31  ;;  %7939 = vmatprep.subr.mxu1 %v7536_v51  ;;  %v7472_v51 = vld [vmem:[#allocation9 + $0xaa8] sm:$0xff] }
 0x37d   :  { %7879 = vmatpush1.msra.mxu0 %v7375_v27  ;;  %7940 = vmatpush1.msra.mxu1 %v7535_v1  ;;  %v7504_v27 = vld [vmem:[#allocation9 + $0xba8] sm:$0xff] }
 0x37e   :  { %7880 = vmatprep.subr.mxu0 %v7372_v33  ;;  %7941 = vmatprep.subr.mxu1 %v7532_v0 }
 0x37f   :  { %7881 = vmatpush1.msra.mxu0 %v7371_v47  ;;  %7942 = vmatpush1.msra.mxu1 %v7531_v3  ;;  %v7471_v47 = vld [vmem:[#allocation9 + $0xaa0] sm:$0xff] }
 0x380   :  { %7882 = vmatprep.subr.mxu0 %v7368_v24  ;;  %7943 = vmatprep.subr.mxu1 %v7528_v60  ;;  %v7503_v3 = vld [vmem:[#allocation9 + $0xba0] sm:$0xff]  ;;  %v7468_v60 = vld [vmem:[#allocation9 + $0xa88] sm:$0xff] }
 0x381   :  { %7883 = vmatpush1.msra.mxu0 %v7367_v6  ;;  %7944 = vmatpush1.msra.mxu1 %v7527_v48  ;;  %v7500_v6 = vld [vmem:[#allocation9 + $0xb88] sm:$0xff] }
 0x382   :  { %7884 = vmatprep.subr.mxu0 %v7364_v5  ;;  %7945 = vmatprep.subr.mxu1 %v7524_v50  ;;  %v7467_v5 = vld [vmem:[#allocation9 + $0xa80] sm:$0xff] }
 0x383   :  { %v5530_v29 = vpop.permute.xlu0 %5529  ;;  %v5532_v45 = vpop.permute.xlu1 %5531  ;;  %7885 = vmatpush1.msra.mxu0 %v7363_v10  ;;  %7946 = vmatpush1.msra.mxu1 %v7523_v57  ;;  %v7499_v50 = vld [vmem:[#allocation9 + $0xb80] sm:$0xff]  ;;  %v7464_v57 = vld [vmem:[#allocation9 + $0xa68] sm:$0xff] }
 0x384   :  { %v5557_v21 = vrot.slane %v5530_v29, 1  ;;  %v5558_v38 = vrot.slane %v5532_v45, 1  ;;  %7886 = vmatprep.subr.mxu0 %v7360_v13  ;;  %7947 = vmatprep.subr.mxu1 %v7520_v30  ;;  %v7496_v13 = vld [vmem:[#allocation9 + $0xb68] sm:$0xff] }
 0x385   :  { %7887 = vmatpush1.msra.mxu0 %v7359_v12  ;;  %7948 = vmatpush1.msra.mxu1 %v7519_v26  ;;  %v7463_v26 = vld [vmem:[#allocation9 + $0xa60] sm:$0xff] }
 0x386   :  { %v5572_v18 = vsel %vm5571_vm4, %v5530_v29, %v5557_v21  ;;  %v5573_v23 = vsel %vm5571_vm4, %v5532_v45, %v5558_v38  ;;  %7888 = vmatprep.subr.mxu0 %v7356_v49  ;;  %7949 = vmatprep.subr.mxu1 %v7516_v53  ;;  %v7495_v21 = vld [vmem:[#allocation9 + $0xb60] sm:$0xff]  ;;  %v7460_v53 = vld [vmem:[#allocation9 + $0xa48] sm:$0xff] }
 0x387   :  { %v5534_v56 = vpop.permute.xlu0 %5533  ;;  %v5536_v41 = vpop.permute.xlu1 %5535  ;;  %7889 = vmatpush1.msra.mxu0 %v7355_v59  ;;  %7950 = vmatpush1.msra.mxu1 %v7515_v20  ;;  %v5600_v2 = vmax.f32 %v15929_v34, %v5572_v18  ;;  %v5601_v61 = vmax.f32 %v15933_v52, %v5573_v23  ;;  %v7492_v20 = vld [vmem:[#allocation9 + $0xb48] sm:$0xff]  ;;  %v7459_v18 = vld [vmem:[#allocation9 + $0xa40] sm:$0xff] }
 0x388   :  { %v5559_v8 = vrot.slane %v5534_v56, 1  ;;  %v5560_v39 = vrot.slane %v5536_v41, 1  ;;  %7890 = vmatprep.subr.mxu0 %v7480_v42  ;;  %7951 = vmatprep.subr.mxu1 %v7512_v54  ;;  %v7491_v42 = vld [vmem:[#allocation9 + $0xb40] sm:$0xff]  ;;  %v7456_v54 = vld [vmem:[#allocation9 + $0xa28] sm:$0xff] }
 0x389   :  { %7891 = vmatpush2.msra.mxu0 %v7479_v32  ;;  %7952 = vmatpush1.msra.mxu1 %v7511_v4  ;;  %v7488_v4 = vld [vmem:[#allocation9 + $0xb28] sm:$0xff] }
 0x38a   :  { %v5574_v35 = vsel %vm5571_vm4, %v5534_v56, %v5559_v8  ;;  %v5575_v31 = vsel %vm5571_vm4, %v5536_v41, %v5560_v39  ;;  %7892 = vmatprep.subr.mxu0 %v7476_v25  ;;  %7953 = vmatprep.subr.mxu1 %v7508_v7  ;;  %v7455_v8 = vld [vmem:[#allocation9 + $0xa20] sm:$0xff] }
 0x38b   :  { %v5602_v1 = vmax.f32 %v15937_v15, %v5574_v35  ;;  %v5603_v33 = vmax.f32 %v15947_v11, %v5575_v31  ;;  %v5538_v0 = vpop.permute.xlu0 %5537  ;;  %v5540_v34 = vpop.permute.xlu1 %5539  ;;  %7893 = vmatpush2.msra.mxu0 %v7475_v14  ;;  %7954 = vmatpush1.msra.mxu1 %v7507_v17  ;;  %v6020_v15 = vcombine.low %v5600_v2, %v5601_v61  ;;  %v7487_v2 = vld [vmem:[#allocation9 + $0xb20] sm:$0xff]  ;;  %v7484_v35 = vld [vmem:[#allocation9 + $0xb08] sm:$0xff] }
 0x38c   :  { %v5561_v24 = vrot.slane %v5538_v0, 1  ;;  %v5562_v52 = vrot.slane %v5540_v34, 1  ;;  %7894 = vmatprep.subr.mxu0 %v7472_v51  ;;  %7955 = vmatprep.subr.mxu1 %v7504_v27  ;;  %v7451_v51 = vld [vmem:[#allocation9 + $0xa00] sm:$0xff] }
 0x38d   :  { %v6021_v48 = vcombine.low %v5602_v1, %v5603_v33  ;;  %7895 = vmatpush2.msra.mxu0 %v7471_v47  ;;  %7956 = vmatpush1.msra.mxu1 %v7503_v3  ;;  %v7483_v27 = vld [vmem:[#allocation9 + $0xb00] sm:$0xff] }
 0x38e   :  { %v5576_v11 = vsel %vm5571_vm4, %v5538_v0, %v5561_v24  ;;  %v5577_v10 = vsel %vm5571_vm4, %v5540_v34, %v5562_v52  ;;  %7896 = vmatprep.subr.mxu0 %v7468_v60  ;;  %7957 = vmatprep.subr.mxu1 %v7500_v6  ;;  %v7448_v24 = vld [vmem:[#allocation9 + $0x9e8] sm:$0xff] }
 0x38f   :  { %v5604_v30 = vmax.f32 %v18473_v44, %v5576_v11  ;;  %v5605_v29 = vmax.f32 %v18472_v63, %v5577_v10  ;;  %v5542_v45 = vpop.permute.xlu0 %5541  ;;  %v5544_v12 = vpop.permute.xlu1 %5543  ;;  %v6036_v38 = vrot.slane %v6021_v48, %v14790_v9  ;;  %7897 = vmatpush2.msra.mxu0 %v7467_v5  ;;  %7958 = vmatpush1.msra.mxu1 %v7499_v50  ;;  %v7576_v52 = vld [vmem:[#allocation9 + $0xde8] sm:$0xff]  ;;  %v7447_v50 = vld [vmem:[#allocation9 + $0x9e0] sm:$0xff] }
 0x390   :  { %v5563_v49 = vrot.slane %v5542_v45, 1  ;;  %7898 = vmatprep.subr.mxu0 %v7464_v57  ;;  %7959 = vmatprep.subr.mxu1 %v7496_v13  ;;  %v6029_v44 = vrot.slane %v6020_v15, %v14790_v9  ;;  %v5564_v56 = vrot.slane %v5544_v12, 1  ;;  %v7575_v57 = vld [vmem:[#allocation9 + $0xde0] sm:$0xff]  ;;  %v7444_v13 = vld [vmem:[#allocation9 + $0x9c8] sm:$0xff] }
 0x391   :  { %v6022_v59 = vcombine.low %v5604_v30, %v5605_v29  ;;  %7899 = vmatpush2.msra.mxu0 %v7463_v26  ;;  %7960 = vmatpush1.msra.mxu1 %v7495_v21 }
 0x392   :  { %v5578_v63 = vsel %vm5571_vm4, %v5542_v45, %v5563_v49  ;;  %7900 = vmatprep.subr.mxu0 %v7460_v53  ;;  %v6051_v39 = vcombine.low %v6029_v44, %v6036_v38  ;;  %7961 = vmatprep.subr.mxu1 %v7492_v20  ;;  %v6052_v14 = vcombine.high %v6029_v44, %v6036_v38  ;;  %v7572_v45 = vld [vmem:[#allocation9 + $0xdc8] sm:$0xff]  ;;  %v7571_v20 = vld [vmem:[#allocation9 + $0xdc0] sm:$0xff] }
 0x393   :  { %v5606_v23 = vmax.f32 %v18480_v40, %v5578_v63  ;;  %v5546_v41 = vpop.permute.xlu0 %5545  ;;  %v5548_v32 = vpop.permute.xlu1 %5547  ;;  %7901 = vmatpush2.msra.mxu0 %v7459_v18  ;;  %v6043_v17 = vrot.slane %v6022_v59, %v14790_v9  ;;  %7962 = vmatpush1.msra.mxu1 %v7491_v42  ;;  %v7452_v40 = vld [vmem:[#allocation9 + $0xa08] sm:$0xff]  ;;  %v5579_v0 = vsel %vm5571_vm4, %v5544_v12, %v5564_v56  ;;  %v7443_v12 = vld [vmem:[#allocation9 + $0x9c0] sm:$0xff] }
 0x394   :  { %v5565_v25 = vrot.slane %v5546_v41, 1  ;;  %v5566_v7 = vrot.slane %v5548_v32, 1  ;;  %7902 = vmatprep.subr.mxu0 %v7456_v54  ;;  %7963 = vmatprep.subr.mxu1 %v7488_v4  ;;  %v6061_v60 = vrot.slane %v6051_v39, %v14790_v9  ;;  %v6068_v15 = vrot.slane %v6052_v14, %v14790_v9  ;;  %v7440_v18 = vld [vmem:[#allocation9 + $0x9a8] sm:$0xff]  ;;  %v7439_v54 = vld [vmem:[#allocation9 + $0x9a0] sm:$0xff] }
 0x395   :  { %v6050_v61 = vrot.slane %v5606_v23, %v14790_v9  ;;  %7903 = vmatpush2.msra.mxu0 %v7455_v8  ;;  %7964 = vmatpush1.msra.mxu1 %v7487_v2  ;;  %v5607_v30 = vmax.f32 %v18477_v43, %v5579_v0  ;;  %v7568_v42 = vld [vmem:[#allocation9 + $0xda8] sm:$0xff]  ;;  %v7567_v56 = vld [vmem:[#allocation9 + $0xda0] sm:$0xff] }
 0x396   :  { %v5580_v31 = vsel %vm5571_vm4, %v5546_v41, %v5565_v25  ;;  %v5581_v34 = vsel %vm5571_vm4, %v5548_v32, %v5566_v7  ;;  %7904 = vmatprep.subr.mxu0 %v7452_v40  ;;  %7965 = vmatprep.subr.mxu1 %v7484_v35  ;;  %v7436_v41 = vld [vmem:[#allocation9 + $0x988] sm:$0xff]  ;;  %v7435_v8 = vld [vmem:[#allocation9 + $0x980] sm:$0xff] }
 0x397   :  { %v6053_v1 = vcombine.low %v6043_v17, %v6050_v61  ;;  %v6054_v33 = vcombine.high %v6043_v17, %v6050_v61  ;;  %v5550_v47 = vpop.permute.xlu0 %5549  ;;  %v5552_v3 = vpop.permute.xlu1 %5551  ;;  %v5608_v6 = vmax.f32 %v18476_v37, %v5580_v31  ;;  %7905 = vmatpush2.msra.mxu0 %v7451_v51  ;;  %7966 = vmatpush1.msra.mxu1 %v7483_v27  ;;  %v7564_v4 = vld [vmem:[#allocation9 + $0xd88] sm:$0xff]  ;;  %v7563_v2 = vld [vmem:[#allocation9 + $0xd80] sm:$0xff] }
 0x398   :  { %v5567_v48 = vrot.slane %v5550_v47, 1  ;;  %v5568_v5 = vrot.slane %v5552_v3, 1  ;;  %v5609_v37 = vmax.f32 %v18479_v36, %v5581_v34  ;;  %7906 = vmatprep.subr.mxu0 %v7448_v24  ;;  %7983 = vmatprep.subr.mxu1 %v7576_v52  ;;  %v7432_v14 = vld [vmem:[#allocation9 + $0x968] sm:$0xff]  ;;  %v7431_v31 = vld [vmem:[#allocation9 + $0x960] sm:$0xff] }
 0x399   :  { %v6075_v11 = vrot.slane %v6053_v1, %v14790_v9  ;;  %v6082_v10 = vrot.slane %v6054_v33, %v14790_v9  ;;  %7907 = vmatpush2.msra.mxu0 %v7447_v50  ;;  %v6087_v44 = vcombine.low %v5607_v30, %v5608_v6  ;;  %7984 = vmatpush2.msra.mxu1 %v7575_v57  ;;  %v7560_v35 = vld [vmem:[#allocation9 + $0xd68] sm:$0xff]  ;;  %v7559_v51 = vld [vmem:[#allocation9 + $0xd60] sm:$0xff] }
 0x39a   :  { %v5582_v29 = vsel %vm5571_vm4, %v5550_v47, %v5567_v48  ;;  %v5583_v36 = vsel %vm5571_vm4, %v5552_v3, %v5568_v5  ;;  %7908 = vmatprep.subr.mxu0 %v7444_v13  ;;  %7985 = vmatprep.subr.mxu1 %v7572_v45  ;;  %v7556_v27 = vld [vmem:[#allocation9 + $0xd48] sm:$0xff]  ;;  %v7427_v1 = vld [vmem:[#allocation9 + $0x940] sm:$0xff] }
 0x39b   :  { %v6083_v26 = vcombine.low %v6061_v60, %v6075_v11  ;;  %v6084_v21 = vcombine.high %v6061_v60, %v6075_v11  ;;  %v6085_v38 = vcombine.low %v6068_v15, %v6082_v10  ;;  %v6086_v49 = vcombine.high %v6068_v15, %v6082_v10  ;;  %v5554_v53 = vpop.permute.xlu0 %5553  ;;  %v5556_v59 = vpop.permute.xlu1 %5555  ;;  %7909 = vmatpush2.msra.mxu0 %v7443_v12  ;;  %v7555_v0 = vld [vmem:[#allocation9 + $0xd40] sm:$0xff]  ;;  %v7424_v34 = vld [vmem:[#allocation9 + $0x928] sm:$0xff] }
 0x39c   :  { %v5610_v43 = vmax.f32 %v18478_v62, %v5582_v29  ;;  %v5569_v63 = vrot.slane %v5554_v53, 1  ;;  %v5570_v23 = vrot.slane %v5556_v59, 1  ;;  %7986 = vmatpush2.msra.mxu1 %v7571_v20  ;;  %7910 = vmatprep.subr.mxu0 %v7440_v18  ;;  %v5611_v39 = vmax.f32 %v18475_v46, %v5583_v36  ;;  %v7552_v47 = vld [vmem:[#allocation9 + $0xd28] sm:$0xff]  ;;  %v7423_v52 = vld [vmem:[#allocation9 + $0x920] sm:$0xff] }
 0x39d   :  { %6162 = vst [vmem:[#allocation2] sm:$0x7f] %v6083_v26  ;;  %6163 = vst [vmem:[#allocation2 + $0x8] sm:$0x7f] %v6085_v38  ;;  %7987 = vmatprep.subr.mxu1 %v7568_v42  ;;  %7911 = vmatpush2.msra.mxu0 %v7439_v54  ;;  %v6096_v17 = vrot.slane %v6087_v44, %v14790_v9  ;;  %v7551_v60 = vld [vmem:[#allocation9 + $0xd20] sm:$0xff]  ;;  %v7420_v6 = vld [vmem:[#allocation9 + $0x908] sm:$0xff] }
 0x39e   :  { %6164 = vst [vmem:[#allocation2 + $0x10] sm:$0x7f] %v6084_v21  ;;  %6166 = vst.msk [vmem:[#allocation2 + $0x18] sm:$0x7f] %vm6165_vm7, %v6086_v49  ;;  %v6088_v32 = vcombine.low %v5609_v37, %v5610_v43  ;;  %v5584_v62 = vsel %vm5571_vm4, %v5554_v53, %v5569_v63  ;;  %v5585_v7 = vsel %vm5571_vm4, %v5556_v59, %v5570_v23  ;;  %7988 = vmatpush2.msra.mxu1 %v7567_v56  ;;  %v7548_v10 = vld [vmem:[#allocation9 + $0xd08] sm:$0xff]  ;;  %v7419_v57 = vld [vmem:[#allocation9 + $0x900] sm:$0xff] }
 0x39f   :  { %v5612_v25 = vmax.f32 %v18474_v19, %v5584_v62  ;;  %v5613_v40 = vmax.f32 %v18481_v58, %v5585_v7  ;;  %7912 = vmatprep.subr.mxu0 %v7436_v41  ;;  %7989 = vmatprep.subr.mxu1 %v7564_v4  ;;  %v7428_v19 = vld [vmem:[#allocation9 + $0x948] sm:$0xff]  ;;  %v7547_v13 = vld [vmem:[#allocation9 + $0xd00] sm:$0xff]  ;;  %v7418_v38 = vld [vmem:[#allocation9 + $0x8f8] sm:$0xff] }
 0x3a0   :  { %v6103_v61 = vrot.slane %v6088_v32, %v14790_v9  ;;  %7913 = vmatpush2.msra.mxu0 %v7435_v8  ;;  %7990 = vmatpush2.msra.mxu1 %v7563_v2  ;;  %v7546_v49 = vld [vmem:[#allocation9 + $0xcf8] sm:$0xff] }
 0x3a1   :  { %v6089_v46 = vcombine.low %v5611_v39, %v5612_v25  ;;  %7914 = vmatprep.subr.mxu0 %v7432_v14  ;;  %v6117_v24 = vrot.slane %v5613_v40, %v14790_v9  ;;  %7991 = vmatprep.subr.mxu1 %v7560_v35 }
 0x3a2   :  { %v6118_v33 = vcombine.low %v6096_v17, %v6103_v61  ;;  %v6119_v3 = vcombine.high %v6096_v17, %v6103_v61  ;;  %7915 = vmatpush2.msra.mxu0 %v7431_v31  ;;  %7992 = vmatpush2.msra.mxu1 %v7559_v51 }
 0x3a3   :  { %v6110_v58 = vrot.slane %v6089_v46, %v14790_v9  ;;  %7916 = vmatprep.subr.mxu0 %v7428_v19  ;;  %7993 = vmatprep.subr.mxu1 %v7556_v27 }
 0x3a4   :  { %7917 = vmatpush2.msra.mxu0 %v7427_v1  ;;  %v13785_v50 = vld [vmem:[#allocation2] ss:$8 sps:$4 sm:$0xff]   ;;  %v6128_v11 = vrot.slane %v6118_v33, %v14790_v9  ;;  %7994 = vmatpush2.msra.mxu1 %v7555_v0  ;;  %v6135_v30 = vrot.slane %v6119_v3, %v14790_v9  ;;  %v13787_v45 = vld [vmem:[#allocation2 + $0x4] ss:$8 sps:$4 sm:$0x77]  }
 0x3a5   :  { %v6120_v48 = vcombine.low %v6110_v58, %v6117_v24  ;;  %v6121_v5 = vcombine.high %v6110_v58, %v6117_v24  ;;  %v13788_v15 = vld [vmem:[#allocation2 + $0x10] ss:$8 sps:$4 sm:$0xff]   ;;  %7918 = vmatprep.subr.mxu0 %v7424_v34  ;;  %7995 = vmatprep.subr.mxu1 %v7552_v47  ;;  %v13790_v12 = vld [vmem:[#allocation2 + $0x14] ss:$8 sps:$4 sm:$0x77]   ;;  %v7597_v26 = vrot.slane %v13785_v50, %v14790_v9 }
 0x3a6   :  { %7919 = vmatpush2.msra.mxu0 %v7423_v52  ;;  %7996 = vmatpush2.msra.mxu1 %v7551_v60  ;;  %v7611_v21 = vrot.slane %v13788_v15, %v14790_v9  ;;  %v7604_v44 = vrot.slane %v13787_v45, %v14790_v9  ;;  %v7618_v43 = vrot.slane %v13790_v12, %v14790_v9 }
 0x3a7   :  { %v6142_v37 = vrot.slane %v6120_v48, %v14790_v9  ;;  %v6149_v29 = vrot.slane %v6121_v5, %v14790_v9  ;;  %7920 = vmatprep.subr.mxu0 %v7420_v6  ;;  %7997 = vmatprep.subr.mxu1 %v7548_v10 }
 0x3a8   :  { %7921 = vmatpush2.msra.mxu0 %v7419_v57  ;;  %7998 = vmatpush2.msra.mxu1 %v7547_v13  ;;  %v7619_v36 = vcombine.low %v7597_v26, %v7611_v21  ;;  %v7620_v63 = vcombine.high %v7597_v26, %v7611_v21  ;;  %v7621_v42 = vcombine.low %v7604_v44, %v7618_v43 }
 0x3a9   :  { %v6150_v53 = vcombine.low %v6128_v11, %v6142_v37  ;;  %v6151_v59 = vcombine.high %v6128_v11, %v6142_v37  ;;  %v6152_v20 = vcombine.low %v6135_v30, %v6149_v29  ;;  %v6153_v18 = vcombine.high %v6135_v30, %v6149_v29  ;;  %8012 = vmatprep.subr.mxu1 %v7418_v38 }
 0x3aa   :  { %8089 = vmatprep.subr.mxu0 %v7546_v49  ;;  %v7622_v54 = vcombine.high %v7604_v44, %v7618_v43  ;;  %v7629_v23 = vrot.slane %v7619_v36, %v14790_v9  ;;  %v7643_v56 = vrot.slane %v7620_v63, %v14790_v9  ;;  %v7636_v41 = vrot.slane %v7621_v42, %v14790_v9  ;;  %v7417_v44 = vld [vmem:[#allocation9 + $0x8f0] sm:$0xff] }
 0x3ab   :  { %6167 = vst [vmem:[#allocation2 + $0x20] sm:$0x7f] %v6150_v53  ;;  %6168 = vst [vmem:[#allocation2 + $0x28] sm:$0x7f] %v6152_v20  ;;  %v7545_v43 = vld [vmem:[#allocation9 + $0xcf0] sm:$0xff] }
 0x3ac   :  { %6169 = vst [vmem:[#allocation2 + $0x30] sm:$0x7f] %v6151_v59  ;;  %6170 = vst.msk [vmem:[#allocation2 + $0x38] sm:$0x7f] %vm6165_vm7, %v6153_v18  ;;  %v7650_v32 = vrot.slane %v7622_v54, %v14790_v9  ;;  %v7721_v8 = vcombine.low %v7629_v23, %v7643_v56  ;;  %v13411_v39 = vcombine.high %v7629_v23, %v7643_v56  ;;  %v7414_v23 = vld [vmem:[#allocation9 + $0x8d8] sm:$0xff] }
 0x3ad   :  { %v7652_v1 = vcombine.high %v7636_v41, %v7636_v41  ;;  %v7542_v56 = vld [vmem:[#allocation9 + $0xcd8] sm:$0xff] }
 0x3ae   :  { %v7723_v35 = vcombine.low %v7636_v41, %v7650_v32  ;;  %v7731_v51 = vrot.slane %v7721_v8, %v14790_v9  ;;  %v7738_v46 = vrot.slane %v13411_v39, %v14790_v9  ;;  %v7413_v32 = vld [vmem:[#allocation9 + $0x8d0] sm:$0xff]  ;;  %v7538_v8 = vld [vmem:[#allocation9 + $0xcb8] sm:$0xff] }
 0x3b0   :  { %v7745_v24 = vrot.slane %v7723_v35, %v14790_v9  ;;  %v7754_v52 = vcombine.high %v7731_v51, %v7738_v46  ;;  %v7753_v5 = vcombine.low %v7731_v51, %v7738_v46  ;;  %v7533_v35 = vld [vmem:[#allocation9 + $0xc90] sm:$0xff]  ;;  %v7530_v51 = vld [vmem:[#allocation9 + $0xc78] sm:$0xff] }
 0x3b1   :  { %v7401_v46 = vld [vmem:[#allocation9 + $0x870] sm:$0xff] }
 0x3b2   :  { %v13791_v62 = vld [vmem:[#allocation2 + $0x20] ss:$8 sps:$4 sm:$0xff]   ;;  %v13795_v25 = vld [vmem:[#allocation2 + $0x24] ss:$8 sps:$4 sm:$0x77]   ;;  %v7770_v37 = vrot.slane %v7754_v52, %v14790_v9  ;;  %v7763_v12 = vrot.slane %v7753_v5, %v14790_v9 }
 0x3b3   :  { %v13793_v4 = vld [vmem:[#allocation2 + $0x30] ss:$8 sps:$4 sm:$0xff]   ;;  %v13796_v7 = vld [vmem:[#allocation2 + $0x34] ss:$8 sps:$4 sm:$0x77]   ;;  %v7664_v2 = vrot.slane %v13791_v62, %v14790_v9  ;;  %v7671_v17 = vrot.slane %v13795_v25, %v14790_v9 }
 0x3b4   :  { %v7678_v14 = vrot.slane %v13793_v4, %v14790_v9  ;;  %v7685_v61 = vrot.slane %v13796_v7, %v14790_v9  ;;  %v7541_v62 = vld [vmem:[#allocation9 + $0xcd0] sm:$0xff]  ;;  %v7410_v4 = vld [vmem:[#allocation9 + $0x8b8] sm:$0xff] }
 0x3b5   :  { %v7518_v52 = vld [vmem:[#allocation9 + $0xc18] sm:$0xff] }
 0x3b6   :  { %v7686_v40 = vcombine.low %v7664_v2, %v7678_v14  ;;  %v7687_v31 = vcombine.high %v7664_v2, %v7678_v14  ;;  %v7688_v19 = vcombine.low %v7671_v17, %v7685_v61  ;;  %v7689_v27 = vcombine.high %v7671_v17, %v7685_v61  ;;  %v7409_v2 = vld [vmem:[#allocation9 + $0x8b0] sm:$0xff]  ;;  %v7406_v17 = vld [vmem:[#allocation9 + $0x898] sm:$0xff] }
 0x3b7   :  { %v7537_v14 = vld [vmem:[#allocation9 + $0xcb0] sm:$0xff]  ;;  %v7534_v61 = vld [vmem:[#allocation9 + $0xc98] sm:$0xff] }
 0x3b8   :  { %v7696_v33 = vrot.slane %v7686_v40, %v14790_v9  ;;  %v7710_v0 = vrot.slane %v7687_v31, %v14790_v9  ;;  %v7703_v34 = vrot.slane %v7688_v19, %v14790_v9  ;;  %v7717_v60 = vrot.slane %v7689_v27, %v14790_v9  ;;  %v7405_v40 = vld [vmem:[#allocation9 + $0x890] sm:$0xff]  ;;  %v7402_v31 = vld [vmem:[#allocation9 + $0x878] sm:$0xff] }
 0x3b9   :  { %v7529_v19 = vld [vmem:[#allocation9 + $0xc70] sm:$0xff]  ;;  %v7398_v27 = vld [vmem:[#allocation9 + $0x858] sm:$0xff] }
 0x3ba   :  { %v7724_v47 = vcombine.low %v7652_v1, %v7696_v33  ;;  %v7718_v3 = vcombine.high %v7696_v33, %v7696_v33  ;;  %v7720_v58 = vcombine.high %v7710_v0, %v7710_v0  ;;  %v7719_v6 = vcombine.high %v7703_v34, %v7703_v34  ;;  %v7526_v1 = vld [vmem:[#allocation9 + $0xc58] sm:$0xff]  ;;  %v7397_v33 = vld [vmem:[#allocation9 + $0x850] sm:$0xff] }
 0x3bb   :  { %v7514_v5 = vld [vmem:[#allocation9 + $0xbf8] sm:$0xff] }
 0x3bc   :  { %v7752_v48 = vrot.slane %v7724_v47, %v14790_v9  ;;  %v7789_v50 = vcombine.low %v7710_v0, %v7718_v3  ;;  %v7790_v15 = vcombine.low %v7720_v58, %v7703_v34  ;;  %v7791_v11 = vcombine.low %v7717_v60, %v7719_v6  ;;  %v7525_v0 = vld [vmem:[#allocation9 + $0xc50] sm:$0xff]  ;;  %v7394_v34 = vld [vmem:[#allocation9 + $0x838] sm:$0xff] }
 0x3bd   :  { %v7522_v47 = vld [vmem:[#allocation9 + $0xc38] sm:$0xff]  ;;  %v7393_v3 = vld [vmem:[#allocation9 + $0x830] sm:$0xff] }
 0x3be   :  { %v7755_v10 = vcombine.low %v7745_v24, %v7752_v48  ;;  %v7756_v57 = vcombine.high %v7745_v24, %v7752_v48  ;;  %v7798_v13 = vrot.slane %v7789_v50, %v14790_v9  ;;  %v7805_v30 = vrot.slane %v7790_v15, %v14790_v9  ;;  %v7521_v58 = vld [vmem:[#allocation9 + $0xc30] sm:$0xff]  ;;  %v7390_v24 = vld [vmem:[#allocation9 + $0x818] sm:$0xff] }
 0x3bf   :  { %v7812_v29 = vrot.slane %v7791_v11, %v14790_v9  ;;  %v7389_v60 = vld [vmem:[#allocation9 + $0x810] sm:$0xff]  ;;  %v7386_v48 = vld [vmem:[#allocation9 + $0x7f8] sm:$0xff] }
 0x3c0   :  { %v7784_v45 = vrot.slane %v7756_v57, %v14790_v9  ;;  %v7777_v26 = vrot.slane %v7755_v10, %v14790_v9  ;;  %v7814_v21 = vcombine.high %v7798_v13, %v7805_v30  ;;  %v7813_v49 = vcombine.low %v7798_v13, %v7805_v30  ;;  %v7517_v6 = vld [vmem:[#allocation9 + $0xc10] sm:$0xff]  ;;  %v7382_v11 = vld [vmem:[#allocation9 + $0x7d8] sm:$0xff] }
 0x3c1   :  { %v7815_v38 = vcombine.high %v7812_v29, %v7812_v29  ;;  %v7836_v39 = vrot.slane %v7812_v29, %v14790_v9  ;;  %v7385_v50 = vld [vmem:[#allocation9 + $0x7f0] sm:$0xff]  ;;  %v7510_v10 = vld [vmem:[#allocation9 + $0xbd8] sm:$0xff] }
 0x3c2   :  { %v16880_v53 = vcombine.low %v7770_v37, %v7784_v45  ;;  %v16882_v59 = vcombine.high %v7770_v37, %v7784_v45  ;;  %v16884_v20 = vcombine.low %v7763_v12, %v7777_v26  ;;  %v16886_v18 = vcombine.high %v7763_v12, %v7777_v26  ;;  %v7513_v15 = vld [vmem:[#allocation9 + $0xbf0] sm:$0xff]  ;;  %v13797_v30 = vld [vmem:[#allocation3] ss:$8 sps:$4 sm:$0xee]   ;;  %v13799_v45 = vld [vmem:[#allocation3 + $0x4] ss:$8 sps:$4 sm:$0xff]  }
 0x3c3   :  { %v7829_v36 = vrot.slane %v7814_v21, %v14790_v9  ;;  %v7843_v63 = vrot.slane %v7815_v38, %v14790_v9  ;;  %v7822_v41 = vrot.slane %v7813_v49, %v14790_v9  ;;  %v7381_v57 = vld [vmem:[#allocation9 + $0x7d0] sm:$0xff]  ;;  %v7378_v37 = vld [vmem:[#allocation9 + $0x7b8] sm:$0xff] }
 0x3c4   :  { %7922 = vmatprep.mubr.f32.mxu0 %v16880_v53  ;;  %13412 = vmatprep.mubr.msk.f32.mxu1 %vm6885_vm6, %v16882_v59  ;;  %v7509_v13 = vld [vmem:[#allocation9 + $0xbd0] sm:$0xff]  ;;  %v7506_v29 = vld [vmem:[#allocation9 + $0xbb8] sm:$0xff] }
 0x3c5   :  { %7923 = vmatmul.mubr.f32.vlgmr.msra.gmra.mxu0 %v16884_v20  ;;  %8000 = vmatmul.mubr.f32.vlgmr.msra.gmra.mxu1 %v16886_v18  ;;  %v16895_v42 = vcombine.low %v7829_v36, %v7843_v63  ;;  %v16897_v54 = vcombine.high %v7829_v36, %v7843_v63  ;;  %v16904_v25 = vcombine.low %v7822_v41, %v7836_v39  ;;  %v7377_v12 = vld [vmem:[#allocation9 + $0x7b0] sm:$0xff]  ;;  %v7374_v38 = vld [vmem:[#allocation9 + $0x798] sm:$0xff] }
 0x3c6   :  { %8013 = vmatpush1.msra.mxu1 %v7417_v44  ;;  %8090 = vmatpush1.msra.mxu0 %v7545_v43  ;;  %v16906_v7 = vcombine.high %v7822_v41, %v7836_v39  ;;  %v7505_v26 = vld [vmem:[#allocation9 + $0xbb0] sm:$0xff]  ;;  %v7502_v49 = vld [vmem:[#allocation9 + $0xb98] sm:$0xff]  ;;  %v8586_v39 = vrot.slane %v13799_v45, %v14790_v9 }
 0x3c7   :  { %7928 = vmatprep.mubr.f32.mxu0 %v16895_v42  ;;  %13413 = vmatprep.mubr.msk.f32.mxu1 %vm6885_vm6, %v16897_v54  ;;  %v13800_v21 = vld [vmem:[#allocation3 + $0x10] ss:$8 sps:$4 sm:$0xee]   ;;  %v13802_v44 = vld [vmem:[#allocation3 + $0x14] ss:$8 sps:$4 sm:$0xff]  }
 0x3c8   :  { %8014 = vmatprep.subr.mxu1 %v7414_v23  ;;  %8091 = vmatprep.subr.mxu0 %v7542_v56  ;;  %v7373_v43 = vld [vmem:[#allocation9 + $0x790] sm:$0xff]  ;;  %v7370_v63 = vld [vmem:[#allocation9 + $0x778] sm:$0xff] }
 0x3c9   :  { %8015 = vmatpush1.msra.mxu1 %v7413_v32  ;;  %8092 = vmatpush1.msra.mxu0 %v7541_v62  ;;  %v7501_v36 = vld [vmem:[#allocation9 + $0xb90] sm:$0xff]  ;;  %v7498_v23 = vld [vmem:[#allocation9 + $0xb78] sm:$0xff]  ;;  %v8579_v32 = vrot.slane %v13797_v30, %v14790_v9  ;;  %v8593_v62 = vrot.slane %v13800_v21, %v14790_v9 }
 0x3ca   :  { %8016 = vmatprep.subr.mxu1 %v7410_v4  ;;  %8093 = vmatprep.subr.mxu0 %v7538_v8  ;;  %v7369_v56 = vld [vmem:[#allocation9 + $0x770] sm:$0xff]  ;;  %v7366_v4 = vld [vmem:[#allocation9 + $0x758] sm:$0xff] }
 0x3cb   :  { %7929 = vmatmul.mubr.f32.gmra.mxu0 %v16904_v25  ;;  %8006 = vmatmul.mubr.f32.gmra.mxu1 %v16906_v7  ;;  %v7497_v41 = vld [vmem:[#allocation9 + $0xb70] sm:$0xff]  ;;  %v7494_v8 = vld [vmem:[#allocation9 + $0xb58] sm:$0xff] }
 0x3cc   :  { %8017 = vmatpush1.msra.mxu1 %v7409_v2  ;;  %8094 = vmatpush1.msra.mxu0 %v7537_v14  ;;  %v8600_v2 = vrot.slane %v13802_v44, %v14790_v9  ;;  %v7365_v14 = vld [vmem:[#allocation9 + $0x750] sm:$0xff]  ;;  %v7566_v45 = vld [vmem:[#allocation9 + $0xd98] sm:$0xff] }
 0x3cd   :  { %8018 = vmatprep.subr.mxu1 %v7406_v17  ;;  %8076 = vmatprep.mubr.f32.mxu1 %v16880_v53  ;;  %v7493_v17 = vld [vmem:[#allocation9 + $0xb50] sm:$0xff]  ;;  %v7466_v44 = vld [vmem:[#allocation9 + $0xa78] sm:$0xff] }
 0x3ce   :  { %8095 = vmatprep.subr.mxu0 %v7534_v61  ;;  %13414 = vmatprep.mubr.msk.f32.mxu0 %vm6885_vm6, %v16882_v59  ;;  %v7362_v61 = vld [vmem:[#allocation9 + $0x738] sm:$0xff]  ;;  %v7569_v30 = vld [vmem:[#allocation9 + $0xdb0] sm:$0xff] }
 0x3cf   :  { %8019 = vmatpush1.msra.mxu1 %v7405_v40  ;;  %8096 = vmatpush1.msra.mxu0 %v7533_v35  ;;  %v7490_v40 = vld [vmem:[#allocation9 + $0xb38] sm:$0xff]  ;;  %v7361_v35 = vld [vmem:[#allocation9 + $0x730] sm:$0xff] }
 0x3d0   :  { %8020 = vmatprep.subr.mxu1 %v7402_v31  ;;  %8097 = vmatprep.subr.mxu0 %v7530_v51  ;;  %v7489_v31 = vld [vmem:[#allocation9 + $0xb30] sm:$0xff]  ;;  %v8601_v51 = vcombine.low %v8579_v32, %v8593_v62 }
 0x3d1   :  { %8021 = vmatpush1.msra.mxu1 %v7401_v46  ;;  %8098 = vmatpush1.msra.mxu0 %v7529_v19  ;;  %v7358_v46 = vld [vmem:[#allocation9 + $0x718] sm:$0xff] }
 0x3d2   :  { %8022 = vmatprep.subr.mxu1 %v7398_v27  ;;  %8099 = vmatprep.subr.mxu0 %v7526_v1  ;;  %v7486_v19 = vld [vmem:[#allocation9 + $0xb18] sm:$0xff]  ;;  %v8602_v27 = vcombine.high %v8579_v32, %v8593_v62  ;;  %v8603_v1 = vcombine.low %v8586_v39, %v8600_v2 }
 0x3d3   :  { %8023 = vmatpush1.msra.mxu1 %v7397_v33  ;;  %8100 = vmatpush1.msra.mxu0 %v7525_v0  ;;  %v8604_v33 = vcombine.high %v8586_v39, %v8600_v2  ;;  %v7357_v0 = vld [vmem:[#allocation9 + $0x710] sm:$0xff]  ;;  %v7558_v32 = vld [vmem:[#allocation9 + $0xd58] sm:$0xff] }
 0x3d4   :  { %8024 = vmatprep.subr.mxu1 %v7394_v34  ;;  %8101 = vmatprep.subr.mxu0 %v7522_v47  ;;  %v7485_v34 = vld [vmem:[#allocation9 + $0xb10] sm:$0xff]  ;;  %v7482_v47 = vld [vmem:[#allocation9 + $0xaf8] sm:$0xff] }
 0x3d5   :  { %8025 = vmatpush1.msra.mxu1 %v7393_v3  ;;  %8102 = vmatpush1.msra.mxu0 %v7521_v58  ;;  %v7578_v3 = vld [vmem:[#allocation9 + $0xdf8] sm:$0xff]  ;;  %v7481_v58 = vld [vmem:[#allocation9 + $0xaf0] sm:$0xff] }
 0x3d6   :  { %8026 = vmatprep.subr.mxu1 %v7390_v24  ;;  %8103 = vmatprep.subr.mxu0 %v7518_v52  ;;  %v7577_v24 = vld [vmem:[#allocation9 + $0xdf0] sm:$0xff]  ;;  %v8611_v52 = vrot.slane %v8601_v51, %v14790_v9  ;;  %v7458_v2 = vld [vmem:[#allocation9 + $0xa38] sm:$0xff] }
 0x3d7   :  { %8027 = vmatpush1.msra.mxu1 %v7389_v60  ;;  %8104 = vmatpush1.msra.mxu0 %v7517_v6  ;;  %v7478_v60 = vld [vmem:[#allocation9 + $0xad8] sm:$0xff]  ;;  %v7557_v39 = vld [vmem:[#allocation9 + $0xd50] sm:$0xff] }
 0x3d8   :  { %8028 = vmatprep.subr.mxu1 %v7386_v48  ;;  %8105 = vmatprep.subr.mxu0 %v7514_v5  ;;  %v7574_v6 = vld [vmem:[#allocation9 + $0xdd8] sm:$0xff]  ;;  %v8618_v48 = vrot.slane %v8603_v1, %v14790_v9  ;;  %v8625_v5 = vrot.slane %v8602_v27, %v14790_v9 }
 0x3d9   :  { %8029 = vmatpush1.msra.mxu1 %v7385_v50  ;;  %8106 = vmatpush1.msra.mxu0 %v7513_v15  ;;  %v8632_v50 = vrot.slane %v8604_v33, %v14790_v9  ;;  %v7477_v15 = vld [vmem:[#allocation9 + $0xad0] sm:$0xff] }
 0x3da   :  { %8030 = vmatprep.subr.mxu1 %v7382_v11  ;;  %8107 = vmatprep.subr.mxu0 %v7510_v10  ;;  %v7573_v11 = vld [vmem:[#allocation9 + $0xdd0] sm:$0xff]  ;;  %v7474_v10 = vld [vmem:[#allocation9 + $0xab8] sm:$0xff] }
 0x3db   :  { %8031 = vmatpush1.msra.mxu1 %v7381_v57  ;;  %8108 = vmatpush1.msra.mxu0 %v7509_v13  ;;  %v7570_v57 = vld [vmem:[#allocation9 + $0xdb8] sm:$0xff]  ;;  %v7473_v13 = vld [vmem:[#allocation9 + $0xab0] sm:$0xff]  ;;  %v8636_v21 = vcombine.high %v8632_v50, %v8632_v50 }
 0x3dc   :  { %8032 = vmatprep.subr.mxu1 %v7378_v37  ;;  %8109 = vmatprep.subr.mxu0 %v7506_v29  ;;  %v8633_v37 = vcombine.high %v8611_v52, %v8611_v52  ;;  %v7470_v29 = vld [vmem:[#allocation9 + $0xa98] sm:$0xff] }
 0x3dd   :  { %8033 = vmatpush1.msra.mxu1 %v7377_v12  ;;  %8110 = vmatpush1.msra.mxu0 %v7505_v26  ;;  %v8634_v12 = vcombine.high %v8618_v48, %v8618_v48  ;;  %v8635_v26 = vcombine.high %v8625_v5, %v8625_v5 }
 0x3de   :  { %8034 = vmatprep.subr.mxu1 %v7374_v38  ;;  %8111 = vmatprep.subr.mxu0 %v7502_v49  ;;  %v7469_v38 = vld [vmem:[#allocation9 + $0xa90] sm:$0xff] }
 0x3df   :  { %8035 = vmatpush1.msra.mxu1 %v7373_v43  ;;  %8112 = vmatpush1.msra.mxu0 %v7501_v36  ;;  %v7565_v49 = vld [vmem:[#allocation9 + $0xd90] sm:$0xff]  ;;  %v7562_v43 = vld [vmem:[#allocation9 + $0xd78] sm:$0xff]  ;;  %v8708_v36 = vcombine.low %v8636_v21, %v16774_v55  ;;  %v8706_v62 = vcombine.low %v8635_v26, %v8618_v48  ;;  %v8397_v48 = vld [vmem:[#allocation9 + $0xfe0] sm:$0xff] }
 0x3e0   :  { %8036 = vmatprep.subr.mxu1 %v7370_v63  ;;  %8113 = vmatprep.subr.mxu0 %v7498_v23  ;;  %v7465_v63 = vld [vmem:[#allocation9 + $0xa70] sm:$0xff] }
 0x3e1   :  { %8037 = vmatpush1.msra.mxu1 %v7369_v56  ;;  %8114 = vmatpush1.msra.mxu0 %v7497_v41  ;;  %v7561_v23 = vld [vmem:[#allocation9 + $0xd70] sm:$0xff]  ;;  %v8705_v56 = vcombine.low %v8625_v5, %v8633_v37  ;;  %v7462_v41 = vld [vmem:[#allocation9 + $0xa58] sm:$0xff]  ;;  %v16931_v1 = vrot.slane %v8706_v62, %v14790_v9  ;;  %v8393_v37 = vld [vmem:[#allocation9 + $0xfc0] sm:$0xff] }
 0x3e2   :  { %8038 = vmatprep.subr.mxu1 %v7366_v4  ;;  %8115 = vmatprep.subr.mxu0 %v7494_v8  ;;  %v8707_v4 = vcombine.low %v8632_v50, %v8634_v12  ;;  %v7461_v8 = vld [vmem:[#allocation9 + $0xa50] sm:$0xff]  ;;  %v7442_v12 = vld [vmem:[#allocation9 + $0x9b8] sm:$0xff] }
 0x3e3   :  { %8039 = vmatpush1.msra.mxu1 %v7365_v14  ;;  %8116 = vmatpush1.msra.mxu0 %v7493_v17  ;;  %v7554_v14 = vld [vmem:[#allocation9 + $0xd38] sm:$0xff]  ;;  %v16923_v17 = vrot.slane %v8708_v36, %v14790_v9  ;;  %v16926_v51 = vrot.slane %v8705_v56, %v14790_v9  ;;  %v8389_v36 = vld [vmem:[#allocation9 + $0xfa0] sm:$0xff]  ;;  %v8386_v56 = vld [vmem:[#allocation9 + $0xf88] sm:$0xff] }
 0x3e4   :  { %8040 = vmatprep.subr.mxu1 %v7362_v61  ;;  %8117 = vmatprep.subr.mxu0 %v7490_v40  ;;  %v7457_v61 = vld [vmem:[#allocation9 + $0xa30] sm:$0xff]  ;;  %v16934_v33 = vrot.slane %v8707_v4, %v14790_v9  ;;  %v8385_v4 = vld [vmem:[#allocation9 + $0xf80] sm:$0xff] }
 0x3e5   :  { %8041 = vmatpush1.msra.mxu1 %v7361_v35  ;;  %8118 = vmatpush1.msra.mxu0 %v7489_v31  ;;  %v7553_v40 = vld [vmem:[#allocation9 + $0xd30] sm:$0xff] }
 0x3e6   :  { %8042 = vmatprep.subr.mxu1 %v7358_v46  ;;  %8119 = vmatprep.subr.mxu0 %v7486_v19  ;;  %v7454_v46 = vld [vmem:[#allocation9 + $0xa18] sm:$0xff]  ;;  %v8740_v52 = vcombine.high %v16934_v33, %v16923_v17  ;;  %v7437_v62 = vld [vmem:[#allocation9 + $0x990] sm:$0xff]  ;;  %v8739_v55 = vcombine.low %v16934_v33, %v16923_v17  ;;  %v8413_v17 = vld [vmem:[#allocation9 + $0x1060] sm:$0xff] }
 0x3e7   :  { %8043 = vmatpush1.msra.mxu1 %v7357_v0  ;;  %8120 = vmatpush1.msra.mxu0 %v7485_v34  ;;  %v7550_v19 = vld [vmem:[#allocation9 + $0xd18] sm:$0xff]  ;;  %v7453_v0 = vld [vmem:[#allocation9 + $0xa10] sm:$0xff]  ;;  %v8541_v33 = vld [vmem:[#allocation9 + $0x1460] sm:$0xff] }
 0x3e8   :  { %8044 = vmatprep.subr.mxu1 %v7482_v47  ;;  %8137 = vmatprep.subr.mxu0 %v7578_v3  ;;  %v7549_v34 = vld [vmem:[#allocation9 + $0xd10] sm:$0xff] }
 0x3e9   :  { %8045 = vmatpush2.msra.mxu1 %v7481_v58  ;;  %8138 = vmatpush2.msra.mxu0 %v7577_v24  ;;  %v7450_v58 = vld [vmem:[#allocation9 + $0x9f8] sm:$0xff] }
 0x3ea   :  { %8046 = vmatprep.subr.mxu1 %v7478_v60  ;;  %8139 = vmatprep.subr.mxu0 %v7574_v6  ;;  %v8398_v60 = vld [vmem:[#allocation9 + $0xfe8] sm:$0xff]  ;;  %v7449_v6 = vld [vmem:[#allocation9 + $0x9f0] sm:$0xff] }
 0x3eb   :  { %8047 = vmatpush2.msra.mxu1 %v7477_v15  ;;  %8140 = vmatpush2.msra.mxu0 %v7573_v11  ;;  %v8738_v15 = vcombine.high %v16926_v51, %v16931_v1  ;;  %v7446_v11 = vld [vmem:[#allocation9 + $0x9d8] sm:$0xff] }
 0x3ec   :  { %8048 = vmatprep.subr.mxu1 %v7474_v10  ;;  %8141 = vmatprep.subr.mxu0 %v7570_v57  ;;  %v8394_v10 = vld [vmem:[#allocation9 + $0xfc8] sm:$0xff] }
 0x3ed   :  { %8049 = vmatpush2.msra.mxu1 %v7473_v13  ;;  %8142 = vmatpush2.msra.mxu0 %v7569_v30  ;;  %v7445_v30 = vld [vmem:[#allocation9 + $0x9d0] sm:$0xff] }
 0x3ee   :  { %8050 = vmatprep.subr.mxu1 %v7470_v29  ;;  %8143 = vmatprep.subr.mxu0 %v7566_v45  ;;  %v16950_v45 = vrot.slane %v8740_v52, %v14790_v9  ;;  %v8369_v52 = vld [vmem:[#allocation9 + $0xf00] sm:$0xff] }
 0x3ef   :  { %8051 = vmatpush2.msra.mxu1 %v7469_v38  ;;  %8144 = vmatpush2.msra.mxu0 %v7565_v49  ;;  %v8390_v38 = vld [vmem:[#allocation9 + $0xfa8] sm:$0xff]  ;;  %v7441_v49 = vld [vmem:[#allocation9 + $0x9b0] sm:$0xff] }
 0x3f0   :  { %8052 = vmatprep.subr.mxu1 %v7466_v44  ;;  %8145 = vmatprep.subr.mxu0 %v7562_v43  ;;  %v16955_v44 = vrot.slane %v8738_v15, %v14790_v9  ;;  %v8525_v15 = vld [vmem:[#allocation9 + $0x13e0] sm:$0xff] }
 0x3f1   :  { %8053 = vmatpush2.msra.mxu1 %v7465_v63  ;;  %8146 = vmatpush2.msra.mxu0 %v7561_v23  ;;  %v7438_v23 = vld [vmem:[#allocation9 + $0x998] sm:$0xff] }
 0x3f2   :  { %8054 = vmatprep.subr.mxu1 %v7462_v41  ;;  %8147 = vmatprep.subr.mxu0 %v7558_v32  ;;  %v6956_v35 = vpop.f32.mrf.mxu0  ;;  %v7033_v31 = vpop.f32.mrf.mxu1  ;;  %v16962_v63 = vcombine.low %v16955_v44, %v16950_v45 }
 0x3f3   :  { %8055 = vmatpush2.msra.mxu1 %v7461_v8  ;;  %8148 = vmatpush2.msra.mxu0 %v7557_v39  ;;  %v16928_v27 = vadd.f32 %v7033_v31, %v6956_v35  ;;  %v7434_v8 = vld [vmem:[#allocation9 + $0x978] sm:$0xff]  ;;  %v8382_v39 = vld [vmem:[#allocation9 + $0xf68] sm:$0xff]  ;;  %v7429_v35 = vld [vmem:[#allocation9 + $0x950] sm:$0xff] }
 0x3f4   :  { %8056 = vmatprep.subr.mxu1 %v7458_v2  ;;  %8149 = vmatprep.subr.mxu0 %v7554_v14  ;;  %v6958_v47 = vpop.f32.mrf.mxu0  ;;  %v7035_v3 = vpop.f32.mrf.mxu1  ;;  %v7433_v2 = vld [vmem:[#allocation9 + $0x970] sm:$0xff]  ;;  %v8381_v14 = vld [vmem:[#allocation9 + $0xf60] sm:$0xff] }
 0x3f5   :  { %8057 = vmatpush2.msra.mxu1 %v7457_v61  ;;  %8150 = vmatpush2.msra.mxu0 %v7553_v40  ;;  %v16936_v24 = vadd.f32 %v7035_v3, %v6958_v47  ;;  %v7430_v61 = vld [vmem:[#allocation9 + $0x958] sm:$0xff]  ;;  %v8378_v40 = vld [vmem:[#allocation9 + $0xf48] sm:$0xff]  ;;  %v8377_v31 = vld [vmem:[#allocation9 + $0xf40] sm:$0xff] }
 0x3f6   :  { %8058 = vmatprep.subr.mxu1 %v7454_v46  ;;  %8151 = vmatprep.subr.mxu0 %v7550_v19  ;;  %v7426_v46 = vld [vmem:[#allocation9 + $0x938] sm:$0xff]  ;;  %v8374_v19 = vld [vmem:[#allocation9 + $0xf28] sm:$0xff] }
 0x3f7   :  { %8059 = vmatpush2.msra.mxu1 %v7453_v0  ;;  %8152 = vmatpush2.msra.mxu0 %v7549_v34  ;;  %v7206_v5 = vcombine.low %v16928_v27, %v16936_v24  ;;  %v7207_v50 = vcombine.high %v16928_v27, %v16936_v24  ;;  %v7425_v0 = vld [vmem:[#allocation9 + $0x930] sm:$0xff]  ;;  %v8373_v34 = vld [vmem:[#allocation9 + $0xf20] sm:$0xff]  ;;  %v7422_v47 = vld [vmem:[#allocation9 + $0x918] sm:$0xff] }
 0x3f8   :  { %8060 = vmatprep.subr.mxu1 %v7450_v58  ;;  %8154 = vmatmul.mubr.f32.vlgmr.msra.gmra.mxu0 %v16886_v18  ;;  %v6962_v57 = vpop.f32.mrf.mxu0  ;;  %v7039_v13 = vpop.f32.mrf.mxu1  ;;  %v8370_v3 = vld [vmem:[#allocation9 + $0xf08] sm:$0xff]  ;;  %v7421_v58 = vld [vmem:[#allocation9 + $0x910] sm:$0xff]  ;;  %v8396_v24 = vld [vmem:[#allocation9 + $0xfd8] sm:$0xff] }
 0x3f9   :  { %8842 = vmatprep.subr.mxu0 %v8398_v60  ;;  %8061 = vmatpush2.msra.mxu1 %v7449_v6  ;;  %v16947_v29 = vadd.f32 %v7039_v13, %v6962_v57  ;;  %v8366_v60 = vld [vmem:[#allocation9 + $0xee8] sm:$0xff]  ;;  %v8361_v57 = vld [vmem:[#allocation9 + $0xec0] sm:$0xff] }
 0x3fa   :  { %13415 = vmatprep.mubr.msk.f32.mxu0 %vm6885_vm6, %v16897_v54  ;;  %8843 = vmatpush1.msra.mxu0 %v8397_v48  ;;  %v6964_v26 = vpop.f32.mrf.mxu0  ;;  %v7041_v21 = vpop.f32.mrf.mxu1  ;;  %v8526_v6 = vld [vmem:[#allocation9 + $0x13e8] sm:$0xff]  ;;  %v8365_v48 = vld [vmem:[#allocation9 + $0xee0] sm:$0xff] }
 0x3fb   :  { %8062 = vmatprep.subr.mxu1 %v7446_v11  ;;  %8844 = vmatprep.subr.mxu0 %v8394_v10  ;;  %v16957_v43 = vadd.f32 %v7041_v21, %v6964_v26  ;;  %v8362_v11 = vld [vmem:[#allocation9 + $0xec8] sm:$0xff]  ;;  %v8521_v13 = vld [vmem:[#allocation9 + $0x13c0] sm:$0xff]  ;;  %v16974_v21 = vcombine.high %v16955_v44, %v16950_v45 }
 0x3fc   :  { %8063 = vmatpush2.msra.mxu1 %v7445_v30  ;;  %8845 = vmatpush1.msra.mxu0 %v8393_v37  ;;  %v8522_v10 = vld [vmem:[#allocation9 + $0x13c8] sm:$0xff]  ;;  %v8517_v26 = vld [vmem:[#allocation9 + $0x13a0] sm:$0xff] }
 0x3fd   :  { %8064 = vmatprep.subr.mxu1 %v7442_v12  ;;  %8160 = vmatmul.mubr.f32.gmra.mxu0 %v16906_v7  ;;  %v7274_v41 = vcombine.low %v16947_v29, %v16957_v43  ;;  %v7275_v32 = vcombine.high %v16947_v29, %v16957_v43  ;;  %v8358_v30 = vld [vmem:[#allocation9 + $0xea8] sm:$0xff]  ;;  %v8357_v12 = vld [vmem:[#allocation9 + $0xea0] sm:$0xff] }
 0x3fe   :  { %8846 = vmatprep.subr.mxu0 %v8390_v38  ;;  %8065 = vmatpush2.msra.mxu1 %v7441_v49  ;;  %v8518_v37 = vld [vmem:[#allocation9 + $0x13a8] sm:$0xff] }
 0x3ff   :  { %8847 = vmatpush1.msra.mxu0 %v8389_v36  ;;  %8906 = vmatprep.mubr.f32.mxu0 %v16962_v63  ;;  %v8354_v38 = vld [vmem:[#allocation9 + $0xe88] sm:$0xff]  ;;  %v8353_v36 = vld [vmem:[#allocation9 + $0xe80] sm:$0xff] }
 0x400   :  { %8066 = vmatprep.subr.mxu1 %v7438_v23  ;;  %8848 = vmatprep.subr.mxu0 %v8386_v56  ;;  %v8514_v49 = vld [vmem:[#allocation9 + $0x1388] sm:$0xff]  ;;  %v8513_v23 = vld [vmem:[#allocation9 + $0x1380] sm:$0xff] }
 0x401   :  { %8067 = vmatpush2.msra.mxu1 %v7437_v62  ;;  %8849 = vmatpush1.msra.mxu0 %v8385_v4  ;;  %v8350_v56 = vld [vmem:[#allocation9 + $0xe68] sm:$0xff]  ;;  %v8349_v4 = vld [vmem:[#allocation9 + $0xe60] sm:$0xff] }
 0x402   :  { %8068 = vmatprep.subr.mxu1 %v7434_v8  ;;  %8850 = vmatprep.subr.mxu0 %v8382_v39  ;;  %v8510_v62 = vld [vmem:[#allocation9 + $0x1368] sm:$0xff]  ;;  %v8509_v8 = vld [vmem:[#allocation9 + $0x1360] sm:$0xff] }
 0x403   :  { %8069 = vmatpush2.msra.mxu1 %v7433_v2  ;;  %8851 = vmatpush1.msra.mxu0 %v8381_v14  ;;  %v8346_v45 = vld [vmem:[#allocation9 + $0xe48] sm:$0xff]  ;;  %v8345_v39 = vld [vmem:[#allocation9 + $0xe40] sm:$0xff] }
 0x404   :  { %8070 = vmatprep.subr.mxu1 %v7430_v61  ;;  %8852 = vmatprep.subr.mxu0 %v8378_v40  ;;  %v8506_v44 = vld [vmem:[#allocation9 + $0x1348] sm:$0xff]  ;;  %v8505_v2 = vld [vmem:[#allocation9 + $0x1340] sm:$0xff] }
 0x405   :  { %8071 = vmatpush2.msra.mxu1 %v7429_v35  ;;  %8853 = vmatpush1.msra.mxu0 %v8377_v31  ;;  %v8342_v14 = vld [vmem:[#allocation9 + $0xe28] sm:$0xff]  ;;  %v8341_v40 = vld [vmem:[#allocation9 + $0xe20] sm:$0xff] }
 0x406   :  { %8072 = vmatprep.subr.mxu1 %v7426_v46  ;;  %8854 = vmatprep.subr.mxu0 %v8374_v19  ;;  %v8502_v61 = vld [vmem:[#allocation9 + $0x1328] sm:$0xff]  ;;  %v8501_v35 = vld [vmem:[#allocation9 + $0x1320] sm:$0xff] }
 0x407   :  { %8073 = vmatpush2.msra.mxu1 %v7425_v0  ;;  %8855 = vmatpush1.msra.mxu0 %v8373_v34  ;;  %v8338_v31 = vld [vmem:[#allocation9 + $0xe08] sm:$0xff]  ;;  %v8337_v19 = vld [vmem:[#allocation9 + $0xe00] sm:$0xff] }
 0x408   :  { %8074 = vmatprep.subr.mxu1 %v7422_v47  ;;  %8856 = vmatprep.subr.mxu0 %v8370_v3  ;;  %v8498_v46 = vld [vmem:[#allocation9 + $0x1308] sm:$0xff]  ;;  %v8497_v0 = vld [vmem:[#allocation9 + $0x1300] sm:$0xff] }
 0x409   :  { %8075 = vmatpush2.msra.mxu1 %v7421_v58  ;;  %8857 = vmatpush1.msra.mxu0 %v8369_v52  ;;  %v13807_v34 = vld [vmem:[#allocation3 + $0x24] ss:$8 sps:$4 sm:$0xff]   ;;  %v13808_v58 = vld [vmem:[#allocation3 + $0x34] ss:$8 sps:$4 sm:$0xff]  }
 0x40a   :  { %8077 = vmatmul.mubr.f32.vlgmr.msra.gmra.mxu1 %v16884_v20  ;;  %8858 = vmatprep.subr.mxu0 %v8366_v60  ;;  %v8462_v47 = vld [vmem:[#allocation9 + $0x11e8] sm:$0xff]  ;;  %v8461_v52 = vld [vmem:[#allocation9 + $0x11e0] sm:$0xff] }
 0x40b   :  { %8919 = vmatprep.subr.mxu1 %v8526_v6  ;;  %8082 = vmatprep.mubr.f32.mxu1 %v16895_v42  ;;  %v8494_v3 = vld [vmem:[#allocation9 + $0x12e8] sm:$0xff]  ;;  %v8493_v60 = vld [vmem:[#allocation9 + $0x12e0] sm:$0xff] }
 0x40c   :  { %8859 = vmatpush1.msra.mxu0 %v8365_v48  ;;  %8920 = vmatpush1.msra.mxu1 %v8525_v15  ;;  %v8458_v6 = vld [vmem:[#allocation9 + $0x11c8] sm:$0xff]  ;;  %v8457_v15 = vld [vmem:[#allocation9 + $0x11c0] sm:$0xff] }
 0x40d   :  { %8860 = vmatprep.subr.mxu0 %v8362_v11  ;;  %8921 = vmatprep.subr.mxu1 %v8522_v10  ;;  %v8490_v48 = vld [vmem:[#allocation9 + $0x12c8] sm:$0xff]  ;;  %v8489_v11 = vld [vmem:[#allocation9 + $0x12c0] sm:$0xff] }
 0x40e   :  { %8861 = vmatpush1.msra.mxu0 %v8361_v57  ;;  %8922 = vmatpush1.msra.mxu1 %v8521_v13  ;;  %v8454_v10 = vld [vmem:[#allocation9 + $0x11a8] sm:$0xff]  ;;  %v8654_v13 = vrot.slane %v13807_v34, %v14790_v9 }
 0x40f   :  { %8083 = vmatmul.mubr.f32.gmra.mxu1 %v16904_v25  ;;  %8862 = vmatprep.subr.mxu0 %v8358_v30  ;;  %v8486_v57 = vld [vmem:[#allocation9 + $0x12a8] sm:$0xff]  ;;  %v8668_v30 = vrot.slane %v13808_v58, %v14790_v9 }
 0x410   :  { %8923 = vmatprep.subr.mxu1 %v8518_v37  ;;  %8863 = vmatpush1.msra.mxu0 %v8357_v12  ;;  %v8453_v37 = vld [vmem:[#allocation9 + $0x11a0] sm:$0xff]  ;;  %v8466_v34 = vld [vmem:[#allocation9 + $0x1208] sm:$0xff] }
 0x411   :  { %8924 = vmatpush1.msra.mxu1 %v8517_v26  ;;  %13418 = vmatprep.mubr.msk.f32.mxu1 %vm6885_vm6, %v16974_v21  ;;  %v8485_v12 = vld [vmem:[#allocation9 + $0x12a0] sm:$0xff]  ;;  %v8450_v26 = vld [vmem:[#allocation9 + $0x1188] sm:$0xff] }
 0x412   :  { %8864 = vmatprep.subr.mxu0 %v8354_v38  ;;  %8925 = vmatprep.subr.mxu1 %v8514_v49  ;;  %v8482_v38 = vld [vmem:[#allocation9 + $0x1288] sm:$0xff]  ;;  %v8449_v49 = vld [vmem:[#allocation9 + $0x1180] sm:$0xff] }
 0x413   :  { %8865 = vmatpush1.msra.mxu0 %v8353_v36  ;;  %8926 = vmatpush1.msra.mxu1 %v8513_v23  ;;  %v8481_v36 = vld [vmem:[#allocation9 + $0x1280] sm:$0xff]  ;;  %v8446_v23 = vld [vmem:[#allocation9 + $0x1168] sm:$0xff] }
 0x414   :  { %8866 = vmatprep.subr.mxu0 %v8350_v56  ;;  %8927 = vmatprep.subr.mxu1 %v8510_v62  ;;  %v8478_v56 = vld [vmem:[#allocation9 + $0x1268] sm:$0xff]  ;;  %v8671_v62 = vcombine.low %v8654_v13, %v8668_v30 }
 0x415   :  { %8867 = vmatpush1.msra.mxu0 %v8349_v4  ;;  %8928 = vmatpush1.msra.mxu1 %v8509_v8  ;;  %v8672_v4 = vcombine.high %v8654_v13, %v8668_v30  ;;  %v8445_v8 = vld [vmem:[#allocation9 + $0x1160] sm:$0xff]  ;;  %v8430_v58 = vld [vmem:[#allocation9 + $0x10e8] sm:$0xff] }
 0x416   :  { %8868 = vmatprep.subr.mxu0 %v8346_v45  ;;  %8929 = vmatprep.subr.mxu1 %v8506_v44  ;;  %v8477_v45 = vld [vmem:[#allocation9 + $0x1260] sm:$0xff]  ;;  %v8442_v44 = vld [vmem:[#allocation9 + $0x1148] sm:$0xff] }
 0x417   :  { %8869 = vmatpush1.msra.mxu0 %v8345_v39  ;;  %8930 = vmatpush1.msra.mxu1 %v8505_v2  ;;  %v8474_v39 = vld [vmem:[#allocation9 + $0x1248] sm:$0xff]  ;;  %v8441_v2 = vld [vmem:[#allocation9 + $0x1140] sm:$0xff] }
 0x418   :  { %8870 = vmatprep.subr.mxu0 %v8342_v14  ;;  %8931 = vmatprep.subr.mxu1 %v8502_v61  ;;  %v8473_v14 = vld [vmem:[#allocation9 + $0x1240] sm:$0xff]  ;;  %v8438_v61 = vld [vmem:[#allocation9 + $0x1128] sm:$0xff] }
 0x419   :  { %8871 = vmatpush1.msra.mxu0 %v8341_v40  ;;  %8932 = vmatpush1.msra.mxu1 %v8501_v35  ;;  %v8470_v40 = vld [vmem:[#allocation9 + $0x1228] sm:$0xff]  ;;  %v8686_v35 = vrot.slane %v8671_v62, %v14790_v9  ;;  %v8553_v13 = vld [vmem:[#allocation9 + $0x14c0] sm:$0xff] }
 0x41a   :  { %8872 = vmatprep.subr.mxu0 %v8338_v31  ;;  %8933 = vmatprep.subr.mxu1 %v8498_v46  ;;  %v8700_v31 = vrot.slane %v8672_v4, %v14790_v9  ;;  %v8437_v46 = vld [vmem:[#allocation9 + $0x1120] sm:$0xff]  ;;  %v8422_v30 = vld [vmem:[#allocation9 + $0x10a8] sm:$0xff] }
 0x41b   :  { %8873 = vmatpush1.msra.mxu0 %v8337_v19  ;;  %8934 = vmatpush1.msra.mxu1 %v8497_v0  ;;  %v8469_v19 = vld [vmem:[#allocation9 + $0x1220] sm:$0xff]  ;;  %v8434_v0 = vld [vmem:[#allocation9 + $0x1108] sm:$0xff] }
 0x41c   :  { %8874 = vmatprep.subr.mxu0 %v8462_v47  ;;  %8935 = vmatprep.subr.mxu1 %v8494_v3  ;;  %v8433_v47 = vld [vmem:[#allocation9 + $0x1100] sm:$0xff]  ;;  %v8546_v62 = vld [vmem:[#allocation9 + $0x1488] sm:$0xff] }
 0x41d   :  { %8875 = vmatpush2.msra.mxu0 %v8461_v52  ;;  %8936 = vmatpush1.msra.mxu1 %v8493_v60  ;;  %v8465_v3 = vld [vmem:[#allocation9 + $0x1200] sm:$0xff]  ;;  %v8558_v52 = vld [vmem:[#allocation9 + $0x14e8] sm:$0xff]  ;;  %v8774_v60 = vcombine.low %v8686_v35, %v8700_v31 }
 0x41e   :  { %8876 = vmatprep.subr.mxu0 %v8458_v6  ;;  %8937 = vmatprep.subr.mxu1 %v8490_v48  ;;  %v13417_v6 = vcombine.high %v8686_v35, %v8700_v31  ;;  %v8429_v48 = vld [vmem:[#allocation9 + $0x10e0] sm:$0xff]  ;;  %v8414_v4 = vld [vmem:[#allocation9 + $0x1068] sm:$0xff]  ;;  %v8761_v31 = vrot.slane %v8739_v55, %v14790_v9  ;;  %v17019_v55 = vrot.slane %v7206_v5, %v14790_v9 }
 0x41f   :  { %8877 = vmatpush2.msra.mxu0 %v8457_v15  ;;  %8938 = vmatpush1.msra.mxu1 %v8489_v11  ;;  %v8557_v15 = vld [vmem:[#allocation9 + $0x14e0] sm:$0xff]  ;;  %v8426_v11 = vld [vmem:[#allocation9 + $0x10c8] sm:$0xff] }
 0x420   :  { %8878 = vmatprep.subr.mxu0 %v8454_v10  ;;  %8939 = vmatprep.subr.mxu1 %v8486_v57  ;;  %v8554_v10 = vld [vmem:[#allocation9 + $0x14c8] sm:$0xff]  ;;  %v8425_v57 = vld [vmem:[#allocation9 + $0x10c0] sm:$0xff] }
 0x421   :  { %8879 = vmatpush2.msra.mxu0 %v8453_v37  ;;  %8940 = vmatpush1.msra.mxu1 %v8485_v12  ;;  %v8550_v37 = vld [vmem:[#allocation9 + $0x14a8] sm:$0xff]  ;;  %v16986_v12 = vrot.slane %v13416_v28, %v14790_v9  ;;  %v8545_v28 = vld [vmem:[#allocation9 + $0x1480] sm:$0xff] }
 0x422   :  { %8880 = vmatprep.subr.mxu0 %v8450_v26  ;;  %8941 = vmatprep.subr.mxu1 %v8482_v38  ;;  %v16989_v26 = vrot.slane %v8774_v60, %v14790_v9  ;;  %v16992_v38 = vrot.slane %v13417_v6, %v14790_v9  ;;  %v8537_v35 = vld [vmem:[#allocation9 + $0x1440] sm:$0xff]  ;;  %v8402_v6 = vld [vmem:[#allocation9 + $0x1008] sm:$0xff] }
 0x423   :  { %8881 = vmatpush2.msra.mxu0 %v8449_v49  ;;  %8942 = vmatpush1.msra.mxu1 %v8481_v36  ;;  %v8421_v49 = vld [vmem:[#allocation9 + $0x10a0] sm:$0xff] }
 0x424   :  { %8882 = vmatprep.subr.mxu0 %v8446_v23  ;;  %8943 = vmatprep.subr.mxu1 %v8478_v56  ;;  %v8549_v36 = vld [vmem:[#allocation9 + $0x14a0] sm:$0xff]  ;;  %v8418_v56 = vld [vmem:[#allocation9 + $0x1088] sm:$0xff] }
 0x425   :  { %8883 = vmatpush2.msra.mxu0 %v8445_v8  ;;  %8944 = vmatpush1.msra.mxu1 %v8477_v45  ;;  %v7187_v23 = vpop.f32.mrf.mxu0  ;;  %v8542_v8 = vld [vmem:[#allocation9 + $0x1468] sm:$0xff]  ;;  %v8798_v45 = vcombine.high %v16986_v12, %v16989_v26 }
 0x426   :  { %8884 = vmatprep.subr.mxu0 %v8442_v44  ;;  %8945 = vmatprep.subr.mxu1 %v8474_v39  ;;  %v8799_v44 = vcombine.high %v16992_v38, %v16992_v38  ;;  %v8737_v39 = vcombine.low %v16926_v51, %v16931_v1 }
 0x427   :  { %8885 = vmatpush2.msra.mxu0 %v8441_v2  ;;  %8946 = vmatpush1.msra.mxu1 %v8473_v14  ;;  %v7189_v2 = vpop.f32.mrf.mxu0  ;;  %v8410_v14 = vld [vmem:[#allocation9 + $0x1048] sm:$0xff]  ;;  %v8813_v1 = vrot.slane %v8798_v45, %v14790_v9  ;;  %v8399_v45 = vld [vmem:[#allocation9 + $0xff0] sm:$0xff] }
 0x428   :  { %8886 = vmatprep.subr.mxu0 %v8438_v61  ;;  %8947 = vmatprep.subr.mxu1 %v8470_v40  ;;  %v8538_v61 = vld [vmem:[#allocation9 + $0x1448] sm:$0xff]  ;;  %v8409_v40 = vld [vmem:[#allocation9 + $0x1040] sm:$0xff] }
 0x429   :  { %8887 = vmatpush2.msra.mxu0 %v8437_v46  ;;  %8948 = vmatpush1.msra.mxu1 %v8469_v19  ;;  %v8406_v46 = vld [vmem:[#allocation9 + $0x1028] sm:$0xff]  ;;  %v7193_v60 = vpop.f32.mrf.mxu0 }
 0x42a   :  { %8888 = vmatprep.subr.mxu0 %v8434_v0  ;;  %8949 = vmatprep.subr.mxu1 %v8466_v34  ;;  %v8534_v19 = vld [vmem:[#allocation9 + $0x1428] sm:$0xff]  ;;  %v8827_v0 = vrot.slane %v8799_v44, %v14790_v9  ;;  %v8797_v34 = vcombine.low %v16986_v12, %v16989_v26  ;;  %v8527_v44 = vld [vmem:[#allocation9 + $0x13f0] sm:$0xff] }
 0x42b   :  { %8889 = vmatpush2.msra.mxu0 %v8433_v47  ;;  %8950 = vmatpush1.msra.mxu1 %v8465_v3  ;;  %v8405_v47 = vld [vmem:[#allocation9 + $0x1020] sm:$0xff] }
 0x42c   :  { %8890 = vmatprep.subr.mxu0 %v8430_v58  ;;  %8967 = vmatprep.subr.mxu1 %v8558_v52  ;;  %v8533_v3 = vld [vmem:[#allocation9 + $0x1420] sm:$0xff]  ;;  %v8747_v52 = vrot.slane %v8737_v39, %v14790_v9  ;;  %v8806_v26 = vrot.slane %v8797_v34, %v14790_v9  ;;  %v8391_v34 = vld [vmem:[#allocation9 + $0xfb0] sm:$0xff] }
 0x42d   :  { %8891 = vmatpush2.msra.mxu0 %v8429_v48  ;;  %8968 = vmatpush2.msra.mxu1 %v8557_v15  ;;  %v8530_v48 = vld [vmem:[#allocation9 + $0x1408] sm:$0xff] }
 0x42e   :  { %8892 = vmatprep.subr.mxu0 %v8426_v11  ;;  %8969 = vmatprep.subr.mxu1 %v8554_v10  ;;  %v8401_v11 = vld [vmem:[#allocation9 + $0x1000] sm:$0xff] }
 0x42f   :  { %8893 = vmatpush2.msra.mxu0 %v8425_v57  ;;  %8970 = vmatpush2.msra.mxu1 %v8553_v13  ;;  %v8529_v10 = vld [vmem:[#allocation9 + $0x1400] sm:$0xff]  ;;  %v17008_v57 = vcombine.low %v8747_v52, %v8761_v31 }
 0x430   :  { %8894 = vmatprep.subr.mxu0 %v8422_v30  ;;  %8971 = vmatprep.subr.mxu1 %v8550_v37  ;;  %v17010_v30 = vcombine.high %v8747_v52, %v8761_v31  ;;  %v17012_v37 = vcombine.low %v8813_v1, %v8827_v0 }
 0x431   :  { %8895 = vmatpush2.msra.mxu0 %v8421_v49  ;;  %8972 = vmatpush2.msra.mxu1 %v8549_v36  ;;  %v8400_v49 = vld [vmem:[#allocation9 + $0xff8] sm:$0xff] }
 0x432   :  { %8896 = vmatprep.subr.mxu0 %v8418_v56  ;;  %8973 = vmatprep.subr.mxu1 %v8546_v62  ;;  %v8528_v36 = vld [vmem:[#allocation9 + $0x13f8] sm:$0xff] }
 0x433   :  { %8897 = vmatpush2.msra.mxu0 %v8417_v22  ;;  %8974 = vmatpush2.msra.mxu1 %v8545_v28  ;;  %v17025_v22 = vrot.slane %v7207_v50, %v14790_v9  ;;  %v7195_v28 = vpop.f32.mrf.mxu0  ;;  %v8524_v50 = vld [vmem:[#allocation9 + $0x13d8] sm:$0xff] }
 0x434   :  { %8898 = vmatprep.subr.mxu0 %v8414_v4  ;;  %8975 = vmatprep.subr.mxu1 %v8542_v8  ;;  %v17027_v4 = vcombine.high %v8813_v1, %v8827_v0  ;;  %v8520_v1 = vld [vmem:[#allocation9 + $0x13b8] sm:$0xff]  ;;  %v17058_v0 = vrot.slane %v7274_v41, %v14790_v9  ;;  %v8519_v41 = vld [vmem:[#allocation9 + $0x13b0] sm:$0xff] }
 0x435   :  { %8899 = vmatpush2.msra.mxu0 %v8413_v17  ;;  %8976 = vmatpush2.msra.mxu1 %v8541_v33  ;;  %v7110_v51 = vpop.f32.mrf.mxu1  ;;  %v8820_v17 = vrot.slane %v16992_v38, %v14790_v9 }
 0x436   :  { %8900 = vmatprep.subr.mxu0 %v8410_v14  ;;  %8977 = vmatprep.subr.mxu1 %v8538_v61  ;;  %v7188_v58 = vadd.f32 %v7187_v23, %v7110_v51  ;;  %v8395_v61 = vld [vmem:[#allocation9 + $0xfd0] sm:$0xff]  ;;  %v8392_v51 = vld [vmem:[#allocation9 + $0xfb8] sm:$0xff] }
 0x437   :  { %8901 = vmatpush2.msra.mxu0 %v8409_v40  ;;  %8978 = vmatpush2.msra.mxu1 %v8537_v35  ;;  %v7112_v15 = vpop.f32.mrf.mxu1  ;;  %v8523_v40 = vld [vmem:[#allocation9 + $0x13d0] sm:$0xff] }
 0x438   :  { %8902 = vmatprep.subr.mxu0 %v8406_v46  ;;  %8979 = vmatprep.subr.mxu1 %v8534_v19  ;;  %v7190_v13 = vadd.f32 %v7189_v2, %v7112_v15  ;;  %v17050_v46 = vcombine.low %v8806_v26, %v8820_v17  ;;  %v17052_v19 = vcombine.high %v8806_v26, %v8820_v17  ;;  %v8515_v15 = vld [vmem:[#allocation9 + $0x1390] sm:$0xff]  ;;  %v8380_v26 = vld [vmem:[#allocation9 + $0xf58] sm:$0xff] }
 0x439   :  { %8903 = vmatpush2.msra.mxu0 %v8405_v47  ;;  %8980 = vmatpush2.msra.mxu1 %v8533_v3  ;;  %v7116_v12 = vpop.f32.mrf.mxu1  ;;  %v8496_v17 = vld [vmem:[#allocation9 + $0x12f8] sm:$0xff] }
 0x43a   :  { %8904 = vmatprep.subr.mxu0 %v8402_v6  ;;  %8981 = vmatprep.subr.mxu1 %v8530_v48  ;;  %v7208_v23 = vcombine.low %v7188_v58, %v7190_v13  ;;  %v7209_v56 = vcombine.high %v7188_v58, %v7190_v13  ;;  %v7194_v62 = vadd.f32 %v7193_v60, %v7116_v12  ;;  %v8388_v6 = vld [vmem:[#allocation9 + $0xf98] sm:$0xff]  ;;  %v8383_v13 = vld [vmem:[#allocation9 + $0xf70] sm:$0xff] }
 0x43b   :  { %8905 = vmatpush2.msra.mxu0 %v8401_v11  ;;  %8982 = vmatpush2.msra.mxu1 %v8529_v10  ;;  %v7118_v8 = vpop.f32.mrf.mxu1  ;;  %v17070_v58 = vrot.slane %v7275_v32, %v14790_v9  ;;  %v8516_v48 = vld [vmem:[#allocation9 + $0x1398] sm:$0xff]  ;;  %v8387_v32 = vld [vmem:[#allocation9 + $0xf90] sm:$0xff] }
 0x43c   :  { %8907 = vmatmul.mubr.f32.vlgmr.msra.gmra.mxu0 %v17008_v57  ;;  %8984 = vmatmul.mubr.f32.vlgmr.msra.gmra.mxu1 %v17010_v30  ;;  %v17032_v5 = vrot.slane %v7208_v23, %v14790_v9  ;;  %v17035_v39 = vrot.slane %v7209_v56, %v14790_v9  ;;  %v7196_v27 = vadd.f32 %v7195_v28, %v7118_v8  ;;  %v8384_v11 = vld [vmem:[#allocation9 + $0xf78] sm:$0xff]  ;;  %v8511_v12 = vld [vmem:[#allocation9 + $0x1370] sm:$0xff] }
 0x43d   :  { %8996 = vmatprep.subr.mxu1 %v8400_v49  ;;  %9073 = vmatprep.subr.mxu0 %v8528_v36  ;;  %v8512_v10 = vld [vmem:[#allocation9 + $0x1378] sm:$0xff]  ;;  %v8379_v36 = vld [vmem:[#allocation9 + $0xf50] sm:$0xff] }
 0x43e   :  { %8912 = vmatprep.mubr.f32.mxu0 %v17012_v37  ;;  %13419 = vmatprep.mubr.msk.f32.mxu1 %vm6885_vm6, %v17027_v4  ;;  %v7238_v33 = vcombine.low %v17019_v55, %v17032_v5  ;;  %v7239_v2 = vcombine.high %v17019_v55, %v17032_v5  ;;  %v7240_v14 = vcombine.low %v17025_v22, %v17035_v39  ;;  %v8508_v49 = vld [vmem:[#allocation9 + $0x1358] sm:$0xff]  ;;  %v8507_v23 = vld [vmem:[#allocation9 + $0x1350] sm:$0xff] }
 0x43f   :  { %8997 = vmatpush1.msra.mxu1 %v8399_v45  ;;  %9074 = vmatpush1.msra.mxu0 %v8527_v44  ;;  %v7241_v38 = vcombine.high %v17025_v22, %v17035_v39  ;;  %v7276_v35 = vcombine.low %v7194_v62, %v7196_v27  ;;  %v7277_v31 = vcombine.high %v7194_v62, %v7196_v27  ;;  %v8376_v56 = vld [vmem:[#allocation9 + $0xf38] sm:$0xff]  ;;  %v8375_v28 = vld [vmem:[#allocation9 + $0xf30] sm:$0xff] }
 0x440   :  { %8998 = vmatprep.subr.mxu1 %v8396_v24  ;;  %9075 = vmatprep.subr.mxu0 %v8524_v50  ;;  %v8504_v62 = vld [vmem:[#allocation9 + $0x1338] sm:$0xff]  ;;  %v8503_v8 = vld [vmem:[#allocation9 + $0x1330] sm:$0xff] }
 0x441   :  { %8999 = vmatpush1.msra.mxu1 %v8395_v61  ;;  %9076 = vmatpush1.msra.mxu0 %v8523_v40  ;;  %v17061_v47 = vrot.slane %v7276_v35, %v14790_v9  ;;  %v17064_v3 = vrot.slane %v7277_v31, %v14790_v9  ;;  %v8372_v45 = vld [vmem:[#allocation9 + $0xf18] sm:$0xff]  ;;  %v8371_v27 = vld [vmem:[#allocation9 + $0xf10] sm:$0xff] }
 0x442   :  { %8913 = vmatmul.mubr.f32.gmra.mxu0 %v17050_v46  ;;  %8990 = vmatmul.mubr.f32.gmra.mxu1 %v17052_v19  ;;  %v8500_v44 = vld [vmem:[#allocation9 + $0x1318] sm:$0xff]  ;;  %v8499_v24 = vld [vmem:[#allocation9 + $0x1310] sm:$0xff] }
 0x443   :  { %9000 = vmatprep.subr.mxu1 %v8392_v51  ;;  %9077 = vmatprep.subr.mxu0 %v8520_v1  ;;  %v7306_v52 = vcombine.low %v17058_v0, %v17061_v47  ;;  %v7307_v60 = vcombine.high %v17058_v0, %v17061_v47  ;;  %v7308_v29 = vcombine.low %v17070_v58, %v17064_v3  ;;  %v8368_v50 = vld [vmem:[#allocation9 + $0xef8] sm:$0xff]  ;;  %v8367_v61 = vld [vmem:[#allocation9 + $0xef0] sm:$0xff] }
 0x444   :  { %9001 = vmatpush1.msra.mxu1 %v8391_v34  ;;  %9060 = vmatprep.mubr.f32.mxu1 %v16962_v63  ;;  %v7309_v43 = vcombine.high %v17070_v58, %v17064_v3  ;;  %v8495_v40 = vld [vmem:[#allocation9 + $0x12f0] sm:$0xff]  ;;  %v8364_v35 = vld [vmem:[#allocation9 + $0xed8] sm:$0xff] }
 0x445   :  { %9078 = vmatpush1.msra.mxu0 %v8519_v41  ;;  %13420 = vmatprep.mubr.msk.f32.mxu0 %vm6885_vm6, %v16974_v21  ;;  %v8492_v31 = vld [vmem:[#allocation9 + $0x12d8] sm:$0xff]  ;;  %v8363_v51 = vld [vmem:[#allocation9 + $0xed0] sm:$0xff] }
 0x446   :  { %9002 = vmatprep.subr.mxu1 %v8388_v6  ;;  %9079 = vmatprep.subr.mxu0 %v8516_v48  ;;  %v8491_v1 = vld [vmem:[#allocation9 + $0x12d0] sm:$0xff]  ;;  %v8360_v34 = vld [vmem:[#allocation9 + $0xeb8] sm:$0xff] }
 0x447   :  { %9003 = vmatpush1.msra.mxu1 %v8387_v32  ;;  %9080 = vmatpush1.msra.mxu0 %v8515_v15  ;;  %v8488_v41 = vld [vmem:[#allocation9 + $0x12b8] sm:$0xff]  ;;  %v8359_v6 = vld [vmem:[#allocation9 + $0xeb0] sm:$0xff] }
 0x448   :  { %9004 = vmatprep.subr.mxu1 %v8384_v11  ;;  %9081 = vmatprep.subr.mxu0 %v8512_v10  ;;  %v8487_v48 = vld [vmem:[#allocation9 + $0x12b0] sm:$0xff]  ;;  %v8356_v32 = vld [vmem:[#allocation9 + $0xe98] sm:$0xff] }
 0x449   :  { %9005 = vmatpush1.msra.mxu1 %v8383_v13  ;;  %9082 = vmatpush1.msra.mxu0 %v8511_v12  ;;  %v8484_v15 = vld [vmem:[#allocation9 + $0x1298] sm:$0xff]  ;;  %v8355_v11 = vld [vmem:[#allocation9 + $0xe90] sm:$0xff] }
 0x44a   :  { %9006 = vmatprep.subr.mxu1 %v8380_v26  ;;  %9083 = vmatprep.subr.mxu0 %v8508_v49  ;;  %v8483_v10 = vld [vmem:[#allocation9 + $0x1290] sm:$0xff]  ;;  %v8352_v13 = vld [vmem:[#allocation9 + $0xe78] sm:$0xff] }
 0x44b   :  { %9007 = vmatpush1.msra.mxu1 %v8379_v36  ;;  %9084 = vmatpush1.msra.mxu0 %v8507_v23  ;;  %v8480_v12 = vld [vmem:[#allocation9 + $0x1278] sm:$0xff]  ;;  %v8351_v26 = vld [vmem:[#allocation9 + $0xe70] sm:$0xff] }
 0x44c   :  { %9008 = vmatprep.subr.mxu1 %v8376_v56  ;;  %9085 = vmatprep.subr.mxu0 %v8504_v62  ;;  %v8479_v49 = vld [vmem:[#allocation9 + $0x1270] sm:$0xff]  ;;  %v8348_v36 = vld [vmem:[#allocation9 + $0xe58] sm:$0xff] }
 0x44d   :  { %9009 = vmatpush1.msra.mxu1 %v8375_v28  ;;  %9086 = vmatpush1.msra.mxu0 %v8503_v8  ;;  %v8476_v23 = vld [vmem:[#allocation9 + $0x1258] sm:$0xff]  ;;  %v8347_v56 = vld [vmem:[#allocation9 + $0xe50] sm:$0xff] }
 0x44e   :  { %9010 = vmatprep.subr.mxu1 %v8372_v45  ;;  %9087 = vmatprep.subr.mxu0 %v8500_v44  ;;  %v8475_v62 = vld [vmem:[#allocation9 + $0x1250] sm:$0xff]  ;;  %v8344_v28 = vld [vmem:[#allocation9 + $0xe38] sm:$0xff] }
 0x44f   :  { %9011 = vmatpush1.msra.mxu1 %v8371_v27  ;;  %9088 = vmatpush1.msra.mxu0 %v8499_v24  ;;  %v8472_v8 = vld [vmem:[#allocation9 + $0x1238] sm:$0xff]  ;;  %v8343_v45 = vld [vmem:[#allocation9 + $0xe30] sm:$0xff] }
 0x450   :  { %9012 = vmatprep.subr.mxu1 %v8368_v50  ;;  %9089 = vmatprep.subr.mxu0 %v8496_v17  ;;  %v8471_v44 = vld [vmem:[#allocation9 + $0x1230] sm:$0xff]  ;;  %v8340_v27 = vld [vmem:[#allocation9 + $0xe18] sm:$0xff] }
 0x451   :  { %9013 = vmatpush1.msra.mxu1 %v8367_v61  ;;  %9090 = vmatpush1.msra.mxu0 %v8495_v40  ;;  %v8468_v24 = vld [vmem:[#allocation9 + $0x1218] sm:$0xff]  ;;  %v8339_v50 = vld [vmem:[#allocation9 + $0xe10] sm:$0xff] }
 0x452   :  { %9014 = vmatprep.subr.mxu1 %v8364_v35  ;;  %9091 = vmatprep.subr.mxu0 %v8492_v31  ;;  %v8467_v17 = vld [vmem:[#allocation9 + $0x1210] sm:$0xff]  ;;  %v8464_v61 = vld [vmem:[#allocation9 + $0x11f8] sm:$0xff] }
 0x453   :  { %9015 = vmatpush1.msra.mxu1 %v8363_v51  ;;  %9092 = vmatpush1.msra.mxu0 %v8491_v1  ;;  %v8560_v40 = vld [vmem:[#allocation9 + $0x14f8] sm:$0xff]  ;;  %v8463_v35 = vld [vmem:[#allocation9 + $0x11f0] sm:$0xff] }
 0x454   :  { %9016 = vmatprep.subr.mxu1 %v8360_v34  ;;  %9093 = vmatprep.subr.mxu0 %v8488_v41  ;;  %v8559_v31 = vld [vmem:[#allocation9 + $0x14f0] sm:$0xff]  ;;  %v8460_v51 = vld [vmem:[#allocation9 + $0x11d8] sm:$0xff] }
 0x455   :  { %9017 = vmatpush1.msra.mxu1 %v8359_v6  ;;  %9094 = vmatpush1.msra.mxu0 %v8487_v48  ;;  %v8556_v1 = vld [vmem:[#allocation9 + $0x14d8] sm:$0xff]  ;;  %v8459_v34 = vld [vmem:[#allocation9 + $0x11d0] sm:$0xff] }
 0x456   :  { %9018 = vmatprep.subr.mxu1 %v8356_v32  ;;  %9095 = vmatprep.subr.mxu0 %v8484_v15  ;;  %v8555_v41 = vld [vmem:[#allocation9 + $0x14d0] sm:$0xff]  ;;  %v8456_v6 = vld [vmem:[#allocation9 + $0x11b8] sm:$0xff] }
 0x457   :  { %9019 = vmatpush1.msra.mxu1 %v8355_v11  ;;  %9096 = vmatpush1.msra.mxu0 %v8483_v10  ;;  %v8552_v48 = vld [vmem:[#allocation9 + $0x14b8] sm:$0xff]  ;;  %v8455_v32 = vld [vmem:[#allocation9 + $0x11b0] sm:$0xff] }
 0x458   :  { %9020 = vmatprep.subr.mxu1 %v8352_v13  ;;  %9097 = vmatprep.subr.mxu0 %v8480_v12  ;;  %v8551_v15 = vld [vmem:[#allocation9 + $0x14b0] sm:$0xff]  ;;  %v8452_v11 = vld [vmem:[#allocation9 + $0x1198] sm:$0xff] }
 0x459   :  { %9021 = vmatpush1.msra.mxu1 %v8351_v26  ;;  %9098 = vmatpush1.msra.mxu0 %v8479_v49  ;;  %v8548_v10 = vld [vmem:[#allocation9 + $0x1498] sm:$0xff]  ;;  %v8451_v13 = vld [vmem:[#allocation9 + $0x1190] sm:$0xff] }
 0x45a   :  { %9022 = vmatprep.subr.mxu1 %v8348_v36  ;;  %9099 = vmatprep.subr.mxu0 %v8476_v23  ;;  %v8547_v12 = vld [vmem:[#allocation9 + $0x1490] sm:$0xff]  ;;  %v8448_v26 = vld [vmem:[#allocation9 + $0x1178] sm:$0xff] }
 0x45b   :  { %9023 = vmatpush1.msra.mxu1 %v8347_v56  ;;  %9100 = vmatpush1.msra.mxu0 %v8475_v62  ;;  %v8544_v49 = vld [vmem:[#allocation9 + $0x1478] sm:$0xff]  ;;  %v8447_v36 = vld [vmem:[#allocation9 + $0x1170] sm:$0xff] }
 0x45c   :  { %9024 = vmatprep.subr.mxu1 %v8344_v28  ;;  %9101 = vmatprep.subr.mxu0 %v8472_v8  ;;  %v8543_v23 = vld [vmem:[#allocation9 + $0x1470] sm:$0xff]  ;;  %v8444_v56 = vld [vmem:[#allocation9 + $0x1158] sm:$0xff] }
 0x45d   :  { %9025 = vmatpush1.msra.mxu1 %v8343_v45  ;;  %9102 = vmatpush1.msra.mxu0 %v8471_v44  ;;  %v8540_v62 = vld [vmem:[#allocation9 + $0x1458] sm:$0xff]  ;;  %v8443_v28 = vld [vmem:[#allocation9 + $0x1150] sm:$0xff] }
 0x45e   :  { %9026 = vmatprep.subr.mxu1 %v8340_v27  ;;  %9103 = vmatprep.subr.mxu0 %v8468_v24  ;;  %v8539_v8 = vld [vmem:[#allocation9 + $0x1450] sm:$0xff]  ;;  %v8440_v45 = vld [vmem:[#allocation9 + $0x1138] sm:$0xff] }
 0x45f   :  { %9027 = vmatpush1.msra.mxu1 %v8339_v50  ;;  %9104 = vmatpush1.msra.mxu0 %v8467_v17  ;;  %v8536_v44 = vld [vmem:[#allocation9 + $0x1438] sm:$0xff]  ;;  %v8439_v27 = vld [vmem:[#allocation9 + $0x1130] sm:$0xff] }
 0x460   :  { %9028 = vmatprep.subr.mxu1 %v8464_v61  ;;  %9121 = vmatprep.subr.mxu0 %v8560_v40  ;;  %v8535_v24 = vld [vmem:[#allocation9 + $0x1430] sm:$0xff]  ;;  %v8436_v50 = vld [vmem:[#allocation9 + $0x1118] sm:$0xff] }
 0x461   :  { %9029 = vmatpush2.msra.mxu1 %v8463_v35  ;;  %9122 = vmatpush2.msra.mxu0 %v8559_v31  ;;  %v8532_v17 = vld [vmem:[#allocation9 + $0x1418] sm:$0xff]  ;;  %v8435_v61 = vld [vmem:[#allocation9 + $0x1110] sm:$0xff] }
 0x462   :  { %9030 = vmatprep.subr.mxu1 %v8460_v51  ;;  %9123 = vmatprep.subr.mxu0 %v8556_v1  ;;  %v8531_v40 = vld [vmem:[#allocation9 + $0x1410] sm:$0xff]  ;;  %v8432_v35 = vld [vmem:[#allocation9 + $0x10f8] sm:$0xff]  ;;  %v13821_v1 = vld [vmem:[#allocation9 + $0x1e8] sm:$0xff] }
 0x463   :  { %9031 = vmatpush2.msra.mxu1 %v8459_v34  ;;  %9124 = vmatpush2.msra.mxu0 %v8555_v41  ;;  %v8431_v31 = vld [vmem:[#allocation9 + $0x10f0] sm:$0xff]  ;;  %v8428_v51 = vld [vmem:[#allocation9 + $0x10d8] sm:$0xff]  ;;  %v13822_v41 = vld [vmem:[#allocation9 + $0x1e0] sm:$0xff] }
 0x464   :  { %9032 = vmatprep.subr.mxu1 %v8456_v6  ;;  %9125 = vmatprep.subr.mxu0 %v8552_v48  ;;  %v8427_v34 = vld [vmem:[#allocation9 + $0x10d0] sm:$0xff]  ;;  %v8424_v6 = vld [vmem:[#allocation9 + $0x10b8] sm:$0xff]  ;;  %v13823_v48 = vld [vmem:[#allocation9 + $0x1c8] sm:$0xff] }
 0x465   :  { %9033 = vmatpush2.msra.mxu1 %v8455_v32  ;;  %9126 = vmatpush2.msra.mxu0 %v8551_v15  ;;  %v8423_v32 = vld [vmem:[#allocation9 + $0x10b0] sm:$0xff]  ;;  %v13824_v15 = vld [vmem:[#allocation9 + $0x1c0] sm:$0xff]  ;;  %v13974_v55 = vld [vmem:[#allocation9 + $0x4b8] sm:$0xff] }
 0x466   :  { %9034 = vmatprep.subr.mxu1 %v8452_v11  ;;  %9127 = vmatprep.subr.mxu0 %v8548_v10  ;;  %v8420_v11 = vld [vmem:[#allocation9 + $0x1098] sm:$0xff]  ;;  %v13825_v10 = vld [vmem:[#allocation9 + $0x1a8] sm:$0xff]  ;;  %v13984_v0 = vld [vmem:[#allocation9 + $0x470] sm:$0xff] }
 0x467   :  { %9035 = vmatpush2.msra.mxu1 %v8451_v13  ;;  %9128 = vmatpush2.msra.mxu0 %v8547_v12  ;;  %v8419_v13 = vld [vmem:[#allocation9 + $0x1090] sm:$0xff]  ;;  %v13826_v12 = vld [vmem:[#allocation9 + $0x1a0] sm:$0xff] }
 0x468   :  { %9036 = vmatprep.subr.mxu1 %v8448_v26  ;;  %9129 = vmatprep.subr.mxu0 %v8544_v49  ;;  %v8416_v26 = vld [vmem:[#allocation9 + $0x1078] sm:$0xff]  ;;  %v13827_v49 = vld [vmem:[#allocation9 + $0x188] sm:$0xff] }
 0x469   :  { %9037 = vmatpush2.msra.mxu1 %v8447_v36  ;;  %9130 = vmatpush2.msra.mxu0 %v8543_v23  ;;  %v8415_v36 = vld [vmem:[#allocation9 + $0x1070] sm:$0xff]  ;;  %v13828_v23 = vld [vmem:[#allocation9 + $0x180] sm:$0xff] }
 0x46a   :  { %9038 = vmatprep.subr.mxu1 %v8444_v56  ;;  %9131 = vmatprep.subr.mxu0 %v8540_v62  ;;  %v8412_v56 = vld [vmem:[#allocation9 + $0x1058] sm:$0xff]  ;;  %v13829_v62 = vld [vmem:[#allocation9 + $0x168] sm:$0xff] }
 0x46b   :  { %9039 = vmatpush2.msra.mxu1 %v8443_v28  ;;  %9132 = vmatpush2.msra.mxu0 %v8539_v8  ;;  %v8411_v28 = vld [vmem:[#allocation9 + $0x1050] sm:$0xff]  ;;  %v13830_v8 = vld [vmem:[#allocation9 + $0x160] sm:$0xff] }
 0x46c   :  { %9040 = vmatprep.subr.mxu1 %v8440_v45  ;;  %9133 = vmatprep.subr.mxu0 %v8536_v44  ;;  %v8408_v45 = vld [vmem:[#allocation9 + $0x1038] sm:$0xff]  ;;  %v13831_v44 = vld [vmem:[#allocation9 + $0x148] sm:$0xff] }
 0x46d   :  { %9041 = vmatpush2.msra.mxu1 %v8439_v27  ;;  %9134 = vmatpush2.msra.mxu0 %v8535_v24  ;;  %v8407_v27 = vld [vmem:[#allocation9 + $0x1030] sm:$0xff]  ;;  %v13832_v24 = vld [vmem:[#allocation9 + $0x140] sm:$0xff] }
 0x46e   :  { %9042 = vmatprep.subr.mxu1 %v8436_v50  ;;  %9135 = vmatprep.subr.mxu0 %v8532_v17  ;;  %v8404_v50 = vld [vmem:[#allocation9 + $0x1018] sm:$0xff]  ;;  %v13833_v17 = vld [vmem:[#allocation9 + $0x128] sm:$0xff] }
 0x46f   :  { %9043 = vmatpush2.msra.mxu1 %v8435_v61  ;;  %9136 = vmatpush2.msra.mxu0 %v8531_v40  ;;  %v8403_v61 = vld [vmem:[#allocation9 + $0x1010] sm:$0xff]  ;;  %v13834_v40 = vld [vmem:[#allocation9 + $0x120] sm:$0xff] }
 0x470   :  { %9044 = vmatprep.subr.mxu1 %v8432_v35  ;;  %9138 = vmatmul.mubr.f32.vlgmr.msra.gmra.mxu0 %v17010_v30  ;;  %v13835_v35 = vld [vmem:[#allocation9 + $0x108] sm:$0xff] }
 0x471   :  { %9439 = vmatprep.subr.mxu0 %v13821_v1  ;;  %9045 = vmatpush2.msra.mxu1 %v8431_v31  ;;  %v13836_v31 = vld [vmem:[#allocation9 + $0x100] sm:$0xff]  ;;  %v13838_v1 = vld [vmem:[#allocation9 + $0x5e8] sm:$0xff] }
 0x472   :  { %13421 = vmatprep.mubr.msk.f32.mxu0 %vm6885_vm6, %v17027_v4  ;;  %9440 = vmatpush1.msra.mxu0 %v13822_v41  ;;  %v13840_v41 = vld [vmem:[#allocation9 + $0x5e0] sm:$0xff] }
 0x473   :  { %9046 = vmatprep.subr.mxu1 %v8428_v51  ;;  %9441 = vmatprep.subr.mxu0 %v13823_v48  ;;  %v13837_v51 = vld [vmem:[#allocation9 + $0xe8] sm:$0xff] }
 0x474   :  { %9047 = vmatpush2.msra.mxu1 %v8427_v34  ;;  %9442 = vmatpush1.msra.mxu0 %v13824_v15  ;;  %v13839_v34 = vld [vmem:[#allocation9 + $0xe0] sm:$0xff]  ;;  %v13842_v48 = vld [vmem:[#allocation9 + $0x5c8] sm:$0xff] }
 0x475   :  { %9048 = vmatprep.subr.mxu1 %v8424_v6  ;;  %9144 = vmatmul.mubr.f32.gmra.mxu0 %v17052_v19  ;;  %v13841_v6 = vld [vmem:[#allocation9 + $0xc8] sm:$0xff] }
 0x476   :  { %9443 = vmatprep.subr.mxu0 %v13825_v10  ;;  %9049 = vmatpush2.msra.mxu1 %v8423_v32  ;;  %v13844_v10 = vld [vmem:[#allocation9 + $0x5c0] sm:$0xff] }
 0x477   :  { %9444 = vmatpush1.msra.mxu0 %v13826_v12  ;;  %9503 = vmatprep.mubr.f32.mxu0 %v16880_v53  ;;  %v13845_v12 = vld [vmem:[#allocation9 + $0xa8] sm:$0xff] }
 0x478   :  { %9050 = vmatprep.subr.mxu1 %v8420_v11  ;;  %9445 = vmatprep.subr.mxu0 %v13827_v49  ;;  %v13843_v11 = vld [vmem:[#allocation9 + $0xc0] sm:$0xff] }
 0x479   :  { %9051 = vmatpush2.msra.mxu1 %v8419_v13  ;;  %9446 = vmatpush1.msra.mxu0 %v13828_v23  ;;  %v13847_v23 = vld [vmem:[#allocation9 + $0xa0] sm:$0xff] }
 0x47a   :  { %9052 = vmatprep.subr.mxu1 %v8416_v26  ;;  %9447 = vmatprep.subr.mxu0 %v13829_v62  ;;  %v13848_v62 = vld [vmem:[#allocation9 + $0x5a0] sm:$0xff] }
 0x47b   :  { %9053 = vmatpush2.msra.mxu1 %v8415_v36  ;;  %9448 = vmatpush1.msra.mxu0 %v13830_v8  ;;  %v13846_v36 = vld [vmem:[#allocation9 + $0x5a8] sm:$0xff] }
 0x47c   :  { %9054 = vmatprep.subr.mxu1 %v8412_v56  ;;  %9449 = vmatprep.subr.mxu0 %v13831_v44  ;;  %v13850_v8 = vld [vmem:[#allocation9 + $0x588] sm:$0xff] }
 0x47d   :  { %9055 = vmatpush2.msra.mxu1 %v8411_v28  ;;  %9450 = vmatpush1.msra.mxu0 %v13832_v24  ;;  %v13849_v28 = vld [vmem:[#allocation9 + $0x88] sm:$0xff]  ;;  %v13852_v24 = vld [vmem:[#allocation9 + $0x580] sm:$0xff] }
 0x47e   :  { %9056 = vmatprep.subr.mxu1 %v8408_v45  ;;  %9451 = vmatprep.subr.mxu0 %v13833_v17 }
 0x47f   :  { %9057 = vmatpush2.msra.mxu1 %v8407_v27  ;;  %9452 = vmatpush1.msra.mxu0 %v13834_v40  ;;  %v13851_v27 = vld [vmem:[#allocation9 + $0x80] sm:$0xff]  ;;  %v13854_v40 = vld [vmem:[#allocation9 + $0x568] sm:$0xff] }
 0x480   :  { %9058 = vmatprep.subr.mxu1 %v8404_v50  ;;  %9453 = vmatprep.subr.mxu0 %v13835_v35 }
 0x481   :  { %9059 = vmatpush2.msra.mxu1 %v8403_v61  ;;  %9454 = vmatpush1.msra.mxu0 %v13836_v31  ;;  %v13853_v61 = vld [vmem:[#allocation9 + $0x68] sm:$0xff]  ;;  %v13855_v31 = vld [vmem:[#allocation9 + $0x60] sm:$0xff] }
 0x482   :  { %9061 = vmatmul.mubr.f32.vlgmr.msra.gmra.mxu1 %v17008_v57  ;;  %9455 = vmatprep.subr.mxu0 %v13837_v51  ;;  %v13856_v51 = vld [vmem:[#allocation9 + $0x560] sm:$0xff] }
 0x483   :  { %9516 = vmatprep.subr.mxu1 %v13838_v1  ;;  %9066 = vmatprep.mubr.f32.mxu1 %v17012_v37 }
 0x484   :  { %9456 = vmatpush1.msra.mxu0 %v13839_v34  ;;  %9517 = vmatpush1.msra.mxu1 %v13840_v41  ;;  %v13857_v41 = vld [vmem:[#allocation9 + $0x48] sm:$0xff] }
 0x485   :  { %9457 = vmatprep.subr.mxu0 %v13841_v6  ;;  %9518 = vmatprep.subr.mxu1 %v13842_v48  ;;  %v7924_v32 = vpop.f32.mrf.mxu0  ;;  %v8001_v15 = vpop.f32.mrf.mxu1  ;;  %v13858_v6 = vld [vmem:[#allocation9 + $0x548] sm:$0xff] }
 0x486   :  { %9458 = vmatpush1.msra.mxu0 %v13843_v11  ;;  %9519 = vmatpush1.msra.mxu1 %v13844_v10  ;;  %v17092_v13 = vadd.f32 %v8001_v15, %v7924_v32  ;;  %v13859_v32 = vld [vmem:[#allocation9 + $0x40] sm:$0xff]  ;;  %v13861_v11 = vld [vmem:[#allocation9 + $0x28] sm:$0xff] }
 0x487   :  { %9067 = vmatmul.mubr.f32.gmra.mxu1 %v17050_v46  ;;  %9459 = vmatprep.subr.mxu0 %v13845_v12  ;;  %v7926_v26 = vpop.f32.mrf.mxu0  ;;  %v8003_v49 = vpop.f32.mrf.mxu1  ;;  %v13860_v15 = vld [vmem:[#allocation9 + $0x540] sm:$0xff]  ;;  %v13862_v10 = vld [vmem:[#allocation9 + $0x528] sm:$0xff] }
 0x488   :  { %9520 = vmatprep.subr.mxu1 %v13846_v36  ;;  %9460 = vmatpush1.msra.mxu0 %v13847_v23  ;;  %v17095_v56 = vadd.f32 %v8003_v49, %v7926_v26  ;;  %v13863_v49 = vld [vmem:[#allocation9 + $0x20] sm:$0xff]  ;;  %v13865_v23 = vld [vmem:[#allocation9 + $0x8] sm:$0xff] }
 0x489   :  { %9521 = vmatpush1.msra.mxu1 %v13848_v62  ;;  %13422 = vmatprep.mubr.msk.f32.mxu1 %vm6885_vm6, %v16882_v59  ;;  %v13864_v36 = vld [vmem:[#allocation9 + $0x520] sm:$0xff]  ;;  %v13866_v62 = vld [vmem:[#allocation9 + $0x508] sm:$0xff] }
 0x48a   :  { %9461 = vmatprep.subr.mxu0 %v13849_v28  ;;  %9522 = vmatprep.subr.mxu1 %v13850_v8  ;;  %v8174_v45 = vcombine.low %v17092_v13, %v17095_v56  ;;  %v8175_v44 = vcombine.high %v17092_v13, %v17095_v56  ;;  %v13867_v28 = vld [vmem:[#allocation9] sm:$0xff]  ;;  %v13985_v56 = vld [vmem:[#allocation9 + $0x58] sm:$0xff] }
 0x48b   :  { %9462 = vmatpush1.msra.mxu0 %v13851_v27  ;;  %9523 = vmatpush1.msra.mxu1 %v13852_v24  ;;  %v7930_v50 = vpop.f32.mrf.mxu0  ;;  %v8007_v17 = vpop.f32.mrf.mxu1  ;;  %v13868_v8 = vld [vmem:[#allocation9 + $0x500] sm:$0xff]  ;;  %v13869_v27 = vld [vmem:[#allocation9 + $0x3e8] sm:$0xff] }
 0x48c   :  { %9463 = vmatprep.subr.mxu0 %v13853_v61  ;;  %9524 = vmatprep.subr.mxu1 %v13854_v40  ;;  %v17103_v35 = vadd.f32 %v8007_v17, %v7930_v50  ;;  %v13870_v24 = vld [vmem:[#allocation9 + $0x4e8] sm:$0xff]  ;;  %v13871_v50 = vld [vmem:[#allocation9 + $0x3e0] sm:$0xff] }
 0x48d   :  { %9464 = vmatpush1.msra.mxu0 %v13855_v31  ;;  %9525 = vmatpush1.msra.mxu1 %v13856_v51  ;;  %v7932_v1 = vpop.f32.mrf.mxu0  ;;  %v8009_v34 = vpop.f32.mrf.mxu1  ;;  %v13872_v17 = vld [vmem:[#allocation9 + $0x4e0] sm:$0xff]  ;;  %v13873_v61 = vld [vmem:[#allocation9 + $0x3c8] sm:$0xff] }
 0x48e   :  { %9465 = vmatprep.subr.mxu0 %v13857_v41  ;;  %9526 = vmatprep.subr.mxu1 %v13858_v6  ;;  %v17105_v48 = vadd.f32 %v8009_v34, %v7932_v1  ;;  %v13874_v40 = vld [vmem:[#allocation9 + $0x4c8] sm:$0xff]  ;;  %v13875_v31 = vld [vmem:[#allocation9 + $0x3c0] sm:$0xff] }
 0x48f   :  { %9466 = vmatpush1.msra.mxu0 %v13859_v32  ;;  %9527 = vmatpush1.msra.mxu1 %v13860_v15  ;;  %v13876_v51 = vld [vmem:[#allocation9 + $0x4c0] sm:$0xff]  ;;  %v13877_v1 = vld [vmem:[#allocation9 + $0x3a8] sm:$0xff] }
 0x490   :  { %9467 = vmatprep.subr.mxu0 %v13861_v11  ;;  %9528 = vmatprep.subr.mxu1 %v13862_v10  ;;  %v8242_v12 = vcombine.low %v17103_v35, %v17105_v48  ;;  %v8243_v26 = vcombine.high %v17103_v35, %v17105_v48  ;;  %v13878_v34 = vld [vmem:[#allocation9 + $0x4a8] sm:$0xff]  ;;  %v13879_v41 = vld [vmem:[#allocation9 + $0x3a0] sm:$0xff] }
 0x491   :  { %9468 = vmatpush1.msra.mxu0 %v13863_v49  ;;  %9529 = vmatpush1.msra.mxu1 %v13864_v36  ;;  %v13880_v6 = vld [vmem:[#allocation9 + $0x4a0] sm:$0xff]  ;;  %v13881_v32 = vld [vmem:[#allocation9 + $0x388] sm:$0xff] }
 0x492   :  { %9469 = vmatprep.subr.mxu0 %v13865_v23  ;;  %9530 = vmatprep.subr.mxu1 %v13866_v62  ;;  %v13882_v15 = vld [vmem:[#allocation9 + $0x488] sm:$0xff]  ;;  %v13883_v11 = vld [vmem:[#allocation9 + $0x380] sm:$0xff]  ;;  %v17185_v13 = vrot.slane %v8243_v26, %v14790_v9  ;;  %v13991_v26 = vld [vmem:[#allocation9 + $0x30] sm:$0xff] }
 0x493   :  { %9470 = vmatpush1.msra.mxu0 %v13867_v28  ;;  %9531 = vmatpush1.msra.mxu1 %v13868_v8  ;;  %v13884_v10 = vld [vmem:[#allocation9 + $0x480] sm:$0xff]  ;;  %v13885_v49 = vld [vmem:[#allocation9 + $0x368] sm:$0xff] }
 0x494   :  { %9471 = vmatprep.subr.mxu0 %v13869_v27  ;;  %9532 = vmatprep.subr.mxu1 %v13870_v24  ;;  %v13886_v36 = vld [vmem:[#allocation9 + $0x468] sm:$0xff]  ;;  %v13887_v23 = vld [vmem:[#allocation9 + $0x360] sm:$0xff] }
 0x495   :  { %9472 = vmatpush2.msra.mxu0 %v13871_v50  ;;  %9533 = vmatpush1.msra.mxu1 %v13872_v17  ;;  %v13888_v62 = vld [vmem:[#allocation9 + $0x460] sm:$0xff]  ;;  %v13889_v28 = vld [vmem:[#allocation9 + $0x348] sm:$0xff] }
 0x496   :  { %9473 = vmatprep.subr.mxu0 %v13873_v61  ;;  %9534 = vmatprep.subr.mxu1 %v13874_v40  ;;  %v13890_v8 = vld [vmem:[#allocation9 + $0x448] sm:$0xff]  ;;  %v13891_v27 = vld [vmem:[#allocation9 + $0x340] sm:$0xff] }
 0x497   :  { %9474 = vmatpush2.msra.mxu0 %v13875_v31  ;;  %9535 = vmatpush1.msra.mxu1 %v13876_v51  ;;  %v13892_v24 = vld [vmem:[#allocation9 + $0x440] sm:$0xff]  ;;  %v13893_v50 = vld [vmem:[#allocation9 + $0x328] sm:$0xff] }
 0x498   :  { %9475 = vmatprep.subr.mxu0 %v13877_v1  ;;  %9536 = vmatprep.subr.mxu1 %v13878_v34  ;;  %v13894_v17 = vld [vmem:[#allocation9 + $0x428] sm:$0xff]  ;;  %v13895_v61 = vld [vmem:[#allocation9 + $0x320] sm:$0xff] }
 0x499   :  { %9476 = vmatpush2.msra.mxu0 %v13879_v41  ;;  %9537 = vmatpush1.msra.mxu1 %v13880_v6  ;;  %v13896_v40 = vld [vmem:[#allocation9 + $0x420] sm:$0xff]  ;;  %v13897_v31 = vld [vmem:[#allocation9 + $0x308] sm:$0xff] }
 0x49a   :  { %9477 = vmatprep.subr.mxu0 %v13881_v32  ;;  %9538 = vmatprep.subr.mxu1 %v13882_v15  ;;  %v13898_v51 = vld [vmem:[#allocation9 + $0x408] sm:$0xff]  ;;  %v13899_v1 = vld [vmem:[#allocation9 + $0x300] sm:$0xff] }
 0x49b   :  { %9478 = vmatpush2.msra.mxu0 %v13883_v11  ;;  %9539 = vmatpush1.msra.mxu1 %v13884_v10  ;;  %v13900_v34 = vld [vmem:[#allocation9 + $0x400] sm:$0xff]  ;;  %v13901_v41 = vld [vmem:[#allocation9 + $0x2e8] sm:$0xff] }
 0x49c   :  { %9479 = vmatprep.subr.mxu0 %v13885_v49  ;;  %9540 = vmatprep.subr.mxu1 %v13886_v36  ;;  %v13902_v6 = vld [vmem:[#allocation9 + $0x6e8] sm:$0xff]  ;;  %v13903_v32 = vld [vmem:[#allocation9 + $0x2e0] sm:$0xff] }
 0x49d   :  { %9480 = vmatpush2.msra.mxu0 %v13887_v23  ;;  %9541 = vmatpush1.msra.mxu1 %v13888_v62  ;;  %v13904_v15 = vld [vmem:[#allocation9 + $0x6e0] sm:$0xff]  ;;  %v13905_v11 = vld [vmem:[#allocation9 + $0x2c8] sm:$0xff] }
 0x49e   :  { %9481 = vmatprep.subr.mxu0 %v13889_v28  ;;  %9542 = vmatprep.subr.mxu1 %v13890_v8  ;;  %v13906_v10 = vld [vmem:[#allocation9 + $0x6c8] sm:$0xff]  ;;  %v13907_v49 = vld [vmem:[#allocation9 + $0x2c0] sm:$0xff] }
 0x49f   :  { %9482 = vmatpush2.msra.mxu0 %v13891_v27  ;;  %9543 = vmatpush1.msra.mxu1 %v13892_v24  ;;  %v13908_v36 = vld [vmem:[#allocation9 + $0x6c0] sm:$0xff]  ;;  %v13909_v23 = vld [vmem:[#allocation9 + $0x2a8] sm:$0xff] }
 0x4a0   :  { %9483 = vmatprep.subr.mxu0 %v13893_v50  ;;  %9544 = vmatprep.subr.mxu1 %v13894_v17  ;;  %v13910_v62 = vld [vmem:[#allocation9 + $0x6a8] sm:$0xff]  ;;  %v13911_v28 = vld [vmem:[#allocation9 + $0x2a0] sm:$0xff] }
 0x4a1   :  { %9484 = vmatpush2.msra.mxu0 %v13895_v61  ;;  %9545 = vmatpush1.msra.mxu1 %v13896_v40  ;;  %v13912_v8 = vld [vmem:[#allocation9 + $0x6a0] sm:$0xff]  ;;  %v13913_v27 = vld [vmem:[#allocation9 + $0x288] sm:$0xff] }
 0x4a2   :  { %9485 = vmatprep.subr.mxu0 %v13897_v31  ;;  %9546 = vmatprep.subr.mxu1 %v13898_v51  ;;  %v13914_v24 = vld [vmem:[#allocation9 + $0x688] sm:$0xff]  ;;  %v13915_v50 = vld [vmem:[#allocation9 + $0x280] sm:$0xff] }
 0x4a3   :  { %9486 = vmatpush2.msra.mxu0 %v13899_v1  ;;  %9547 = vmatpush1.msra.mxu1 %v13900_v34  ;;  %v13916_v17 = vld [vmem:[#allocation9 + $0x680] sm:$0xff]  ;;  %v13917_v61 = vld [vmem:[#allocation9 + $0x268] sm:$0xff] }
 0x4a4   :  { %9487 = vmatprep.subr.mxu0 %v13901_v41  ;;  %9564 = vmatprep.subr.mxu1 %v13902_v6  ;;  %v13918_v40 = vld [vmem:[#allocation9 + $0x668] sm:$0xff]  ;;  %v13919_v31 = vld [vmem:[#allocation9 + $0x260] sm:$0xff] }
 0x4a5   :  { %9488 = vmatpush2.msra.mxu0 %v13903_v32  ;;  %9565 = vmatpush2.msra.mxu1 %v13904_v15  ;;  %v13920_v51 = vld [vmem:[#allocation9 + $0x660] sm:$0xff]  ;;  %v13921_v1 = vld [vmem:[#allocation9 + $0x248] sm:$0xff] }
 0x4a6   :  { %9489 = vmatprep.subr.mxu0 %v13905_v11  ;;  %9566 = vmatprep.subr.mxu1 %v13906_v10  ;;  %v13922_v34 = vld [vmem:[#allocation9 + $0x648] sm:$0xff]  ;;  %v13923_v41 = vld [vmem:[#allocation9 + $0x240] sm:$0xff] }
 0x4a7   :  { %9490 = vmatpush2.msra.mxu0 %v13907_v49  ;;  %9567 = vmatpush2.msra.mxu1 %v13908_v36  ;;  %v13924_v6 = vld [vmem:[#allocation9 + $0x640] sm:$0xff]  ;;  %v13925_v32 = vld [vmem:[#allocation9 + $0x228] sm:$0xff] }
 0x4a8   :  { %9491 = vmatprep.subr.mxu0 %v13909_v23  ;;  %9568 = vmatprep.subr.mxu1 %v13910_v62  ;;  %v13926_v15 = vld [vmem:[#allocation9 + $0x628] sm:$0xff]  ;;  %v13927_v11 = vld [vmem:[#allocation9 + $0x220] sm:$0xff] }
 0x4a9   :  { %9492 = vmatpush2.msra.mxu0 %v13911_v28  ;;  %9569 = vmatpush2.msra.mxu1 %v13912_v8  ;;  %v13928_v10 = vld [vmem:[#allocation9 + $0x620] sm:$0xff]  ;;  %v13929_v49 = vld [vmem:[#allocation9 + $0x208] sm:$0xff]  ;;  %v13933_v28 = vld [vmem:[#allocation9 + $0x1f8] sm:$0xff] }
 0x4aa   :  { %9493 = vmatprep.subr.mxu0 %v13913_v27  ;;  %9570 = vmatprep.subr.mxu1 %v13914_v24  ;;  %v13930_v36 = vld [vmem:[#allocation9 + $0x608] sm:$0xff]  ;;  %v13931_v23 = vld [vmem:[#allocation9 + $0x200] sm:$0xff]  ;;  %v13934_v8 = vld [vmem:[#allocation9 + $0x5f8] sm:$0xff] }
 0x4ab   :  { %9494 = vmatpush2.msra.mxu0 %v13915_v50  ;;  %9571 = vmatpush2.msra.mxu1 %v13916_v17  ;;  %v13932_v62 = vld [vmem:[#allocation9 + $0x600] sm:$0xff]  ;;  %v13935_v27 = vld [vmem:[#allocation9 + $0x1f0] sm:$0xff]  ;;  %v13937_v50 = vld [vmem:[#allocation9 + $0x1d8] sm:$0xff] }
 0x4ac   :  { %9495 = vmatprep.subr.mxu0 %v13917_v61  ;;  %9572 = vmatprep.subr.mxu1 %v13918_v40  ;;  %v13936_v24 = vld [vmem:[#allocation9 + $0x5f0] sm:$0xff]  ;;  %v13938_v17 = vld [vmem:[#allocation9 + $0x5d8] sm:$0xff] }
 0x4ad   :  { %9496 = vmatpush2.msra.mxu0 %v13919_v31  ;;  %9573 = vmatpush2.msra.mxu1 %v13920_v51  ;;  %v13939_v61 = vld [vmem:[#allocation9 + $0x1d0] sm:$0xff]  ;;  %v13941_v31 = vld [vmem:[#allocation9 + $0x1b8] sm:$0xff] }
 0x4ae   :  { %9497 = vmatprep.subr.mxu0 %v13921_v1  ;;  %9574 = vmatprep.subr.mxu1 %v13922_v34  ;;  %v13940_v40 = vld [vmem:[#allocation9 + $0x5d0] sm:$0xff]  ;;  %v13942_v51 = vld [vmem:[#allocation9 + $0x5b8] sm:$0xff] }
 0x4af   :  { %9498 = vmatpush2.msra.mxu0 %v13923_v41  ;;  %9575 = vmatpush2.msra.mxu1 %v13924_v6  ;;  %v13943_v1 = vld [vmem:[#allocation9 + $0x1b0] sm:$0xff]  ;;  %v13945_v41 = vld [vmem:[#allocation9 + $0x198] sm:$0xff] }
 0x4b0   :  { %9499 = vmatprep.subr.mxu0 %v13925_v32  ;;  %9576 = vmatprep.subr.mxu1 %v13926_v15  ;;  %v13944_v34 = vld [vmem:[#allocation9 + $0x5b0] sm:$0xff]  ;;  %v13946_v6 = vld [vmem:[#allocation9 + $0x598] sm:$0xff] }
 0x4b1   :  { %9500 = vmatpush2.msra.mxu0 %v13927_v11  ;;  %9577 = vmatpush2.msra.mxu1 %v13928_v10  ;;  %v13947_v32 = vld [vmem:[#allocation9 + $0x190] sm:$0xff]  ;;  %v13949_v11 = vld [vmem:[#allocation9 + $0x178] sm:$0xff] }
 0x4b2   :  { %9501 = vmatprep.subr.mxu0 %v13929_v49  ;;  %9578 = vmatprep.subr.mxu1 %v13930_v36  ;;  %v13948_v15 = vld [vmem:[#allocation9 + $0x590] sm:$0xff]  ;;  %v13950_v10 = vld [vmem:[#allocation9 + $0x578] sm:$0xff] }
 0x4b3   :  { %9502 = vmatpush2.msra.mxu0 %v13931_v23  ;;  %9579 = vmatpush2.msra.mxu1 %v13932_v62  ;;  %v13951_v49 = vld [vmem:[#allocation9 + $0x170] sm:$0xff]  ;;  %v13953_v36 = vld [vmem:[#allocation9 + $0x158] sm:$0xff] }
 0x4b4   :  { %9504 = vmatmul.mubr.f32.vlgmr.msra.gmra.mxu0 %v16884_v20  ;;  %9581 = vmatmul.mubr.f32.vlgmr.msra.gmra.mxu1 %v16886_v18  ;;  %v13954_v23 = vld [vmem:[#allocation9 + $0x558] sm:$0xff]  ;;  %v13956_v62 = vld [vmem:[#allocation9 + $0x550] sm:$0xff] }
 0x4b5   :  { %9593 = vmatprep.subr.mxu1 %v13933_v28  ;;  %9670 = vmatprep.subr.mxu0 %v13934_v8  ;;  %v13957_v28 = vld [vmem:[#allocation9 + $0x138] sm:$0xff] }
 0x4b6   :  { %9509 = vmatprep.mubr.f32.mxu0 %v16895_v42  ;;  %13423 = vmatprep.mubr.msk.f32.mxu1 %vm6885_vm6, %v16897_v54  ;;  %v13958_v8 = vld [vmem:[#allocation9 + $0x538] sm:$0xff] }
 0x4b7   :  { %9594 = vmatpush1.msra.mxu1 %v13935_v27  ;;  %9671 = vmatpush1.msra.mxu0 %v13936_v24  ;;  %v13959_v27 = vld [vmem:[#allocation9 + $0x130] sm:$0xff] }
 0x4b8   :  { %9595 = vmatprep.subr.mxu1 %v13937_v50  ;;  %9672 = vmatprep.subr.mxu0 %v13938_v17  ;;  %v13960_v24 = vld [vmem:[#allocation9 + $0x530] sm:$0xff]  ;;  %v8155_v50 = vpop.f32.mrf.mxu0  ;;  %v13961_v17 = vld [vmem:[#allocation9 + $0x118] sm:$0xff] }
 0x4b9   :  { %9596 = vmatpush1.msra.mxu1 %v13939_v61  ;;  %9673 = vmatpush1.msra.mxu0 %v13940_v40  ;;  %v13962_v61 = vld [vmem:[#allocation9 + $0x518] sm:$0xff]  ;;  %v13963_v40 = vld [vmem:[#allocation9 + $0x110] sm:$0xff] }
 0x4ba   :  { %9510 = vmatmul.mubr.f32.gmra.mxu0 %v16904_v25  ;;  %9587 = vmatmul.mubr.f32.gmra.mxu1 %v16906_v7 }
 0x4bb   :  { %9597 = vmatprep.subr.mxu1 %v13941_v31  ;;  %9674 = vmatprep.subr.mxu0 %v13942_v51  ;;  %v13964_v31 = vld [vmem:[#allocation9 + $0x510] sm:$0xff]  ;;  %v13965_v51 = vld [vmem:[#allocation9 + $0xf8] sm:$0xff] }
 0x4bc   :  { %9598 = vmatpush1.msra.mxu1 %v13943_v1  ;;  %9657 = vmatprep.mubr.f32.mxu1 %v16880_v53  ;;  %v13952_v53 = vld [vmem:[#allocation9 + $0x570] sm:$0xff]  ;;  %v13966_v1 = vld [vmem:[#allocation9 + $0x4f8] sm:$0xff] }
 0x4bd   :  { %9675 = vmatpush1.msra.mxu0 %v13944_v34  ;;  %13424 = vmatprep.mubr.msk.f32.mxu0 %vm6885_vm6, %v16882_v59  ;;  %v13955_v59 = vld [vmem:[#allocation9 + $0x150] sm:$0xff]  ;;  %v17125_v34 = vrot.slane %v7238_v33, %v14790_v9  ;;  %v17143_v33 = vrot.slane %v7241_v38, %v14790_v9 }
 0x4be   :  { %9599 = vmatprep.subr.mxu1 %v13945_v41  ;;  %9676 = vmatprep.subr.mxu0 %v13946_v6  ;;  %v13967_v41 = vld [vmem:[#allocation9 + $0xf0] sm:$0xff] }
 0x4bf   :  { %9600 = vmatpush1.msra.mxu1 %v13947_v32  ;;  %9677 = vmatpush1.msra.mxu0 %v13948_v15  ;;  %v13968_v6 = vld [vmem:[#allocation9 + $0x4f0] sm:$0xff]  ;;  %v8157_v32 = vpop.f32.mrf.mxu0  ;;  %v17131_v15 = vrot.slane %v7240_v14, %v14790_v9  ;;  %v7270_v22 = vcombine.high %v17125_v34, %v17125_v34 }
 0x4c0   :  { %9601 = vmatprep.subr.mxu1 %v13949_v11  ;;  %9678 = vmatprep.subr.mxu0 %v13950_v10  ;;  %v17137_v11 = vrot.slane %v7239_v2, %v14790_v9  ;;  %v13969_v10 = vld [vmem:[#allocation9 + $0xd8] sm:$0xff]  ;;  %v13972_v14 = vld [vmem:[#allocation9 + $0x4d0] sm:$0xff] }
 0x4c1   :  { %9602 = vmatpush1.msra.mxu1 %v13951_v49  ;;  %9679 = vmatpush1.msra.mxu0 %v13952_v53  ;;  %v13970_v49 = vld [vmem:[#allocation9 + $0x4d8] sm:$0xff]  ;;  %v8161_v39 = vpop.f32.mrf.mxu0  ;;  %v13975_v2 = vld [vmem:[#allocation9 + $0xb0] sm:$0xff] }
 0x4c2   :  { %9603 = vmatprep.subr.mxu1 %v13953_v36  ;;  %9680 = vmatprep.subr.mxu0 %v13954_v23  ;;  %v13971_v36 = vld [vmem:[#allocation9 + $0xd0] sm:$0xff] }
 0x4c3   :  { %9604 = vmatpush1.msra.mxu1 %v13955_v59  ;;  %9681 = vmatpush1.msra.mxu0 %v13956_v62  ;;  %v13973_v59 = vld [vmem:[#allocation9 + $0xb8] sm:$0xff]  ;;  %v13976_v38 = vld [vmem:[#allocation9 + $0x4b0] sm:$0xff] }
 0x4c4   :  { %9605 = vmatprep.subr.mxu1 %v13957_v28  ;;  %9682 = vmatprep.subr.mxu0 %v13958_v8  ;;  %v7271_v28 = vcombine.high %v17131_v15, %v17131_v15  ;;  %v7272_v8 = vcombine.high %v17137_v11, %v17137_v11 }
 0x4c5   :  { %9606 = vmatpush1.msra.mxu1 %v13959_v27  ;;  %9683 = vmatpush1.msra.mxu0 %v13960_v24  ;;  %v7273_v27 = vcombine.high %v17143_v33, %v17143_v33  ;;  %v13977_v24 = vld [vmem:[#allocation9 + $0x98] sm:$0xff] }
 0x4c6   :  { %9607 = vmatprep.subr.mxu1 %v13961_v17  ;;  %9684 = vmatprep.subr.mxu0 %v13962_v61  ;;  %v17157_v17 = vrot.slane %v7306_v52, %v14790_v9  ;;  %v13979_v61 = vld [vmem:[#allocation9 + $0x90] sm:$0xff]  ;;  %v13981_v52 = vld [vmem:[#allocation9 + $0x78] sm:$0xff] }
 0x4c7   :  { %9608 = vmatpush1.msra.mxu1 %v13963_v40  ;;  %9685 = vmatpush1.msra.mxu0 %v13964_v31  ;;  %v13980_v40 = vld [vmem:[#allocation9 + $0x490] sm:$0xff] }
 0x4c8   :  { %9609 = vmatprep.subr.mxu1 %v13965_v51  ;;  %9686 = vmatprep.subr.mxu0 %v13966_v1  ;;  %v7338_v3 = vcombine.high %v17157_v17, %v17157_v17 }
 0x4c9   :  { %9610 = vmatpush1.msra.mxu1 %v13967_v41  ;;  %9687 = vmatpush1.msra.mxu0 %v13968_v6  ;;  %v17163_v41 = vrot.slane %v7307_v60, %v14790_v9  ;;  %v8184_v6 = vrot.slane %v8174_v45, %v14790_v9 }
 0x4ca   :  { %9611 = vmatprep.subr.mxu1 %v13969_v10  ;;  %9688 = vmatprep.subr.mxu0 %v13970_v49  ;;  %v8078_v53 = vpop.f32.mrf.mxu1  ;;  %v8191_v49 = vrot.slane %v8175_v44, %v14790_v9  ;;  %v13986_v44 = vld [vmem:[#allocation9 + $0x458] sm:$0xff] }
 0x4cb   :  { %9612 = vmatpush1.msra.mxu1 %v13971_v36  ;;  %9689 = vmatpush1.msra.mxu0 %v13972_v14  ;;  %v8156_v23 = vadd.f32 %v8155_v50, %v8078_v53  ;;  %v13978_v50 = vld [vmem:[#allocation9 + $0x498] sm:$0xff]  ;;  %v8163_v53 = vpop.f32.mrf.mxu0  ;;  %v13983_v36 = vld [vmem:[#allocation9 + $0x70] sm:$0xff]  ;;  %v17179_v14 = vrot.slane %v8242_v12, %v14790_v9  ;;  %v7339_v58 = vcombine.high %v17163_v41, %v17163_v41 }
 0x4cc   :  { %9613 = vmatprep.subr.mxu1 %v13973_v59  ;;  %9690 = vmatprep.subr.mxu0 %v13974_v55  ;;  %v8080_v5 = vpop.f32.mrf.mxu1  ;;  %v13987_v59 = vld [vmem:[#allocation9 + $0x50] sm:$0xff]  ;;  %v13989_v12 = vld [vmem:[#allocation9 + $0x38] sm:$0xff] }
 0x4cd   :  { %9614 = vmatpush1.msra.mxu1 %v13975_v2  ;;  %9691 = vmatpush1.msra.mxu0 %v13976_v38  ;;  %v8158_v62 = vadd.f32 %v8157_v32, %v8080_v5  ;;  %v13982_v32 = vld [vmem:[#allocation9 + $0x478] sm:$0xff]  ;;  %v13988_v55 = vld [vmem:[#allocation9 + $0x450] sm:$0xff] }
 0x4ce   :  { %9615 = vmatprep.subr.mxu1 %v13977_v24  ;;  %9692 = vmatprep.subr.mxu0 %v13978_v50  ;;  %v13990_v38 = vld [vmem:[#allocation9 + $0x438] sm:$0xff]  ;;  %v13992_v24 = vld [vmem:[#allocation9 + $0x430] sm:$0xff] }
 0x4cf   :  { %9616 = vmatpush1.msra.mxu1 %v13979_v61  ;;  %9693 = vmatpush1.msra.mxu0 %v13980_v40  ;;  %v8176_v31 = vcombine.low %v8156_v23, %v8158_v62  ;;  %v8177_v51 = vcombine.high %v8156_v23, %v8158_v62  ;;  %v8084_v1 = vpop.f32.mrf.mxu1 }
 0x4d0   :  { %9617 = vmatprep.subr.mxu1 %v13981_v52  ;;  %9694 = vmatprep.subr.mxu0 %v13982_v32  ;;  %v8162_v10 = vadd.f32 %v8161_v39, %v8084_v1  ;;  %v13995_v32 = vld [vmem:[#allocation9 + $0x10] sm:$0xff] }
 0x4d1   :  { %9618 = vmatpush1.msra.mxu1 %v13983_v36  ;;  %9695 = vmatpush1.msra.mxu0 %v13984_v0  ;;  %v8198_v47 = vrot.slane %v8176_v31, %v14790_v9  ;;  %v8205_v60 = vrot.slane %v8177_v51, %v14790_v9  ;;  %v8086_v45 = vpop.f32.mrf.mxu1  ;;  %v13993_v31 = vld [vmem:[#allocation9 + $0x18] sm:$0xff] }
 0x4d2   :  { %9619 = vmatprep.subr.mxu1 %v13985_v56  ;;  %9696 = vmatprep.subr.mxu0 %v13986_v44  ;;  %v8164_v23 = vadd.f32 %v8163_v53, %v8086_v45  ;;  %v13994_v51 = vld [vmem:[#allocation9 + $0x418] sm:$0xff]  ;;  %v13999_v44 = vld [vmem:[#allocation9 + $0x3f0] sm:$0xff] }
 0x4d3   :  { %9620 = vmatpush1.msra.mxu1 %v13987_v59  ;;  %9697 = vmatpush1.msra.mxu0 %v13988_v55  ;;  %v8206_v5 = vcombine.low %v8184_v6, %v8198_v47  ;;  %v8207_v39 = vcombine.high %v8184_v6, %v8198_v47  ;;  %v8208_v2 = vcombine.low %v8191_v49, %v8205_v60  ;;  %v13997_v0 = vld [vmem:[#allocation9 + $0x3f8] sm:$0xff] }
 0x4d4   :  { %9621 = vmatprep.subr.mxu1 %v13989_v12  ;;  %9698 = vmatprep.subr.mxu0 %v13990_v38  ;;  %v8209_v62 = vcombine.high %v8191_v49, %v8205_v60  ;;  %v8244_v35 = vcombine.low %v8162_v10, %v8164_v23  ;;  %v8245_v48 = vcombine.high %v8162_v10, %v8164_v23  ;;  %v13996_v10 = vld [vmem:[#allocation9 + $0x410] sm:$0xff]  ;;  %v13998_v47 = vld [vmem:[#allocation9 + $0x6f8] sm:$0xff] }
 0x4d5   :  { %9622 = vmatpush1.msra.mxu1 %v13991_v26  ;;  %9699 = vmatpush1.msra.mxu0 %v13992_v24  ;;  %v8216_v50 = vrot.slane %v8206_v5, %v14790_v9  ;;  %v8223_v61 = vrot.slane %v8208_v2, %v14790_v9  ;;  %v8230_v40 = vrot.slane %v8207_v39, %v14790_v9  ;;  %v14000_v23 = vld [vmem:[#allocation9 + $0x6f0] sm:$0xff] }
 0x4d6   :  { %9623 = vmatprep.subr.mxu1 %v13993_v31  ;;  %9700 = vmatprep.subr.mxu0 %v13994_v51  ;;  %v8237_v1 = vrot.slane %v8209_v62, %v14790_v9  ;;  %v8266_v6 = vrot.slane %v8244_v35, %v14790_v9  ;;  %v8273_v52 = vrot.slane %v8245_v48, %v14790_v9  ;;  %v14004_v12 = vld [vmem:[#allocation9 + $0x6d0] sm:$0xff]  ;;  %v14006_v35 = vld [vmem:[#allocation9 + $0x6b8] sm:$0xff] }
 0x4d7   :  { %9624 = vmatpush1.msra.mxu1 %v13995_v32  ;;  %9701 = vmatpush1.msra.mxu0 %v13996_v10  ;;  %v8238_v49 = vcombine.high %v8216_v50, %v8216_v50  ;;  %v8239_v53 = vcombine.high %v8223_v61, %v8223_v61  ;;  %v8240_v36 = vcombine.high %v8230_v40, %v8230_v40  ;;  %v14007_v26 = vld [vmem:[#allocation9 + $0x3b0] sm:$0xff] }
 0x4d8   :  { %9625 = vmatprep.subr.mxu1 %v13997_v0  ;;  %9718 = vmatprep.subr.mxu0 %v13998_v47  ;;  %v8241_v60 = vcombine.high %v8237_v1, %v8237_v1  ;;  %v17194_v45 = vadd.f32 %v8216_v50, %v17125_v34  ;;  %v17197_v56 = vadd.f32 %v8230_v40, %v17137_v11  ;;  %v14002_v11 = vld [vmem:[#allocation9 + $0x6d8] sm:$0xff]  ;;  %v14012_v10 = vld [vmem:[#allocation9 + $0x690] sm:$0xff] }
 0x4d9   :  { %9626 = vmatpush2.msra.mxu1 %v13999_v44  ;;  %9719 = vmatpush2.msra.mxu0 %v14000_v23  ;;  %v17202_v59 = vadd.f32 %v8238_v49, %v7270_v22  ;;  %v17207_v55 = vadd.f32 %v8240_v36, %v7272_v8  ;;  %v17210_v5 = vadd.f32 %v8223_v61, %v17131_v15  ;;  %v14001_v22 = vld [vmem:[#allocation9 + $0x3d8] sm:$0xff]  ;;  %v14003_v8 = vld [vmem:[#allocation9 + $0x3d0] sm:$0xff] }
 0x4da   :  { %v17213_v39 = vadd.f32 %v8237_v1, %v17143_v33  ;;  %v17218_v2 = vadd.f32 %v8239_v53, %v7271_v28  ;;  %v17223_v34 = vadd.f32 %v8241_v60, %v7273_v27  ;;  %9627 = vmatprep.subr.mxu1 %v14001_v22  ;;  %9720 = vmatprep.subr.mxu0 %v14002_v11  ;;  %v14005_v27 = vld [vmem:[#allocation9 + $0x3b8] sm:$0xff]  ;;  %v14019_v44 = vld [vmem:[#allocation9 + $0x350] sm:$0xff] }
 0x4db   :  { %9628 = vmatpush2.msra.mxu1 %v14003_v8  ;;  %9721 = vmatpush2.msra.mxu0 %v14004_v12  ;;  %v8274_v38 = vcombine.low %v17179_v14, %v8266_v6  ;;  %v8275_v62 = vcombine.high %v17179_v14, %v8266_v6  ;;  %v8276_v15 = vcombine.low %v17185_v13, %v8273_v52  ;;  %v14008_v14 = vld [vmem:[#allocation9 + $0x6b0] sm:$0xff]  ;;  %v14009_v61 = vld [vmem:[#allocation9 + $0x398] sm:$0xff] }
 0x4dc   :  { %v7323_v33 = vrot.slane %v7308_v29, %v14790_v9  ;;  %v7337_v28 = vrot.slane %v7309_v43, %v14790_v9  ;;  %9629 = vmatprep.subr.mxu1 %v14005_v27  ;;  %9722 = vmatprep.subr.mxu0 %v14006_v35  ;;  %v8277_v48 = vcombine.high %v17185_v13, %v8273_v52  ;;  %v14010_v13 = vld [vmem:[#allocation9 + $0x698] sm:$0xff]  ;;  %v14011_v6 = vld [vmem:[#allocation9 + $0x390] sm:$0xff]  ;;  %v14030_v27 = vld [vmem:[#allocation9 + $0x8e8] sm:$0xff] }
 0x4dd   :  { %9630 = vmatpush2.msra.mxu1 %v14007_v26  ;;  %9723 = vmatpush2.msra.mxu0 %v14008_v14  ;;  %v8284_v24 = vrot.slane %v8274_v38, %v14790_v9  ;;  %v8291_v50 = vrot.slane %v8276_v15, %v14790_v9  ;;  %v8298_v29 = vrot.slane %v8275_v62, %v14790_v9  ;;  %v14013_v49 = vld [vmem:[#allocation9 + $0x378] sm:$0xff]  ;;  %v14020_v23 = vld [vmem:[#allocation9 + $0x650] sm:$0xff]  ;;  %v14034_v14 = vld [vmem:[#allocation9 + $0x8c8] sm:$0xff] }
 0x4de   :  { %v8305_v43 = vrot.slane %v8277_v48, %v14790_v9  ;;  %9631 = vmatprep.subr.mxu1 %v14009_v61  ;;  %9724 = vmatprep.subr.mxu0 %v14010_v13  ;;  %v14014_v0 = vld [vmem:[#allocation9 + $0x678] sm:$0xff]  ;;  %v14023_v8 = vld [vmem:[#allocation9 + $0x330] sm:$0xff]  ;;  %v14032_v48 = vld [vmem:[#allocation9 + $0x8e0] sm:$0xff] }
 0x4df   :  { %v8306_v40 = vcombine.high %v8284_v24, %v8284_v24  ;;  %v8307_v31 = vcombine.high %v8298_v29, %v8298_v29  ;;  %v17246_v51 = vadd.f32 %v8284_v24, %v17157_v17  ;;  %v17249_v1 = vadd.f32 %v8298_v29, %v17163_v41  ;;  %9632 = vmatpush2.msra.mxu1 %v14011_v6  ;;  %v14015_v17 = vld [vmem:[#allocation9 + $0x370] sm:$0xff]  ;;  %v14017_v47 = vld [vmem:[#allocation9 + $0x358] sm:$0xff]  ;;  %v14044_v13 = vld [vmem:[#allocation9 + $0x880] sm:$0xff] }
 0x4e0   :  { %v17251_v52 = vadd.f32 %v8291_v50, %v7323_v33  ;;  %v17253_v32 = vadd.f32 %v8305_v43, %v7337_v28  ;;  %9725 = vmatpush2.msra.mxu0 %v14012_v10  ;;  %9633 = vmatprep.subr.mxu1 %v14013_v49  ;;  %v14016_v41 = vld [vmem:[#allocation9 + $0x670] sm:$0xff]  ;;  %v14018_v60 = vld [vmem:[#allocation9 + $0x658] sm:$0xff]  ;;  %v14036_v50 = vld [vmem:[#allocation9 + $0x8c0] sm:$0xff] }
 0x4e1   :  { %v17255_v53 = vadd.f32 %v8306_v40, %v7338_v3  ;;  %v17257_v36 = vadd.f32 %v8307_v31, %v7339_v58  ;;  %9726 = vmatprep.subr.mxu0 %v14014_v0  ;;  %9634 = vmatpush2.msra.mxu1 %v14015_v17  ;;  %v14021_v22 = vld [vmem:[#allocation9 + $0x338] sm:$0xff]  ;;  %v14024_v12 = vld [vmem:[#allocation9 + $0x630] sm:$0xff]  ;;  %v14040_v58 = vld [vmem:[#allocation9 + $0x8a0] sm:$0xff] }
 0x4e2   :  { %9727 = vmatpush2.msra.mxu0 %v14016_v41  ;;  %9635 = vmatprep.subr.mxu1 %v14017_v47  ;;  %v14022_v11 = vld [vmem:[#allocation9 + $0x638] sm:$0xff]  ;;  %v14027_v15 = vld [vmem:[#allocation9 + $0x310] sm:$0xff]  ;;  %v14042_v43 = vld [vmem:[#allocation9 + $0x888] sm:$0xff] }
 0x4e3   :  { %9728 = vmatprep.subr.mxu0 %v14018_v60  ;;  %9636 = vmatpush2.msra.mxu1 %v14019_v44  ;;  %v14025_v38 = vld [vmem:[#allocation9 + $0x318] sm:$0xff]  ;;  %v14028_v33 = vld [vmem:[#allocation9 + $0x610] sm:$0xff]  ;;  %v14046_v31 = vld [vmem:[#allocation9 + $0x868] sm:$0xff] }
 0x4e4   :  { %9729 = vmatpush2.msra.mxu0 %v14020_v23  ;;  %9637 = vmatprep.subr.mxu1 %v14021_v22  ;;  %v14026_v62 = vld [vmem:[#allocation9 + $0x618] sm:$0xff]  ;;  %v14031_v35 = vld [vmem:[#allocation9 + $0x2f0] sm:$0xff]  ;;  %v14048_v6 = vld [vmem:[#allocation9 + $0x860] sm:$0xff] }
 0x4e5   :  { %9730 = vmatprep.subr.mxu0 %v14022_v11  ;;  %9638 = vmatpush2.msra.mxu1 %v14023_v8  ;;  %v14029_v28 = vld [vmem:[#allocation9 + $0x2f8] sm:$0xff]  ;;  %v14035_v24 = vld [vmem:[#allocation9 + $0x2d0] sm:$0xff]  ;;  %v14050_v49 = vld [vmem:[#allocation9 + $0x848] sm:$0xff] }
 0x4e6   :  { %9731 = vmatpush2.msra.mxu0 %v14024_v12  ;;  %9639 = vmatprep.subr.mxu1 %v14025_v38  ;;  %v14033_v26 = vld [vmem:[#allocation9 + $0x2d8] sm:$0xff]  ;;  %v14039_v3 = vld [vmem:[#allocation9 + $0x2b0] sm:$0xff]  ;;  %v14052_v17 = vld [vmem:[#allocation9 + $0x840] sm:$0xff] }
 0x4e7   :  { %9732 = vmatprep.subr.mxu0 %v14026_v62  ;;  %9640 = vmatpush2.msra.mxu1 %v14027_v15  ;;  %v14037_v29 = vld [vmem:[#allocation9 + $0x2b8] sm:$0xff]  ;;  %v14043_v61 = vld [vmem:[#allocation9 + $0x290] sm:$0xff]  ;;  %v14054_v47 = vld [vmem:[#allocation9 + $0x828] sm:$0xff] }
 0x4e8   :  { %9733 = vmatpush2.msra.mxu0 %v14028_v33  ;;  %9641 = vmatprep.subr.mxu1 %v14029_v28  ;;  %v14045_v40 = vld [vmem:[#allocation9 + $0x278] sm:$0xff]  ;;  %v14051_v0 = vld [vmem:[#allocation9 + $0x250] sm:$0xff]  ;;  %v14056_v44 = vld [vmem:[#allocation9 + $0x820] sm:$0xff] }
 0x4e9   :  { %9735 = vmatmul.mubr.f32.vlgmr.msra.gmra.mxu0 %v16886_v18  ;;  %9903 = vmatprep.subr.mxu0 %v14030_v27  ;;  %v14038_v18 = vld [vmem:[#allocation9 + $0x8a8] sm:$0xff]  ;;  %v14049_v10 = vld [vmem:[#allocation9 + $0x258] sm:$0xff]  ;;  %v14055_v60 = vld [vmem:[#allocation9 + $0x230] sm:$0xff] }
 0x4ea   :  { %9642 = vmatpush2.msra.mxu1 %v14031_v35  ;;  %13425 = vmatprep.mubr.msk.f32.mxu0 %vm6885_vm6, %v16897_v54  ;;  %v14041_v54 = vld [vmem:[#allocation9 + $0x298] sm:$0xff]  ;;  %v14058_v22 = vld [vmem:[#allocation9 + $0x808] sm:$0xff]  ;;  %v14059_v11 = vld [vmem:[#allocation9 + $0x210] sm:$0xff] }
 0x4eb   :  { %9904 = vmatpush1.msra.mxu0 %v14032_v48  ;;  %9643 = vmatprep.subr.mxu1 %v14033_v26  ;;  %v14053_v41 = vld [vmem:[#allocation9 + $0x238] sm:$0xff]  ;;  %v14060_v8 = vld [vmem:[#allocation9 + $0x800] sm:$0xff]  ;;  %v14061_v12 = vld [vmem:[#allocation9 + $0x7e8] sm:$0xff] }
 0x4ec   :  { %9905 = vmatprep.subr.mxu0 %v14034_v14  ;;  %9644 = vmatpush2.msra.mxu1 %v14035_v24  ;;  %v14057_v23 = vld [vmem:[#allocation9 + $0x218] sm:$0xff]  ;;  %v14062_v38 = vld [vmem:[#allocation9 + $0xce8] sm:$0xff]  ;;  %v14063_v62 = vld [vmem:[#allocation9 + $0x7e0] sm:$0xff] }
 0x4ed   :  { %9906 = vmatpush1.msra.mxu0 %v14036_v50  ;;  %9645 = vmatprep.subr.mxu1 %v14037_v29  ;;  %v14064_v28 = vld [vmem:[#allocation9 + $0xce0] sm:$0xff]  ;;  %v14065_v27 = vld [vmem:[#allocation9 + $0x7c8] sm:$0xff] }
 0x4ee   :  { %9741 = vmatmul.mubr.f32.gmra.mxu0 %v16906_v7  ;;  %9907 = vmatprep.subr.mxu0 %v14038_v18  ;;  %v14047_v7 = vld [vmem:[#allocation9 + $0x270] sm:$0xff]  ;;  %v14066_v35 = vld [vmem:[#allocation9 + $0xcc8] sm:$0xff]  ;;  %v14067_v48 = vld [vmem:[#allocation9 + $0x7c0] sm:$0xff] }
 0x4ef   :  { %9646 = vmatpush2.msra.mxu1 %v14039_v3  ;;  %9908 = vmatpush1.msra.mxu0 %v14040_v58  ;;  %v14068_v14 = vld [vmem:[#allocation9 + $0xcc0] sm:$0xff]  ;;  %v14070_v24 = vld [vmem:[#allocation9 + $0xca8] sm:$0xff] }
 0x4f0   :  { %9967 = vmatprep.mubr.f32.mxu0 %v16962_v63  ;;  %9647 = vmatprep.subr.mxu1 %v14041_v54  ;;  %v14071_v50 = vld [vmem:[#allocation9 + $0x7a0] sm:$0xff]  ;;  %v14073_v18 = vld [vmem:[#allocation9 + $0x788] sm:$0xff] }
 0x4f1   :  { %9909 = vmatprep.subr.mxu0 %v14042_v43  ;;  %9648 = vmatpush2.msra.mxu1 %v14043_v61  ;;  %v14072_v29 = vld [vmem:[#allocation9 + $0xca0] sm:$0xff]  ;;  %v14074_v54 = vld [vmem:[#allocation9 + $0xc88] sm:$0xff] }
 0x4f2   :  { %9910 = vmatpush1.msra.mxu0 %v14044_v13  ;;  %9649 = vmatprep.subr.mxu1 %v14045_v40  ;;  %v14075_v43 = vld [vmem:[#allocation9 + $0x780] sm:$0xff]  ;;  %v14077_v13 = vld [vmem:[#allocation9 + $0x768] sm:$0xff] }
 0x4f3   :  { %9911 = vmatprep.subr.mxu0 %v14046_v31  ;;  %9650 = vmatpush2.msra.mxu1 %v14047_v7  ;;  %v14078_v40 = vld [vmem:[#allocation9 + $0xc68] sm:$0xff]  ;;  %v14079_v31 = vld [vmem:[#allocation9 + $0x760] sm:$0xff] }
 0x4f4   :  { %9912 = vmatpush1.msra.mxu0 %v14048_v6  ;;  %9651 = vmatprep.subr.mxu1 %v14049_v10  ;;  %v14080_v7 = vld [vmem:[#allocation9 + $0xc60] sm:$0xff]  ;;  %v14081_v6 = vld [vmem:[#allocation9 + $0x748] sm:$0xff] }
 0x4f5   :  { %9913 = vmatprep.subr.mxu0 %v14050_v49  ;;  %9652 = vmatpush2.msra.mxu1 %v14051_v0  ;;  %v14082_v10 = vld [vmem:[#allocation9 + $0xc48] sm:$0xff]  ;;  %v14083_v49 = vld [vmem:[#allocation9 + $0x740] sm:$0xff] }
 0x4f6   :  { %9914 = vmatpush1.msra.mxu0 %v14052_v17  ;;  %9653 = vmatprep.subr.mxu1 %v14053_v41  ;;  %v14084_v0 = vld [vmem:[#allocation9 + $0xc40] sm:$0xff]  ;;  %v14085_v17 = vld [vmem:[#allocation9 + $0x728] sm:$0xff] }
 0x4f7   :  { %9915 = vmatprep.subr.mxu0 %v14054_v47  ;;  %9654 = vmatpush2.msra.mxu1 %v14055_v60  ;;  %v14086_v41 = vld [vmem:[#allocation9 + $0xc28] sm:$0xff]  ;;  %v14087_v47 = vld [vmem:[#allocation9 + $0x720] sm:$0xff] }
 0x4f8   :  { %9916 = vmatpush1.msra.mxu0 %v14056_v44  ;;  %9655 = vmatprep.subr.mxu1 %v14057_v23  ;;  %v14088_v60 = vld [vmem:[#allocation9 + $0xc20] sm:$0xff]  ;;  %v14089_v44 = vld [vmem:[#allocation9 + $0x708] sm:$0xff] }
 0x4f9   :  { %9917 = vmatprep.subr.mxu0 %v14058_v22  ;;  %9656 = vmatpush2.msra.mxu1 %v14059_v11  ;;  %v14090_v23 = vld [vmem:[#allocation9 + $0xc08] sm:$0xff]  ;;  %v14091_v22 = vld [vmem:[#allocation9 + $0x700] sm:$0xff] }
 0x4fa   :  { %9918 = vmatpush1.msra.mxu0 %v14060_v8  ;;  %9658 = vmatmul.mubr.f32.vlgmr.msra.gmra.mxu1 %v16884_v20  ;;  %v14092_v11 = vld [vmem:[#allocation9 + $0xc00] sm:$0xff]  ;;  %v14093_v8 = vld [vmem:[#allocation9 + $0xae8] sm:$0xff] }
 0x4fb   :  { %9919 = vmatprep.subr.mxu0 %v14061_v12  ;;  %9980 = vmatprep.subr.mxu1 %v14062_v38  ;;  %v14094_v12 = vld [vmem:[#allocation9 + $0xbe8] sm:$0xff]  ;;  %v14095_v38 = vld [vmem:[#allocation9 + $0xae0] sm:$0xff] }
 0x4fc   :  { %9663 = vmatprep.mubr.f32.mxu1 %v16895_v42  ;;  %9920 = vmatpush1.msra.mxu0 %v14063_v62  ;;  %v17266_v15 = vpop.f32.mrf.mxu0  ;;  %v17268_v33 = vpop.f32.mrf.mxu1  ;;  %v14069_v42 = vld [vmem:[#allocation9 + $0x7a8] sm:$0xff]  ;;  %v14096_v62 = vld [vmem:[#allocation9 + $0xbe0] sm:$0xff] }
 0x4fd   :  { %9981 = vmatpush1.msra.mxu1 %v14064_v28  ;;  %9921 = vmatprep.subr.mxu0 %v14065_v27  ;;  %v14097_v28 = vld [vmem:[#allocation9 + $0xac8] sm:$0xff] }
 0x4fe   :  { %9982 = vmatprep.subr.mxu1 %v14066_v35  ;;  %9922 = vmatpush1.msra.mxu0 %v14067_v48  ;;  %v17270_v20 = vpop.f32.mrf.mxu0  ;;  %v17272_v26 = vpop.f32.mrf.mxu1  ;;  %v14098_v27 = vld [vmem:[#allocation9 + $0xbc8] sm:$0xff]  ;;  %v14099_v35 = vld [vmem:[#allocation9 + $0xac0] sm:$0xff] }
 0x4ff   :  { %9983 = vmatpush1.msra.mxu1 %v14068_v14  ;;  %9923 = vmatprep.subr.mxu0 %v14069_v42  ;;  %v14100_v48 = vld [vmem:[#allocation9 + $0xbc0] sm:$0xff]  ;;  %v14101_v14 = vld [vmem:[#allocation9 + $0xaa8] sm:$0xff] }
 0x500   :  { %9664 = vmatmul.mubr.f32.gmra.mxu1 %v16904_v25  ;;  %9984 = vmatprep.subr.mxu1 %v14070_v24  ;;  %v14076_v25 = vld [vmem:[#allocation9 + $0xc80] sm:$0xff]  ;;  %v14102_v42 = vld [vmem:[#allocation9 + $0xba8] sm:$0xff] }
 0x501   :  { %9924 = vmatpush1.msra.mxu0 %v14071_v50  ;;  %9985 = vmatpush1.msra.mxu1 %v14072_v29  ;;  %v14103_v24 = vld [vmem:[#allocation9 + $0xaa0] sm:$0xff]  ;;  %v14105_v29 = vld [vmem:[#allocation9 + $0xa88] sm:$0xff] }
 0x502   :  { %13426 = vmatprep.mubr.msk.f32.mxu1 %vm6885_vm6, %v16974_v21  ;;  %9925 = vmatprep.subr.mxu0 %v14073_v18  ;;  %v8914_v3 = vpop.f32.mrf.mxu0  ;;  %v8991_v58 = vpop.f32.mrf.mxu1  ;;  %v14104_v50 = vld [vmem:[#allocation9 + $0xba0] sm:$0xff]  ;;  %v14106_v18 = vld [vmem:[#allocation9 + $0xb88] sm:$0xff] }
 0x503   :  { %9986 = vmatprep.subr.mxu1 %v14074_v54  ;;  %9926 = vmatpush1.msra.mxu0 %v14075_v43  ;;  %v17277_v61 = vadd.f32 %v8991_v58, %v8914_v3  ;;  %v14107_v3 = vld [vmem:[#allocation9 + $0xa80] sm:$0xff]  ;;  %v14109_v54 = vld [vmem:[#allocation9 + $0xa68] sm:$0xff] }
 0x504   :  { %9987 = vmatpush1.msra.mxu1 %v14076_v25  ;;  %9927 = vmatprep.subr.mxu0 %v14077_v13  ;;  %v14108_v58 = vld [vmem:[#allocation9 + $0xb80] sm:$0xff]  ;;  %v14110_v43 = vld [vmem:[#allocation9 + $0xb68] sm:$0xff] }
 0x505   :  { %9988 = vmatprep.subr.mxu1 %v14078_v40  ;;  %9928 = vmatpush1.msra.mxu0 %v14079_v31  ;;  %v14111_v25 = vld [vmem:[#allocation9 + $0xa60] sm:$0xff]  ;;  %v14113_v40 = vld [vmem:[#allocation9 + $0xa48] sm:$0xff] }
 0x506   :  { %9989 = vmatpush1.msra.mxu1 %v14080_v7  ;;  %9929 = vmatprep.subr.mxu0 %v14081_v6  ;;  %v14112_v13 = vld [vmem:[#allocation9 + $0xb60] sm:$0xff]  ;;  %v14114_v31 = vld [vmem:[#allocation9 + $0xb48] sm:$0xff] }
 0x507   :  { %9990 = vmatprep.subr.mxu1 %v14082_v10  ;;  %9930 = vmatpush1.msra.mxu0 %v14083_v49  ;;  %v14115_v7 = vld [vmem:[#allocation9 + $0xa40] sm:$0xff]  ;;  %v14117_v10 = vld [vmem:[#allocation9 + $0xa28] sm:$0xff] }
 0x508   :  { %9991 = vmatpush1.msra.mxu1 %v14084_v0  ;;  %9931 = vmatprep.subr.mxu0 %v14085_v17  ;;  %v14116_v6 = vld [vmem:[#allocation9 + $0xb40] sm:$0xff]  ;;  %v14118_v49 = vld [vmem:[#allocation9 + $0xb28] sm:$0xff] }
 0x509   :  { %9992 = vmatprep.subr.mxu1 %v14086_v41  ;;  %9932 = vmatpush1.msra.mxu0 %v14087_v47  ;;  %v14119_v0 = vld [vmem:[#allocation9 + $0xa20] sm:$0xff]  ;;  %v14121_v41 = vld [vmem:[#allocation9 + $0xa08] sm:$0xff] }
 0x50a   :  { %9993 = vmatpush1.msra.mxu1 %v14088_v60  ;;  %9933 = vmatprep.subr.mxu0 %v14089_v44  ;;  %v14120_v17 = vld [vmem:[#allocation9 + $0xb20] sm:$0xff]  ;;  %v14122_v47 = vld [vmem:[#allocation9 + $0xb08] sm:$0xff] }
 0x50b   :  { %9994 = vmatprep.subr.mxu1 %v14090_v23  ;;  %9934 = vmatpush1.msra.mxu0 %v14091_v22  ;;  %v14123_v60 = vld [vmem:[#allocation9 + $0xa00] sm:$0xff]  ;;  %v14125_v23 = vld [vmem:[#allocation9 + $0x9e8] sm:$0xff] }
 0x50c   :  { %9995 = vmatpush1.msra.mxu1 %v14092_v11  ;;  %9935 = vmatprep.subr.mxu0 %v14093_v8  ;;  %v14124_v44 = vld [vmem:[#allocation9 + $0xb00] sm:$0xff]  ;;  %v14126_v22 = vld [vmem:[#allocation9 + $0xde8] sm:$0xff] }
 0x50d   :  { %9996 = vmatprep.subr.mxu1 %v14094_v12  ;;  %9936 = vmatpush2.msra.mxu0 %v14095_v38  ;;  %v14127_v11 = vld [vmem:[#allocation9 + $0x9e0] sm:$0xff]  ;;  %v14129_v12 = vld [vmem:[#allocation9 + $0x9c8] sm:$0xff] }
 0x50e   :  { %9997 = vmatpush1.msra.mxu1 %v14096_v62  ;;  %9937 = vmatprep.subr.mxu0 %v14097_v28  ;;  %v14128_v8 = vld [vmem:[#allocation9 + $0xde0] sm:$0xff]  ;;  %v14130_v38 = vld [vmem:[#allocation9 + $0xdc8] sm:$0xff] }
 0x50f   :  { %9998 = vmatprep.subr.mxu1 %v14098_v27  ;;  %9938 = vmatpush2.msra.mxu0 %v14099_v35  ;;  %v14131_v62 = vld [vmem:[#allocation9 + $0x9c0] sm:$0xff]  ;;  %v14133_v27 = vld [vmem:[#allocation9 + $0x9a8] sm:$0xff] }
 0x510   :  { %9999 = vmatpush1.msra.mxu1 %v14100_v48  ;;  %9939 = vmatprep.subr.mxu0 %v14101_v14  ;;  %v14132_v28 = vld [vmem:[#allocation9 + $0xdc0] sm:$0xff]  ;;  %v14134_v35 = vld [vmem:[#allocation9 + $0xda8] sm:$0xff] }
 0x511   :  { %10000 = vmatprep.subr.mxu1 %v14102_v42  ;;  %9940 = vmatpush2.msra.mxu0 %v14103_v24  ;;  %v14135_v48 = vld [vmem:[#allocation9 + $0x9a0] sm:$0xff]  ;;  %v14137_v42 = vld [vmem:[#allocation9 + $0x988] sm:$0xff] }
 0x512   :  { %10001 = vmatpush1.msra.mxu1 %v14104_v50  ;;  %9941 = vmatprep.subr.mxu0 %v14105_v29  ;;  %v14136_v14 = vld [vmem:[#allocation9 + $0xda0] sm:$0xff]  ;;  %v14138_v24 = vld [vmem:[#allocation9 + $0xd88] sm:$0xff] }
 0x513   :  { %10002 = vmatprep.subr.mxu1 %v14106_v18  ;;  %9942 = vmatpush2.msra.mxu0 %v14107_v3  ;;  %v14139_v50 = vld [vmem:[#allocation9 + $0x980] sm:$0xff]  ;;  %v14141_v18 = vld [vmem:[#allocation9 + $0x968] sm:$0xff] }
 0x514   :  { %10003 = vmatpush1.msra.mxu1 %v14108_v58  ;;  %9943 = vmatprep.subr.mxu0 %v14109_v54  ;;  %v14140_v29 = vld [vmem:[#allocation9 + $0xd80] sm:$0xff]  ;;  %v14142_v3 = vld [vmem:[#allocation9 + $0xd68] sm:$0xff] }
 0x515   :  { %10004 = vmatprep.subr.mxu1 %v14110_v43  ;;  %9944 = vmatpush2.msra.mxu0 %v14111_v25  ;;  %v14143_v58 = vld [vmem:[#allocation9 + $0x960] sm:$0xff]  ;;  %v14145_v43 = vld [vmem:[#allocation9 + $0x948] sm:$0xff] }
 0x516   :  { %10005 = vmatpush1.msra.mxu1 %v14112_v13  ;;  %9945 = vmatprep.subr.mxu0 %v14113_v40  ;;  %v14144_v54 = vld [vmem:[#allocation9 + $0xd60] sm:$0xff]  ;;  %v14146_v25 = vld [vmem:[#allocation9 + $0xd48] sm:$0xff] }
 0x517   :  { %10006 = vmatprep.subr.mxu1 %v14114_v31  ;;  %9946 = vmatpush2.msra.mxu0 %v14115_v7  ;;  %v14147_v13 = vld [vmem:[#allocation9 + $0x940] sm:$0xff]  ;;  %v14149_v31 = vld [vmem:[#allocation9 + $0x928] sm:$0xff] }
 0x518   :  { %10007 = vmatpush1.msra.mxu1 %v14116_v6  ;;  %9947 = vmatprep.subr.mxu0 %v14117_v10  ;;  %v14148_v40 = vld [vmem:[#allocation9 + $0xd40] sm:$0xff]  ;;  %v14150_v7 = vld [vmem:[#allocation9 + $0xd28] sm:$0xff] }
 0x519   :  { %10008 = vmatprep.subr.mxu1 %v14118_v49  ;;  %9948 = vmatpush2.msra.mxu0 %v14119_v0  ;;  %v14151_v6 = vld [vmem:[#allocation9 + $0x920] sm:$0xff]  ;;  %v14153_v49 = vld [vmem:[#allocation9 + $0x908] sm:$0xff] }
 0x51a   :  { %10009 = vmatpush1.msra.mxu1 %v14120_v17  ;;  %9949 = vmatprep.subr.mxu0 %v14121_v41  ;;  %v14152_v10 = vld [vmem:[#allocation9 + $0xd20] sm:$0xff]  ;;  %v14154_v0 = vld [vmem:[#allocation9 + $0xd08] sm:$0xff] }
 0x51b   :  { %10010 = vmatprep.subr.mxu1 %v14122_v47  ;;  %9950 = vmatpush2.msra.mxu0 %v14123_v60  ;;  %v14155_v17 = vld [vmem:[#allocation9 + $0x900] sm:$0xff]  ;;  %v14157_v47 = vld [vmem:[#allocation9 + $0x8f8] sm:$0xff] }
 0x51c   :  { %10011 = vmatpush1.msra.mxu1 %v14124_v44  ;;  %9951 = vmatprep.subr.mxu0 %v14125_v23  ;;  %v14156_v41 = vld [vmem:[#allocation9 + $0xd00] sm:$0xff]  ;;  %v14158_v60 = vld [vmem:[#allocation9 + $0xcf8] sm:$0xff]  ;;  %v14159_v44 = vld [vmem:[#allocation9 + $0x8f0] sm:$0xff] }
 0x51d   :  { %10028 = vmatprep.subr.mxu1 %v14126_v22  ;;  %9952 = vmatpush2.msra.mxu0 %v14127_v11  ;;  %v14160_v23 = vld [vmem:[#allocation9 + $0xcf0] sm:$0xff]  ;;  %v14161_v22 = vld [vmem:[#allocation9 + $0x8d8] sm:$0xff] }
 0x51e   :  { %10029 = vmatpush2.msra.mxu1 %v14128_v8  ;;  %9953 = vmatprep.subr.mxu0 %v14129_v12  ;;  %v14162_v11 = vld [vmem:[#allocation9 + $0xcd8] sm:$0xff]  ;;  %v14163_v8 = vld [vmem:[#allocation9 + $0x8d0] sm:$0xff] }
 0x51f   :  { %10030 = vmatprep.subr.mxu1 %v14130_v38  ;;  %9954 = vmatpush2.msra.mxu0 %v14131_v62  ;;  %v14164_v12 = vld [vmem:[#allocation9 + $0xcd0] sm:$0xff]  ;;  %v14165_v38 = vld [vmem:[#allocation9 + $0x8b8] sm:$0xff] }
 0x520   :  { %10031 = vmatpush2.msra.mxu1 %v14132_v28  ;;  %9955 = vmatprep.subr.mxu0 %v14133_v27  ;;  %v14166_v62 = vld [vmem:[#allocation9 + $0xcb8] sm:$0xff]  ;;  %v14167_v28 = vld [vmem:[#allocation9 + $0x8b0] sm:$0xff] }
 0x521   :  { %10032 = vmatprep.subr.mxu1 %v14134_v35  ;;  %9956 = vmatpush2.msra.mxu0 %v14135_v48  ;;  %v14168_v27 = vld [vmem:[#allocation9 + $0xcb0] sm:$0xff]  ;;  %v14169_v35 = vld [vmem:[#allocation9 + $0x898] sm:$0xff] }
 0x522   :  { %10033 = vmatpush2.msra.mxu1 %v14136_v14  ;;  %9957 = vmatprep.subr.mxu0 %v14137_v42  ;;  %v14170_v48 = vld [vmem:[#allocation9 + $0xc98] sm:$0xff]  ;;  %v14171_v14 = vld [vmem:[#allocation9 + $0x890] sm:$0xff] }
 0x523   :  { %10034 = vmatprep.subr.mxu1 %v14138_v24  ;;  %9958 = vmatpush2.msra.mxu0 %v14139_v50  ;;  %v14172_v42 = vld [vmem:[#allocation9 + $0xc90] sm:$0xff]  ;;  %v14173_v24 = vld [vmem:[#allocation9 + $0x878] sm:$0xff] }
 0x524   :  { %10035 = vmatpush2.msra.mxu1 %v14140_v29  ;;  %9959 = vmatprep.subr.mxu0 %v14141_v18  ;;  %v14174_v50 = vld [vmem:[#allocation9 + $0xc78] sm:$0xff]  ;;  %v14175_v29 = vld [vmem:[#allocation9 + $0x870] sm:$0xff] }
 0x525   :  { %10036 = vmatprep.subr.mxu1 %v14142_v3  ;;  %9960 = vmatpush2.msra.mxu0 %v14143_v58  ;;  %v14177_v18 = vld [vmem:[#allocation9 + $0x858] sm:$0xff]  ;;  %v17289_v3 = vpop.f32.mrf.mxu0  ;;  %v14179_v58 = vld [vmem:[#allocation9 + $0x850] sm:$0xff] }
 0x526   :  { %10037 = vmatpush2.msra.mxu1 %v14144_v54  ;;  %9961 = vmatprep.subr.mxu0 %v14145_v43  ;;  %v14180_v54 = vld [vmem:[#allocation9 + $0xc50] sm:$0xff]  ;;  %v14181_v43 = vld [vmem:[#allocation9 + $0x838] sm:$0xff] }
 0x527   :  { %10038 = vmatprep.subr.mxu1 %v14146_v25  ;;  %9962 = vmatpush2.msra.mxu0 %v14147_v13  ;;  %v14182_v25 = vld [vmem:[#allocation9 + $0xc38] sm:$0xff]  ;;  %v14183_v13 = vld [vmem:[#allocation9 + $0x830] sm:$0xff] }
 0x528   :  { %10039 = vmatpush2.msra.mxu1 %v14148_v40  ;;  %9963 = vmatprep.subr.mxu0 %v14149_v31  ;;  %v14184_v31 = vld [vmem:[#allocation9 + $0xc30] sm:$0xff] }
 0x529   :  { %10040 = vmatprep.subr.mxu1 %v14150_v7  ;;  %9964 = vmatpush2.msra.mxu0 %v14151_v6  ;;  %v14185_v7 = vld [vmem:[#allocation9 + $0x818] sm:$0xff] }
 0x52a   :  { %10041 = vmatpush2.msra.mxu1 %v14152_v10  ;;  %9965 = vmatprep.subr.mxu0 %v14153_v49  ;;  %v14186_v6 = vld [vmem:[#allocation9 + $0xc18] sm:$0xff]  ;;  %v14187_v10 = vld [vmem:[#allocation9 + $0x810] sm:$0xff]  ;;  %v17293_v49 = vpop.f32.mrf.mxu1 }
 0x52b   :  { %10042 = vmatprep.subr.mxu1 %v14154_v0  ;;  %9966 = vmatpush2.msra.mxu0 %v14155_v17  ;;  %v14188_v0 = vld [vmem:[#allocation9 + $0xc10] sm:$0xff]  ;;  %v14189_v17 = vld [vmem:[#allocation9 + $0x7f8] sm:$0xff] }
 0x52c   :  { %10043 = vmatpush2.msra.mxu1 %v14156_v41  ;;  %9968 = vmatmul.mubr.f32.vlgmr.msra.gmra.mxu0 %v17008_v57  ;;  %v14190_v41 = vld [vmem:[#allocation9 + $0xbf8] sm:$0xff] }
 0x52d   :  { %10045 = vmatmul.mubr.f32.vlgmr.msra.gmra.mxu1 %v17010_v30  ;;  %10057 = vmatprep.subr.mxu1 %v14157_v47  ;;  %v14191_v47 = vld [vmem:[#allocation9 + $0x7f0] sm:$0xff] }
 0x52e   :  { %10134 = vmatprep.subr.mxu0 %v14158_v60  ;;  %9973 = vmatprep.mubr.f32.mxu0 %v17012_v37 }
 0x52f   :  { %13427 = vmatprep.mubr.msk.f32.mxu1 %vm6885_vm6, %v17027_v4  ;;  %10058 = vmatpush1.msra.mxu1 %v14159_v44  ;;  %v14192_v44 = vld [vmem:[#allocation9 + $0xbf0] sm:$0xff] }
 0x530   :  { %10135 = vmatpush1.msra.mxu0 %v14160_v23  ;;  %10059 = vmatprep.subr.mxu1 %v14161_v22  ;;  %v17291_v40 = vpop.f32.mrf.mxu0  ;;  %v14193_v23 = vld [vmem:[#allocation9 + $0x7d8] sm:$0xff] }
 0x531   :  { %10136 = vmatprep.subr.mxu0 %v14162_v11  ;;  %10060 = vmatpush1.msra.mxu1 %v14163_v8  ;;  %v13809_v11 = vld [vmem:[#allocation2] ss:$8 sps:$4 sm:$0xee]   ;;  %v13812_v8 = vld [vmem:[#allocation2 + $0x10] ss:$8 sps:$4 sm:$0xee]  }
 0x532   :  { %10137 = vmatpush1.msra.mxu0 %v14164_v12  ;;  %10051 = vmatmul.mubr.f32.gmra.mxu1 %v17052_v19  ;;  %v17295_v60 = vpop.f32.mrf.mxu0  ;;  %v14194_v12 = vld [vmem:[#allocation9 + $0xbd8] sm:$0xff] }
 0x533   :  { %9974 = vmatmul.mubr.f32.gmra.mxu0 %v17050_v46  ;;  %10061 = vmatprep.subr.mxu1 %v14165_v38  ;;  %v14195_v38 = vld [vmem:[#allocation9 + $0x7d0] sm:$0xff] }
 0x534   :  { %10138 = vmatprep.subr.mxu0 %v14166_v62  ;;  %10062 = vmatpush1.msra.mxu1 %v14167_v28  ;;  %v14196_v62 = vld [vmem:[#allocation9 + $0xbd0] sm:$0xff]  ;;  %v14197_v28 = vld [vmem:[#allocation9 + $0x7b8] sm:$0xff] }
 0x535   :  { %10121 = vmatprep.mubr.f32.mxu1 %v16962_v63  ;;  %10139 = vmatpush1.msra.mxu0 %v14168_v27  ;;  %v14176_v63 = vld [vmem:[#allocation9 + $0xc70] sm:$0xff] }
 0x536   :  { %13428 = vmatprep.mubr.msk.f32.mxu0 %vm6885_vm6, %v16974_v21  ;;  %10063 = vmatprep.subr.mxu1 %v14169_v35  ;;  %v14178_v21 = vld [vmem:[#allocation9 + $0xc58] sm:$0xff]  ;;  %v9145_v35 = vpop.f32.mrf.mxu0 }
 0x537   :  { %10140 = vmatprep.subr.mxu0 %v14170_v48  ;;  %10064 = vmatpush1.msra.mxu1 %v14171_v14  ;;  %v14198_v48 = vld [vmem:[#allocation9 + $0xbb8] sm:$0xff]  ;;  %v14199_v14 = vld [vmem:[#allocation9 + $0x7b0] sm:$0xff] }
 0x538   :  { %10141 = vmatpush1.msra.mxu0 %v14172_v42  ;;  %10065 = vmatprep.subr.mxu1 %v14173_v24  ;;  %v13811_v42 = vld [vmem:[#allocation2 + $0x4] ss:$8 sps:$4 sm:$0xff]   ;;  %v13814_v24 = vld [vmem:[#allocation2 + $0x14] ss:$8 sps:$4 sm:$0xff]  }
 0x539   :  { %10142 = vmatprep.subr.mxu0 %v14174_v50  ;;  %10066 = vmatpush1.msra.mxu1 %v14175_v29  ;;  %v14200_v50 = vld [vmem:[#allocation9 + $0xbb0] sm:$0xff]  ;;  %v14201_v29 = vld [vmem:[#allocation9 + $0x798] sm:$0xff] }
 0x53a   :  { %10143 = vmatpush1.msra.mxu0 %v14176_v63  ;;  %10067 = vmatprep.subr.mxu1 %v14177_v18  ;;  %v17302_v63 = vrot.slane %v13809_v11, %v14790_v9  ;;  %v10413_v18 = vrot.slane %v13812_v8, %v14790_v9  ;;  %v14210_v8 = vld [vmem:[#allocation9 + $0xb58] sm:$0xff] }
 0x53b   :  { %10144 = vmatprep.subr.mxu0 %v14178_v21  ;;  %10068 = vmatpush1.msra.mxu1 %v14179_v58  ;;  %v14202_v21 = vld [vmem:[#allocation9 + $0xb98] sm:$0xff]  ;;  %v14203_v58 = vld [vmem:[#allocation9 + $0x790] sm:$0xff] }
 0x53c   :  { %10145 = vmatpush1.msra.mxu0 %v14180_v54  ;;  %10069 = vmatprep.subr.mxu1 %v14181_v43  ;;  %v13815_v43 = vld [vmem:[#allocation2 + $0x20] ss:$8 sps:$4 sm:$0xee]   ;;  %v10421_v11 = vcombine.low %v17302_v63, %v10413_v18 }
 0x53d   :  { %10146 = vmatprep.subr.mxu0 %v14182_v25  ;;  %10070 = vmatpush1.msra.mxu1 %v14183_v13  ;;  %v14204_v25 = vld [vmem:[#allocation9 + $0xb90] sm:$0xff]  ;;  %v14205_v13 = vld [vmem:[#allocation9 + $0x778] sm:$0xff] }
 0x53e   :  { %10147 = vmatpush1.msra.mxu0 %v14184_v31  ;;  %10071 = vmatprep.subr.mxu1 %v14185_v7  ;;  %v13817_v31 = vld [vmem:[#allocation2 + $0x30] ss:$8 sps:$4 sm:$0xee]   ;;  %v9147_v7 = vpop.f32.mrf.mxu0 }
 0x53f   :  { %10148 = vmatprep.subr.mxu0 %v14186_v6  ;;  %10072 = vmatpush1.msra.mxu1 %v14187_v10  ;;  %v14206_v6 = vld [vmem:[#allocation9 + $0xb78] sm:$0xff]  ;;  %v14207_v10 = vld [vmem:[#allocation9 + $0x770] sm:$0xff] }
 0x540   :  { %10149 = vmatpush1.msra.mxu0 %v14188_v0  ;;  %10073 = vmatprep.subr.mxu1 %v14189_v17  ;;  %v10406_v17 = vrot.slane %v13811_v42, %v14790_v9 }
 0x541   :  { %10150 = vmatprep.subr.mxu0 %v14190_v41  ;;  %10074 = vmatpush1.msra.mxu1 %v14191_v47  ;;  %v10420_v41 = vrot.slane %v13814_v24, %v14790_v9  ;;  %v14208_v47 = vld [vmem:[#allocation9 + $0xb70] sm:$0xff]  ;;  %v17315_v24 = vrot.slane %v13817_v31, %v14790_v9  ;;  %v14221_v31 = vld [vmem:[#allocation9 + $0xaf8] sm:$0xff] }
 0x542   :  { %10151 = vmatpush1.msra.mxu0 %v14192_v44  ;;  %10075 = vmatprep.subr.mxu1 %v14193_v23  ;;  %v17297_v22 = vpop.f32.mrf.mxu1  ;;  %v14209_v44 = vld [vmem:[#allocation9 + $0x758] sm:$0xff] }
 0x543   :  { %10152 = vmatprep.subr.mxu0 %v14194_v12  ;;  %10076 = vmatpush1.msra.mxu1 %v14195_v38  ;;  %v14211_v12 = vld [vmem:[#allocation9 + $0x750] sm:$0xff]  ;;  %v10422_v38 = vcombine.high %v17302_v63, %v10413_v18  ;;  %v14217_v18 = vld [vmem:[#allocation9 + $0x718] sm:$0xff] }
 0x544   :  { %10153 = vmatpush1.msra.mxu0 %v14196_v62  ;;  %10077 = vmatprep.subr.mxu1 %v14197_v28  ;;  %v17299_v27 = vpop.f32.mrf.mxu1  ;;  %v17310_v62 = vrot.slane %v13815_v43, %v14790_v9  ;;  %v8994_v28 = vadd.f32 %v17293_v49, %v17289_v3  ;;  %v14216_v63 = vld [vmem:[#allocation9 + $0xb30] sm:$0xff]  ;;  %v10424_v43 = vcombine.high %v10406_v17, %v10420_v41  ;;  %v14218_v49 = vld [vmem:[#allocation9 + $0xb18] sm:$0xff] }
 0x545   :  { %10154 = vmatprep.subr.mxu0 %v14198_v48  ;;  %10078 = vmatpush1.msra.mxu1 %v14199_v14  ;;  %v14212_v48 = vld [vmem:[#allocation9 + $0xb50] sm:$0xff]  ;;  %v14213_v14 = vld [vmem:[#allocation9 + $0x738] sm:$0xff]  ;;  %v10431_v3 = vrot.slane %v10421_v11, %v14790_v9 }
 0x546   :  { %10155 = vmatpush1.msra.mxu0 %v14200_v50  ;;  %10079 = vmatprep.subr.mxu1 %v14201_v29  ;;  %v14214_v50 = vld [vmem:[#allocation9 + $0xb38] sm:$0xff]  ;;  %v14215_v29 = vld [vmem:[#allocation9 + $0x730] sm:$0xff] }
 0x547   :  { %10156 = vmatprep.subr.mxu0 %v14202_v21  ;;  %10080 = vmatpush1.msra.mxu1 %v14203_v58  ;;  %v9068_v54 = vpop.f32.mrf.mxu1  ;;  %v10423_v21 = vcombine.low %v10406_v17, %v10420_v41  ;;  %v14223_v17 = vld [vmem:[#allocation9 + $0xaf0] sm:$0xff]  ;;  %v10453_v11 = vcombine.high %v10431_v3, %v10431_v3 }
 0x548   :  { %10157 = vmatpush1.msra.mxu0 %v14204_v25  ;;  %10081 = vmatprep.subr.mxu1 %v14205_v13  ;;  %v9146_v42 = vadd.f32 %v9145_v35, %v9068_v54  ;;  %v14219_v25 = vld [vmem:[#allocation9 + $0x710] sm:$0xff]  ;;  %v9226_v54 = vcombine.low %v17277_v61, %v8994_v28 }
 0x549   :  { %10158 = vmatprep.subr.mxu0 %v14206_v6  ;;  %10082 = vmatpush1.msra.mxu1 %v14207_v10  ;;  %v9070_v0 = vpop.f32.mrf.mxu1  ;;  %v14220_v13 = vld [vmem:[#allocation9 + $0xb10] sm:$0xff]  ;;  %v10490_v6 = vcombine.high %v17310_v62, %v17315_v24  ;;  %v9227_v10 = vcombine.high %v17277_v61, %v8994_v28  ;;  %v10438_v41 = vrot.slane %v10423_v21, %v14790_v9  ;;  %v14226_v61 = vld [vmem:[#allocation9 + $0xdd8] sm:$0xff] }
 0x54a   :  { %10159 = vmatpush1.msra.mxu0 %v14208_v47  ;;  %10083 = vmatprep.subr.mxu1 %v14209_v44  ;;  %v9148_v23 = vadd.f32 %v9147_v7, %v9070_v0  ;;  %v10445_v7 = vrot.slane %v10422_v38, %v14790_v9  ;;  %v14222_v0 = vld [vmem:[#allocation9 + $0xdf8] sm:$0xff]  ;;  %v14224_v47 = vld [vmem:[#allocation9 + $0xdf0] sm:$0xff]  ;;  %v9236_v38 = vrot.slane %v9226_v54, %v14790_v9 }
 0x54b   :  { %10160 = vmatprep.subr.mxu0 %v14210_v8  ;;  %10084 = vmatpush1.msra.mxu1 %v14211_v12  ;;  %v14225_v8 = vld [vmem:[#allocation9 + $0xad8] sm:$0xff]  ;;  %v14227_v28 = vld [vmem:[#allocation9 + $0xad0] sm:$0xff]  ;;  %v10454_v21 = vcombine.high %v10438_v41, %v10438_v41 }
 0x54c   :  { %10161 = vmatpush1.msra.mxu0 %v14212_v48  ;;  %10085 = vmatprep.subr.mxu1 %v14213_v14  ;;  %v9228_v58 = vcombine.low %v9146_v42, %v9148_v23  ;;  %v9229_v35 = vcombine.high %v9146_v42, %v9148_v23  ;;  %v10452_v23 = vrot.slane %v10424_v43, %v14790_v9 }
 0x54d   :  { %10162 = vmatprep.subr.mxu0 %v14214_v50  ;;  %10086 = vmatpush1.msra.mxu1 %v14215_v29  ;;  %v10455_v48 = vcombine.high %v10445_v7, %v10445_v7  ;;  %v17329_v14 = vrot.slane %v10490_v6, %v14790_v9  ;;  %v9243_v42 = vrot.slane %v9227_v10, %v14790_v9  ;;  %v14228_v50 = vld [vmem:[#allocation9 + $0xdd0] sm:$0xff]  ;;  %v14229_v29 = vld [vmem:[#allocation9 + $0xab8] sm:$0xff] }
 0x54e   :  { %10163 = vmatpush1.msra.mxu0 %v14216_v63  ;;  %10087 = vmatprep.subr.mxu1 %v14217_v18  ;;  %v9250_v44 = vrot.slane %v9228_v58, %v14790_v9  ;;  %v9257_v12 = vrot.slane %v9229_v35, %v14790_v9  ;;  %v14230_v63 = vld [vmem:[#allocation9 + $0xdb8] sm:$0xff]  ;;  %v14231_v18 = vld [vmem:[#allocation9 + $0xab0] sm:$0xff]  ;;  %v10456_v43 = vcombine.high %v10452_v23, %v10452_v23 }
 0x54f   :  { %10164 = vmatprep.subr.mxu0 %v14218_v49  ;;  %10088 = vmatpush1.msra.mxu1 %v14219_v25  ;;  %v10525_v3 = vcombine.low %v10445_v7, %v10453_v11  ;;  %v14232_v49 = vld [vmem:[#allocation9 + $0xdb0] sm:$0xff]  ;;  %v14234_v6 = vld [vmem:[#allocation9 + $0xd98] sm:$0xff] }
 0x550   :  { %10165 = vmatpush1.msra.mxu0 %v14220_v13  ;;  %10089 = vmatprep.subr.mxu1 %v14221_v31  ;;  %v9258_v58 = vcombine.low %v9236_v38, %v9250_v44  ;;  %v9259_v25 = vcombine.high %v9236_v38, %v9250_v44  ;;  %v9260_v35 = vcombine.low %v9243_v42, %v9257_v12  ;;  %v14233_v13 = vld [vmem:[#allocation9 + $0xa98] sm:$0xff]  ;;  %v14235_v10 = vld [vmem:[#allocation9 + $0xa90] sm:$0xff] }
 0x551   :  { %10182 = vmatprep.subr.mxu0 %v14222_v0  ;;  %10090 = vmatpush2.msra.mxu1 %v14223_v17  ;;  %v9261_v54 = vcombine.high %v9243_v42, %v9257_v12  ;;  %v10526_v0 = vcombine.low %v10455_v48, %v10438_v41  ;;  %v10528_v17 = vcombine.low %v10456_v43, %v17329_v14  ;;  %v14236_v44 = vld [vmem:[#allocation9 + $0xd90] sm:$0xff] }
 0x552   :  { %10183 = vmatpush2.msra.mxu0 %v14224_v47  ;;  %10091 = vmatprep.subr.mxu1 %v14225_v8  ;;  %v9268_v31 = vrot.slane %v9258_v58, %v14790_v9  ;;  %v9275_v47 = vrot.slane %v9260_v35, %v14790_v9  ;;  %v9282_v7 = vrot.slane %v9259_v25, %v14790_v9  ;;  %v14237_v8 = vld [vmem:[#allocation9 + $0xa78] sm:$0xff]  ;;  %v14247_v35 = vld [vmem:[#allocation9 + $0xa30] sm:$0xff] }
 0x553   :  { %10184 = vmatprep.subr.mxu0 %v14226_v61  ;;  %10092 = vmatpush2.msra.mxu1 %v14227_v28  ;;  %v9289_v11 = vrot.slane %v9261_v54, %v14790_v9  ;;  %v14238_v61 = vld [vmem:[#allocation9 + $0xd78] sm:$0xff]  ;;  %v14239_v28 = vld [vmem:[#allocation9 + $0xa70] sm:$0xff]  ;;  %v10527_v41 = vcombine.low %v10452_v23, %v10454_v21  ;;  %v17353_v23 = vrot.slane %v10528_v17, %v14790_v9  ;;  %v14254_v17 = vld [vmem:[#allocation9 + $0xfe8] sm:$0xff] }
 0x554   :  { %10185 = vmatpush2.msra.mxu0 %v14228_v50  ;;  %10093 = vmatprep.subr.mxu1 %v14229_v29  ;;  %v9290_v12 = vcombine.high %v9268_v31, %v9268_v31  ;;  %v17338_v38 = vadd.f32 %v9268_v31, %v17246_v51  ;;  %v9291_v48 = vcombine.high %v9282_v7, %v9282_v7  ;;  %v14242_v58 = vld [vmem:[#allocation9 + $0xd58] sm:$0xff]  ;;  %v14244_v21 = vld [vmem:[#allocation9 + $0xd50] sm:$0xff] }
 0x555   :  { %10186 = vmatprep.subr.mxu0 %v14230_v63  ;;  %10094 = vmatpush2.msra.mxu1 %v14231_v18  ;;  %v17341_v42 = vadd.f32 %v9282_v7, %v17249_v1  ;;  %v17344_v50 = vadd.f32 %v9275_v47, %v17251_v52  ;;  %v17347_v29 = vadd.f32 %v9289_v11, %v17253_v32  ;;  %v14240_v63 = vld [vmem:[#allocation9 + $0xd70] sm:$0xff]  ;;  %v14241_v18 = vld [vmem:[#allocation9 + $0xa58] sm:$0xff]  ;;  %v14256_v11 = vld [vmem:[#allocation9 + $0xfe0] sm:$0xff] }
 0x556   :  { %10187 = vmatpush2.msra.mxu0 %v14232_v49  ;;  %10095 = vmatprep.subr.mxu1 %v14233_v13  ;;  %v17350_v51 = vadd.f32 %v9290_v12, %v17255_v53  ;;  %v17356_v1 = vadd.f32 %v9291_v48, %v17257_v36  ;;  %v14243_v52 = vld [vmem:[#allocation9 + $0xa50] sm:$0xff]  ;;  %v14245_v32 = vld [vmem:[#allocation9 + $0xa38] sm:$0xff]  ;;  %v17359_v43 = vrot.slane %v10525_v3, %v14790_v9 }
 0x557   :  { %10188 = vmatprep.subr.mxu0 %v14234_v6  ;;  %10096 = vmatpush2.msra.mxu1 %v14235_v10  ;;  %v17362_v53 = vrot.slane %v10526_v0, %v14790_v9  ;;  %v17365_v49 = vrot.slane %v10527_v41, %v14790_v9  ;;  %v14246_v25 = vld [vmem:[#allocation9 + $0xd38] sm:$0xff]  ;;  %v14248_v36 = vld [vmem:[#allocation9 + $0xd30] sm:$0xff] }
 0x558   :  { %10189 = vmatpush2.msra.mxu0 %v14236_v44  ;;  %10097 = vmatprep.subr.mxu1 %v14237_v8  ;;  %v14249_v54 = vld [vmem:[#allocation9 + $0xa18] sm:$0xff]  ;;  %v14251_v3 = vld [vmem:[#allocation9 + $0xa10] sm:$0xff]  ;;  %v14258_v8 = vld [vmem:[#allocation9 + $0xfc8] sm:$0xff] }
 0x559   :  { %10190 = vmatprep.subr.mxu0 %v14238_v61  ;;  %10098 = vmatpush2.msra.mxu1 %v14239_v28  ;;  %v10560_v13 = vcombine.high %v17365_v49, %v17353_v23  ;;  %v14250_v31 = vld [vmem:[#allocation9 + $0xd18] sm:$0xff]  ;;  %v14252_v6 = vld [vmem:[#allocation9 + $0xd10] sm:$0xff]  ;;  %v10558_v0 = vcombine.high %v17359_v43, %v17362_v53  ;;  %v14260_v61 = vld [vmem:[#allocation9 + $0xfc0] sm:$0xff] }
 0x55a   :  { %10191 = vmatpush2.msra.mxu0 %v14240_v63  ;;  %10099 = vmatprep.subr.mxu1 %v14241_v18  ;;  %v14253_v10 = vld [vmem:[#allocation9 + $0x9f8] sm:$0xff]  ;;  %v14255_v47 = vld [vmem:[#allocation9 + $0x9f0] sm:$0xff]  ;;  %v14264_v63 = vld [vmem:[#allocation9 + $0xfa0] sm:$0xff] }
 0x55b   :  { %10192 = vmatprep.subr.mxu0 %v14242_v58  ;;  %10100 = vmatpush2.msra.mxu1 %v14243_v52  ;;  %v17375_v7 = vrot.slane %v10560_v13, %v14790_v9  ;;  %v14257_v44 = vld [vmem:[#allocation9 + $0x9d8] sm:$0xff]  ;;  %v14259_v12 = vld [vmem:[#allocation9 + $0x9d0] sm:$0xff]  ;;  %v14266_v58 = vld [vmem:[#allocation9 + $0xf88] sm:$0xff] }
 0x55c   :  { %10193 = vmatpush2.msra.mxu0 %v14244_v21  ;;  %10101 = vmatprep.subr.mxu1 %v14245_v32  ;;  %v14261_v28 = vld [vmem:[#allocation9 + $0x9b8] sm:$0xff]  ;;  %v14263_v48 = vld [vmem:[#allocation9 + $0x9b0] sm:$0xff]  ;;  %v14268_v21 = vld [vmem:[#allocation9 + $0xf80] sm:$0xff] }
 0x55d   :  { %10194 = vmatprep.subr.mxu0 %v14246_v25  ;;  %10102 = vmatpush2.msra.mxu1 %v14247_v35  ;;  %v14265_v18 = vld [vmem:[#allocation9 + $0x998] sm:$0xff]  ;;  %v14267_v52 = vld [vmem:[#allocation9 + $0x990] sm:$0xff]  ;;  %v14270_v32 = vld [vmem:[#allocation9 + $0xf68] sm:$0xff] }
 0x55e   :  { %10195 = vmatpush2.msra.mxu0 %v14248_v36  ;;  %10103 = vmatprep.subr.mxu1 %v14249_v54  ;;  %v14271_v25 = vld [vmem:[#allocation9 + $0x970] sm:$0xff]  ;;  %v14272_v35 = vld [vmem:[#allocation9 + $0xf60] sm:$0xff]  ;;  %v14273_v36 = vld [vmem:[#allocation9 + $0x958] sm:$0xff] }
 0x55f   :  { %10196 = vmatprep.subr.mxu0 %v14250_v31  ;;  %10104 = vmatpush2.msra.mxu1 %v14251_v3  ;;  %v14274_v54 = vld [vmem:[#allocation9 + $0xf48] sm:$0xff]  ;;  %v14275_v13 = vld [vmem:[#allocation9 + $0x950] sm:$0xff]  ;;  %v14276_v31 = vld [vmem:[#allocation9 + $0xf40] sm:$0xff] }
 0x560   :  { %10197 = vmatpush2.msra.mxu0 %v14252_v6  ;;  %10105 = vmatprep.subr.mxu1 %v14253_v10  ;;  %v14277_v3 = vld [vmem:[#allocation9 + $0x938] sm:$0xff]  ;;  %v14278_v6 = vld [vmem:[#allocation9 + $0xf28] sm:$0xff]  ;;  %v14279_v10 = vld [vmem:[#allocation9 + $0x930] sm:$0xff] }
 0x561   :  { %10199 = vmatmul.mubr.f32.vlgmr.msra.gmra.mxu0 %v17010_v30  ;;  %10662 = vmatprep.subr.mxu0 %v14254_v17  ;;  %v17378_v30 = vrot.slane %v10558_v0, %v14790_v9  ;;  %v14280_v0 = vld [vmem:[#allocation9 + $0xf20] sm:$0xff]  ;;  %v14281_v17 = vld [vmem:[#allocation9 + $0x918] sm:$0xff] }
 0x562   :  { %10106 = vmatpush2.msra.mxu1 %v14255_v47  ;;  %13429 = vmatprep.mubr.msk.f32.mxu0 %vm6885_vm6, %v17027_v4  ;;  %v14262_v4 = vld [vmem:[#allocation9 + $0xfa8] sm:$0xff] }
 0x563   :  { %10663 = vmatpush1.msra.mxu0 %v14256_v11  ;;  %10107 = vmatprep.subr.mxu1 %v14257_v44  ;;  %v17383_v41 = vcombine.low %v17378_v30, %v17375_v7  ;;  %v14282_v47 = vld [vmem:[#allocation9 + $0xf08] sm:$0xff]  ;;  %v14283_v11 = vld [vmem:[#allocation9 + $0x910] sm:$0xff]  ;;  %v14284_v44 = vld [vmem:[#allocation9 + $0xf00] sm:$0xff] }
 0x564   :  { %10664 = vmatprep.subr.mxu0 %v14258_v8  ;;  %10108 = vmatpush2.msra.mxu1 %v14259_v12  ;;  %v14285_v8 = vld [vmem:[#allocation9 + $0xee8] sm:$0xff] }
 0x565   :  { %10665 = vmatpush1.msra.mxu0 %v14260_v61  ;;  %10109 = vmatprep.subr.mxu1 %v14261_v28  ;;  %v14286_v12 = vld [vmem:[#allocation9 + $0x13e8] sm:$0xff]  ;;  %v14287_v61 = vld [vmem:[#allocation9 + $0xee0] sm:$0xff] }
 0x566   :  { %10205 = vmatmul.mubr.f32.gmra.mxu0 %v17052_v19  ;;  %10666 = vmatprep.subr.mxu0 %v14262_v4  ;;  %v14269_v19 = vld [vmem:[#allocation9 + $0x978] sm:$0xff]  ;;  %v14288_v28 = vld [vmem:[#allocation9 + $0x13e0] sm:$0xff]  ;;  %v14289_v4 = vld [vmem:[#allocation9 + $0xec8] sm:$0xff] }
 0x567   :  { %10110 = vmatpush2.msra.mxu1 %v14263_v48  ;;  %10667 = vmatpush1.msra.mxu0 %v14264_v63  ;;  %v14290_v48 = vld [vmem:[#allocation9 + $0x13c8] sm:$0xff]  ;;  %v14291_v63 = vld [vmem:[#allocation9 + $0xec0] sm:$0xff] }
 0x568   :  { %10726 = vmatprep.mubr.f32.mxu0 %v17383_v41  ;;  %10111 = vmatprep.subr.mxu1 %v14265_v18  ;;  %v14292_v18 = vld [vmem:[#allocation9 + $0x13c0] sm:$0xff] }
 0x569   :  { %10668 = vmatprep.subr.mxu0 %v14266_v58  ;;  %10112 = vmatpush2.msra.mxu1 %v14267_v52  ;;  %v14293_v58 = vld [vmem:[#allocation9 + $0xea8] sm:$0xff]  ;;  %v14295_v52 = vld [vmem:[#allocation9 + $0xea0] sm:$0xff] }
 0x56a   :  { %10669 = vmatpush1.msra.mxu0 %v14268_v21  ;;  %10113 = vmatprep.subr.mxu1 %v14269_v19  ;;  %v14296_v21 = vld [vmem:[#allocation9 + $0x13a0] sm:$0xff]  ;;  %v14297_v19 = vld [vmem:[#allocation9 + $0xe88] sm:$0xff] }
 0x56b   :  { %10670 = vmatprep.subr.mxu0 %v14270_v32  ;;  %10114 = vmatpush2.msra.mxu1 %v14271_v25  ;;  %v14298_v32 = vld [vmem:[#allocation9 + $0x1388] sm:$0xff]  ;;  %v14299_v25 = vld [vmem:[#allocation9 + $0xe80] sm:$0xff] }
 0x56c   :  { %10671 = vmatpush1.msra.mxu0 %v14272_v35  ;;  %10115 = vmatprep.subr.mxu1 %v14273_v36  ;;  %v14301_v35 = vld [vmem:[#allocation9 + $0xe68] sm:$0xff] }
 0x56d   :  { %10672 = vmatprep.subr.mxu0 %v14274_v54  ;;  %10116 = vmatpush2.msra.mxu1 %v14275_v13  ;;  %v14302_v36 = vld [vmem:[#allocation9 + $0x1368] sm:$0xff] }
 0x56e   :  { %10673 = vmatpush1.msra.mxu0 %v14276_v31  ;;  %10117 = vmatprep.subr.mxu1 %v14277_v3  ;;  %v14305_v54 = vld [vmem:[#allocation9 + $0xe48] sm:$0xff]  ;;  %v14307_v31 = vld [vmem:[#allocation9 + $0xe40] sm:$0xff] }
 0x56f   :  { %10674 = vmatprep.subr.mxu0 %v14278_v6  ;;  %10118 = vmatpush2.msra.mxu1 %v14279_v10  ;;  %v14306_v13 = vld [vmem:[#allocation9 + $0x1348] sm:$0xff]  ;;  %v14308_v3 = vld [vmem:[#allocation9 + $0x1340] sm:$0xff] }
 0x570   :  { %10675 = vmatpush1.msra.mxu0 %v14280_v0  ;;  %10119 = vmatprep.subr.mxu1 %v14281_v17  ;;  %v14309_v6 = vld [vmem:[#allocation9 + $0xe28] sm:$0xff]  ;;  %v14311_v0 = vld [vmem:[#allocation9 + $0xe20] sm:$0xff] }
 0x571   :  { %10676 = vmatprep.subr.mxu0 %v14282_v47  ;;  %10120 = vmatpush2.msra.mxu1 %v14283_v11  ;;  %v14310_v10 = vld [vmem:[#allocation9 + $0x1328] sm:$0xff]  ;;  %v14312_v17 = vld [vmem:[#allocation9 + $0x1320] sm:$0xff] }
 0x572   :  { %10677 = vmatpush1.msra.mxu0 %v14284_v44  ;;  %10122 = vmatmul.mubr.f32.vlgmr.msra.gmra.mxu1 %v17008_v57  ;;  %v14294_v57 = vld [vmem:[#allocation9 + $0x13a8] sm:$0xff]  ;;  %v14315_v44 = vld [vmem:[#allocation9 + $0xe00] sm:$0xff] }
 0x573   :  { %10678 = vmatprep.subr.mxu0 %v14285_v8  ;;  %10739 = vmatprep.subr.mxu1 %v14286_v12  ;;  %v14313_v47 = vld [vmem:[#allocation9 + $0xe08] sm:$0xff]  ;;  %v14316_v8 = vld [vmem:[#allocation9 + $0x1300] sm:$0xff] }
 0x574   :  { %10127 = vmatprep.mubr.f32.mxu1 %v17012_v37  ;;  %10679 = vmatpush1.msra.mxu0 %v14287_v61  ;;  %v17391_v37 = vcombine.high %v17378_v30, %v17375_v7  ;;  %v14303_v7 = vld [vmem:[#allocation9 + $0xe60] sm:$0xff]  ;;  %v14314_v11 = vld [vmem:[#allocation9 + $0x1308] sm:$0xff] }
 0x575   :  { %10740 = vmatpush1.msra.mxu1 %v14288_v28  ;;  %10680 = vmatprep.subr.mxu0 %v14289_v4  ;;  %v14304_v30 = vld [vmem:[#allocation9 + $0x1360] sm:$0xff]  ;;  %v14317_v12 = vld [vmem:[#allocation9 + $0x11e8] sm:$0xff]  ;;  %v13820_v28 = vld [vmem:[#allocation2 + $0x34] ss:$8 sps:$4 sm:$0xff]  }
 0x576   :  { %10741 = vmatprep.subr.mxu1 %v14290_v48  ;;  %10681 = vmatpush1.msra.mxu0 %v14291_v63  ;;  %v13819_v61 = vld [vmem:[#allocation2 + $0x24] ss:$8 sps:$4 sm:$0xff]  }
 0x577   :  { %10742 = vmatpush1.msra.mxu1 %v14292_v18  ;;  %10682 = vmatprep.subr.mxu0 %v14293_v58  ;;  %v14318_v4 = vld [vmem:[#allocation9 + $0x12e8] sm:$0xff]  ;;  %v14319_v48 = vld [vmem:[#allocation9 + $0x11e0] sm:$0xff] }
 0x578   :  { %10128 = vmatmul.mubr.f32.gmra.mxu1 %v17050_v46  ;;  %10743 = vmatprep.subr.mxu1 %v14294_v57  ;;  %v14300_v46 = vld [vmem:[#allocation9 + $0x1380] sm:$0xff]  ;;  %v14321_v18 = vld [vmem:[#allocation9 + $0x11c8] sm:$0xff] }
 0x579   :  { %10683 = vmatpush1.msra.mxu0 %v14295_v52  ;;  %10744 = vmatpush1.msra.mxu1 %v14296_v21  ;;  %v14320_v63 = vld [vmem:[#allocation9 + $0x12e0] sm:$0xff]  ;;  %v14322_v58 = vld [vmem:[#allocation9 + $0x12c8] sm:$0xff] }
 0x57a   :  { %13432 = vmatprep.mubr.msk.f32.mxu1 %vm6885_vm6, %v17391_v37  ;;  %10684 = vmatprep.subr.mxu0 %v14297_v19  ;;  %v14323_v57 = vld [vmem:[#allocation9 + $0x11c0] sm:$0xff]  ;;  %v14325_v21 = vld [vmem:[#allocation9 + $0x11a8] sm:$0xff]  ;;  %v10474_v19 = vrot.slane %v13819_v61, %v14790_v9 }
 0x57b   :  { %10745 = vmatprep.subr.mxu1 %v14298_v32  ;;  %10685 = vmatpush1.msra.mxu0 %v14299_v25  ;;  %v14324_v52 = vld [vmem:[#allocation9 + $0x12c0] sm:$0xff]  ;;  %v10488_v32 = vrot.slane %v13820_v28, %v14790_v9  ;;  %v14326_v25 = vld [vmem:[#allocation9 + $0x12a8] sm:$0xff] }
 0x57c   :  { %10746 = vmatpush1.msra.mxu1 %v14300_v46  ;;  %10686 = vmatprep.subr.mxu0 %v14301_v35  ;;  %v14327_v46 = vld [vmem:[#allocation9 + $0x11a0] sm:$0xff]  ;;  %v14342_v28 = vld [vmem:[#allocation9 + $0x1228] sm:$0xff] }
 0x57d   :  { %10747 = vmatprep.subr.mxu1 %v14302_v36  ;;  %10687 = vmatpush1.msra.mxu0 %v14303_v7  ;;  %v14328_v35 = vld [vmem:[#allocation9 + $0x12a0] sm:$0xff]  ;;  %v14329_v36 = vld [vmem:[#allocation9 + $0x1188] sm:$0xff] }
 0x57e   :  { %10748 = vmatpush1.msra.mxu1 %v14304_v30  ;;  %10688 = vmatprep.subr.mxu0 %v14305_v54  ;;  %v14330_v7 = vld [vmem:[#allocation9 + $0x1288] sm:$0xff]  ;;  %v14331_v30 = vld [vmem:[#allocation9 + $0x1180] sm:$0xff] }
 0x57f   :  { %10749 = vmatprep.subr.mxu1 %v14306_v13  ;;  %10689 = vmatpush1.msra.mxu0 %v14307_v31  ;;  %v14332_v54 = vld [vmem:[#allocation9 + $0x1280] sm:$0xff]  ;;  %v14333_v13 = vld [vmem:[#allocation9 + $0x1168] sm:$0xff]  ;;  %v10489_v31 = vcombine.low %v17310_v62, %v17315_v24 }
 0x580   :  { %10750 = vmatpush1.msra.mxu1 %v14308_v3  ;;  %10690 = vmatprep.subr.mxu0 %v14309_v6  ;;  %v10491_v3 = vcombine.low %v10474_v19, %v10488_v32  ;;  %v10492_v6 = vcombine.high %v10474_v19, %v10488_v32 }
 0x581   :  { %10751 = vmatprep.subr.mxu1 %v14310_v10  ;;  %10691 = vmatpush1.msra.mxu0 %v14311_v0  ;;  %v14334_v10 = vld [vmem:[#allocation9 + $0x1268] sm:$0xff]  ;;  %v14335_v0 = vld [vmem:[#allocation9 + $0x1160] sm:$0xff]  ;;  %v10499_v62 = vrot.slane %v10489_v31, %v14790_v9 }
 0x582   :  { %10752 = vmatpush1.msra.mxu1 %v14312_v17  ;;  %10692 = vmatprep.subr.mxu0 %v14313_v47  ;;  %v14336_v17 = vld [vmem:[#allocation9 + $0x1260] sm:$0xff]  ;;  %v14337_v47 = vld [vmem:[#allocation9 + $0x1148] sm:$0xff]  ;;  %v10506_v24 = vrot.slane %v10491_v3, %v14790_v9  ;;  %v10520_v61 = vrot.slane %v10492_v6, %v14790_v9 }
 0x583   :  { %10753 = vmatprep.subr.mxu1 %v14314_v11  ;;  %10693 = vmatpush1.msra.mxu0 %v14315_v44  ;;  %v14338_v11 = vld [vmem:[#allocation9 + $0x1248] sm:$0xff]  ;;  %v14339_v44 = vld [vmem:[#allocation9 + $0x1140] sm:$0xff] }
 0x584   :  { %10754 = vmatpush1.msra.mxu1 %v14316_v8  ;;  %10694 = vmatprep.subr.mxu0 %v14317_v12  ;;  %v14340_v8 = vld [vmem:[#allocation9 + $0x1240] sm:$0xff]  ;;  %v14341_v12 = vld [vmem:[#allocation9 + $0x1128] sm:$0xff]  ;;  %v10594_v19 = vcombine.low %v10506_v24, %v10520_v61  ;;  %v13431_v32 = vcombine.high %v10506_v24, %v10520_v61 }
 0x585   :  { %10755 = vmatprep.subr.mxu1 %v14318_v4  ;;  %10695 = vmatpush2.msra.mxu0 %v14319_v48  ;;  %v14343_v4 = vld [vmem:[#allocation9 + $0x1120] sm:$0xff]  ;;  %v14358_v6 = vld [vmem:[#allocation9 + $0x14a8] sm:$0xff] }
 0x586   :  { %10756 = vmatpush1.msra.mxu1 %v14320_v63  ;;  %10696 = vmatprep.subr.mxu0 %v14321_v18  ;;  %v14344_v48 = vld [vmem:[#allocation9 + $0x1220] sm:$0xff]  ;;  %v14345_v63 = vld [vmem:[#allocation9 + $0x1108] sm:$0xff]  ;;  %v10609_v31 = vrot.slane %v10594_v19, %v14790_v9  ;;  %v17408_v3 = vrot.slane %v13431_v32, %v14790_v9 }
 0x587   :  { %10757 = vmatprep.subr.mxu1 %v14322_v58  ;;  %10697 = vmatpush2.msra.mxu0 %v14323_v57  ;;  %v14346_v18 = vld [vmem:[#allocation9 + $0x1208] sm:$0xff]  ;;  %v14347_v58 = vld [vmem:[#allocation9 + $0x1100] sm:$0xff] }
 0x588   :  { %10758 = vmatpush1.msra.mxu1 %v14324_v52  ;;  %10698 = vmatprep.subr.mxu0 %v14325_v21  ;;  %v14348_v57 = vld [vmem:[#allocation9 + $0x1200] sm:$0xff]  ;;  %v14349_v52 = vld [vmem:[#allocation9 + $0x10e8] sm:$0xff]  ;;  %v13430_v21 = vcombine.high %v10499_v62, %v17329_v14 }
 0x589   :  { %10759 = vmatprep.subr.mxu1 %v14326_v25  ;;  %10699 = vmatpush2.msra.mxu0 %v14327_v46  ;;  %v14350_v25 = vld [vmem:[#allocation9 + $0x14e8] sm:$0xff]  ;;  %v14351_v46 = vld [vmem:[#allocation9 + $0x10e0] sm:$0xff] }
 0x58a   :  { %10760 = vmatpush1.msra.mxu1 %v14328_v35  ;;  %10700 = vmatprep.subr.mxu0 %v14329_v36  ;;  %v14352_v35 = vld [vmem:[#allocation9 + $0x14e0] sm:$0xff]  ;;  %v14353_v36 = vld [vmem:[#allocation9 + $0x10c8] sm:$0xff]  ;;  %v17404_v14 = vrot.slane %v13430_v21, %v14790_v9 }
 0x58b   :  { %10761 = vmatprep.subr.mxu1 %v14330_v7  ;;  %10701 = vmatpush2.msra.mxu0 %v14331_v30  ;;  %v14354_v7 = vld [vmem:[#allocation9 + $0x14c8] sm:$0xff]  ;;  %v14355_v30 = vld [vmem:[#allocation9 + $0x10c0] sm:$0xff] }
 0x58c   :  { %10762 = vmatpush1.msra.mxu1 %v14332_v54  ;;  %10702 = vmatprep.subr.mxu0 %v14333_v13  ;;  %v14356_v54 = vld [vmem:[#allocation9 + $0x14c0] sm:$0xff]  ;;  %v14357_v13 = vld [vmem:[#allocation9 + $0x10a8] sm:$0xff]  ;;  %v10618_v24 = vcombine.high %v17404_v14, %v10609_v31  ;;  %v10617_v21 = vcombine.low %v17404_v14, %v10609_v31  ;;  %v14381_v31 = vld [vmem:[#allocation9 + $0xff8] sm:$0xff] }
 0x58d   :  { %10763 = vmatprep.subr.mxu1 %v14334_v10  ;;  %10703 = vmatpush2.msra.mxu0 %v14335_v0  ;;  %v14359_v10 = vld [vmem:[#allocation9 + $0x10a0] sm:$0xff]  ;;  %v10559_v0 = vcombine.low %v17365_v49, %v17353_v23  ;;  %v14365_v62 = vld [vmem:[#allocation9 + $0x1068] sm:$0xff]  ;;  %v10619_v23 = vcombine.high %v17408_v3, %v17408_v3 }
 0x58e   :  { %10764 = vmatpush1.msra.mxu1 %v14336_v17  ;;  %10704 = vmatprep.subr.mxu0 %v14337_v47  ;;  %v14360_v17 = vld [vmem:[#allocation9 + $0x14a0] sm:$0xff]  ;;  %v14361_v47 = vld [vmem:[#allocation9 + $0x1088] sm:$0xff]  ;;  %v10626_v14 = vrot.slane %v10617_v21, %v14790_v9  ;;  %v14405_v21 = vld [vmem:[#allocation9 + $0xf38] sm:$0xff] }
 0x58f   :  { %10765 = vmatprep.subr.mxu1 %v14338_v11  ;;  %10705 = vmatpush2.msra.mxu0 %v14339_v44  ;;  %v10557_v11 = vcombine.low %v17359_v43, %v17362_v53  ;;  %v14362_v44 = vld [vmem:[#allocation9 + $0x1488] sm:$0xff]  ;;  %v14367_v61 = vld [vmem:[#allocation9 + $0x1060] sm:$0xff]  ;;  %v10581_v53 = vrot.slane %v10559_v0, %v14790_v9  ;;  %v10640_v0 = vrot.slane %v17408_v3, %v14790_v9  ;;  %v14389_v3 = vld [vmem:[#allocation9 + $0xfb8] sm:$0xff] }
 0x590   :  { %10766 = vmatpush1.msra.mxu1 %v14340_v8  ;;  %10706 = vmatprep.subr.mxu0 %v14341_v12  ;;  %v14363_v8 = vld [vmem:[#allocation9 + $0x1080] sm:$0xff]  ;;  %v14366_v49 = vld [vmem:[#allocation9 + $0x1468] sm:$0xff] }
 0x591   :  { %10767 = vmatprep.subr.mxu1 %v14342_v28  ;;  %10707 = vmatpush2.msra.mxu0 %v14343_v4  ;;  %v14364_v12 = vld [vmem:[#allocation9 + $0x1480] sm:$0xff]  ;;  %v14369_v43 = vld [vmem:[#allocation9 + $0x1048] sm:$0xff] }
 0x592   :  { %10768 = vmatpush1.msra.mxu1 %v14344_v48  ;;  %10708 = vmatprep.subr.mxu0 %v14345_v63  ;;  %v14368_v28 = vld [vmem:[#allocation9 + $0x1460] sm:$0xff]  ;;  %v14370_v4 = vld [vmem:[#allocation9 + $0x1448] sm:$0xff]  ;;  %v10567_v63 = vrot.slane %v10557_v11, %v14790_v9  ;;  %v14385_v11 = vld [vmem:[#allocation9 + $0xfd8] sm:$0xff] }
 0x593   :  { %10769 = vmatprep.subr.mxu1 %v14346_v18  ;;  %10709 = vmatpush2.msra.mxu0 %v14347_v58  ;;  %v14371_v48 = vld [vmem:[#allocation9 + $0x1040] sm:$0xff]  ;;  %v14373_v58 = vld [vmem:[#allocation9 + $0x1028] sm:$0xff] }
 0x594   :  { %10770 = vmatpush1.msra.mxu1 %v14348_v57  ;;  %10710 = vmatprep.subr.mxu0 %v14349_v52  ;;  %v14372_v18 = vld [vmem:[#allocation9 + $0x1440] sm:$0xff]  ;;  %v10633_v57 = vrot.slane %v10618_v24, %v14790_v9  ;;  %v10647_v52 = vrot.slane %v10619_v23, %v14790_v9  ;;  %v14374_v19 = vld [vmem:[#allocation9 + $0x1428] sm:$0xff]  ;;  %v14388_v24 = vld [vmem:[#allocation9 + $0x13d0] sm:$0xff] }
 0x595   :  { %10787 = vmatprep.subr.mxu1 %v14350_v25  ;;  %10711 = vmatpush2.msra.mxu0 %v14351_v46  ;;  %v14375_v32 = vld [vmem:[#allocation9 + $0x1020] sm:$0xff]  ;;  %v14377_v46 = vld [vmem:[#allocation9 + $0x1008] sm:$0xff]  ;;  %v14390_v23 = vld [vmem:[#allocation9 + $0x13b8] sm:$0xff] }
 0x596   :  { %10788 = vmatpush2.msra.mxu1 %v14352_v35  ;;  %10712 = vmatprep.subr.mxu0 %v14353_v36  ;;  %v14376_v25 = vld [vmem:[#allocation9 + $0x1420] sm:$0xff]  ;;  %v17422_v35 = vcombine.low %v10567_v63, %v10581_v53  ;;  %v14378_v36 = vld [vmem:[#allocation9 + $0x1408] sm:$0xff] }
 0x597   :  { %10789 = vmatprep.subr.mxu1 %v14354_v7  ;;  %10713 = vmatpush2.msra.mxu0 %v14355_v30  ;;  %v14379_v7 = vld [vmem:[#allocation9 + $0x1000] sm:$0xff]  ;;  %v17424_v30 = vcombine.high %v10567_v63, %v10581_v53  ;;  %v14395_v53 = vld [vmem:[#allocation9 + $0xf90] sm:$0xff]  ;;  %v14398_v63 = vld [vmem:[#allocation9 + $0x1378] sm:$0xff] }
 0x598   :  { %10790 = vmatpush2.msra.mxu1 %v14356_v54  ;;  %10714 = vmatprep.subr.mxu0 %v14357_v13  ;;  %v14380_v54 = vld [vmem:[#allocation9 + $0x1400] sm:$0xff]  ;;  %v17427_v13 = vcombine.low %v10633_v57, %v10647_v52 }
 0x599   :  { %10791 = vmatprep.subr.mxu1 %v14358_v6  ;;  %10715 = vmatpush2.msra.mxu0 %v14359_v10  ;;  %v17431_v6 = vcombine.high %v10633_v57, %v10647_v52  ;;  %v14382_v10 = vld [vmem:[#allocation9 + $0x13f8] sm:$0xff]  ;;  %v14404_v52 = vld [vmem:[#allocation9 + $0x1350] sm:$0xff] }
 0x59a   :  { %10792 = vmatpush2.msra.mxu1 %v14360_v17  ;;  %10716 = vmatprep.subr.mxu0 %v14361_v47  ;;  %v14383_v17 = vld [vmem:[#allocation9 + $0xff0] sm:$0xff]  ;;  %v14402_v57 = vld [vmem:[#allocation9 + $0x1358] sm:$0xff] }
 0x59b   :  { %10793 = vmatprep.subr.mxu1 %v14362_v44  ;;  %10717 = vmatpush2.msra.mxu0 %v14363_v8  ;;  %v14384_v47 = vld [vmem:[#allocation9 + $0x13f0] sm:$0xff]  ;;  %v17438_v44 = vcombine.high %v10626_v14, %v10640_v0  ;;  %v14386_v8 = vld [vmem:[#allocation9 + $0x13d8] sm:$0xff] }
 0x59c   :  { %10794 = vmatpush2.msra.mxu1 %v14364_v12  ;;  %10718 = vmatprep.subr.mxu0 %v14365_v62  ;;  %v14387_v12 = vld [vmem:[#allocation9 + $0xfd0] sm:$0xff]  ;;  %v17440_v62 = vcombine.low %v10626_v14, %v10640_v0  ;;  %v14413_v14 = vld [vmem:[#allocation9 + $0xef8] sm:$0xff] }
 0x59d   :  { %10795 = vmatprep.subr.mxu1 %v14366_v49  ;;  %10719 = vmatpush2.msra.mxu0 %v14367_v61  ;;  %v14391_v49 = vld [vmem:[#allocation9 + $0xfb0] sm:$0xff] }
 0x59e   :  { %10796 = vmatpush2.msra.mxu1 %v14368_v28  ;;  %10720 = vmatprep.subr.mxu0 %v14369_v43  ;;  %v14392_v61 = vld [vmem:[#allocation9 + $0x13b0] sm:$0xff]  ;;  %v14393_v28 = vld [vmem:[#allocation9 + $0xf98] sm:$0xff] }
 0x59f   :  { %10797 = vmatprep.subr.mxu1 %v14370_v4  ;;  %10721 = vmatpush2.msra.mxu0 %v14371_v48  ;;  %v14394_v43 = vld [vmem:[#allocation9 + $0x1398] sm:$0xff]  ;;  %v14396_v4 = vld [vmem:[#allocation9 + $0x1390] sm:$0xff] }
 0x5a0   :  { %10798 = vmatpush2.msra.mxu1 %v14372_v18  ;;  %10722 = vmatprep.subr.mxu0 %v14373_v58  ;;  %v14397_v48 = vld [vmem:[#allocation9 + $0xf78] sm:$0xff]  ;;  %v14399_v18 = vld [vmem:[#allocation9 + $0xf70] sm:$0xff] }
 0x5a1   :  { %10799 = vmatprep.subr.mxu1 %v14374_v19  ;;  %10723 = vmatpush2.msra.mxu0 %v14375_v32  ;;  %v14401_v58 = vld [vmem:[#allocation9 + $0xf58] sm:$0xff]  ;;  %v14407_v32 = vld [vmem:[#allocation9 + $0xf30] sm:$0xff] }
 0x5a2   :  { %10800 = vmatpush2.msra.mxu1 %v14376_v25  ;;  %10724 = vmatprep.subr.mxu0 %v14377_v46  ;;  %v14406_v19 = vld [vmem:[#allocation9 + $0x1338] sm:$0xff]  ;;  %v14408_v25 = vld [vmem:[#allocation9 + $0x1330] sm:$0xff] }
 0x5a3   :  { %10801 = vmatprep.subr.mxu1 %v14378_v36  ;;  %10725 = vmatpush2.msra.mxu0 %v14379_v7  ;;  %v14409_v46 = vld [vmem:[#allocation9 + $0xf18] sm:$0xff]  ;;  %v14411_v7 = vld [vmem:[#allocation9 + $0xf10] sm:$0xff] }
 0x5a4   :  { %10802 = vmatpush2.msra.mxu1 %v14380_v54  ;;  %10727 = vmatmul.mubr.f32.vlgmr.msra.gmra.mxu0 %v17422_v35  ;;  %v14410_v36 = vld [vmem:[#allocation9 + $0x1318] sm:$0xff]  ;;  %v14412_v54 = vld [vmem:[#allocation9 + $0x1310] sm:$0xff] }
 0x5a5   :  { %10804 = vmatmul.mubr.f32.vlgmr.msra.gmra.mxu1 %v17424_v30  ;;  %10816 = vmatprep.subr.mxu1 %v14381_v31  ;;  %v14414_v31 = vld [vmem:[#allocation9 + $0x12f8] sm:$0xff]  ;;  %v14416_v0 = vld [vmem:[#allocation9 + $0x12f0] sm:$0xff] }
 0x5a6   :  { %10893 = vmatprep.subr.mxu0 %v14382_v10  ;;  %10732 = vmatprep.mubr.f32.mxu0 %v17427_v13  ;;  %v14415_v10 = vld [vmem:[#allocation9 + $0xef0] sm:$0xff] }
 0x5a7   :  { %13433 = vmatprep.mubr.msk.f32.mxu1 %vm6885_vm6, %v17431_v6  ;;  %10817 = vmatpush1.msra.mxu1 %v14383_v17  ;;  %v14417_v17 = vld [vmem:[#allocation9 + $0xed8] sm:$0xff] }
 0x5a8   :  { %10894 = vmatpush1.msra.mxu0 %v14384_v47  ;;  %10818 = vmatprep.subr.mxu1 %v14385_v11  ;;  %v14418_v47 = vld [vmem:[#allocation9 + $0x12d8] sm:$0xff]  ;;  %v14419_v11 = vld [vmem:[#allocation9 + $0xed0] sm:$0xff] }
 0x5a9   :  { %10895 = vmatprep.subr.mxu0 %v14386_v8  ;;  %10819 = vmatpush1.msra.mxu1 %v14387_v12  ;;  %v14420_v8 = vld [vmem:[#allocation9 + $0x12d0] sm:$0xff]  ;;  %v14421_v12 = vld [vmem:[#allocation9 + $0xeb8] sm:$0xff] }
 0x5aa   :  { %10896 = vmatpush1.msra.mxu0 %v14388_v24  ;;  %10810 = vmatmul.mubr.f32.gmra.mxu1 %v17438_v44  ;;  %v14422_v24 = vld [vmem:[#allocation9 + $0x12b8] sm:$0xff] }
 0x5ab   :  { %10733 = vmatmul.mubr.f32.gmra.mxu0 %v17440_v62  ;;  %10820 = vmatprep.subr.mxu1 %v14389_v3  ;;  %v14423_v3 = vld [vmem:[#allocation9 + $0xeb0] sm:$0xff] }
 0x5ac   :  { %10897 = vmatprep.subr.mxu0 %v14390_v23  ;;  %10821 = vmatpush1.msra.mxu1 %v14391_v49  ;;  %v14424_v23 = vld [vmem:[#allocation9 + $0x12b0] sm:$0xff]  ;;  %v14425_v49 = vld [vmem:[#allocation9 + $0xe98] sm:$0xff] }
 0x5ad   :  { %10880 = vmatprep.mubr.f32.mxu1 %v17383_v41  ;;  %10898 = vmatpush1.msra.mxu0 %v14392_v61  ;;  %v14400_v41 = vld [vmem:[#allocation9 + $0x1370] sm:$0xff]  ;;  %v14426_v61 = vld [vmem:[#allocation9 + $0x1298] sm:$0xff] }
 0x5ae   :  { %13434 = vmatprep.mubr.msk.f32.mxu0 %vm6885_vm6, %v17391_v37  ;;  %10822 = vmatprep.subr.mxu1 %v14393_v28  ;;  %v14403_v37 = vld [vmem:[#allocation9 + $0xf50] sm:$0xff] }
 0x5af   :  { %10899 = vmatprep.subr.mxu0 %v14394_v43  ;;  %10823 = vmatpush1.msra.mxu1 %v14395_v53  ;;  %v14427_v28 = vld [vmem:[#allocation9 + $0xe90] sm:$0xff]  ;;  %v14429_v53 = vld [vmem:[#allocation9 + $0xe78] sm:$0xff] }
 0x5b0   :  { %10900 = vmatpush1.msra.mxu0 %v14396_v4  ;;  %10824 = vmatprep.subr.mxu1 %v14397_v48  ;;  %v14428_v43 = vld [vmem:[#allocation9 + $0x1290] sm:$0xff]  ;;  %v14430_v4 = vld [vmem:[#allocation9 + $0x1278] sm:$0xff] }
 0x5b1   :  { %10901 = vmatprep.subr.mxu0 %v14398_v63  ;;  %10825 = vmatpush1.msra.mxu1 %v14399_v18  ;;  %v14431_v48 = vld [vmem:[#allocation9 + $0xe70] sm:$0xff]  ;;  %v14433_v18 = vld [vmem:[#allocation9 + $0xe58] sm:$0xff] }
 0x5b2   :  { %10902 = vmatpush1.msra.mxu0 %v14400_v41  ;;  %10826 = vmatprep.subr.mxu1 %v14401_v58  ;;  %v14432_v63 = vld [vmem:[#allocation9 + $0x1270] sm:$0xff]  ;;  %v14434_v41 = vld [vmem:[#allocation9 + $0x1258] sm:$0xff] }
 0x5b3   :  { %10903 = vmatprep.subr.mxu0 %v14402_v57  ;;  %10827 = vmatpush1.msra.mxu1 %v14403_v37  ;;  %v14435_v58 = vld [vmem:[#allocation9 + $0xe50] sm:$0xff]  ;;  %v14437_v37 = vld [vmem:[#allocation9 + $0xe38] sm:$0xff] }
 0x5b4   :  { %10904 = vmatpush1.msra.mxu0 %v14404_v52  ;;  %10828 = vmatprep.subr.mxu1 %v14405_v21  ;;  %v14436_v57 = vld [vmem:[#allocation9 + $0x1250] sm:$0xff]  ;;  %v14438_v52 = vld [vmem:[#allocation9 + $0x1238] sm:$0xff] }
 0x5b5   :  { %10905 = vmatprep.subr.mxu0 %v14406_v19  ;;  %10829 = vmatpush1.msra.mxu1 %v14407_v32  ;;  %v14439_v21 = vld [vmem:[#allocation9 + $0xe30] sm:$0xff]  ;;  %v14441_v32 = vld [vmem:[#allocation9 + $0xe18] sm:$0xff] }
 0x5b6   :  { %10906 = vmatpush1.msra.mxu0 %v14408_v25  ;;  %10830 = vmatprep.subr.mxu1 %v14409_v46  ;;  %v14440_v19 = vld [vmem:[#allocation9 + $0x1230] sm:$0xff]  ;;  %v14442_v25 = vld [vmem:[#allocation9 + $0x1218] sm:$0xff] }
 0x5b7   :  { %10907 = vmatprep.subr.mxu0 %v14410_v36  ;;  %10831 = vmatpush1.msra.mxu1 %v14411_v7  ;;  %v14443_v46 = vld [vmem:[#allocation9 + $0xe10] sm:$0xff]  ;;  %v14445_v7 = vld [vmem:[#allocation9 + $0x11f8] sm:$0xff] }
 0x5b8   :  { %10908 = vmatpush1.msra.mxu0 %v14412_v54  ;;  %10832 = vmatprep.subr.mxu1 %v14413_v14  ;;  %v14444_v36 = vld [vmem:[#allocation9 + $0x1210] sm:$0xff]  ;;  %v14446_v54 = vld [vmem:[#allocation9 + $0x14f8] sm:$0xff] }
 0x5b9   :  { %10909 = vmatprep.subr.mxu0 %v14414_v31  ;;  %10833 = vmatpush1.msra.mxu1 %v14415_v10  ;;  %v14447_v14 = vld [vmem:[#allocation9 + $0x11f0] sm:$0xff]  ;;  %v14449_v10 = vld [vmem:[#allocation9 + $0x11d8] sm:$0xff] }
 0x5ba   :  { %10910 = vmatpush1.msra.mxu0 %v14416_v0  ;;  %10834 = vmatprep.subr.mxu1 %v14417_v17  ;;  %v14448_v31 = vld [vmem:[#allocation9 + $0x14f0] sm:$0xff]  ;;  %v14450_v0 = vld [vmem:[#allocation9 + $0x14d8] sm:$0xff] }
 0x5bb   :  { %10911 = vmatprep.subr.mxu0 %v14418_v47  ;;  %10835 = vmatpush1.msra.mxu1 %v14419_v11  ;;  %v14451_v17 = vld [vmem:[#allocation9 + $0x11d0] sm:$0xff]  ;;  %v14453_v11 = vld [vmem:[#allocation9 + $0x11b8] sm:$0xff] }
 0x5bc   :  { %10912 = vmatpush1.msra.mxu0 %v14420_v8  ;;  %10836 = vmatprep.subr.mxu1 %v14421_v12  ;;  %v14452_v47 = vld [vmem:[#allocation9 + $0x14d0] sm:$0xff]  ;;  %v14454_v8 = vld [vmem:[#allocation9 + $0x14b8] sm:$0xff] }
 0x5bd   :  { %10913 = vmatprep.subr.mxu0 %v14422_v24  ;;  %10837 = vmatpush1.msra.mxu1 %v14423_v3  ;;  %v14455_v12 = vld [vmem:[#allocation9 + $0x11b0] sm:$0xff]  ;;  %v14457_v3 = vld [vmem:[#allocation9 + $0x1198] sm:$0xff] }
 0x5be   :  { %10914 = vmatpush1.msra.mxu0 %v14424_v23  ;;  %10838 = vmatprep.subr.mxu1 %v14425_v49  ;;  %v14456_v24 = vld [vmem:[#allocation9 + $0x14b0] sm:$0xff]  ;;  %v14458_v23 = vld [vmem:[#allocation9 + $0x1498] sm:$0xff] }
 0x5bf   :  { %10915 = vmatprep.subr.mxu0 %v14426_v61  ;;  %10839 = vmatpush1.msra.mxu1 %v14427_v28  ;;  %v14459_v49 = vld [vmem:[#allocation9 + $0x1190] sm:$0xff]  ;;  %v14461_v28 = vld [vmem:[#allocation9 + $0x1178] sm:$0xff] }
 0x5c0   :  { %10916 = vmatpush1.msra.mxu0 %v14428_v43  ;;  %10840 = vmatprep.subr.mxu1 %v14429_v53  ;;  %v14460_v61 = vld [vmem:[#allocation9 + $0x1490] sm:$0xff]  ;;  %v14462_v43 = vld [vmem:[#allocation9 + $0x1478] sm:$0xff] }
 0x5c1   :  { %10917 = vmatprep.subr.mxu0 %v14430_v4  ;;  %10841 = vmatpush1.msra.mxu1 %v14431_v48  ;;  %v14463_v53 = vld [vmem:[#allocation9 + $0x1170] sm:$0xff]  ;;  %v14465_v48 = vld [vmem:[#allocation9 + $0x1158] sm:$0xff] }
 0x5c2   :  { %10918 = vmatpush1.msra.mxu0 %v14432_v63  ;;  %10842 = vmatprep.subr.mxu1 %v14433_v18  ;;  %v14464_v4 = vld [vmem:[#allocation9 + $0x1470] sm:$0xff]  ;;  %v14466_v63 = vld [vmem:[#allocation9 + $0x1458] sm:$0xff] }
 0x5c3   :  { %10919 = vmatprep.subr.mxu0 %v14434_v41  ;;  %10843 = vmatpush1.msra.mxu1 %v14435_v58  ;;  %v14467_v18 = vld [vmem:[#allocation9 + $0x1150] sm:$0xff]  ;;  %v14469_v58 = vld [vmem:[#allocation9 + $0x1138] sm:$0xff] }
 0x5c4   :  { %10920 = vmatpush1.msra.mxu0 %v14436_v57  ;;  %10844 = vmatprep.subr.mxu1 %v14437_v37  ;;  %v14468_v41 = vld [vmem:[#allocation9 + $0x1450] sm:$0xff]  ;;  %v14470_v57 = vld [vmem:[#allocation9 + $0x1438] sm:$0xff] }
 0x5c5   :  { %10921 = vmatprep.subr.mxu0 %v14438_v52  ;;  %10845 = vmatpush1.msra.mxu1 %v14439_v21  ;;  %v14471_v37 = vld [vmem:[#allocation9 + $0x1130] sm:$0xff]  ;;  %v14473_v21 = vld [vmem:[#allocation9 + $0x1118] sm:$0xff] }
 0x5c6   :  { %10922 = vmatpush1.msra.mxu0 %v14440_v19  ;;  %10846 = vmatprep.subr.mxu1 %v14441_v32  ;;  %v14472_v52 = vld [vmem:[#allocation9 + $0x1430] sm:$0xff]  ;;  %v14474_v19 = vld [vmem:[#allocation9 + $0x1418] sm:$0xff] }
 0x5c7   :  { %10923 = vmatprep.subr.mxu0 %v14442_v25  ;;  %10847 = vmatpush1.msra.mxu1 %v14443_v46  ;;  %v14475_v32 = vld [vmem:[#allocation9 + $0x1110] sm:$0xff]  ;;  %v14477_v46 = vld [vmem:[#allocation9 + $0x10f8] sm:$0xff] }
 0x5c8   :  { %10924 = vmatpush1.msra.mxu0 %v14444_v36  ;;  %10848 = vmatprep.subr.mxu1 %v14445_v7  ;;  %v14476_v25 = vld [vmem:[#allocation9 + $0x1410] sm:$0xff]  ;;  %v14479_v7 = vld [vmem:[#allocation9 + $0x10d8] sm:$0xff] }
 0x5c9   :  { %10941 = vmatprep.subr.mxu0 %v14446_v54  ;;  %10849 = vmatpush2.msra.mxu1 %v14447_v14  ;;  %v14478_v36 = vld [vmem:[#allocation9 + $0x10f0] sm:$0xff]  ;;  %v14481_v14 = vld [vmem:[#allocation9 + $0x10b8] sm:$0xff] }
 0x5ca   :  { %10942 = vmatpush2.msra.mxu0 %v14448_v31  ;;  %10850 = vmatprep.subr.mxu1 %v14449_v10  ;;  %v14480_v54 = vld [vmem:[#allocation9 + $0x10d0] sm:$0xff]  ;;  %v14483_v10 = vld [vmem:[#allocation9 + $0x1098] sm:$0xff] }
 0x5cb   :  { %10943 = vmatprep.subr.mxu0 %v14450_v0  ;;  %10851 = vmatpush2.msra.mxu1 %v14451_v17  ;;  %v14482_v31 = vld [vmem:[#allocation9 + $0x10b0] sm:$0xff] }
 0x5cc   :  { %10944 = vmatpush2.msra.mxu0 %v14452_v47  ;;  %10852 = vmatprep.subr.mxu1 %v14453_v11  ;;  %v14484_v0 = vld [vmem:[#allocation9 + $0x1090] sm:$0xff]  ;;  %v14487_v47 = vld [vmem:[#allocation9 + $0x1058] sm:$0xff] }
 0x5cd   :  { %10945 = vmatprep.subr.mxu0 %v14454_v8  ;;  %10853 = vmatpush2.msra.mxu1 %v14455_v12  ;;  %v14486_v17 = vld [vmem:[#allocation9 + $0x1070] sm:$0xff]  ;;  %v14489_v11 = vld [vmem:[#allocation9 + $0x1038] sm:$0xff] }
 0x5ce   :  { %10946 = vmatpush2.msra.mxu0 %v14456_v24  ;;  %10854 = vmatprep.subr.mxu1 %v14457_v3  ;;  %v14490_v8 = vld [vmem:[#allocation9 + $0x1030] sm:$0xff]  ;;  %v14491_v12 = vld [vmem:[#allocation9 + $0x1018] sm:$0xff]  ;;  %v17455_v24 = vpop.f32.mrf.mxu0  ;;  %v17457_v3 = vpop.f32.mrf.mxu1 }
 0x5cf   :  { %10947 = vmatprep.subr.mxu0 %v14458_v23  ;;  %10855 = vmatpush2.msra.mxu1 %v14459_v49 }
 0x5d0   :  { %10948 = vmatpush2.msra.mxu0 %v14460_v61  ;;  %10856 = vmatprep.subr.mxu1 %v14461_v28  ;;  %v17459_v23 = vpop.f32.mrf.mxu0  ;;  %v17461_v49 = vpop.f32.mrf.mxu1 }
 0x5d1   :  { %10949 = vmatprep.subr.mxu0 %v14462_v43  ;;  %10857 = vmatpush2.msra.mxu1 %v14463_v53 }
 0x5d2   :  { %10950 = vmatpush2.msra.mxu0 %v14464_v4  ;;  %10858 = vmatprep.subr.mxu1 %v14465_v48  ;;  %v17463_v61 = vpop.f32.mrf.mxu0  ;;  %v17465_v28 = vpop.f32.mrf.mxu1  ;;  %v9142_v4 = vadd.f32 %v17295_v60, %v17299_v27 }
 0x5d3   :  { %10951 = vmatprep.subr.mxu0 %v14466_v63  ;;  %10859 = vmatpush2.msra.mxu1 %v14467_v18  ;;  %v8988_v63 = vadd.f32 %v17272_v26, %v17270_v20  ;;  %v9140_v18 = vadd.f32 %v17291_v40, %v17297_v22  ;;  %v8986_v20 = vadd.f32 %v17268_v33, %v17266_v15 }
 0x5d4   :  { %10952 = vmatpush2.msra.mxu0 %v14468_v41  ;;  %10860 = vmatprep.subr.mxu1 %v14469_v58  ;;  %v17467_v43 = vpop.f32.mrf.mxu0  ;;  %v17471_v53 = vpop.f32.mrf.mxu1  ;;  %v18487_v41 = vld [vmem:[#allocation25_spill] sm:$0xff] }
 0x5d5   :  { %10953 = vmatprep.subr.mxu0 %v14470_v57  ;;  %10861 = vmatpush2.msra.mxu1 %v14471_v37  ;;  %v18488_v58 = vsub.s32 0, %v18487_v41  ;;  %v18489_v37 = vsub.s32 1, %v18487_v41  ;;  %v9160_v26 = vcombine.low %v9140_v18, %v9142_v4  ;;  %v9158_v40 = vcombine.low %v8986_v20, %v8988_v63 }
 0x5d6   :  { %10954 = vmatpush2.msra.mxu0 %v14472_v52  ;;  %10862 = vmatprep.subr.mxu1 %v14473_v21  ;;  %v18490_v21 = vsub.s32 2, %v18487_v41  ;;  %v9161_v22 = vcombine.high %v9140_v18, %v9142_v4 }
 0x5d7   :  { %10955 = vmatprep.subr.mxu0 %v14474_v19  ;;  %10863 = vmatpush2.msra.mxu1 %v14475_v32  ;;  %v18491_v32 = vsub.s32 3, %v18487_v41 }
 0x5d8   :  { %10956 = vmatpush2.msra.mxu0 %v14476_v25  ;;  %10864 = vmatprep.subr.mxu1 %v14477_v46  ;;  %v9189_v15 = vrot.slane %v9161_v22, %v14790_v9 }
 0x5d9   :  { %10958 = vmatmul.mubr.f32.vlgmr.msra.gmra.mxu0 %v17424_v30  ;;  %10865 = vmatpush2.msra.mxu1 %v14478_v36  ;;  %v14485_v30 = vld [vmem:[#allocation9 + $0x1078] sm:$0xff] }
 0x5da   :  { %13435 = vmatprep.mubr.msk.f32.mxu0 %vm6885_vm6, %v17431_v6  ;;  %10866 = vmatprep.subr.mxu1 %v14479_v7  ;;  %v14488_v6 = vld [vmem:[#allocation9 + $0x1050] sm:$0xff] }
 0x5db   :  { %10867 = vmatpush2.msra.mxu1 %v14480_v54  ;;  %v9159_v54 = vcombine.high %v8986_v20, %v8988_v63 }
 0x5dc   :  { %10868 = vmatprep.subr.mxu1 %v14481_v14  ;;  %v9182_v14 = vrot.slane %v9160_v26, %v14790_v9 }
 0x5dd   :  { %10964 = vmatmul.mubr.f32.gmra.mxu0 %v17438_v44  ;;  %10869 = vmatpush2.msra.mxu1 %v14482_v31  ;;  %v14492_v44 = vld [vmem:[#allocation9 + $0x1010] sm:$0xff] }
 0x5de   :  { %10870 = vmatprep.subr.mxu1 %v14483_v10 }
 0x5df   :  { %10871 = vmatpush2.msra.mxu1 %v14484_v0 }
 0x5e0   :  { %10872 = vmatprep.subr.mxu1 %v14485_v30  ;;  %v9168_v30 = vrot.slane %v9158_v40, %v14790_v9 }
 0x5e1   :  { %10873 = vmatpush2.msra.mxu1 %v14486_v17 }
 0x5e2   :  { %10874 = vmatprep.subr.mxu1 %v14487_v47 }
 0x5e3   :  { %10875 = vmatpush2.msra.mxu1 %v14488_v6 }
 0x5e4   :  { %10876 = vmatprep.subr.mxu1 %v14489_v11  ;;  %v9175_v11 = vrot.slane %v9159_v54, %v14790_v9 }
 0x5e5   :  { %10877 = vmatpush2.msra.mxu1 %v14490_v8  ;;  %v9190_v8 = vcombine.low %v9168_v30, %v9182_v14 }
 0x5e6   :  { %10878 = vmatprep.subr.mxu1 %v14491_v12  ;;  %v9191_v12 = vcombine.high %v9168_v30, %v9182_v14  ;;  %v9192_v63 = vcombine.low %v9175_v11, %v9189_v15  ;;  %v9193_v18 = vcombine.high %v9175_v11, %v9189_v15 }
 0x5e7   :  { %10879 = vmatpush2.msra.mxu1 %v14492_v44 }
 0x5e8   :  { %10881 = vmatmul.mubr.f32.vlgmr.msra.gmra.mxu1 %v17422_v35  ;;  %11776 = vmatprep.subr.mxu1 %v18483_v16  ;;  %v17469_v35 = vpop.f32.mrf.mxu0 }
 0x5e9   :  { %10886 = vmatprep.mubr.f32.mxu1 %v17427_v13  ;;  %v17473_v13 = vpop.f32.mrf.mxu1 }
 0x5ea   :  { %v17477_v48 = vpop.f32.mrf.mxu0 }
 0x5eb   :  { %v17491_v27 = vpop.f32.mrf.mxu1 }
 0x5ec   :  { %10887 = vmatmul.mubr.f32.gmra.mxu1 %v17440_v62  ;;  %v6385_v62 = vld [vmem:[#allocation10] sm:$0xf]  ;;  %v17495_v25 = vpop.f32.mrf.mxu0 }
 0x5ed   :  { %v9324_v57 = vrot.slane %v6385_v62, %v18488_v58  ;;  %v9328_v52 = vrot.slane %v6385_v62, %v18489_v37  ;;  %v9332_v19 = vrot.slane %v6385_v62, %v18490_v21  ;;  %v9336_v60 = vrot.slane %v6385_v62, %v18491_v32  ;;  %v17497_v7 = vpop.f32.mrf.mxu1 }
 0x5ee   :  { %v17500_v31 = vpop.f32.mrf.mxu0  ;;  %v9214_v37 = vrot.slane %v9191_v12, %v14790_v9  ;;  %v9207_v32 = vrot.slane %v9192_v63, %v14790_v9 }
 0x5ef   :  { %v9337_v46 = vcombine.low %v9324_v57, %v9328_v52  ;;  %v9339_v36 = vcombine.low %v9332_v19, %v9336_v60  ;;  %v9338_v10 = vcombine.high %v9324_v57, %v9328_v52  ;;  %v9340_v0 = vcombine.high %v9332_v19, %v9336_v60  ;;  %v17508_v6 = vpop.f32.mrf.mxu1 }
 0x5f0   :  { %v17504_v33 = vpop.f32.mrf.mxu0  ;;  %v9200_v57 = vrot.slane %v9190_v8, %v14790_v9  ;;  %v9221_v60 = vrot.slane %v9193_v18, %v14790_v9  ;;  %v9224_v22 = vcombine.high %v9214_v37, %v9214_v37 }
 0x5f1   :  { %v9347_v17 = vrot.slane %v9337_v46, %v14790_v9  ;;  %v9361_v47 = vrot.slane %v9339_v36, %v14790_v9  ;;  %v9354_v44 = vrot.slane %v9338_v10, %v14790_v9  ;;  %v9368_v62 = vrot.slane %v9340_v0, %v14790_v9  ;;  %v17513_v4 = vpop.f32.mrf.mxu1 }
 0x5f2   :  { %v17515_v41 = vpop.f32.mrf.mxu0  ;;  %v9222_v40 = vcombine.high %v9200_v57, %v9200_v57  ;;  %v9223_v10 = vcombine.high %v9207_v32, %v9207_v32  ;;  %v9225_v0 = vcombine.high %v9221_v60, %v9221_v60  ;;  %v9306_v15 = vadd.f32 %v9200_v57, %v17194_v45 }
 0x5f3   :  { %v9369_v58 = vcombine.low %v9347_v17, %v9361_v47  ;;  %v9370_v52 = vcombine.high %v9347_v17, %v9361_v47  ;;  %v9371_v21 = vcombine.low %v9354_v44, %v9368_v62  ;;  %v17519_v19 = vpop.f32.mrf.mxu1  ;;  %v9372_v36 = vcombine.high %v9354_v44, %v9368_v62 }
 0x5f4   :  { %v17523_v20 = vpop.f32.mrf.mxu0  ;;  %v9307_v47 = vadd.f32 %v9214_v37, %v17197_v56  ;;  %v9308_v11 = vadd.f32 %v9222_v40, %v17202_v59  ;;  %v9309_v8 = vadd.f32 %v9224_v22, %v17207_v55  ;;  %v9310_v56 = vadd.f32 %v9207_v32, %v17210_v5 }
 0x5f5   :  { %v17526_v26 = vrot.slane %v9369_v58, %v14790_v9  ;;  %v17529_v46 = vrot.slane %v9370_v52, %v14790_v9  ;;  %v17532_v54 = vrot.slane %v9371_v21, %v14790_v9  ;;  %v17534_v14 = vpop.f32.mrf.mxu1  ;;  %v17551_v62 = vrot.slane %v9372_v36, %v14790_v9 }
 0x5f6   :  { %v17536_v30 = vpop.f32.mrf.mxu0  ;;  %v9311_v59 = vadd.f32 %v9221_v60, %v17213_v39  ;;  %v9312_v55 = vadd.f32 %v9223_v10, %v17218_v2  ;;  %v9313_v18 = vadd.f32 %v9225_v0, %v17223_v34  ;;  %v9739_v40 = vadd.f32 %v17477_v48, %v17491_v27 }
 0x5f7   :  { %v17541_v17 = vcombine.high %v17526_v26, %v17526_v26  ;;  %v17548_v12 = vcombine.high %v17529_v46, %v17529_v46  ;;  %v17555_v45 = vcombine.high %v17532_v54, %v17532_v54  ;;  %v17557_v63 = vpop.f32.mrf.mxu1  ;;  %v17564_v58 = vadd.f32 %v17526_v26, %v9306_v15 }
 0x5f8   :  { %v17567_v37 = vadd.f32 %v17529_v46, %v9307_v47  ;;  %v17576_v39 = vadd.f32 %v17532_v54, %v9310_v56  ;;  %v17579_v2 = vadd.f32 %v17551_v62, %v9311_v59  ;;  %v17585_v32 = vadd.f32 %v17526_v26, %v9313_v18 }
 0x5f9   :  { %v17570_v52 = vadd.f32 %v17541_v17, %v9308_v11  ;;  %v17573_v21 = vadd.f32 %v17548_v12, %v9309_v8  ;;  %v17582_v34 = vadd.f32 %v17555_v45, %v9312_v55  ;;  %v17595_v15 = vadd.f32 %v17529_v46, %v17338_v38 }
 0x5fa   :  { %18494 = vst [vmem:[#allocation49_spill] sm:$0xff] %v17585_v32  ;;  %v17599_v11 = vadd.f32 %v17541_v17, %v17341_v42  ;;  %v17603_v8 = vadd.f32 %v17551_v62, %v17344_v50  ;;  %v9585_v48 = vadd.f32 %v17461_v49, %v17459_v23  ;;  %v9737_v27 = vadd.f32 %v17469_v35, %v17473_v13 }
 0x5fb   :  { %18492 = vst [vmem:[#allocation47_spill] sm:$0xff] %v17570_v52  ;;  %18493 = vst [vmem:[#allocation48_spill] sm:$0xff] %v17573_v21  ;;  %v17615_v42 = vadd.f32 %v17548_v12, %v17350_v51  ;;  %v17619_v50 = vadd.f32 %v17555_v45, %v17347_v29  ;;  %v9583_v23 = vadd.f32 %v17457_v3, %v17455_v24 }
 0x5fc   :  { %18495 = vst [vmem:[#allocation50_spill] sm:$0xff] %v17595_v15  ;;  %18496 = vst [vmem:[#allocation27_spill] sm:$0xff] %v17599_v11  ;;  %v9757_v49 = vcombine.low %v9737_v27, %v9739_v40  ;;  %v17625_v13 = vadd.f32 %v17532_v54, %v17356_v1  ;;  %v9591_v55 = vadd.f32 %v17471_v53, %v17467_v43 }
 0x5fd   :  { %18497 = vst [vmem:[#allocation26_spill] sm:$0xff] %v17603_v8  ;;  %18498 = vst [vmem:[#allocation32_spill] sm:$0xff] %v17615_v42  ;;  %v9755_v59 = vcombine.low %v9583_v23, %v9585_v48  ;;  %v9745_v24 = vadd.f32 %v17500_v31, %v17508_v6  ;;  %v9589_v3 = vadd.f32 %v17465_v28, %v17463_v61 }
 0x5fe   :  { %18499 = vst [vmem:[#allocation38_spill] sm:$0xff] %v17619_v50  ;;  %18500 = vst [vmem:[#allocation36_spill] sm:$0xff] %v17625_v13  ;;  %v9758_v1 = vcombine.high %v9737_v27, %v9739_v40  ;;  %v10049_v18 = vadd.f32 %v17519_v19, %v17515_v41  ;;  %v9756_v53 = vcombine.high %v9583_v23, %v9585_v48 }
 0x5ff   :  { %v9823_v6 = vcombine.low %v9589_v3, %v9591_v55  ;;  %v10047_v61 = vadd.f32 %v17513_v4, %v17504_v33  ;;  %v9765_v41 = vrot.slane %v9755_v59, %v14790_v9  ;;  %v9824_v19 = vcombine.high %v9589_v3, %v9591_v55 }
 0x600   :  { %v9786_v48 = vrot.slane %v9758_v1, %v14790_v9  ;;  %v10055_v4 = vadd.f32 %v17557_v63, %v17536_v30 }
 0x601   :  { %v10219_v27 = vcombine.low %v10047_v61, %v10049_v18  ;;  %v10220_v43 = vcombine.high %v10047_v61, %v10049_v18  ;;  %v9833_v33 = vrot.slane %v9823_v6, %v14790_v9  ;;  %v9840_v55 = vrot.slane %v9824_v19, %v14790_v9 }
 0x603   :  { %v10229_v18 = vrot.slane %v10219_v27, %v14790_v9 }
 0x621   :  { %v10200_v44 = vpop.f32.mrf.mxu0 }
 0x623   :  { %v10202_v5 = vpop.f32.mrf.mxu0 }
 0x626   :  { %v10206_v47 = vpop.f32.mrf.mxu0 }
 0x628   :  { %v10208_v51 = vpop.f32.mrf.mxu0 }
 0x632   :  { %v10123_v57 = vpop.f32.mrf.mxu1 }
 0x633   :  { %v10201_v38 = vadd.f32 %v10200_v44, %v10123_v57 }
 0x634   :  { %v10125_v22 = vpop.f32.mrf.mxu1 }
 0x635   :  { %v10203_v0 = vadd.f32 %v10202_v5, %v10125_v22  ;;  %v9779_v5 = vrot.slane %v9757_v49, %v14790_v9  ;;  %v9743_v22 = vadd.f32 %v17495_v25, %v17497_v7  ;;  %v9772_v7 = vrot.slane %v9756_v53, %v14790_v9 }
 0x637   :  { %v10221_v28 = vcombine.low %v10201_v38, %v10203_v0  ;;  %v9825_v44 = vcombine.low %v9743_v22, %v9745_v24  ;;  %v10222_v57 = vcombine.high %v10201_v38, %v10203_v0  ;;  %v9787_v49 = vcombine.low %v9765_v41, %v9779_v5 }
 0x638   :  { %v10129_v35 = vpop.f32.mrf.mxu1  ;;  %v9826_v31 = vcombine.high %v9743_v22, %v9745_v24  ;;  %v9788_v3 = vcombine.high %v9765_v41, %v9779_v5  ;;  %v9789_v1 = vcombine.low %v9772_v7, %v9786_v48  ;;  %v10053_v24 = vadd.f32 %v17534_v14, %v17523_v20 }
 0x639   :  { %v10243_v59 = vrot.slane %v10221_v28, %v14790_v9  ;;  %v10207_v0 = vadd.f32 %v10206_v47, %v10129_v35  ;;  %v9790_v63 = vcombine.high %v9772_v7, %v9786_v48  ;;  %v9797_v47 = vrot.slane %v9787_v49, %v14790_v9 }
 0x63a   :  { %v10131_v29 = vpop.f32.mrf.mxu1  ;;  %v9854_v35 = vrot.slane %v9826_v31, %v14790_v9  ;;  %v10236_v5 = vrot.slane %v10220_v43, %v14790_v9  ;;  %v10287_v22 = vcombine.low %v10053_v24, %v10055_v4  ;;  %v9804_v20 = vrot.slane %v9789_v1, %v14790_v9 }
 0x63b   :  { %v10209_v23 = vadd.f32 %v10208_v51, %v10131_v29  ;;  %v9847_v51 = vrot.slane %v9825_v44, %v14790_v9  ;;  %v10250_v29 = vrot.slane %v10222_v57, %v14790_v9  ;;  %v10251_v6 = vcombine.low %v10229_v18, %v10243_v59 }
 0x63c   :  { %v10252_v61 = vcombine.high %v10229_v18, %v10243_v59  ;;  %v9811_v14 = vrot.slane %v9788_v3, %v14790_v9  ;;  %v10288_v48 = vcombine.high %v10053_v24, %v10055_v4  ;;  %v9818_v31 = vrot.slane %v9790_v63, %v14790_v9 }
 0x63d   :  { %v10289_v53 = vcombine.low %v10207_v0, %v10209_v23  ;;  %v10290_v28 = vcombine.high %v10207_v0, %v10209_v23  ;;  %v9855_v19 = vcombine.low %v9833_v33, %v9847_v51  ;;  %v9856_v44 = vcombine.high %v9833_v33, %v9847_v51 }
 0x63e   :  { %v10253_v57 = vcombine.low %v10236_v5, %v10250_v29  ;;  %v10254_v27 = vcombine.high %v10236_v5, %v10250_v29  ;;  %v9819_v43 = vcombine.high %v9797_v47, %v9797_v47  ;;  %v9857_v40 = vcombine.low %v9840_v55, %v9854_v35 }
 0x63f   :  { %v10311_v7 = vrot.slane %v10289_v53, %v14790_v9  ;;  %v9858_v10 = vcombine.high %v9840_v55, %v9854_v35  ;;  %v10297_v23 = vrot.slane %v10287_v22, %v14790_v9  ;;  %v10261_v59 = vrot.slane %v10251_v6, %v14790_v9 }
 0x640   :  { %v10275_v33 = vrot.slane %v10252_v61, %v14790_v9  ;;  %v10318_v0 = vrot.slane %v10290_v28, %v14790_v9  ;;  %v17677_v4 = vrot.slane %v9855_v19, %v14790_v9  ;;  %v17680_v3 = vrot.slane %v9856_v44, %v14790_v9 }
 0x641   :  { %v10268_v1 = vrot.slane %v10253_v57, %v14790_v9  ;;  %v10282_v55 = vrot.slane %v10254_v27, %v14790_v9  ;;  %v9820_v18 = vcombine.high %v9804_v20, %v9804_v20  ;;  %v9821_v24 = vcombine.high %v9811_v14, %v9811_v14 }
 0x642   :  { %v10304_v53 = vrot.slane %v10288_v48, %v14790_v9  ;;  %v10319_v63 = vcombine.low %v10297_v23, %v10311_v7  ;;  %v9822_v35 = vcombine.high %v9818_v31, %v9818_v31  ;;  %v9872_v5 = vrot.slane %v9857_v40, %v14790_v9 }
 0x643   :  { %v9886_v22 = vrot.slane %v9858_v10, %v14790_v9  ;;  %v10320_v6 = vcombine.high %v10297_v23, %v10311_v7  ;;  %v10283_v61 = vcombine.high %v10261_v59, %v10261_v59  ;;  %v10285_v28 = vcombine.high %v10275_v33, %v10275_v33 }
 0x644   :  { %v10321_v19 = vcombine.low %v10304_v53, %v10318_v0  ;;  %v9887_v57 = vcombine.high %v17677_v4, %v17677_v4  ;;  %v9888_v27 = vcombine.high %v17680_v3, %v17680_v3  ;;  %v10284_v48 = vcombine.high %v10268_v1, %v10268_v1 }
 0x645   :  { %v10286_v16 = vcombine.high %v10282_v55, %v10282_v55  ;;  %v10367_v42 = vadd.f32 %v10261_v59, %v9797_v47  ;;  %v10322_v13 = vcombine.high %v10304_v53, %v10318_v0  ;;  %v10329_v40 = vrot.slane %v10319_v63, %v14790_v9 }
 0x646   :  { %v10368_v23 = vadd.f32 %v10275_v33, %v9811_v14  ;;  %v10343_v32 = vrot.slane %v10320_v6, %v14790_v9  ;;  %v10369_v50 = vadd.f32 %v10283_v61, %v9819_v43  ;;  %v10370_v8 = vadd.f32 %v10285_v28, %v9821_v24 }
 0x647   :  { %v10336_v11 = vrot.slane %v10321_v19, %v14790_v9  ;;  %v10373_v47 = vadd.f32 %v10284_v48, %v9820_v18  ;;  %v10374_v63 = vadd.f32 %v10286_v16, %v9822_v35  ;;  %v17698_v33 = vadd.f32 %v10329_v40, %v17677_v4 }
 0x649   :  { %v17703_v24 = vadd.f32 %v10336_v11, %v9872_v5 }
 0x664   :  { %v17638_v56 = vpop.f32.mrf.mxu0 }
 0x665   :  { %v17655_v38 = vpop.f32.mrf.mxu1 }
 0x666   :  { %v10730_v25 = vpop.f32.mrf.mxu0  ;;  %v10806_v10 = vadd.f32 %v17655_v38, %v17638_v56  ;;  %v10350_v56 = vrot.slane %v10322_v13, %v14790_v9  ;;  %v10351_v38 = vcombine.high %v10329_v40, %v10329_v40 }
 0x667   :  { %v10807_v41 = vpop.f32.mrf.mxu1 }
 0x668   :  { %v10808_v44 = vadd.f32 %v10807_v41, %v10730_v25  ;;  %v10371_v25 = vadd.f32 %v10268_v1, %v9804_v20  ;;  %v10372_v41 = vadd.f32 %v10282_v55, %v9818_v31  ;;  %v10352_v31 = vcombine.high %v10343_v32, %v10343_v32 }
 0x669   :  { %v17701_v55 = vadd.f32 %v10343_v32, %v17680_v3  ;;  %v17710_v18 = vadd.f32 %v10350_v56, %v9886_v22  ;;  %v17712_v61 = vadd.f32 %v10351_v38, %v9887_v57 }
 0x66a   :  { %v10811_v51 = vpop.f32.mrf.mxu1  ;;  %v10978_v15 = vcombine.low %v10806_v10, %v10808_v44  ;;  %v10979_v59 = vcombine.high %v10806_v10, %v10808_v44 }
 0x66b   :  { %v17663_v30 = vpop.f32.mrf.mxu0 }
 0x66c   :  { %v10813_v36 = vpop.f32.mrf.mxu1  ;;  %v10812_v16 = vadd.f32 %v10811_v51, %v17663_v30  ;;  %v17714_v30 = vadd.f32 %v10352_v31, %v9888_v27 }
 0x66d   :  { %v10736_v49 = vpop.f32.mrf.mxu0 }
 0x66e   :  { %v10814_v14 = vadd.f32 %v10813_v36, %v10736_v49  ;;  %v10995_v36 = vrot.slane %v10979_v59, %v14790_v9 }
 0x670   :  { %v11046_v35 = vcombine.low %v10812_v16, %v10814_v14  ;;  %v11047_v32 = vcombine.high %v10812_v16, %v10814_v14 }
 0x672   :  { %v11063_v40 = vrot.slane %v11047_v32, %v14790_v9 }
 0x699   :  { %v10959_v29 = vpop.f32.mrf.mxu0 }
 0x69b   :  { %v10961_v60 = vpop.f32.mrf.mxu0 }
 0x69d   :  { %v10965_v21 = vpop.f32.mrf.mxu0 }
 0x6a8   :  { %v10882_v7 = vpop.f32.mrf.mxu1 }
 0x6a9   :  { %v10960_v0 = vadd.f32 %v10959_v29, %v10882_v7  ;;  %v10988_v29 = vrot.slane %v10978_v15, %v14790_v9 }
 0x6aa   :  { %v10884_v52 = vpop.f32.mrf.mxu1 }
 0x6ab   :  { %v10962_v53 = vadd.f32 %v10961_v60, %v10884_v52  ;;  %v10967_v52 = vpop.f32.mrf.mxu0 }
 0x6ac   :  { %v10888_v20 = vpop.f32.mrf.mxu1 }
 0x6ad   :  { %v10980_v43 = vcombine.low %v10960_v0, %v10962_v53  ;;  %v10981_v1 = vcombine.high %v10960_v0, %v10962_v53  ;;  %v10966_v3 = vadd.f32 %v10965_v21, %v10888_v20  ;;  %v11056_v21 = vrot.slane %v11046_v35, %v14790_v9 }
 0x6ae   :  { %v10890_v60 = vpop.f32.mrf.mxu1  ;;  %v18501_v35 = vmax.f32 %v17564_v58, 0.0 }
 0x6af   :  { %v11002_v13 = vrot.slane %v10980_v43, %v14790_v9  ;;  %v11009_v49 = vrot.slane %v10981_v1, %v14790_v9  ;;  %v10968_v4 = vadd.f32 %v10967_v52, %v10890_v60 }
 0x6b1   :  { %v11010_v11 = vcombine.low %v10988_v29, %v11002_v13  ;;  %v11011_v5 = vcombine.high %v10988_v29, %v11002_v13  ;;  %v11012_v6 = vcombine.low %v10995_v36, %v11009_v49  ;;  %v11013_v15 = vcombine.high %v10995_v36, %v11009_v49 }
 0x6b2   :  { %v11048_v51 = vcombine.low %v10966_v3, %v10968_v4  ;;  %v11049_v28 = vcombine.high %v10966_v3, %v10968_v4  ;;  %v18502_v3 = vmax.f32 %v17567_v37, 0.0 }
 0x6b3   :  { %v11020_v19 = vrot.slane %v11010_v11, %v14790_v9  ;;  %v11027_v44 = vrot.slane %v11012_v6, %v14790_v9  ;;  %v11034_v22 = vrot.slane %v11011_v5, %v14790_v9  ;;  %v11041_v48 = vrot.slane %v11013_v15, %v14790_v9 }
 0x6b4   :  { %v11070_v10 = vrot.slane %v11048_v51, %v14790_v9  ;;  %v11077_v57 = vrot.slane %v11049_v28, %v14790_v9  ;;  %v18503_v5 = vmax.f32 %v17576_v39, 0.0  ;;  %v18505_v51 = vmax.f32 %v17582_v34, 0.0 }
 0x6b5   :  { %v11042_v27 = vcombine.high %v11020_v19, %v11020_v19  ;;  %v11043_v7 = vcombine.high %v11027_v44, %v11027_v44  ;;  %v11044_v59 = vcombine.high %v11034_v22, %v11034_v22  ;;  %v11045_v0 = vcombine.high %v11041_v48, %v11041_v48 }
 0x6b6   :  { %v11126_v53 = vadd.f32 %v11020_v19, %v10367_v42  ;;  %v11127_v56 = vadd.f32 %v11034_v22, %v10368_v23  ;;  %v11130_v38 = vadd.f32 %v11027_v44, %v10371_v25  ;;  %v11131_v14 = vadd.f32 %v11041_v48, %v10372_v41  ;;  %v18506_v48 = vld [vmem:[#allocation47_spill] sm:$0xff] }
 0x6b7   :  { %v11128_v20 = vadd.f32 %v11042_v27, %v10369_v50  ;;  %v11129_v31 = vadd.f32 %v11044_v59, %v10370_v8  ;;  %v11132_v43 = vadd.f32 %v11043_v7, %v10373_v47  ;;  %v11133_v1 = vadd.f32 %v11045_v0, %v10374_v63  ;;  %v18508_v7 = vld [vmem:[#allocation48_spill] sm:$0xff] }
 0x6b8   :  { %v11140_v29 = vadd.f32 %v11126_v53, %v17526_v26  ;;  %v11141_v16 = vadd.f32 %v11127_v56, %v17529_v46  ;;  %v11144_v52 = vadd.f32 %v11130_v38, %v17532_v54  ;;  %v11145_v60 = vadd.f32 %v11131_v14, %v17551_v62 }
 0x6b9   :  { %v11142_v36 = vadd.f32 %v11128_v20, %v17541_v17  ;;  %v11143_v13 = vadd.f32 %v11129_v31, %v17548_v12  ;;  %v11146_v42 = vadd.f32 %v11132_v43, %v17555_v45  ;;  %v11147_v23 = vadd.f32 %v11133_v1, %v17526_v26 }
 0x6ba   :  { %v11154_v50 = vmax.f32 %v11140_v29, 0.0  ;;  %v11155_v8 = vmax.f32 %v11141_v16, 0.0  ;;  %v11158_v25 = vmax.f32 %v11144_v52, 0.0  ;;  %v11159_v41 = vmax.f32 %v11145_v60, 0.0 }
 0x6bb   :  { %v11156_v47 = vmax.f32 %v11142_v36, 0.0  ;;  %v11157_v63 = vmax.f32 %v11143_v13, 0.0  ;;  %v11160_v49 = vmax.f32 %v11146_v42, 0.0  ;;  %v11161_v4 = vmax.f32 %v11147_v23, 0.0 }
 0x6bc   :  { %v17734_v32 = vmax.f32 %v18501_v35, %v11154_v50  ;;  %v17738_v11 = vmax.f32 %v18502_v3, %v11155_v8  ;;  %v17742_v6 = vmax.f32 %v18503_v5, %v11158_v25  ;;  %v18504_v26 = vmax.f32 %v17579_v2, 0.0  ;;  %v18516_v5 = vld [vmem:[#allocation38_spill] sm:$0xff] }
 0x6bd   :  { %v17750_v28 = vmax.f32 %v18505_v51, %v11160_v49  ;;  %v11078_v19 = vcombine.low %v11056_v21, %v11070_v10  ;;  %v11079_v58 = vcombine.high %v11056_v21, %v11070_v10  ;;  %v11080_v44 = vcombine.low %v11063_v40, %v11077_v57 }
 0x6be   :  { %v17746_v15 = vmax.f32 %v18504_v26, %v11159_v41  ;;  %v11081_v22 = vcombine.high %v11063_v40, %v11077_v57  ;;  %v18507_v27 = vmax.f32 %v18506_v48, 0.0  ;;  %v18509_v59 = vmax.f32 %v18508_v7, 0.0  ;;  %v18510_v41 = vld [vmem:[#allocation50_spill] sm:$0xff]  ;;  %v18522_v7 = vld [vmem:[#allocation32_spill] sm:$0xff] }
 0x6bf   :  { %v11088_v0 = vrot.slane %v11078_v19, %v14790_v9  ;;  %v11095_v34 = vrot.slane %v11080_v44, %v14790_v9  ;;  %v11102_v53 = vrot.slane %v11079_v58, %v14790_v9  ;;  %v11196_v21 = vcombine.low %v17734_v32, %v17738_v11  ;;  %v18518_v58 = vld [vmem:[#allocation49_spill] sm:$0xff] }
 0x6c0   :  { %v11198_v37 = vcombine.low %v17742_v6, %v17746_v15  ;;  %v17756_v39 = vmax.f32 %v18507_v27, %v11156_v47  ;;  %v17760_v2 = vmax.f32 %v18509_v59, %v11157_v63  ;;  %v11109_v10 = vrot.slane %v11081_v22, %v14790_v9  ;;  %v18512_v63 = vld [vmem:[#allocation27_spill] sm:$0xff]  ;;  %v18520_v22 = vld [vmem:[#allocation36_spill] sm:$0xff] }
 0x6c1   :  { %v11226_v56 = vrot.slane %v17750_v28, %v14790_v9  ;;  %v11110_v38 = vcombine.high %v11088_v0, %v11088_v0  ;;  %v11111_v14 = vcombine.high %v11102_v53, %v11102_v53  ;;  %v11134_v20 = vadd.f32 %v11088_v0, %v17698_v33 }
 0x6c2   :  { %v11197_v40 = vcombine.low %v17756_v39, %v17760_v2  ;;  %v11219_v57 = vrot.slane %v11198_v37, %v14790_v9  ;;  %v11135_v31 = vadd.f32 %v11102_v53, %v17701_v55  ;;  %v11138_v43 = vadd.f32 %v11095_v34, %v17703_v24 }
 0x6c3   :  { %v11139_v1 = vadd.f32 %v11109_v10, %v17710_v18  ;;  %v11205_v29 = vrot.slane %v11196_v21, %v14790_v9  ;;  %v11136_v52 = vadd.f32 %v11110_v38, %v17712_v61  ;;  %v11137_v60 = vadd.f32 %v11111_v14, %v17714_v30 }
 0x6c4   :  { %v11212_v16 = vrot.slane %v11197_v40, %v14790_v9  ;;  %v11148_v36 = vadd.f32 %v11134_v20, %v17529_v46  ;;  %v11149_v13 = vadd.f32 %v11135_v31, %v17541_v17  ;;  %v11152_v33 = vadd.f32 %v11138_v43, %v17551_v62 }
 0x6c5   :  { %v11153_v55 = vadd.f32 %v11139_v1, %v17555_v45  ;;  %v11229_v24 = vcombine.low %v11219_v57, %v11226_v56  ;;  %v11150_v18 = vadd.f32 %v11136_v52, %v17548_v12  ;;  %v11151_v23 = vadd.f32 %v11137_v60, %v17532_v54  ;;  %v18514_v54 = vld [vmem:[#allocation26_spill] sm:$0xff] }
 0x6c6   :  { %v11227_v42 = vcombine.low %v11205_v29, %v11212_v16  ;;  %v11162_v50 = vmax.f32 %v11148_v36, 0.0  ;;  %v11163_v8 = vmax.f32 %v11149_v13, 0.0  ;;  %v11166_v25 = vmax.f32 %v11152_v33, 0.0 }
 0x6c7   :  { %v11167_v61 = vmax.f32 %v11153_v55, 0.0  ;;  %v17791_v46 = vrot.slane %v11229_v24, %v14790_v9  ;;  %v11164_v17 = vmax.f32 %v11150_v18, 0.0  ;;  %v11165_v62 = vmax.f32 %v11151_v23, 0.0  ;;  %v11665_v18 = vld [vmem:[#allocation12 + $0x338] sm:$0xff]  ;;  %v11664_v23 = vld [vmem:[#allocation12 + $0x330] sm:$0xff] }
 0x6c8   :  { %v17788_v30 = vrot.slane %v11227_v42, %v14790_v9  ;;  %v18511_v45 = vmax.f32 %v18510_v41, 0.0  ;;  %v18513_v12 = vmax.f32 %v18512_v63, 0.0  ;;  %v18515_v35 = vmax.f32 %v18514_v54, 0.0  ;;  %11777 = vmatpush1.msra.mxu1 %v11665_v18  ;;  %v11662_v41 = vld [vmem:[#allocation12 + $0x320] sm:$0xff]  ;;  %v11631_v63 = vld [vmem:[#allocation12 + $0x228] sm:$0xff]  ;;  %v11625_v18 = vld [vmem:[#allocation12 + $0x1f8] sm:$0xff] }
 0x6c9   :  { %v18517_v26 = vmax.f32 %v18516_v5, 0.0  ;;  %v18519_v44 = vmax.f32 %v18518_v58, 0.0  ;;  %v18521_v48 = vmax.f32 %v18520_v22, 0.0  ;;  %v18523_v59 = vmax.f32 %v18522_v7, 0.0  ;;  %v11646_v54 = vld [vmem:[#allocation12 + $0x2a0] sm:$0xff]  ;;  %v11660_v5 = vld [vmem:[#allocation12 + $0x310] sm:$0xff] }
 0x6ca   :  { %v17795_v47 = vmax.f32 %v18511_v45, %v11162_v50  ;;  %v17799_v49 = vmax.f32 %v18513_v12, %v11163_v8  ;;  %v17803_v3 = vmax.f32 %v18515_v35, %v11166_v25  ;;  %v11259_v19 = vcombine.low %v17788_v30, %v17791_v46  ;;  %v11663_v8 = vld [vmem:[#allocation12 + $0x328] sm:$0xff]  ;;  %v11649_v25 = vld [vmem:[#allocation12 + $0x2b8] sm:$0xff]  ;;  %v11630_v35 = vld [vmem:[#allocation12 + $0x220] sm:$0xff] }
 0x6cb   :  { %v17807_v51 = vmax.f32 %v18517_v26, %v11167_v61  ;;  %v17813_v37 = vmax.f32 %v18519_v44, %v11161_v4  ;;  %v17817_v27 = vmax.f32 %v18521_v48, %v11165_v62  ;;  %v17821_v0 = vmax.f32 %v18523_v59, %v11164_v17  ;;  %v11633_v61 = vld [vmem:[#allocation12 + $0x238] sm:$0xff]  ;;  %13451 = vmatprep.subr.mxu0 %v11649_v25  ;;  %v11648_v17 = vld [vmem:[#allocation12 + $0x2b0] sm:$0xff]  ;;  %v11647_v45 = vld [vmem:[#allocation12 + $0x2a8] sm:$0xff] }
 0x6cc   :  { %v11228_v34 = vcombine.high %v11205_v29, %v11212_v16  ;;  %v11230_v53 = vcombine.high %v11219_v57, %v11226_v56  ;;  %11334 = vrot.lane.b32.xlu0 %v11259_v19, %s14699_s0  ;;  %v18524_v50 = vmov 0.0   ;;  %v11632_v62 = vld [vmem:[#allocation12 + $0x230] sm:$0xff]  ;;  %13452 = vmatpush3.msra.mxu0 %v11633_v61  ;;  %v11661_v12 = vld [vmem:[#allocation12 + $0x318] sm:$0xff]  ;;  %v11659_v58 = vld [vmem:[#allocation12 + $0x308] sm:$0xff] }
 0x6cd   :  { %v11263_v21 = vcombine.low %v17813_v37, %v17795_v47  ;;  %v11265_v10 = vcombine.low %v17817_v27, %v17803_v3  ;;  %v11264_v4 = vcombine.low %v17799_v49, %v17821_v0  ;;  %v11293_v57 = vrot.slane %v17807_v51, %v14790_v9  ;;  %11778 = vmatprep.subr.mxu1 %v18524_v50  ;;  %v11645_v26 = vld [vmem:[#allocation12 + $0x298] sm:$0xff]  ;;  %v11644_v44 = vld [vmem:[#allocation12 + $0x290] sm:$0xff]  ;;  %v11658_v48 = vld [vmem:[#allocation12 + $0x300] sm:$0xff] }
 0x6ce   :  { %v17831_v40 = vrot.slane %v11228_v34, %v14790_v9  ;;  %v17834_v38 = vrot.slane %v11230_v53, %v14790_v9  ;;  %11779 = vmatpush1.msra.mxu1 %v11664_v23  ;;  %13453 = vmatprep.subr.mxu0 %v11648_v17  ;;  %v11629_v19 = vld [vmem:[#allocation12 + $0x218] sm:$0xff]  ;;  %v11628_v22 = vld [vmem:[#allocation12 + $0x210] sm:$0xff]  ;;  %v11643_v7 = vld [vmem:[#allocation12 + $0x288] sm:$0xff] }
 0x6cf   :  { %v11272_v14 = vrot.slane %v11263_v21, %v14790_v9  ;;  %v11279_v56 = vrot.slane %v11264_v4, %v14790_v9  ;;  %v11286_v20 = vrot.slane %v11265_v10, %v14790_v9  ;;  %11780 = vmatprep.subr.mxu1 %v18524_v50  ;;  %13454 = vmatpush3.msra.mxu0 %v11632_v62  ;;  %v11627_v59 = vld [vmem:[#allocation12 + $0x208] sm:$0xff]  ;;  %v11657_v34 = vld [vmem:[#allocation12 + $0x2f8] sm:$0xff]  ;;  %v11642_v53 = vld [vmem:[#allocation12 + $0x280] sm:$0xff] }
 0x6d0   :  { %v11262_v31 = vcombine.high %v17831_v40, %v17834_v38  ;;  %v13436_v43 = vcombine.low %v17788_v30, %v17831_v40  ;;  %11781 = vmatpush1.msra.mxu1 %v11663_v8  ;;  %13455 = vmatprep.subr.mxu0 %v11647_v45  ;;  %v11656_v21 = vld [vmem:[#allocation12 + $0x2f0] sm:$0xff]  ;;  %v11655_v10 = vld [vmem:[#allocation12 + $0x2e8] sm:$0xff]  ;;  %v11654_v4 = vld [vmem:[#allocation12 + $0x2e0] sm:$0xff] }
 0x6d1   :  { %v11294_v1 = vcombine.low %v11272_v14, %v11279_v56  ;;  %v11296_v29 = vcombine.low %v11286_v20, %v11293_v57  ;;  %v11295_v16 = vcombine.high %v11272_v14, %v11279_v56  ;;  %v11297_v52 = vcombine.high %v11286_v20, %v11293_v57  ;;  %11782 = vmatprep.subr.mxu1 %v18524_v50  ;;  %v11653_v14 = vld [vmem:[#allocation12 + $0x2d8] sm:$0xff]  ;;  %v11652_v57 = vld [vmem:[#allocation12 + $0x2d0] sm:$0xff]  ;;  %v11650_v23 = vld [vmem:[#allocation12 + $0x2c0] sm:$0xff] }
 0x6d2   :  { %11783 = vmatpush1.msra.mxu1 %v11662_v41  ;;  %13456 = vmatpush3.msra.mxu0 %v11631_v63  ;;  %v11260_v56 = vcombine.high %v17788_v30, %v17791_v46  ;;  %v11640_v8 = vld [vmem:[#allocation12 + $0x270] sm:$0xff]  ;;  %v11352_v17 = vrot.slane %v13436_v43, %v14790_v9 }
 0x6d3   :  { %v17846_v60 = vrot.slane %v11294_v1, %v14790_v9  ;;  %v17849_v36 = vrot.slane %v11296_v29, %v14790_v9  ;;  %v17852_v13 = vrot.slane %v11295_v16, %v14790_v9  ;;  %v17855_v33 = vrot.slane %v11297_v52, %v14790_v9  ;;  %11784 = vmatprep.subr.mxu1 %v18524_v50  ;;  %v11626_v29 = vld [vmem:[#allocation12 + $0x200] sm:$0xff]  ;;  %v11651_v16 = vld [vmem:[#allocation12 + $0x2c8] sm:$0xff]  ;;  %v11641_v52 = vld [vmem:[#allocation12 + $0x278] sm:$0xff] }
 0x6d4   :  { %11785 = vmatpush1.msra.mxu1 %v11661_v12  ;;  %13457 = vmatprep.subr.mxu0 %v11646_v54  ;;  %v13437_v1 = vcombine.low %v17791_v46, %v17834_v38 }
 0x6d5   :  { %v11326_v55 = vcombine.low %v17846_v60, %v17849_v36  ;;  %v11329_v42 = vcombine.high %v17852_v13, %v17855_v33  ;;  %v13439_v24 = vcombine.low %v17846_v60, %v17852_v13  ;;  %11786 = vmatprep.subr.mxu1 %v18524_v50  ;;  %13458 = vmatpush3.msra.mxu0 %v11630_v35 }
 0x6d6   :  { %11787 = vmatpush1.msra.mxu1 %v11660_v5  ;;  %13459 = vmatprep.subr.mxu0 %v11645_v26  ;;  %v11359_v62 = vrot.slane %v13437_v1, %v14790_v9  ;;  %v11327_v40 = vcombine.high %v17846_v60, %v17849_v36  ;;  %v13440_v12 = vcombine.low %v17849_v36, %v17855_v33  ;;  %v11639_v60 = vld [vmem:[#allocation12 + $0x268] sm:$0xff]  ;;  %v11621_v1 = vld [vmem:[#allocation12 + $0x1d8] sm:$0xff] }
 0x6d7   :  { %11336 = vrot.lane.b32.xlu1 %v11326_v55, %s14699_s0  ;;  %11788 = vmatprep.subr.mxu1 %v18524_v50 }
 0x6d8   :  { %13460 = vmatpush3.msra.mxu0 %v11629_v19  ;;  %11789 = vmatpush1.msra.mxu1 %v11659_v58  ;;  %v17922_v33 = vrot.slane %v13440_v12, %v14790_v9 }
 0x6d9   :  { %13461 = vmatprep.subr.mxu0 %v11644_v44  ;;  %11790 = vmatprep.subr.mxu1 %v18524_v50  ;;  %v11419_v44 = vrot.slane %v13439_v24, %v14790_v9  ;;  %v11623_v24 = vld [vmem:[#allocation12 + $0x1e8] sm:$0xff] }
 0x6da   :  { %13462 = vmatpush3.msra.mxu0 %v11628_v22  ;;  %11791 = vmatpush1.msra.mxu1 %v11658_v48 }
 0x6db   :  { %13463 = vmatprep.subr.mxu0 %v11643_v7  ;;  %11792 = vmatprep.subr.mxu1 %v18524_v50 }
 0x6dc   :  { %13464 = vmatpush3.msra.mxu0 %v11627_v59  ;;  %11793 = vmatpush1.msra.mxu1 %v11657_v34  ;;  %v11624_v34 = vld [vmem:[#allocation12 + $0x1f0] sm:$0xff] }
 0x6dd   :  { %13465 = vmatprep.subr.mxu0 %v11642_v53  ;;  %11794 = vmatprep.subr.mxu1 %v18524_v50  ;;  %v11673_v53 = vld [vmem:[#allocation12 + $0x378] sm:$0xff] }
 0x6de   :  { %11795 = vmatpush1.msra.mxu1 %v11656_v21  ;;  %13466 = vmatpush3.msra.mxu0 %v11626_v29  ;;  %v11672_v21 = vld [vmem:[#allocation12 + $0x370] sm:$0xff]  ;;  %v11670_v29 = vld [vmem:[#allocation12 + $0x360] sm:$0xff] }
 0x6df   :  { %11796 = vmatprep.subr.mxu1 %v18524_v50  ;;  %13467 = vmatprep.subr.mxu0 %v11641_v52 }
 0x6e0   :  { %11797 = vmatpush1.msra.mxu1 %v11655_v10  ;;  %13468 = vmatpush3.msra.mxu0 %v11625_v18  ;;  %v11638_v10 = vld [vmem:[#allocation12 + $0x260] sm:$0xff]  ;;  %v11620_v18 = vld [vmem:[#allocation12 + $0x1d0] sm:$0xff] }
 0x6e1   :  { %11798 = vmatprep.subr.mxu1 %v18524_v50  ;;  %13469 = vmatprep.subr.mxu0 %v11640_v8  ;;  %v11635_v8 = vld [vmem:[#allocation12 + $0x248] sm:$0xff] }
 0x6e2   :  { %11799 = vmatpush1.msra.mxu1 %v11654_v4  ;;  %13470 = vmatpush3.msra.mxu0 %v11624_v34  ;;  %v11622_v4 = vld [vmem:[#allocation12 + $0x1e0] sm:$0xff] }
 0x6e3   :  { %11800 = vmatprep.subr.mxu1 %v18524_v50  ;;  %13471 = vmatprep.subr.mxu0 %v11639_v60 }
 0x6e4   :  { %11801 = vmatpush1.msra.mxu1 %v11653_v14  ;;  %13472 = vmatpush3.msra.mxu0 %v11623_v24 }
 0x6e5   :  { %11802 = vmatprep.subr.mxu1 %v18524_v50  ;;  %13473 = vmatprep.subr.mxu0 %v11638_v10 }
 0x6e6   :  { %11803 = vmatpush1.msra.mxu1 %v11652_v57  ;;  %v11671_v57 = vld [vmem:[#allocation12 + $0x368] sm:$0xff]  ;;  %13474 = vmatpush3.msra.mxu0 %v11622_v4  ;;  %v11591_v4 = vld [vmem:[#allocation12 + $0xf0] sm:$0xff] }
 0x6e7   :  { %11804 = vmatprep.subr.mxu1 %v18524_v50 }
 0x6e8   :  { %11805 = vmatpush1.msra.mxu1 %v11651_v16  ;;  %v11636_v16 = vld [vmem:[#allocation12 + $0x250] sm:$0xff] }
 0x6e9   :  { %11806 = vmatprep.subr.mxu1 %v18524_v50 }
 0x6ea   :  { %11807 = vmatpush1.msra.mxu1 %v11650_v23  ;;  %v11669_v23 = vld [vmem:[#allocation12 + $0x358] sm:$0xff] }
 0x6eb   :  { %11824 = vmatprep.subr.mxu1 %v18524_v50 }
 0x6ec   :  { %11825 = vmatpush2.msra.mxu1 %v11673_v53 }
 0x6ed   :  { %11826 = vmatprep.subr.mxu1 %v18524_v50 }
 0x6ee   :  { %11827 = vmatpush2.msra.mxu1 %v11672_v21  ;;  %v11576_v21 = vld [vmem:[#allocation12 + $0x78] sm:$0xff] }
 0x6ef   :  { %11828 = vmatprep.subr.mxu1 %v18524_v50 }
 0x6f0   :  { %11829 = vmatpush2.msra.mxu1 %v11671_v57  ;;  %v11575_v57 = vld [vmem:[#allocation12 + $0x70] sm:$0xff] }
 0x6f1   :  { %11830 = vmatprep.subr.mxu1 %v18524_v50 }
 0x6f2   :  { %11831 = vmatpush2.msra.mxu1 %v11670_v29 }
 0x6f3   :  { %11832 = vmatprep.subr.mxu1 %v18524_v50 }
 0x6f4   :  { %11833 = vmatpush2.msra.mxu1 %v11669_v23  ;;  %v11588_v23 = vld [vmem:[#allocation12 + $0xd8] sm:$0xff] }
 0x6f5   :  { %11834 = vmatprep.subr.mxu1 %v18524_v50 }
 0x73e   :  { %v11335_v20 = vpop.permute.xlu0 %11334 }
 0x73f   :  { %v11338_v55 = vsel %vm5386_vm2, %v11335_v20, %v11262_v31  ;;  %v11637_v20 = vld [vmem:[#allocation12 + $0x258] sm:$0xff] }
 0x740   :  { %v11344_v25 = vcombine.low %v11260_v56, %v11338_v55  ;;  %v13438_v61 = vcombine.high %v17791_v46, %v11338_v55  ;;  %13475 = vmatprep.subr.mxu0 %v11637_v20 }
 0x741   :  { %13476 = vmatpush3.msra.mxu0 %v11621_v1  ;;  %v11574_v1 = vld [vmem:[#allocation12 + $0x68] sm:$0xff] }
 0x742   :  { %v11366_v38 = vrot.slane %v11344_v25, %v14790_v9  ;;  %v17894_v31 = vrot.slane %v13438_v61, %v14790_v9  ;;  %13477 = vmatprep.subr.mxu0 %v11636_v16  ;;  %v11619_v25 = vld [vmem:[#allocation12 + $0x1c8] sm:$0xff]  ;;  %v11607_v16 = vld [vmem:[#allocation12 + $0x170] sm:$0xff] }
 0x743   :  { %13478 = vmatpush3.msra.mxu0 %v11620_v18  ;;  %v11606_v18 = vld [vmem:[#allocation12 + $0x168] sm:$0xff] }
 0x744   :  { %v11375_v46 = vcombine.high %v11352_v17, %v11366_v38  ;;  %v11374_v41 = vcombine.low %v11352_v17, %v11366_v38  ;;  %v11376_v45 = vcombine.low %v11359_v62, %v17894_v31  ;;  %v11377_v63 = vcombine.high %v11359_v62, %v17894_v31  ;;  %v11668_v17 = vld [vmem:[#allocation12 + $0x350] sm:$0xff]  ;;  %13479 = vmatprep.subr.mxu0 %v11635_v8  ;;  %v11634_v31 = vld [vmem:[#allocation12 + $0x240] sm:$0xff] }
 0x745   :  { %13480 = vmatpush3.msra.mxu0 %v11619_v25  ;;  %v11618_v62 = vld [vmem:[#allocation12 + $0x1c0] sm:$0xff]  ;;  %11835 = vmatpush2.msra.mxu1 %v11668_v17  ;;  %v11572_v25 = vld [vmem:[#allocation12 + $0x58] sm:$0xff]  ;;  %v11587_v17 = vld [vmem:[#allocation12 + $0xd0] sm:$0xff] }
 0x746   :  { %v11398_v30 = vrot.slane %v11375_v46, %v14790_v9  ;;  %v11384_v35 = vrot.slane %v11374_v41, %v14790_v9  ;;  %v11391_v56 = vrot.slane %v11376_v45, %v14790_v9  ;;  %v11405_v55 = vrot.slane %v11377_v63, %v14790_v9  ;;  %v11667_v46 = vld [vmem:[#allocation12 + $0x348] sm:$0xff]  ;;  %13481 = vmatprep.subr.mxu0 %v11634_v31  ;;  %v11592_v45 = vld [vmem:[#allocation12 + $0xf8] sm:$0xff]  ;;  %v11666_v63 = vld [vmem:[#allocation12 + $0x340] sm:$0xff] }
 0x747   :  { %11836 = vmatprep.subr.mxu1 %v18524_v50  ;;  %13482 = vmatpush3.msra.mxu0 %v11618_v62  ;;  %v11571_v31 = vld [vmem:[#allocation12 + $0x50] sm:$0xff]  ;;  %v11604_v62 = vld [vmem:[#allocation12 + $0x158] sm:$0xff] }
 0x748   :  { %11478 = vrot.lane.b32.xlu0 %v11398_v30, %s14701_s18  ;;  %v11408_v13 = vcombine.high %v11398_v30, %v11398_v30  ;;  %v11407_v38 = vcombine.high %v11391_v56, %v11391_v56  ;;  %11837 = vmatpush2.msra.mxu1 %v11667_v46 }
 0x749   :  { %v11337_v43 = vpop.permute.xlu1 %11336  ;;  %11838 = vmatprep.subr.mxu1 %v18524_v50  ;;  %13486 = vmatprep.subr.mxu0 %v11592_v45  ;;  %v11570_v45 = vld [vmem:[#allocation12 + $0x48] sm:$0xff] }
 0x74a   :  { %v11339_v54 = vsel %vm5386_vm2, %v11337_v43, %v11329_v42  ;;  %v11406_v42 = vcombine.high %v11384_v35, %v11384_v35  ;;  %11839 = vmatpush2.msra.mxu1 %v11666_v63  ;;  %v11603_v63 = vld [vmem:[#allocation12 + $0x150] sm:$0xff] }
 0x74b   :  { %v11411_v5 = vcombine.low %v11327_v40, %v11339_v54  ;;  %v13441_v26 = vcombine.high %v17849_v36, %v11339_v54  ;;  %11948 = vmatprep.subr.mxu1 %v18524_v50 }
 0x74c   :  { %11476 = vrot.lane.b32.xlu0 %v11384_v35, %s14701_s18 }
 0x74d   :  { %v11433_v19 = vrot.slane %v11411_v5, %v14790_v9  ;;  %v17915_v58 = vrot.slane %v13441_v26, %v14790_v9 }
 0x74f   :  { %v11442_v22 = vcombine.high %v11419_v44, %v11433_v19  ;;  %v11441_v48 = vcombine.low %v11419_v44, %v11433_v19  ;;  %v11443_v36 = vcombine.low %v17922_v33, %v17915_v58  ;;  %v11444_v7 = vcombine.high %v17922_v33, %v17915_v58 }
 0x750   :  { %11480 = vrot.lane.b32.xlu0 %v11406_v42, %s14701_s18 }
 0x751   :  { %v11465_v59 = vrot.slane %v11442_v22, %v14790_v9  ;;  %v11451_v14 = vrot.slane %v11441_v48, %v14790_v9  ;;  %v11458_v41 = vrot.slane %v11443_v36, %v14790_v9  ;;  %v11472_v30 = vrot.slane %v11444_v7, %v14790_v9 }
 0x753   :  { %11492 = vrot.lane.b32.xlu1 %v11465_v59, %s14701_s18  ;;  %v11473_v52 = vcombine.high %v11451_v14, %v11451_v14  ;;  %v11475_v61 = vcombine.high %v11465_v59, %v11465_v59  ;;  %v11474_v40 = vcombine.high %v11458_v41, %v11458_v41 }
 0x754   :  { %11482 = vrot.lane.b32.xlu0 %v11408_v13, %s14701_s18 }
 0x757   :  { %11490 = vrot.lane.b32.xlu1 %v11451_v14, %s14701_s18 }
 0x758   :  { %11484 = vrot.lane.b32.xlu0 %v11391_v56, %s14701_s18  ;;  %v11590_v56 = vld [vmem:[#allocation12 + $0xe8] sm:$0xff] }
 0x75b   :  { %11494 = vrot.lane.b32.xlu1 %v11473_v52, %s14701_s18  ;;  %v11589_v52 = vld [vmem:[#allocation12 + $0xe0] sm:$0xff] }
 0x75c   :  { %11486 = vrot.lane.b32.xlu0 %v11405_v55, %s14701_s18  ;;  %v11573_v55 = vld [vmem:[#allocation12 + $0x60] sm:$0xff] }
 0x75f   :  { %11496 = vrot.lane.b32.xlu1 %v11475_v61, %s14701_s18  ;;  %v11605_v61 = vld [vmem:[#allocation12 + $0x160] sm:$0xff] }
 0x760   :  { %11488 = vrot.lane.b32.xlu0 %v11407_v38, %s14701_s18 }
 0x763   :  { %11498 = vrot.lane.b32.xlu1 %v11458_v41, %s14701_s18  ;;  %v11586_v41 = vld [vmem:[#allocation12 + $0xc8] sm:$0xff] }
 0x767   :  { %11500 = vrot.lane.b32.xlu1 %v11472_v30, %s14701_s18 }
 0x76b   :  { %11502 = vrot.lane.b32.xlu1 %v11474_v40, %s14701_s18  ;;  %v11585_v40 = vld [vmem:[#allocation12 + $0xc0] sm:$0xff] }
 0x7ba   :  { %v11479_v43 = vpop.permute.xlu0 %11478 }
 0x7bb   :  { %v11505_v12 = vrot.slane %v11479_v43, 1 }
 0x7bd   :  { %v11520_v5 = vsel %vm11518_vm8, %v11479_v43, %v11505_v12  ;;  %v11569_v43 = vld [vmem:[#allocation12 + $0x40] sm:$0xff]  ;;  %v11602_v12 = vld [vmem:[#allocation12 + $0x148] sm:$0xff] }
 0x7be   :  { %v11477_v54 = vpop.permute.xlu0 %11476  ;;  %v11548_v58 = vmax.f32 %v17738_v11, %v11520_v5  ;;  %v11568_v5 = vld [vmem:[#allocation12 + $0x38] sm:$0xff] }
 0x7bf   :  { %v11504_v26 = vrot.slane %v11477_v54, 1 }
 0x7c1   :  { %v11519_v22 = vsel %vm11518_vm8, %v11477_v54, %v11504_v26  ;;  %v11601_v26 = vld [vmem:[#allocation12 + $0x140] sm:$0xff] }
 0x7c2   :  { %v11547_v59 = vmax.f32 %v17734_v32, %v11519_v22  ;;  %v11481_v38 = vpop.permute.xlu0 %11480  ;;  %v11582_v22 = vld [vmem:[#allocation12 + $0xa8] sm:$0xff] }
 0x7c3   :  { %v11506_v30 = vrot.slane %v11481_v38, 1 }
 0x7c5   :  { %v11493_v35 = vpop.permute.xlu1 %11492 }
 0x7c6   :  { %v11512_v19 = vrot.slane %v11493_v35, 1 }
 0x7c8   :  { %v11527_v44 = vsel %vm11518_vm8, %v11493_v35, %v11512_v19  ;;  %v11584_v35 = vld [vmem:[#allocation12 + $0xb8] sm:$0xff]  ;;  %v11521_v19 = vsel %vm11518_vm8, %v11481_v38, %v11506_v30 }
 0x7c9   :  { %v11555_v33 = vmax.f32 %v17795_v47, %v11527_v44  ;;  %v11491_v42 = vpop.permute.xlu1 %11490  ;;  %v11583_v44 = vld [vmem:[#allocation12 + $0xb0] sm:$0xff]  ;;  %v11616_v38 = vld [vmem:[#allocation12 + $0x1b8] sm:$0xff] }
 0x7ca   :  { %v11511_v48 = vrot.slane %v11491_v42, 1 }
 0x7cb   :  { %v11676_v36 = vcombine.low %v11548_v58, %v11555_v33  ;;  %v11567_v33 = vld [vmem:[#allocation12 + $0x30] sm:$0xff] }
 0x7cc   :  { %v11526_v7 = vsel %vm11518_vm8, %v11491_v42, %v11511_v48  ;;  %v11600_v42 = vld [vmem:[#allocation12 + $0x138] sm:$0xff]  ;;  %v11549_v48 = vmax.f32 %v17756_v39, %v11521_v19  ;;  %v12044_v19 = vld [vmem:[#allocation12 + $0x448] sm:$0xff] }
 0x7cd   :  { %v11683_v34 = vrot.slane %v11676_v36, %v14790_v9  ;;  %v11554_v53 = vmax.f32 %v17813_v37, %v11526_v7  ;;  %v11608_v37 = vld [vmem:[#allocation12 + $0x178] sm:$0xff]  ;;  %v11495_v8 = vpop.permute.xlu1 %11494  ;;  %v11566_v36 = vld [vmem:[#allocation12 + $0x28] sm:$0xff]  ;;  %v11599_v7 = vld [vmem:[#allocation12 + $0x130] sm:$0xff] }
 0x7ce   :  { %v11513_v46 = vrot.slane %v11495_v8, 1  ;;  %v11564_v39 = vld [vmem:[#allocation12 + $0x18] sm:$0xff] }
 0x7cf   :  { %v11848_v60 = vcombine.low %v11547_v59, %v11554_v53  ;;  %v11684_v13 = vcombine.high %v11683_v34, %v11683_v34  ;;  %v11691_v24 = vrot.slane %v11683_v34, %v14790_v9  ;;  %v11581_v59 = vld [vmem:[#allocation12 + $0xa0] sm:$0xff]  ;;  %v11598_v53 = vld [vmem:[#allocation12 + $0x128] sm:$0xff] }
 0x7d0   :  { %v11528_v54 = vsel %vm11518_vm8, %v11495_v8, %v11513_v46  ;;  %v12034_v8 = vld [vmem:[#allocation12 + $0x3f8] sm:$0xff] }
 0x7d1   :  { %v17968_v11 = vrot.slane %v11848_v60, %v14790_v9  ;;  %v11698_v47 = vrot.slane %v11684_v13, %v14790_v9  ;;  %v11699_v14 = vcombine.high %v11691_v24, %v11691_v24  ;;  %v11556_v58 = vmax.f32 %v17799_v49, %v11528_v54  ;;  %v11565_v49 = vld [vmem:[#allocation12 + $0x20] sm:$0xff]  ;;  %v11580_v60 = vld [vmem:[#allocation12 + $0x98] sm:$0xff] }
 0x7d2   :  { %v11597_v13 = vld [vmem:[#allocation12 + $0x120] sm:$0xff] }
 0x7d3   :  { %v11700_v10 = vcombine.high %v11698_v47, %v11698_v47  ;;  %11770 = vmatprep.mubr.f32.mxu0 %v11698_v47  ;;  %v11856_v32 = vcombine.high %v17968_v11, %v17968_v11  ;;  %v12077_v34 = vcombine.low %v11549_v48, %v11556_v58  ;;  %v11611_v58 = vld [vmem:[#allocation12 + $0x190] sm:$0xff]  ;;  %v12027_v48 = vld [vmem:[#allocation12 + $0x3c0] sm:$0xff] }
 0x7d4   :  { %11771 = vmatmul.mubr.f32.vlgmr.msra.gmra.mxu0 %v11691_v24  ;;  %v11579_v24 = vld [vmem:[#allocation12 + $0x90] sm:$0xff] }
 0x7d5   :  { %13487 = vmatpush3.msra.mxu0 %v11576_v21  ;;  %13442 = vmatprep.mubr.msk.f32.mxu1 %vm6885_vm6, %v11700_v10  ;;  %v11870_v20 = vrot.slane %v11856_v32, %v14790_v9  ;;  %v17991_v47 = vrot.slane %v12077_v34, %v14790_v9  ;;  %v11563_v21 = vld [vmem:[#allocation12 + $0x10] sm:$0xff]  ;;  %v11596_v10 = vld [vmem:[#allocation12 + $0x118] sm:$0xff]  ;;  %v11578_v32 = vld [vmem:[#allocation12 + $0x88] sm:$0xff] }
 0x7d6   :  { %13488 = vmatprep.subr.mxu0 %v11591_v4  ;;  %11841 = vmatmul.mubr.f32.vlgmr.msra.gmra.mxu1 %v11699_v14  ;;  %v11497_v4 = vpop.permute.xlu1 %11496  ;;  %v11562_v14 = vld [vmem:[#allocation12 + $0x8] sm:$0xff] }
 0x7d7   :  { %13489 = vmatpush3.msra.mxu0 %v11575_v57  ;;  %11949 = vmatpush1.msra.mxu1 %v11608_v37  ;;  %v11872_v29 = vcombine.high %v11870_v20, %v11870_v20  ;;  %v11595_v57 = vld [vmem:[#allocation12 + $0x110] sm:$0xff]  ;;  %v11483_v37 = vpop.permute.xlu0 %11482 }
 0x7d8   :  { %13490 = vmatprep.subr.mxu0 %v11590_v56  ;;  %11942 = vmatprep.mubr.f32.mxu0 %v11870_v20  ;;  %v11577_v56 = vld [vmem:[#allocation12 + $0x80] sm:$0xff]  ;;  %v11514_v20 = vrot.slane %v11497_v4, 1 }
 0x7d9   :  { %11950 = vmatprep.subr.mxu1 %v18524_v50  ;;  %13491 = vmatpush3.msra.mxu0 %v11574_v1  ;;  %v11561_v1 = vld [vmem:[#allocation12] sm:$0xff] }
 0x7da   :  { %11951 = vmatpush1.msra.mxu1 %v11607_v16  ;;  %13492 = vmatprep.subr.mxu0 %v11589_v52  ;;  %v12085_v16 = vcombine.high %v17991_v47, %v17991_v47  ;;  %v11507_v52 = vrot.slane %v11483_v37, 1 }
 0x7db   :  { %11952 = vmatprep.subr.mxu1 %v18524_v50  ;;  %13443 = vmatprep.mubr.msk.f32.mxu1 %vm6885_vm6, %v11872_v29  ;;  %v11594_v29 = vld [vmem:[#allocation12 + $0x108] sm:$0xff] }
 0x7dc   :  { %13493 = vmatpush3.msra.mxu0 %v11573_v55  ;;  %11953 = vmatpush1.msra.mxu1 %v11606_v18  ;;  %v18001_v55 = vrot.slane %v17968_v11, %v14790_v9  ;;  %v12050_v18 = vld [vmem:[#allocation12 + $0x478] sm:$0xff]  ;;  %v12033_v11 = vld [vmem:[#allocation12 + $0x3f0] sm:$0xff] }
 0x7dd   :  { %13494 = vmatprep.subr.mxu0 %v11588_v23  ;;  %11954 = vmatprep.subr.mxu1 %v18524_v50  ;;  %v11593_v23 = vld [vmem:[#allocation12 + $0x100] sm:$0xff] }
 0x7de   :  { %13495 = vmatpush3.msra.mxu0 %v11572_v25  ;;  %11955 = vmatpush1.msra.mxu1 %v11605_v61  ;;  %v11529_v25 = vsel %vm11518_vm8, %v11497_v4, %v11514_v20  ;;  %v18007_v61 = vrot.slane %v12085_v16, %v14790_v9  ;;  %v12024_v4 = vld [vmem:[#allocation12 + $0x3a8] sm:$0xff]  ;;  %v12038_v20 = vld [vmem:[#allocation12 + $0x418] sm:$0xff]  ;;  %v12261_v16 = vld [vmem:[#allocation12 + $0x5a0] sm:$0xff] }
 0x7df   :  { %13496 = vmatprep.subr.mxu0 %v11587_v17  ;;  %11956 = vmatprep.subr.mxu1 %v18524_v50  ;;  %v12049_v17 = vld [vmem:[#allocation12 + $0x470] sm:$0xff]  ;;  %v11557_v46 = vmax.f32 %v17821_v0, %v11529_v25  ;;  %v11613_v0 = vld [vmem:[#allocation12 + $0x1a0] sm:$0xff] }
 0x7e0   :  { %13497 = vmatpush3.msra.mxu0 %v11571_v31  ;;  %11957 = vmatpush1.msra.mxu1 %v11604_v62  ;;  %v11522_v31 = vsel %vm11518_vm8, %v11483_v37, %v11507_v52  ;;  %v12048_v62 = vld [vmem:[#allocation12 + $0x468] sm:$0xff]  ;;  %v12023_v37 = vld [vmem:[#allocation12 + $0x3a0] sm:$0xff]  ;;  %v12037_v52 = vld [vmem:[#allocation12 + $0x410] sm:$0xff] }
 0x7e1   :  { %13498 = vmatprep.subr.mxu0 %v11586_v41  ;;  %11958 = vmatprep.subr.mxu1 %v18524_v50  ;;  %v11615_v41 = vld [vmem:[#allocation12 + $0x1b0] sm:$0xff]  ;;  %v11550_v30 = vmax.f32 %v17760_v2, %v11522_v31  ;;  %v11612_v2 = vld [vmem:[#allocation12 + $0x198] sm:$0xff]  ;;  %v12274_v31 = vld [vmem:[#allocation12 + $0x608] sm:$0xff] }
 0x7e2   :  { %13499 = vmatpush3.msra.mxu0 %v11570_v45  ;;  %11959 = vmatpush1.msra.mxu1 %v11603_v63  ;;  %v12032_v45 = vld [vmem:[#allocation12 + $0x3e8] sm:$0xff]  ;;  %v12047_v63 = vld [vmem:[#allocation12 + $0x460] sm:$0xff]  ;;  %v12275_v25 = vld [vmem:[#allocation12 + $0x610] sm:$0xff] }
 0x7e3   :  { %13500 = vmatprep.subr.mxu0 %v11585_v40  ;;  %11960 = vmatprep.subr.mxu1 %v18524_v50  ;;  %v11614_v40 = vld [vmem:[#allocation12 + $0x1a8] sm:$0xff]  ;;  %v12307_v54 = vcombine.low %v11550_v30, %v11557_v46  ;;  %v12257_v30 = vld [vmem:[#allocation12 + $0x580] sm:$0xff] }
 0x7e4   :  { %13501 = vmatpush3.msra.mxu0 %v11569_v43  ;;  %11961 = vmatpush1.msra.mxu1 %v11602_v12  ;;  %v12031_v43 = vld [vmem:[#allocation12 + $0x3e0] sm:$0xff]  ;;  %v12046_v12 = vld [vmem:[#allocation12 + $0x458] sm:$0xff]  ;;  %v12258_v46 = vld [vmem:[#allocation12 + $0x588] sm:$0xff] }
 0x7e5   :  { %13502 = vmatprep.subr.mxu0 %v11584_v35  ;;  %11962 = vmatprep.subr.mxu1 %v18524_v50  ;;  %v12030_v35 = vld [vmem:[#allocation12 + $0x3d8] sm:$0xff] }
 0x7e6   :  { %13503 = vmatpush3.msra.mxu0 %v11568_v5  ;;  %11963 = vmatpush1.msra.mxu1 %v11601_v26  ;;  %v12045_v5 = vld [vmem:[#allocation12 + $0x450] sm:$0xff] }
 0x7e7   :  { %13504 = vmatprep.subr.mxu0 %v11583_v44  ;;  %11964 = vmatprep.subr.mxu1 %v18524_v50  ;;  %v12029_v26 = vld [vmem:[#allocation12 + $0x3d0] sm:$0xff]  ;;  %v18018_v44 = vrot.slane %v12307_v54, %v14790_v9  ;;  %v12256_v54 = vld [vmem:[#allocation12 + $0x578] sm:$0xff] }
 0x7e8   :  { %13505 = vmatpush3.msra.mxu0 %v11567_v33  ;;  %11965 = vmatpush1.msra.mxu1 %v11600_v42  ;;  %v12028_v33 = vld [vmem:[#allocation12 + $0x3c8] sm:$0xff]  ;;  %v12043_v42 = vld [vmem:[#allocation12 + $0x440] sm:$0xff] }
 0x7e9   :  { %13506 = vmatprep.subr.mxu0 %v11582_v22  ;;  %11966 = vmatprep.subr.mxu1 %v18524_v50  ;;  %v11610_v22 = vld [vmem:[#allocation12 + $0x188] sm:$0xff]  ;;  %v12315_v34 = vcombine.high %v18018_v44, %v18018_v44 }
 0x7ea   :  { %13507 = vmatpush3.msra.mxu0 %v11566_v36  ;;  %11967 = vmatpush1.msra.mxu1 %v11599_v7  ;;  %v12042_v36 = vld [vmem:[#allocation12 + $0x438] sm:$0xff]  ;;  %v11609_v7 = vld [vmem:[#allocation12 + $0x180] sm:$0xff] }
 0x7eb   :  { %13508 = vmatprep.subr.mxu0 %v11581_v59  ;;  %11968 = vmatprep.subr.mxu1 %v18524_v50  ;;  %v12026_v59 = vld [vmem:[#allocation12 + $0x3b8] sm:$0xff] }
 0x7ec   :  { %13509 = vmatpush3.msra.mxu0 %v11565_v49  ;;  %11969 = vmatpush1.msra.mxu1 %v11598_v53  ;;  %v12041_v49 = vld [vmem:[#allocation12 + $0x430] sm:$0xff]  ;;  %v11871_v53 = vcombine.high %v18001_v55, %v18001_v55 }
 0x7ed   :  { %13510 = vmatprep.subr.mxu0 %v11580_v60  ;;  %11970 = vmatprep.subr.mxu1 %v18524_v50  ;;  %v12280_v60 = vld [vmem:[#allocation12 + $0x638] sm:$0xff] }
 0x7ee   :  { %13511 = vmatpush3.msra.mxu0 %v11564_v39  ;;  %11971 = vmatpush1.msra.mxu1 %v11597_v13  ;;  %v12025_v39 = vld [vmem:[#allocation12 + $0x3b0] sm:$0xff]  ;;  %v12264_v13 = vld [vmem:[#allocation12 + $0x5b8] sm:$0xff] }
 0x7ef   :  { %13512 = vmatprep.subr.mxu0 %v11579_v24  ;;  %11972 = vmatprep.subr.mxu1 %v18524_v50  ;;  %v18029_v24 = vrot.slane %v12315_v34, %v14790_v9  ;;  %v12059_v34 = vld [vmem:[#allocation12 + $0x4c0] sm:$0xff] }
 0x7f0   :  { %13513 = vmatpush3.msra.mxu0 %v11563_v21  ;;  %11973 = vmatpush1.msra.mxu1 %v11596_v10  ;;  %v12040_v21 = vld [vmem:[#allocation12 + $0x428] sm:$0xff]  ;;  %v12279_v10 = vld [vmem:[#allocation12 + $0x630] sm:$0xff] }
 0x7f1   :  { %13514 = vmatprep.subr.mxu0 %v11578_v32  ;;  %11974 = vmatprep.subr.mxu1 %v18524_v50  ;;  %v12263_v32 = vld [vmem:[#allocation12 + $0x5b0] sm:$0xff] }
 0x7f2   :  { %13515 = vmatpush3.msra.mxu0 %v11562_v14  ;;  %11975 = vmatpush1.msra.mxu1 %v11595_v57  ;;  %v12039_v14 = vld [vmem:[#allocation12 + $0x420] sm:$0xff]  ;;  %v12278_v57 = vld [vmem:[#allocation12 + $0x628] sm:$0xff] }
 0x7f3   :  { %13516 = vmatprep.subr.mxu0 %v11577_v56  ;;  %11976 = vmatprep.subr.mxu1 %v18524_v50  ;;  %v12262_v56 = vld [vmem:[#allocation12 + $0x5a8] sm:$0xff] }
 0x7f4   :  { %13517 = vmatpush3.msra.mxu0 %v11561_v1  ;;  %11977 = vmatpush1.msra.mxu1 %v11594_v29  ;;  %v12277_v1 = vld [vmem:[#allocation12 + $0x620] sm:$0xff]  ;;  %v12022_v29 = vld [vmem:[#allocation12 + $0x398] sm:$0xff] }
 0x7f5   :  { %11943 = vmatmul.mubr.f32.vlgmr.msra.gmra.mxu0 %v18001_v55  ;;  %11978 = vmatprep.subr.mxu1 %v18524_v50  ;;  %v12276_v55 = vld [vmem:[#allocation12 + $0x618] sm:$0xff] }
 0x7f6   :  { %13521 = vmatprep.subr.mxu0 %v12050_v18  ;;  %11979 = vmatpush1.msra.mxu1 %v11593_v23  ;;  %v12021_v18 = vld [vmem:[#allocation12 + $0x390] sm:$0xff]  ;;  %v12260_v23 = vld [vmem:[#allocation12 + $0x598] sm:$0xff] }
 0x7f7   :  { %13522 = vmatpush3.msra.mxu0 %v12034_v8  ;;  %12171 = vmatprep.mubr.f32.mxu0 %v18007_v61  ;;  %v12036_v8 = vld [vmem:[#allocation12 + $0x408] sm:$0xff] }
 0x7f8   :  { %11996 = vmatprep.subr.mxu1 %v18524_v50  ;;  %13523 = vmatprep.subr.mxu0 %v12049_v17  ;;  %v12020_v17 = vld [vmem:[#allocation12 + $0x388] sm:$0xff] }
 0x7f9   :  { %11997 = vmatpush2.msra.mxu1 %v11616_v38  ;;  %13524 = vmatpush3.msra.mxu0 %v12033_v11  ;;  %v12259_v38 = vld [vmem:[#allocation12 + $0x590] sm:$0xff]  ;;  %v12035_v11 = vld [vmem:[#allocation12 + $0x400] sm:$0xff] }
 0x7fa   :  { %11998 = vmatprep.subr.mxu1 %v18524_v50  ;;  %13525 = vmatprep.subr.mxu0 %v12048_v62  ;;  %v12019_v62 = vld [vmem:[#allocation12 + $0x380] sm:$0xff] }
 0x7fb   :  { %11999 = vmatpush2.msra.mxu1 %v11615_v41  ;;  %13526 = vmatpush3.msra.mxu0 %v12032_v45  ;;  %v18034_v41 = vrot.slane %v17991_v47, %v14790_v9  ;;  %v12273_v45 = vld [vmem:[#allocation12 + $0x600] sm:$0xff]  ;;  %v12271_v47 = vld [vmem:[#allocation12 + $0x5f0] sm:$0xff] }
 0x7fc   :  { %12000 = vmatprep.subr.mxu1 %v18524_v50  ;;  %13527 = vmatprep.subr.mxu0 %v12047_v63  ;;  %v12066_v63 = vld [vmem:[#allocation12 + $0x4f8] sm:$0xff] }
 0x7fd   :  { %12001 = vmatpush2.msra.mxu1 %v11614_v40  ;;  %13528 = vmatpush3.msra.mxu0 %v12031_v43  ;;  %v12101_v40 = vcombine.high %v18007_v61, %v18007_v61  ;;  %v12272_v43 = vld [vmem:[#allocation12 + $0x5f8] sm:$0xff]  ;;  %v12270_v61 = vld [vmem:[#allocation12 + $0x5e8] sm:$0xff] }
 0x7fe   :  { %12002 = vmatprep.subr.mxu1 %v18524_v50  ;;  %13529 = vmatprep.subr.mxu0 %v12046_v12  ;;  %v12065_v12 = vld [vmem:[#allocation12 + $0x4f0] sm:$0xff] }
 0x7ff   :  { %12003 = vmatpush2.msra.mxu1 %v11613_v0  ;;  %13530 = vmatpush3.msra.mxu0 %v12030_v35  ;;  %v12064_v0 = vld [vmem:[#allocation12 + $0x4e8] sm:$0xff]  ;;  %v12255_v35 = vld [vmem:[#allocation12 + $0x570] sm:$0xff] }
 0x800   :  { %12004 = vmatprep.subr.mxu1 %v18524_v50  ;;  %13531 = vmatprep.subr.mxu0 %v12045_v5  ;;  %v12063_v5 = vld [vmem:[#allocation12 + $0x4e0] sm:$0xff] }
 0x801   :  { %12005 = vmatpush2.msra.mxu1 %v11612_v2  ;;  %13532 = vmatpush3.msra.mxu0 %v12029_v26  ;;  %v12254_v2 = vld [vmem:[#allocation12 + $0x568] sm:$0xff]  ;;  %v12269_v26 = vld [vmem:[#allocation12 + $0x5e0] sm:$0xff] }
 0x802   :  { %12006 = vmatprep.subr.mxu1 %v18524_v50  ;;  %13533 = vmatprep.subr.mxu0 %v12044_v19  ;;  %v12062_v19 = vld [vmem:[#allocation12 + $0x4d8] sm:$0xff] }
 0x803   :  { %12007 = vmatpush2.msra.mxu1 %v11611_v58  ;;  %13534 = vmatpush3.msra.mxu0 %v12028_v33  ;;  %v12253_v58 = vld [vmem:[#allocation12 + $0x560] sm:$0xff]  ;;  %v12268_v33 = vld [vmem:[#allocation12 + $0x5d8] sm:$0xff] }
 0x804   :  { %12008 = vmatprep.subr.mxu1 %v18524_v50  ;;  %13535 = vmatprep.subr.mxu0 %v12043_v42  ;;  %v12061_v42 = vld [vmem:[#allocation12 + $0x4d0] sm:$0xff] }
 0x805   :  { %12009 = vmatpush2.msra.mxu1 %v11610_v22  ;;  %13536 = vmatpush3.msra.mxu0 %v12027_v48  ;;  %v12252_v22 = vld [vmem:[#allocation12 + $0x558] sm:$0xff]  ;;  %v12267_v48 = vld [vmem:[#allocation12 + $0x5d0] sm:$0xff] }
 0x806   :  { %12010 = vmatprep.subr.mxu1 %v18524_v50  ;;  %13537 = vmatprep.subr.mxu0 %v12042_v36  ;;  %v12060_v36 = vld [vmem:[#allocation12 + $0x4c8] sm:$0xff] }
 0x807   :  { %12011 = vmatpush2.msra.mxu1 %v11609_v7  ;;  %13538 = vmatpush3.msra.mxu0 %v12026_v59  ;;  %v12251_v7 = vld [vmem:[#allocation12 + $0x550] sm:$0xff]  ;;  %v12266_v59 = vld [vmem:[#allocation12 + $0x5c8] sm:$0xff] }
 0x808   :  { %12013 = vmatmul.mubr.f32.vlgmr.msra.gmra.mxu1 %v11871_v53  ;;  %13539 = vmatprep.subr.mxu0 %v12041_v49  ;;  %v12250_v49 = vld [vmem:[#allocation12 + $0x548] sm:$0xff]  ;;  %v12265_v53 = vld [vmem:[#allocation12 + $0x5c0] sm:$0xff] }
 0x809   :  { %13556 = vmatprep.subr.mxu1 %v12280_v60  ;;  %13540 = vmatpush3.msra.mxu0 %v12025_v39  ;;  %v12058_v60 = vld [vmem:[#allocation12 + $0x4b8] sm:$0xff]  ;;  %v12249_v39 = vld [vmem:[#allocation12 + $0x540] sm:$0xff] }
 0x80a   :  { %13557 = vmatpush3.msra.mxu1 %v12264_v13  ;;  %12401 = vmatprep.mubr.f32.mxu1 %v18029_v24  ;;  %v18051_v13 = vrot.slane %v18018_v44, %v14790_v9  ;;  %v12055_v44 = vld [vmem:[#allocation12 + $0x4a0] sm:$0xff] }
 0x80b   :  { %13541 = vmatprep.subr.mxu0 %v12040_v21  ;;  %13558 = vmatprep.subr.mxu1 %v12279_v10  ;;  %v12057_v21 = vld [vmem:[#allocation12 + $0x4b0] sm:$0xff]  ;;  %v12296_v10 = vld [vmem:[#allocation12 + $0x6b8] sm:$0xff] }
 0x80c   :  { %13542 = vmatpush3.msra.mxu0 %v12024_v4  ;;  %13559 = vmatpush3.msra.mxu1 %v12263_v32  ;;  %v12331_v4 = vcombine.high %v18029_v24, %v18029_v24  ;;  %v12056_v32 = vld [vmem:[#allocation12 + $0x4a8] sm:$0xff]  ;;  %v11499_v24 = vpop.permute.xlu1 %11498 }
 0x80d   :  { %13543 = vmatprep.subr.mxu0 %v12039_v14  ;;  %13560 = vmatprep.subr.mxu1 %v12278_v57  ;;  %v12295_v14 = vld [vmem:[#allocation12 + $0x6b0] sm:$0xff]  ;;  %v12294_v57 = vld [vmem:[#allocation12 + $0x6a8] sm:$0xff] }
 0x80e   :  { %13544 = vmatpush3.msra.mxu0 %v12023_v37  ;;  %13561 = vmatpush3.msra.mxu1 %v12262_v56  ;;  %v12054_v37 = vld [vmem:[#allocation12 + $0x498] sm:$0xff]  ;;  %v12293_v56 = vld [vmem:[#allocation12 + $0x6a0] sm:$0xff] }
 0x80f   :  { %13545 = vmatprep.subr.mxu0 %v12038_v20  ;;  %13562 = vmatprep.subr.mxu1 %v12277_v1  ;;  %v11485_v20 = vpop.permute.xlu0 %11484  ;;  %v12053_v1 = vld [vmem:[#allocation12 + $0x490] sm:$0xff] }
 0x810   :  { %13546 = vmatpush3.msra.mxu0 %v12022_v29  ;;  %13563 = vmatpush3.msra.mxu1 %v12261_v16  ;;  %v12292_v29 = vld [vmem:[#allocation12 + $0x698] sm:$0xff]  ;;  %v11515_v16 = vrot.slane %v11499_v24, 1 }
 0x811   :  { %13547 = vmatprep.subr.mxu0 %v12037_v52  ;;  %13564 = vmatprep.subr.mxu1 %v12276_v55  ;;  %v12052_v52 = vld [vmem:[#allocation12 + $0x488] sm:$0xff]  ;;  %v12291_v55 = vld [vmem:[#allocation12 + $0x690] sm:$0xff] }
 0x812   :  { %13548 = vmatpush3.msra.mxu0 %v12021_v18  ;;  %13565 = vmatpush3.msra.mxu1 %v12260_v23  ;;  %v11508_v18 = vrot.slane %v11485_v20, 1  ;;  %v12051_v23 = vld [vmem:[#allocation12 + $0x480] sm:$0xff] }
 0x813   :  { %13549 = vmatprep.subr.mxu0 %v12036_v8  ;;  %13566 = vmatprep.subr.mxu1 %v12275_v25  ;;  %v12290_v8 = vld [vmem:[#allocation12 + $0x688] sm:$0xff]  ;;  %v11530_v25 = vsel %vm11518_vm8, %v11499_v24, %v11515_v16  ;;  %v12506_v24 = vld [vmem:[#allocation12 + $0x7d8] sm:$0xff] }
 0x814   :  { %13550 = vmatpush3.msra.mxu0 %v12020_v17  ;;  %13567 = vmatpush3.msra.mxu1 %v12259_v38  ;;  %v12074_v17 = vld [vmem:[#allocation12 + $0x538] sm:$0xff]  ;;  %v12289_v38 = vld [vmem:[#allocation12 + $0x680] sm:$0xff] }
 0x815   :  { %13551 = vmatprep.subr.mxu0 %v12035_v11  ;;  %13568 = vmatprep.subr.mxu1 %v12274_v31  ;;  %v11523_v11 = vsel %vm11518_vm8, %v11485_v20, %v11508_v18  ;;  %v11558_v31 = vmax.f32 %v17817_v27, %v11530_v25  ;;  %v12071_v27 = vld [vmem:[#allocation12 + $0x520] sm:$0xff]  ;;  %v12505_v20 = vld [vmem:[#allocation12 + $0x7d0] sm:$0xff]  ;;  %v12502_v25 = vld [vmem:[#allocation12 + $0x7b8] sm:$0xff] }
 0x816   :  { %13552 = vmatpush3.msra.mxu0 %v12019_v62  ;;  %13569 = vmatpush3.msra.mxu1 %v12258_v46  ;;  %v12073_v62 = vld [vmem:[#allocation12 + $0x530] sm:$0xff]  ;;  %v12288_v46 = vld [vmem:[#allocation12 + $0x678] sm:$0xff]  ;;  %v12503_v18 = vld [vmem:[#allocation12 + $0x7c0] sm:$0xff] }
 0x817   :  { %12172 = vmatmul.mubr.f32.vlgmr.msra.gmra.mxu0 %v18034_v41  ;;  %12177 = vmatprep.subr.mxu0 %v18524_v50 }
 0x818   :  { %13570 = vmatprep.subr.mxu1 %v12273_v45  ;;  %12178 = vmatpush1.msra.mxu0 %v12066_v63  ;;  %v11551_v45 = vmax.f32 %v17742_v6, %v11523_v11  ;;  %v12072_v63 = vld [vmem:[#allocation12 + $0x528] sm:$0xff]  ;;  %v12070_v6 = vld [vmem:[#allocation12 + $0x518] sm:$0xff] }
 0x819   :  { %13444 = vmatprep.mubr.msk.f32.mxu0 %vm6885_vm6, %v12101_v40  ;;  %13571 = vmatpush3.msra.mxu1 %v12257_v30  ;;  %v12287_v30 = vld [vmem:[#allocation12 + $0x670] sm:$0xff] }
 0x81a   :  { %12179 = vmatprep.subr.mxu0 %v18524_v50  ;;  %13572 = vmatprep.subr.mxu1 %v12272_v43  ;;  %v12537_v40 = vcombine.low %v11551_v45, %v11558_v31  ;;  %v12286_v43 = vld [vmem:[#allocation12 + $0x668] sm:$0xff]  ;;  %v12501_v31 = vld [vmem:[#allocation12 + $0x7b0] sm:$0xff] }
 0x81b   :  { %12180 = vmatpush1.msra.mxu0 %v12065_v12  ;;  %13573 = vmatpush3.msra.mxu1 %v12256_v54  ;;  %v12285_v12 = vld [vmem:[#allocation12 + $0x660] sm:$0xff]  ;;  %v12485_v45 = vld [vmem:[#allocation12 + $0x730] sm:$0xff] }
 0x81c   :  { %12181 = vmatprep.subr.mxu0 %v18524_v50  ;;  %13574 = vmatprep.subr.mxu1 %v12271_v47  ;;  %v18084_v54 = vrot.slane %v12537_v40, %v14790_v9  ;;  %v12069_v47 = vld [vmem:[#allocation12 + $0x510] sm:$0xff]  ;;  %v12500_v40 = vld [vmem:[#allocation12 + $0x7a8] sm:$0xff] }
 0x81d   :  { %12182 = vmatpush1.msra.mxu0 %v12064_v0  ;;  %13575 = vmatpush3.msra.mxu1 %v12255_v35  ;;  %v12284_v0 = vld [vmem:[#allocation12 + $0x658] sm:$0xff]  ;;  %v11501_v35 = vpop.permute.xlu1 %11500 }
 0x81e   :  { %12183 = vmatprep.subr.mxu0 %v18524_v50  ;;  %13576 = vmatprep.subr.mxu1 %v12270_v61  ;;  %v12068_v61 = vld [vmem:[#allocation12 + $0x508] sm:$0xff] }
 0x81f   :  { %12184 = vmatpush1.msra.mxu0 %v12063_v5  ;;  %13577 = vmatpush3.msra.mxu1 %v12254_v2  ;;  %v12283_v5 = vld [vmem:[#allocation12 + $0x650] sm:$0xff]  ;;  %v11487_v2 = vpop.permute.xlu0 %11486 }
 0x820   :  { %12185 = vmatprep.subr.mxu0 %v18524_v50  ;;  %13578 = vmatprep.subr.mxu1 %v12269_v26  ;;  %v11516_v26 = vrot.slane %v11501_v35, 1 }
 0x821   :  { %12186 = vmatpush1.msra.mxu0 %v12062_v19  ;;  %13579 = vmatpush3.msra.mxu1 %v12253_v58  ;;  %v12067_v19 = vld [vmem:[#allocation12 + $0x500] sm:$0xff]  ;;  %v12282_v58 = vld [vmem:[#allocation12 + $0x648] sm:$0xff] }
 0x822   :  { %12187 = vmatprep.subr.mxu0 %v18524_v50  ;;  %13580 = vmatprep.subr.mxu1 %v12268_v33  ;;  %v12545_v33 = vcombine.high %v18084_v54, %v18084_v54 }
 0x823   :  { %12188 = vmatpush1.msra.mxu0 %v12061_v42  ;;  %13581 = vmatpush3.msra.mxu1 %v12252_v22  ;;  %v11509_v42 = vrot.slane %v11487_v2, 1  ;;  %v12100_v22 = vcombine.high %v18034_v41, %v18034_v41 }
 0x824   :  { %12189 = vmatprep.subr.mxu0 %v18524_v50  ;;  %13582 = vmatprep.subr.mxu1 %v12267_v48  ;;  %v12510_v48 = vld [vmem:[#allocation12 + $0x7f8] sm:$0xff] }
 0x825   :  { %12190 = vmatpush1.msra.mxu0 %v12060_v36  ;;  %13583 = vmatpush3.msra.mxu1 %v12251_v7  ;;  %v12281_v36 = vld [vmem:[#allocation12 + $0x640] sm:$0xff]  ;;  %v12494_v7 = vld [vmem:[#allocation12 + $0x778] sm:$0xff]  ;;  %v11524_v41 = vsel %vm11518_vm8, %v11487_v2, %v11509_v42  ;;  %v12496_v42 = vld [vmem:[#allocation12 + $0x788] sm:$0xff] }
 0x826   :  { %12191 = vmatprep.subr.mxu0 %v18524_v50  ;;  %13584 = vmatprep.subr.mxu1 %v12266_v59  ;;  %v11531_v59 = vsel %vm11518_vm8, %v11501_v35, %v11516_v26  ;;  %v12498_v35 = vld [vmem:[#allocation12 + $0x798] sm:$0xff]  ;;  %v12721_v2 = vld [vmem:[#allocation12 + $0x920] sm:$0xff]  ;;  %v12497_v26 = vld [vmem:[#allocation12 + $0x790] sm:$0xff] }
 0x827   :  { %12192 = vmatpush1.msra.mxu0 %v12059_v34  ;;  %13585 = vmatpush3.msra.mxu1 %v12250_v49  ;;  %v18101_v34 = vrot.slane %v12545_v33, %v14790_v9  ;;  %v12509_v49 = vld [vmem:[#allocation12 + $0x7f0] sm:$0xff]  ;;  %v12720_v33 = vld [vmem:[#allocation12 + $0x918] sm:$0xff] }
 0x828   :  { %12193 = vmatprep.subr.mxu0 %v18524_v50  ;;  %13586 = vmatprep.subr.mxu1 %v12265_v53  ;;  %v12304_v53 = vld [vmem:[#allocation12 + $0x6f8] sm:$0xff] }
 0x829   :  { %12194 = vmatpush1.msra.mxu0 %v12058_v60  ;;  %13587 = vmatpush3.msra.mxu1 %v12249_v39  ;;  %v12493_v60 = vld [vmem:[#allocation12 + $0x770] sm:$0xff]  ;;  %v12508_v39 = vld [vmem:[#allocation12 + $0x7e8] sm:$0xff] }
 0x82a   :  { %12195 = vmatprep.subr.mxu0 %v18524_v50  ;;  %12402 = vmatmul.mubr.f32.vlgmr.msra.gmra.mxu1 %v18051_v13 }
 0x82b   :  { %12407 = vmatprep.subr.mxu1 %v18524_v50  ;;  %12196 = vmatpush1.msra.mxu0 %v12057_v21  ;;  %v11559_v21 = vmax.f32 %v17803_v3, %v11531_v59  ;;  %v12301_v3 = vld [vmem:[#allocation12 + $0x6e0] sm:$0xff]  ;;  %v12734_v59 = vld [vmem:[#allocation12 + $0x988] sm:$0xff] }
 0x82c   :  { %12408 = vmatpush1.msra.mxu1 %v12296_v10  ;;  %13445 = vmatprep.mubr.msk.f32.mxu1 %vm6885_vm6, %v12331_v4  ;;  %v12303_v10 = vld [vmem:[#allocation12 + $0x6f0] sm:$0xff]  ;;  %v12492_v4 = vld [vmem:[#allocation12 + $0x768] sm:$0xff] }
 0x82d   :  { %12197 = vmatprep.subr.mxu0 %v18524_v50  ;;  %12409 = vmatprep.subr.mxu1 %v18524_v50 }
 0x82e   :  { %12198 = vmatpush1.msra.mxu0 %v12056_v32  ;;  %12410 = vmatpush1.msra.mxu1 %v12295_v14  ;;  %v12507_v32 = vld [vmem:[#allocation12 + $0x7e0] sm:$0xff]  ;;  %v11552_v14 = vmax.f32 %v17746_v15, %v11524_v41  ;;  %v12300_v15 = vld [vmem:[#allocation12 + $0x6d8] sm:$0xff] }
 0x82f   :  { %12199 = vmatprep.subr.mxu0 %v18524_v50  ;;  %12411 = vmatprep.subr.mxu1 %v18524_v50  ;;  %v12733_v41 = vld [vmem:[#allocation12 + $0x980] sm:$0xff] }
 0x830   :  { %12200 = vmatpush1.msra.mxu0 %v12055_v44  ;;  %12412 = vmatpush1.msra.mxu1 %v12294_v57  ;;  %v12302_v44 = vld [vmem:[#allocation12 + $0x6e8] sm:$0xff]  ;;  %v12491_v57 = vld [vmem:[#allocation12 + $0x760] sm:$0xff] }
 0x831   :  { %12201 = vmatprep.subr.mxu0 %v18524_v50  ;;  %12413 = vmatprep.subr.mxu1 %v18524_v50 }
 0x832   :  { %12202 = vmatpush1.msra.mxu0 %v12054_v37  ;;  %12414 = vmatpush1.msra.mxu1 %v12293_v56  ;;  %v12767_v37 = vcombine.low %v11552_v14, %v11559_v21  ;;  %v12490_v56 = vld [vmem:[#allocation12 + $0x758] sm:$0xff]  ;;  %v12717_v21 = vld [vmem:[#allocation12 + $0x900] sm:$0xff] }
 0x833   :  { %12203 = vmatprep.subr.mxu0 %v18524_v50  ;;  %12415 = vmatprep.subr.mxu1 %v18524_v50  ;;  %v12716_v14 = vld [vmem:[#allocation12 + $0x8f8] sm:$0xff] }
 0x834   :  { %12204 = vmatpush1.msra.mxu0 %v12053_v1  ;;  %12416 = vmatpush1.msra.mxu1 %v12292_v29  ;;  %v12489_v1 = vld [vmem:[#allocation12 + $0x750] sm:$0xff]  ;;  %v12504_v29 = vld [vmem:[#allocation12 + $0x7c8] sm:$0xff]  ;;  %v18112_v16 = vrot.slane %v12767_v37, %v14790_v9 }
 0x835   :  { %12205 = vmatprep.subr.mxu0 %v18524_v50  ;;  %12417 = vmatprep.subr.mxu1 %v18524_v50  ;;  %v12714_v37 = vld [vmem:[#allocation12 + $0x8e8] sm:$0xff] }
 0x836   :  { %12206 = vmatpush1.msra.mxu0 %v12052_v52  ;;  %12418 = vmatpush1.msra.mxu1 %v12291_v55  ;;  %v12299_v52 = vld [vmem:[#allocation12 + $0x6d0] sm:$0xff]  ;;  %v12488_v55 = vld [vmem:[#allocation12 + $0x748] sm:$0xff]  ;;  %v12775_v11 = vcombine.high %v18112_v16, %v18112_v16 }
 0x837   :  { %12207 = vmatprep.subr.mxu0 %v18524_v50  ;;  %12419 = vmatprep.subr.mxu1 %v18524_v50 }
 0x838   :  { %12208 = vmatpush1.msra.mxu0 %v12051_v23  ;;  %12420 = vmatpush1.msra.mxu1 %v12290_v8  ;;  %v12298_v23 = vld [vmem:[#allocation12 + $0x6c8] sm:$0xff]  ;;  %v12487_v8 = vld [vmem:[#allocation12 + $0x740] sm:$0xff] }
 0x839   :  { %12225 = vmatprep.subr.mxu0 %v18524_v50  ;;  %12421 = vmatprep.subr.mxu1 %v18524_v50 }
 0x83a   :  { %12226 = vmatpush2.msra.mxu0 %v12074_v17  ;;  %12422 = vmatpush1.msra.mxu1 %v12289_v38  ;;  %v12297_v17 = vld [vmem:[#allocation12 + $0x6c0] sm:$0xff]  ;;  %v12486_v38 = vld [vmem:[#allocation12 + $0x738] sm:$0xff] }
 0x83b   :  { %12227 = vmatprep.subr.mxu0 %v18524_v50  ;;  %12423 = vmatprep.subr.mxu1 %v18524_v50 }
 0x83c   :  { %12228 = vmatpush2.msra.mxu0 %v12073_v62  ;;  %12424 = vmatpush1.msra.mxu1 %v12288_v46  ;;  %v12330_v62 = vcombine.high %v18051_v13, %v18051_v13  ;;  %v12740_v46 = vld [vmem:[#allocation12 + $0x9b8] sm:$0xff]  ;;  %v12499_v13 = vld [vmem:[#allocation12 + $0x7a0] sm:$0xff] }
 0x83d   :  { %12229 = vmatprep.subr.mxu0 %v18524_v50  ;;  %12425 = vmatprep.subr.mxu1 %v18524_v50 }
 0x83e   :  { %12230 = vmatpush2.msra.mxu0 %v12072_v63  ;;  %12426 = vmatpush1.msra.mxu1 %v12287_v30  ;;  %v12724_v63 = vld [vmem:[#allocation12 + $0x938] sm:$0xff]  ;;  %v18123_v30 = vrot.slane %v12775_v11, %v14790_v9  ;;  %v12709_v11 = vld [vmem:[#allocation12 + $0x8c0] sm:$0xff] }
 0x83f   :  { %12231 = vmatprep.subr.mxu0 %v18524_v50  ;;  %12427 = vmatprep.subr.mxu1 %v18524_v50 }
 0x840   :  { %12232 = vmatpush2.msra.mxu0 %v12071_v27  ;;  %12428 = vmatpush1.msra.mxu1 %v12286_v43  ;;  %v12739_v27 = vld [vmem:[#allocation12 + $0x9b0] sm:$0xff]  ;;  %v12484_v43 = vld [vmem:[#allocation12 + $0x728] sm:$0xff] }
 0x841   :  { %12233 = vmatprep.subr.mxu0 %v18524_v50  ;;  %12429 = vmatprep.subr.mxu1 %v18524_v50 }
 0x842   :  { %12234 = vmatpush2.msra.mxu0 %v12070_v6  ;;  %12430 = vmatpush1.msra.mxu1 %v12285_v12  ;;  %v12723_v6 = vld [vmem:[#allocation12 + $0x930] sm:$0xff]  ;;  %v12738_v12 = vld [vmem:[#allocation12 + $0x9a8] sm:$0xff] }
 0x843   :  { %12235 = vmatprep.subr.mxu0 %v18524_v50  ;;  %12431 = vmatprep.subr.mxu1 %v18524_v50 }
 0x844   :  { %12236 = vmatpush2.msra.mxu0 %v12069_v47  ;;  %12432 = vmatpush1.msra.mxu1 %v12284_v0  ;;  %v12483_v47 = vld [vmem:[#allocation12 + $0x720] sm:$0xff]  ;;  %v12722_v0 = vld [vmem:[#allocation12 + $0x928] sm:$0xff] }
 0x845   :  { %12237 = vmatprep.subr.mxu0 %v18524_v50  ;;  %12433 = vmatprep.subr.mxu1 %v18524_v50 }
 0x846   :  { %12238 = vmatpush2.msra.mxu0 %v12068_v61  ;;  %12434 = vmatpush1.msra.mxu1 %v12283_v5  ;;  %v12737_v61 = vld [vmem:[#allocation12 + $0x9a0] sm:$0xff]  ;;  %v12482_v5 = vld [vmem:[#allocation12 + $0x718] sm:$0xff] }
 0x847   :  { %12239 = vmatprep.subr.mxu0 %v18524_v50  ;;  %12435 = vmatprep.subr.mxu1 %v18524_v50 }
 0x848   :  { %12240 = vmatpush2.msra.mxu0 %v12067_v19  ;;  %12436 = vmatpush1.msra.mxu1 %v12282_v58  ;;  %v12736_v19 = vld [vmem:[#allocation12 + $0x998] sm:$0xff]  ;;  %v12481_v58 = vld [vmem:[#allocation12 + $0x710] sm:$0xff] }
 0x849   :  { %12242 = vmatmul.mubr.f32.vlgmr.msra.gmra.mxu0 %v12100_v22  ;;  %12437 = vmatprep.subr.mxu1 %v18524_v50  ;;  %v12735_v22 = vld [vmem:[#allocation12 + $0x990] sm:$0xff] }
 0x84a   :  { %13591 = vmatprep.subr.mxu0 %v12510_v48  ;;  %12438 = vmatpush1.msra.mxu1 %v12281_v36  ;;  %v12480_v48 = vld [vmem:[#allocation12 + $0x708] sm:$0xff]  ;;  %v12719_v36 = vld [vmem:[#allocation12 + $0x910] sm:$0xff] }
 0x84b   :  { %13592 = vmatpush3.msra.mxu0 %v12494_v7  ;;  %12631 = vmatprep.mubr.f32.mxu0 %v18101_v34  ;;  %v12495_v7 = vld [vmem:[#allocation12 + $0x780] sm:$0xff] }
 0x84c   :  { %12455 = vmatprep.subr.mxu1 %v18524_v50  ;;  %13593 = vmatprep.subr.mxu0 %v12509_v49  ;;  %v12479_v49 = vld [vmem:[#allocation12 + $0x700] sm:$0xff] }
 0x84d   :  { %12456 = vmatpush2.msra.mxu1 %v12304_v53  ;;  %13594 = vmatpush3.msra.mxu0 %v12493_v60  ;;  %v12718_v53 = vld [vmem:[#allocation12 + $0x908] sm:$0xff]  ;;  %v18128_v60 = vrot.slane %v18084_v54, %v14790_v9  ;;  %v12731_v54 = vld [vmem:[#allocation12 + $0x970] sm:$0xff] }
 0x84e   :  { %12457 = vmatprep.subr.mxu1 %v18524_v50  ;;  %13595 = vmatprep.subr.mxu0 %v12508_v39  ;;  %v12526_v39 = vld [vmem:[#allocation12 + $0x878] sm:$0xff] }
 0x84f   :  { %12458 = vmatpush2.msra.mxu1 %v12303_v10  ;;  %13596 = vmatpush3.msra.mxu0 %v12492_v4  ;;  %v12561_v10 = vcombine.high %v18101_v34, %v18101_v34  ;;  %v12732_v4 = vld [vmem:[#allocation12 + $0x978] sm:$0xff]  ;;  %v12730_v34 = vld [vmem:[#allocation12 + $0x968] sm:$0xff] }
 0x850   :  { %12459 = vmatprep.subr.mxu1 %v18524_v50  ;;  %13597 = vmatprep.subr.mxu0 %v12507_v32  ;;  %v12525_v32 = vld [vmem:[#allocation12 + $0x870] sm:$0xff] }
 0x851   :  { %12460 = vmatpush2.msra.mxu1 %v12302_v44  ;;  %13598 = vmatpush3.msra.mxu0 %v12491_v57  ;;  %v12524_v44 = vld [vmem:[#allocation12 + $0x868] sm:$0xff]  ;;  %v12715_v57 = vld [vmem:[#allocation12 + $0x8f0] sm:$0xff] }
 0x852   :  { %12461 = vmatprep.subr.mxu1 %v18524_v50  ;;  %13599 = vmatprep.subr.mxu0 %v12506_v24  ;;  %v12523_v24 = vld [vmem:[#allocation12 + $0x860] sm:$0xff] }
 0x853   :  { %12462 = vmatpush2.msra.mxu1 %v12301_v3  ;;  %13600 = vmatpush3.msra.mxu0 %v12490_v56  ;;  %v12729_v3 = vld [vmem:[#allocation12 + $0x960] sm:$0xff]  ;;  %v12522_v56 = vld [vmem:[#allocation12 + $0x858] sm:$0xff] }
 0x854   :  { %12463 = vmatprep.subr.mxu1 %v18524_v50  ;;  %13601 = vmatprep.subr.mxu0 %v12505_v20  ;;  %v12713_v20 = vld [vmem:[#allocation12 + $0x8e0] sm:$0xff] }
 0x855   :  { %12464 = vmatpush2.msra.mxu1 %v12300_v15  ;;  %13602 = vmatpush3.msra.mxu0 %v12489_v1  ;;  %v12728_v15 = vld [vmem:[#allocation12 + $0x958] sm:$0xff]  ;;  %v12521_v1 = vld [vmem:[#allocation12 + $0x850] sm:$0xff] }
 0x856   :  { %12465 = vmatprep.subr.mxu1 %v18524_v50  ;;  %13603 = vmatprep.subr.mxu0 %v12504_v29  ;;  %v12712_v29 = vld [vmem:[#allocation12 + $0x8d8] sm:$0xff] }
 0x857   :  { %12466 = vmatpush2.msra.mxu1 %v12299_v52  ;;  %13604 = vmatpush3.msra.mxu0 %v12488_v55  ;;  %v12727_v52 = vld [vmem:[#allocation12 + $0x950] sm:$0xff]  ;;  %v12520_v55 = vld [vmem:[#allocation12 + $0x848] sm:$0xff] }
 0x858   :  { %12467 = vmatprep.subr.mxu1 %v18524_v50  ;;  %13605 = vmatprep.subr.mxu0 %v12503_v18  ;;  %v12711_v18 = vld [vmem:[#allocation12 + $0x8d0] sm:$0xff] }
 0x859   :  { %12468 = vmatpush2.msra.mxu1 %v12298_v23  ;;  %13606 = vmatpush3.msra.mxu0 %v12487_v8  ;;  %v12726_v23 = vld [vmem:[#allocation12 + $0x948] sm:$0xff]  ;;  %v12519_v8 = vld [vmem:[#allocation12 + $0x840] sm:$0xff] }
 0x85a   :  { %12469 = vmatprep.subr.mxu1 %v18524_v50  ;;  %13607 = vmatprep.subr.mxu0 %v12502_v25  ;;  %v12710_v25 = vld [vmem:[#allocation12 + $0x8c8] sm:$0xff] }
 0x85b   :  { %12470 = vmatpush2.msra.mxu1 %v12297_v17  ;;  %13608 = vmatpush3.msra.mxu0 %v12486_v38  ;;  %v12725_v17 = vld [vmem:[#allocation12 + $0x940] sm:$0xff]  ;;  %v12518_v38 = vld [vmem:[#allocation12 + $0x838] sm:$0xff] }
 0x85c   :  { %12472 = vmatmul.mubr.f32.vlgmr.msra.gmra.mxu1 %v12330_v62  ;;  %13609 = vmatprep.subr.mxu0 %v12501_v31  ;;  %v18145_v31 = vrot.slane %v18112_v16, %v14790_v9  ;;  %v12517_v62 = vld [vmem:[#allocation12 + $0x830] sm:$0xff]  ;;  %v12515_v16 = vld [vmem:[#allocation12 + $0x820] sm:$0xff] }
 0x85d   :  { %13626 = vmatprep.subr.mxu1 %v12740_v46  ;;  %13610 = vmatpush3.msra.mxu0 %v12485_v45  ;;  %v12756_v46 = vld [vmem:[#allocation12 + $0xa38] sm:$0xff]  ;;  %v12791_v45 = vcombine.high %v18123_v30, %v18123_v30 }
 0x85e   :  { %13627 = vmatpush3.msra.mxu1 %v12724_v63  ;;  %12861 = vmatprep.mubr.f32.mxu1 %v18123_v30  ;;  %v12516_v63 = vld [vmem:[#allocation12 + $0x828] sm:$0xff]  ;;  %v11503_v30 = vpop.permute.xlu1 %11502 }
 0x85f   :  { %13611 = vmatprep.subr.mxu0 %v12500_v40  ;;  %13628 = vmatprep.subr.mxu1 %v12739_v27  ;;  %v12755_v40 = vld [vmem:[#allocation12 + $0xa30] sm:$0xff]  ;;  %v12754_v27 = vld [vmem:[#allocation12 + $0xa28] sm:$0xff] }
 0x860   :  { %13612 = vmatpush3.msra.mxu0 %v12484_v43  ;;  %13629 = vmatpush3.msra.mxu1 %v12723_v6  ;;  %v12514_v43 = vld [vmem:[#allocation12 + $0x818] sm:$0xff]  ;;  %v12753_v6 = vld [vmem:[#allocation12 + $0xa20] sm:$0xff] }
 0x861   :  { %13613 = vmatprep.subr.mxu0 %v12499_v13  ;;  %13630 = vmatprep.subr.mxu1 %v12738_v12  ;;  %v11489_v13 = vpop.permute.xlu0 %11488  ;;  %v12513_v12 = vld [vmem:[#allocation12 + $0x810] sm:$0xff] }
 0x862   :  { %13614 = vmatpush3.msra.mxu0 %v12483_v47  ;;  %13631 = vmatpush3.msra.mxu1 %v12722_v0  ;;  %v12752_v47 = vld [vmem:[#allocation12 + $0xa18] sm:$0xff]  ;;  %v11517_v0 = vrot.slane %v11503_v30, 1 }
 0x863   :  { %13615 = vmatprep.subr.mxu0 %v12498_v35  ;;  %13632 = vmatprep.subr.mxu1 %v12737_v61  ;;  %v12512_v35 = vld [vmem:[#allocation12 + $0x808] sm:$0xff]  ;;  %v12751_v61 = vld [vmem:[#allocation12 + $0xa10] sm:$0xff] }
 0x864   :  { %13616 = vmatpush3.msra.mxu0 %v12482_v5  ;;  %13633 = vmatpush3.msra.mxu1 %v12721_v2  ;;  %v11510_v5 = vrot.slane %v11489_v13, 1  ;;  %v12511_v2 = vld [vmem:[#allocation12 + $0x800] sm:$0xff] }
 0x865   :  { %13617 = vmatprep.subr.mxu0 %v12497_v26  ;;  %13634 = vmatprep.subr.mxu1 %v12736_v19  ;;  %v12750_v26 = vld [vmem:[#allocation12 + $0xa08] sm:$0xff]  ;;  %v11532_v19 = vsel %vm11518_vm8, %v11503_v30, %v11517_v0  ;;  %v12962_v0 = vld [vmem:[#allocation12 + $0xb38] sm:$0xff] }
 0x866   :  { %13618 = vmatpush3.msra.mxu0 %v12481_v58  ;;  %13635 = vmatpush3.msra.mxu1 %v12720_v33  ;;  %v12534_v58 = vld [vmem:[#allocation12 + $0x8b8] sm:$0xff]  ;;  %v12749_v33 = vld [vmem:[#allocation12 + $0xa00] sm:$0xff]  ;;  %v12964_v30 = vld [vmem:[#allocation12 + $0xb48] sm:$0xff] }
 0x867   :  { %13619 = vmatprep.subr.mxu0 %v12496_v42  ;;  %13636 = vmatprep.subr.mxu1 %v12735_v22  ;;  %v11525_v42 = vsel %vm11518_vm8, %v11489_v13, %v11510_v5  ;;  %v11560_v22 = vmax.f32 %v17807_v51, %v11532_v19  ;;  %v12531_v51 = vld [vmem:[#allocation12 + $0x8a0] sm:$0xff]  ;;  %v12961_v5 = vld [vmem:[#allocation12 + $0xb30] sm:$0xff]  ;;  %v12960_v19 = vld [vmem:[#allocation12 + $0xb28] sm:$0xff] }
 0x868   :  { %13620 = vmatpush3.msra.mxu0 %v12480_v48  ;;  %13637 = vmatpush3.msra.mxu1 %v12719_v36  ;;  %v12533_v48 = vld [vmem:[#allocation12 + $0x8b0] sm:$0xff]  ;;  %v12748_v36 = vld [vmem:[#allocation12 + $0x9f8] sm:$0xff]  ;;  %v12963_v13 = vld [vmem:[#allocation12 + $0xb40] sm:$0xff] }
 0x869   :  { %13621 = vmatprep.subr.mxu0 %v12495_v7  ;;  %13638 = vmatprep.subr.mxu1 %v12734_v59  ;;  %v11553_v7 = vmax.f32 %v17750_v28, %v11525_v42  ;;  %v12532_v59 = vld [vmem:[#allocation12 + $0x8a8] sm:$0xff]  ;;  %v12530_v28 = vld [vmem:[#allocation12 + $0x898] sm:$0xff]  ;;  %v12943_v42 = vld [vmem:[#allocation12 + $0xaa0] sm:$0xff] }
 0x86a   :  { %13622 = vmatpush3.msra.mxu0 %v12479_v49  ;;  %13639 = vmatpush3.msra.mxu1 %v12718_v53  ;;  %v12747_v49 = vld [vmem:[#allocation12 + $0x9f0] sm:$0xff] }
 0x86b   :  { %12632 = vmatmul.mubr.f32.vlgmr.msra.gmra.mxu0 %v18128_v60  ;;  %12637 = vmatprep.subr.mxu0 %v18524_v50  ;;  %v12997_v53 = vcombine.low %v11553_v7, %v11560_v22  ;;  %v12958_v22 = vld [vmem:[#allocation12 + $0xb18] sm:$0xff]  ;;  %v12941_v7 = vld [vmem:[#allocation12 + $0xa90] sm:$0xff] }
 0x86c   :  { %13640 = vmatprep.subr.mxu1 %v12733_v41  ;;  %12638 = vmatpush1.msra.mxu0 %v12526_v39  ;;  %v12746_v41 = vld [vmem:[#allocation12 + $0x9e8] sm:$0xff]  ;;  %v12745_v39 = vld [vmem:[#allocation12 + $0x9e0] sm:$0xff] }
 0x86d   :  { %13446 = vmatprep.mubr.msk.f32.mxu0 %vm6885_vm6, %v12561_v10  ;;  %13641 = vmatpush3.msra.mxu1 %v12717_v21  ;;  %v18178_v10 = vrot.slane %v12997_v53, %v14790_v9  ;;  %v12940_v53 = vld [vmem:[#allocation12 + $0xa88] sm:$0xff] }
 0x86e   :  { %12639 = vmatprep.subr.mxu0 %v18524_v50  ;;  %13642 = vmatprep.subr.mxu1 %v12732_v4  ;;  %v12529_v4 = vld [vmem:[#allocation12 + $0x890] sm:$0xff] }
 0x86f   :  { %12640 = vmatpush1.msra.mxu0 %v12525_v32  ;;  %13643 = vmatpush3.msra.mxu1 %v12716_v14  ;;  %v12744_v32 = vld [vmem:[#allocation12 + $0x9d8] sm:$0xff] }
 0x870   :  { %12641 = vmatprep.subr.mxu0 %v18524_v50  ;;  %13644 = vmatprep.subr.mxu1 %v12731_v54 }
 0x871   :  { %12642 = vmatpush1.msra.mxu0 %v12524_v44  ;;  %13645 = vmatpush3.msra.mxu1 %v12715_v57  ;;  %v12528_v44 = vld [vmem:[#allocation12 + $0x888] sm:$0xff]  ;;  %v12743_v57 = vld [vmem:[#allocation12 + $0x9d0] sm:$0xff] }
 0x872   :  { %12643 = vmatprep.subr.mxu0 %v18524_v50  ;;  %13646 = vmatprep.subr.mxu1 %v12730_v34 }
 0x873   :  { %12644 = vmatpush1.msra.mxu0 %v12523_v24  ;;  %13647 = vmatpush3.msra.mxu1 %v12714_v37  ;;  %v12527_v37 = vld [vmem:[#allocation12 + $0x880] sm:$0xff] }
 0x874   :  { %12645 = vmatprep.subr.mxu0 %v18524_v50  ;;  %13648 = vmatprep.subr.mxu1 %v12729_v3  ;;  %v12742_v3 = vld [vmem:[#allocation12 + $0x9c8] sm:$0xff] }
 0x875   :  { %12646 = vmatpush1.msra.mxu0 %v12522_v56  ;;  %13649 = vmatpush3.msra.mxu1 %v12713_v20  ;;  %v13005_v56 = vcombine.high %v18178_v10, %v18178_v10 }
 0x876   :  { %12647 = vmatprep.subr.mxu0 %v18524_v50  ;;  %13650 = vmatprep.subr.mxu1 %v12728_v15  ;;  %v12560_v15 = vcombine.high %v18128_v60, %v18128_v60  ;;  %v12968_v60 = vld [vmem:[#allocation12 + $0xb68] sm:$0xff] }
 0x877   :  { %12648 = vmatpush1.msra.mxu0 %v12521_v1  ;;  %13651 = vmatpush3.msra.mxu1 %v12712_v29  ;;  %v12970_v1 = vld [vmem:[#allocation12 + $0xb78] sm:$0xff]  ;;  %v12741_v29 = vld [vmem:[#allocation12 + $0x9c0] sm:$0xff] }
 0x878   :  { %12649 = vmatprep.subr.mxu0 %v18524_v50  ;;  %13652 = vmatprep.subr.mxu1 %v12727_v52  ;;  %v12954_v52 = vld [vmem:[#allocation12 + $0xaf8] sm:$0xff] }
 0x879   :  { %12650 = vmatpush1.msra.mxu0 %v12520_v55  ;;  %13653 = vmatpush3.msra.mxu1 %v12711_v18  ;;  %v18196_v55 = vrot.slane %v13005_v56, %v14790_v9  ;;  %v12969_v18 = vld [vmem:[#allocation12 + $0xb70] sm:$0xff]  ;;  %v12978_v56 = vld [vmem:[#allocation12 + $0xbb8] sm:$0xff] }
 0x87a   :  { %12651 = vmatprep.subr.mxu0 %v18524_v50  ;;  %13654 = vmatprep.subr.mxu1 %v12726_v23  ;;  %v12764_v23 = vld [vmem:[#allocation12 + $0xa78] sm:$0xff] }
 0x87b   :  { %12652 = vmatpush1.msra.mxu0 %v12519_v8  ;;  %13655 = vmatpush3.msra.mxu1 %v12710_v25  ;;  %v12953_v8 = vld [vmem:[#allocation12 + $0xaf0] sm:$0xff] }
 0x87c   :  { %12653 = vmatprep.subr.mxu0 %v18524_v50  ;;  %13656 = vmatprep.subr.mxu1 %v12725_v17  ;;  %v12763_v25 = vld [vmem:[#allocation12 + $0xa70] sm:$0xff]  ;;  %v12952_v17 = vld [vmem:[#allocation12 + $0xae8] sm:$0xff] }
 0x87d   :  { %12654 = vmatpush1.msra.mxu0 %v12518_v38  ;;  %13657 = vmatpush3.msra.mxu1 %v12709_v11  ;;  %v12967_v38 = vld [vmem:[#allocation12 + $0xb60] sm:$0xff]  ;;  %v12762_v11 = vld [vmem:[#allocation12 + $0xa68] sm:$0xff] }
 0x87e   :  { %12655 = vmatprep.subr.mxu0 %v18524_v50  ;;  %12862 = vmatmul.mubr.f32.vlgmr.msra.gmra.mxu1 %v18145_v31 }
 0x87f   :  { %12867 = vmatprep.subr.mxu1 %v18524_v50  ;;  %12656 = vmatpush1.msra.mxu0 %v12517_v62  ;;  %v12951_v62 = vld [vmem:[#allocation12 + $0xae0] sm:$0xff] }
 0x880   :  { %12868 = vmatpush1.msra.mxu1 %v12756_v46  ;;  %13447 = vmatprep.mubr.msk.f32.mxu1 %vm6885_vm6, %v12791_v45  ;;  %v12966_v46 = vld [vmem:[#allocation12 + $0xb58] sm:$0xff]  ;;  %v12761_v45 = vld [vmem:[#allocation12 + $0xa60] sm:$0xff] }
 0x881   :  { %12657 = vmatprep.subr.mxu0 %v18524_v50  ;;  %12869 = vmatprep.subr.mxu1 %v18524_v50 }
 0x882   :  { %12658 = vmatpush1.msra.mxu0 %v12516_v63  ;;  %12870 = vmatpush1.msra.mxu1 %v12755_v40  ;;  %v12950_v63 = vld [vmem:[#allocation12 + $0xad8] sm:$0xff]  ;;  %v12965_v40 = vld [vmem:[#allocation12 + $0xb50] sm:$0xff] }
 0x883   :  { %12659 = vmatprep.subr.mxu0 %v18524_v50  ;;  %12871 = vmatprep.subr.mxu1 %v18524_v50 }
 0x884   :  { %12660 = vmatpush1.msra.mxu0 %v12515_v16  ;;  %12872 = vmatpush1.msra.mxu1 %v12754_v27  ;;  %v12760_v16 = vld [vmem:[#allocation12 + $0xa58] sm:$0xff]  ;;  %v12949_v27 = vld [vmem:[#allocation12 + $0xad0] sm:$0xff] }
 0x885   :  { %12661 = vmatprep.subr.mxu0 %v18524_v50  ;;  %12873 = vmatprep.subr.mxu1 %v18524_v50 }
 0x886   :  { %12662 = vmatpush1.msra.mxu0 %v12514_v43  ;;  %12874 = vmatpush1.msra.mxu1 %v12753_v6  ;;  %v12759_v43 = vld [vmem:[#allocation12 + $0xa50] sm:$0xff]  ;;  %v12948_v6 = vld [vmem:[#allocation12 + $0xac8] sm:$0xff] }
 0x887   :  { %12663 = vmatprep.subr.mxu0 %v18524_v50  ;;  %12875 = vmatprep.subr.mxu1 %v18524_v50 }
 0x888   :  { %12664 = vmatpush1.msra.mxu0 %v12513_v12  ;;  %12876 = vmatpush1.msra.mxu1 %v12752_v47  ;;  %v12758_v12 = vld [vmem:[#allocation12 + $0xa48] sm:$0xff]  ;;  %v12947_v47 = vld [vmem:[#allocation12 + $0xac0] sm:$0xff] }
 0x889   :  { %12665 = vmatprep.subr.mxu0 %v18524_v50  ;;  %12877 = vmatprep.subr.mxu1 %v18524_v50 }
 0x88a   :  { %12666 = vmatpush1.msra.mxu0 %v12512_v35  ;;  %12878 = vmatpush1.msra.mxu1 %v12751_v61  ;;  %v12757_v35 = vld [vmem:[#allocation12 + $0xa40] sm:$0xff]  ;;  %v12946_v61 = vld [vmem:[#allocation12 + $0xab8] sm:$0xff] }
 0x88b   :  { %12667 = vmatprep.subr.mxu0 %v18524_v50  ;;  %12879 = vmatprep.subr.mxu1 %v18524_v50 }
 0x88c   :  { %12668 = vmatpush1.msra.mxu0 %v12511_v2  ;;  %12880 = vmatpush1.msra.mxu1 %v12750_v26  ;;  %v12790_v2 = vcombine.high %v18145_v31, %v18145_v31  ;;  %v12945_v26 = vld [vmem:[#allocation12 + $0xab0] sm:$0xff] }
 0x88d   :  { %12685 = vmatprep.subr.mxu0 %v18524_v50  ;;  %12881 = vmatprep.subr.mxu1 %v18524_v50 }
 0x88e   :  { %12686 = vmatpush2.msra.mxu0 %v12534_v58  ;;  %12882 = vmatpush1.msra.mxu1 %v12749_v33  ;;  %v12944_v58 = vld [vmem:[#allocation12 + $0xaa8] sm:$0xff]  ;;  %v12959_v33 = vld [vmem:[#allocation12 + $0xb20] sm:$0xff] }
 0x88f   :  { %12687 = vmatprep.subr.mxu0 %v18524_v50  ;;  %12883 = vmatprep.subr.mxu1 %v18524_v50 }
 0x890   :  { %12688 = vmatpush2.msra.mxu0 %v12533_v48  ;;  %12884 = vmatpush1.msra.mxu1 %v12748_v36  ;;  %v12942_v48 = vld [vmem:[#allocation12 + $0xa98] sm:$0xff]  ;;  %v12957_v36 = vld [vmem:[#allocation12 + $0xb10] sm:$0xff] }
 0x891   :  { %12689 = vmatprep.subr.mxu0 %v18524_v50  ;;  %12885 = vmatprep.subr.mxu1 %v18524_v50 }
 0x892   :  { %12690 = vmatpush2.msra.mxu0 %v12532_v59  ;;  %12886 = vmatpush1.msra.mxu1 %v12747_v49  ;;  %v12956_v59 = vld [vmem:[#allocation12 + $0xb08] sm:$0xff] }
 0x893   :  { %12691 = vmatprep.subr.mxu0 %v18524_v50  ;;  %12887 = vmatprep.subr.mxu1 %v18524_v50 }
 0x894   :  { %12692 = vmatpush2.msra.mxu0 %v12531_v51  ;;  %12888 = vmatpush1.msra.mxu1 %v12746_v41  ;;  %v13483_v21 = vpop.f32.mrf.mxu0  ;;  %v12955_v41 = vld [vmem:[#allocation12 + $0xb00] sm:$0xff] }
 0x895   :  { %12693 = vmatprep.subr.mxu0 %v18524_v50  ;;  %12889 = vmatprep.subr.mxu1 %v18524_v50 }
 0x896   :  { %12694 = vmatpush2.msra.mxu0 %v12530_v28  ;;  %12890 = vmatpush1.msra.mxu1 %v12745_v39  ;;  %v13484_v14 = vpop.f32.mrf.mxu0  ;;  %v11842_v54 = vpop.f32.mrf.mxu1  ;;  %v12939_v28 = vld [vmem:[#allocation12 + $0xa80] sm:$0xff] }
 0x897   :  { %12695 = vmatprep.subr.mxu0 %v18524_v50  ;;  %12891 = vmatprep.subr.mxu1 %v18524_v50  ;;  %v13485_v34 = vadd.f32 %v13484_v14, %v13483_v21  ;;  %v18213_v21 = vrot.slane %v18178_v10, %v14790_v9  ;;  %v12985_v14 = vld [vmem:[#allocation12 + $0xbf0] sm:$0xff]  ;;  %v12983_v9 = vld [vmem:[#allocation12 + $0xbe0] sm:$0xff]  ;;  %v12982_v10 = vld [vmem:[#allocation12 + $0xbd8] sm:$0xff] }
 0x898   :  { %12696 = vmatpush2.msra.mxu0 %v12529_v4  ;;  %12892 = vmatpush1.msra.mxu1 %v12744_v32  ;;  %v11844_v24 = vpop.f32.mrf.mxu1  ;;  %v12986_v4 = vld [vmem:[#allocation12 + $0xbf8] sm:$0xff]  ;;  %v13021_v32 = vcombine.high %v18196_v55, %v18196_v55 }
 0x899   :  { %12697 = vmatprep.subr.mxu0 %v18524_v50  ;;  %12893 = vmatprep.subr.mxu1 %v18524_v50  ;;  %v18188_v20 = vadd.f32 %v13485_v34, %v11842_v54  ;;  %v12984_v54 = vld [vmem:[#allocation12 + $0xbe8] sm:$0xff] }
 0x89a   :  { %12698 = vmatpush2.msra.mxu0 %v12528_v44  ;;  %12894 = vmatpush1.msra.mxu1 %v12743_v57  ;;  %v12981_v44 = vld [vmem:[#allocation12 + $0xbd0] sm:$0xff]  ;;  %v12980_v57 = vld [vmem:[#allocation12 + $0xbc8] sm:$0xff] }
 0x89b   :  { %12699 = vmatprep.subr.mxu0 %v18524_v50  ;;  %12895 = vmatprep.subr.mxu1 %v18524_v50 }
 0x89c   :  { %12700 = vmatpush2.msra.mxu0 %v12527_v37  ;;  %12896 = vmatpush1.msra.mxu1 %v12742_v3  ;;  %v12979_v37 = vld [vmem:[#allocation12 + $0xbc0] sm:$0xff] }
 0x89d   :  { %12702 = vmatmul.mubr.f32.vlgmr.msra.gmra.mxu0 %v12560_v15  ;;  %12897 = vmatprep.subr.mxu1 %v18524_v50  ;;  %v12976_v15 = vld [vmem:[#allocation12 + $0xba8] sm:$0xff] }
 0x89e   :  { %13661 = vmatprep.subr.mxu0 %v12970_v1  ;;  %12898 = vmatpush1.msra.mxu1 %v12741_v29  ;;  %v12975_v1 = vld [vmem:[#allocation12 + $0xba0] sm:$0xff]  ;;  %v12974_v29 = vld [vmem:[#allocation12 + $0xb98] sm:$0xff] }
 0x89f   :  { %13662 = vmatpush3.msra.mxu0 %v12954_v52  ;;  %13091 = vmatprep.mubr.f32.mxu0 %v18196_v55  ;;  %v12973_v52 = vld [vmem:[#allocation12 + $0xb90] sm:$0xff] }
 0x8a0   :  { %12915 = vmatprep.subr.mxu1 %v18524_v50  ;;  %13663 = vmatprep.subr.mxu0 %v12969_v18  ;;  %v12972_v18 = vld [vmem:[#allocation12 + $0xb88] sm:$0xff] }
 0x8a1   :  { %12916 = vmatpush2.msra.mxu1 %v12764_v23  ;;  %13664 = vmatpush3.msra.mxu0 %v12953_v8  ;;  %v12971_v8 = vld [vmem:[#allocation12 + $0xb80] sm:$0xff] }
 0x8a2   :  { %12917 = vmatprep.subr.mxu1 %v18524_v50  ;;  %13665 = vmatprep.subr.mxu0 %v12968_v60 }
 0x8a3   :  { %12918 = vmatpush2.msra.mxu1 %v12763_v25  ;;  %13666 = vmatpush3.msra.mxu0 %v12952_v17  ;;  %v12994_v25 = vld [vmem:[#allocation12 + $0xc38] sm:$0xff]  ;;  %v12993_v17 = vld [vmem:[#allocation12 + $0xc30] sm:$0xff] }
 0x8a4   :  { %12919 = vmatprep.subr.mxu1 %v18524_v50  ;;  %13667 = vmatprep.subr.mxu0 %v12967_v38  ;;  %v12992_v38 = vld [vmem:[#allocation12 + $0xc28] sm:$0xff] }
 0x8a5   :  { %12920 = vmatpush2.msra.mxu1 %v12762_v11  ;;  %13668 = vmatpush3.msra.mxu0 %v12951_v62  ;;  %v12991_v11 = vld [vmem:[#allocation12 + $0xc20] sm:$0xff]  ;;  %v12990_v62 = vld [vmem:[#allocation12 + $0xc18] sm:$0xff] }
 0x8a6   :  { %12921 = vmatprep.subr.mxu1 %v18524_v50  ;;  %13669 = vmatprep.subr.mxu0 %v12966_v46  ;;  %v12989_v46 = vld [vmem:[#allocation12 + $0xc10] sm:$0xff] }
 0x8a7   :  { %12922 = vmatpush2.msra.mxu1 %v12761_v45  ;;  %13670 = vmatpush3.msra.mxu0 %v12950_v63  ;;  %v12988_v45 = vld [vmem:[#allocation12 + $0xc08] sm:$0xff]  ;;  %v12987_v63 = vld [vmem:[#allocation12 + $0xc00] sm:$0xff] }
 0x8a8   :  { %12923 = vmatprep.subr.mxu1 %v18524_v50  ;;  %13671 = vmatprep.subr.mxu0 %v12965_v40 }
 0x8a9   :  { %12924 = vmatpush2.msra.mxu1 %v12760_v16  ;;  %13672 = vmatpush3.msra.mxu0 %v12949_v27  ;;  %v13020_v16 = vcombine.high %v18213_v21, %v18213_v21 }
 0x8aa   :  { %12925 = vmatprep.subr.mxu1 %v18524_v50  ;;  %13673 = vmatprep.subr.mxu0 %v12964_v30 }
 0x8ab   :  { %12926 = vmatpush2.msra.mxu1 %v12759_v43  ;;  %13674 = vmatpush3.msra.mxu0 %v12948_v6  ;;  %v13192_v43 = vld [vmem:[#allocation15 + $0x78] sm:$0xff]  ;;  %v13191_v6 = vld [vmem:[#allocation15 + $0x70] sm:$0xff] }
 0x8ac   :  { %12927 = vmatprep.subr.mxu1 %v18524_v50  ;;  %13675 = vmatprep.subr.mxu0 %v12963_v13  ;;  %v13190_v13 = vld [vmem:[#allocation15 + $0x68] sm:$0xff] }
 0x8ad   :  { %12928 = vmatpush2.msra.mxu1 %v12758_v12  ;;  %13676 = vmatpush3.msra.mxu0 %v12947_v47  ;;  %v13189_v12 = vld [vmem:[#allocation15 + $0x60] sm:$0xff]  ;;  %v13188_v47 = vld [vmem:[#allocation15 + $0x58] sm:$0xff] }
 0x8ae   :  { %12929 = vmatprep.subr.mxu1 %v18524_v50  ;;  %13677 = vmatprep.subr.mxu0 %v12962_v0 }
 0x8af   :  { %12930 = vmatpush2.msra.mxu1 %v12757_v35  ;;  %13678 = vmatpush3.msra.mxu0 %v12946_v61  ;;  %v13187_v35 = vld [vmem:[#allocation15 + $0x50] sm:$0xff] }
 0x8b0   :  { %12932 = vmatmul.mubr.f32.vlgmr.msra.gmra.mxu1 %v12790_v2  ;;  %13679 = vmatprep.subr.mxu0 %v12961_v5  ;;  %v13186_v2 = vld [vmem:[#allocation15 + $0x48] sm:$0xff] }
 0x8b1   :  { %13680 = vmatpush3.msra.mxu0 %v12945_v26  ;;  %13713 = vmatprep.subr.mxu1 %v18524_v50 }
 0x8b2   :  { %13681 = vmatprep.subr.mxu0 %v12960_v19  ;;  %13714 = vmatpush3.msra.mxu1 %v13192_v43  ;;  %v13185_v19 = vld [vmem:[#allocation15 + $0x40] sm:$0xff] }
 0x8b3   :  { %13682 = vmatpush3.msra.mxu0 %v12944_v58  ;;  %13715 = vmatprep.subr.mxu1 %v18524_v50  ;;  %v13184_v58 = vld [vmem:[#allocation15 + $0x38] sm:$0xff] }
 0x8b4   :  { %13683 = vmatprep.subr.mxu0 %v12959_v33  ;;  %13716 = vmatpush3.msra.mxu1 %v13191_v6  ;;  %v13183_v33 = vld [vmem:[#allocation15 + $0x30] sm:$0xff] }
 0x8b5   :  { %13684 = vmatpush3.msra.mxu0 %v12943_v42  ;;  %v13518_v31 = vpop.f32.mrf.mxu0  ;;  %13717 = vmatprep.subr.mxu1 %v18524_v50  ;;  %v13182_v42 = vld [vmem:[#allocation15 + $0x28] sm:$0xff] }
 0x8b6   :  { %13685 = vmatprep.subr.mxu0 %v12958_v22  ;;  %13718 = vmatpush3.msra.mxu1 %v13190_v13 }
 0x8b7   :  { %13686 = vmatpush3.msra.mxu0 %v12942_v48  ;;  %v13519_v49 = vpop.f32.mrf.mxu0  ;;  %13719 = vmatprep.subr.mxu1 %v18524_v50 }
 0x8b8   :  { %13687 = vmatprep.subr.mxu0 %v12957_v36  ;;  %v13520_v51 = vadd.f32 %v13519_v49, %v13518_v31  ;;  %13720 = vmatpush3.msra.mxu1 %v13189_v12 }
 0x8b9   :  { %13688 = vmatpush3.msra.mxu0 %v12941_v7  ;;  %13721 = vmatprep.subr.mxu1 %v18524_v50 }
 0x8ba   :  { %13689 = vmatprep.subr.mxu0 %v12956_v59  ;;  %v11945_v39 = vadd.f32 %v13520_v51, %v18188_v20  ;;  %v12977_v20 = vld [vmem:[#allocation12 + $0xbb0] sm:$0xff]  ;;  %13722 = vmatpush3.msra.mxu1 %v13188_v47  ;;  %v13180_v51 = vld [vmem:[#allocation15 + $0x18] sm:$0xff] }
 0x8bb   :  { %13690 = vmatpush3.msra.mxu0 %v12940_v53  ;;  %13723 = vmatprep.subr.mxu1 %v18524_v50  ;;  %v13181_v53 = vld [vmem:[#allocation15 + $0x20] sm:$0xff] }
 0x8bc   :  { %13691 = vmatprep.subr.mxu0 %v12955_v41  ;;  %13724 = vmatpush3.msra.mxu1 %v13187_v35  ;;  %v13179_v41 = vld [vmem:[#allocation15 + $0x10] sm:$0xff] }
 0x8bd   :  { %13692 = vmatpush3.msra.mxu0 %v12939_v28  ;;  %13725 = vmatprep.subr.mxu1 %v18524_v50  ;;  %v13178_v28 = vld [vmem:[#allocation15 + $0x8] sm:$0xff] }
 0x8be   :  { %13092 = vmatmul.mubr.f32.vlgmr.msra.gmra.mxu0 %v18213_v21  ;;  %13097 = vmatprep.subr.mxu0 %v18524_v50 }
 0x8bf   :  { %13098 = vmatpush1.msra.mxu0 %v12986_v4  ;;  %13448 = vmatprep.mubr.msk.f32.mxu0 %vm6885_vm6, %v13021_v32 }
 0x8c0   :  { %13099 = vmatprep.subr.mxu0 %v18524_v50  ;;  %13726 = vmatpush3.msra.mxu1 %v13186_v2 }
 0x8c1   :  { %13100 = vmatpush1.msra.mxu0 %v12985_v14  ;;  %13727 = vmatprep.subr.mxu1 %v18524_v50 }
 0x8c2   :  { %13101 = vmatprep.subr.mxu0 %v18524_v50  ;;  %13728 = vmatpush3.msra.mxu1 %v13185_v19 }
 0x8c3   :  { %13102 = vmatpush1.msra.mxu0 %v12984_v54  ;;  %13729 = vmatprep.subr.mxu1 %v18524_v50 }
 0x8c4   :  { %13103 = vmatprep.subr.mxu0 %v18524_v50  ;;  %13730 = vmatpush3.msra.mxu1 %v13184_v58 }
 0x8c5   :  { %13104 = vmatpush1.msra.mxu0 %v12983_v9  ;;  %13731 = vmatprep.subr.mxu1 %v18524_v50 }
 0x8c6   :  { %13105 = vmatprep.subr.mxu0 %v18524_v50  ;;  %13732 = vmatpush3.msra.mxu1 %v13183_v33 }
 0x8c7   :  { %13106 = vmatpush1.msra.mxu0 %v12982_v10  ;;  %13733 = vmatprep.subr.mxu1 %v18524_v50 }
 0x8c8   :  { %13107 = vmatprep.subr.mxu0 %v18524_v50  ;;  %v12014_v34 = vpop.f32.mrf.mxu1  ;;  %13734 = vmatpush3.msra.mxu1 %v13182_v42 }
 0x8c9   :  { %13108 = vmatpush1.msra.mxu0 %v12981_v44  ;;  %v18225_v24 = vadd.f32 %v12014_v34, %v11945_v39  ;;  %13735 = vmatprep.subr.mxu1 %v18524_v50  ;;  %v13177_v39 = vld [vmem:[#allocation15] sm:$0xff] }
 0x8ca   :  { %13109 = vmatprep.subr.mxu0 %v18524_v50  ;;  %v12016_v3 = vpop.f32.mrf.mxu1  ;;  %13736 = vmatpush3.msra.mxu1 %v13181_v53 }
 0x8cb   :  { %13110 = vmatpush1.msra.mxu0 %v12980_v57  ;;  %13745 = vmatprep.mubr.msk.f32.mxu1 %vm14702_vm9, %v18524_v50 }
 0x8cc   :  { %13111 = vmatprep.subr.mxu0 %v18524_v50  ;;  %13737 = vmatprep.subr.mxu1 %v18524_v50 }
 0x8cd   :  { %13112 = vmatpush1.msra.mxu0 %v12979_v37  ;;  %13738 = vmatpush3.msra.mxu1 %v13180_v51 }
 0x8ce   :  { %13113 = vmatprep.subr.mxu0 %v18524_v50  ;;  %13739 = vmatprep.subr.mxu1 %v18524_v50 }
 0x8cf   :  { %13114 = vmatpush1.msra.mxu0 %v12978_v56  ;;  %13740 = vmatpush3.msra.mxu1 %v13179_v41 }
 0x8d0   :  { %13115 = vmatprep.subr.mxu0 %v18524_v50  ;;  %13741 = vmatprep.subr.mxu1 %v18524_v50 }
 0x8d1   :  { %13116 = vmatpush1.msra.mxu0 %v12977_v20  ;;  %13742 = vmatpush3.msra.mxu1 %v13178_v28 }
 0x8d2   :  { %13117 = vmatprep.subr.mxu0 %v18524_v50  ;;  %13743 = vmatprep.subr.mxu1 %v18524_v50 }
 0x8d3   :  { %13118 = vmatpush1.msra.mxu0 %v12976_v15  ;;  %13744 = vmatpush3.msra.mxu1 %v13177_v39 }
 0x8d4   :  { %13119 = vmatprep.subr.mxu0 %v18524_v50 }
 0x8d5   :  { %13120 = vmatpush1.msra.mxu0 %v12975_v1  ;;  %v13449_v1 = vld [vmem:[#allocation13] ss:$0 sm:$0xff] }
 0x8d6   :  { %13121 = vmatprep.subr.mxu0 %v18524_v50 }
 0x8d7   :  { %13122 = vmatpush1.msra.mxu0 %v12974_v29  ;;  %v13553_v55 = vpop.f32.mrf.mxu0 }
 0x8d8   :  { %13123 = vmatprep.subr.mxu0 %v18524_v50 }
 0x8d9   :  { %13124 = vmatpush1.msra.mxu0 %v12973_v52  ;;  %v13554_v23 = vpop.f32.mrf.mxu0 }
 0x8da   :  { %13125 = vmatprep.subr.mxu0 %v18524_v50  ;;  %v13555_v60 = vadd.f32 %v13554_v23, %v13553_v55 }
 0x8db   :  { %13126 = vmatpush1.msra.mxu0 %v12972_v18  ;;  %v13450_v18 = vld [vmem:[#allocation16] ss:$0 sm:$0xff] }
 0x8dc   :  { %13127 = vmatprep.subr.mxu0 %v18524_v50 }
 0x8dd   :  { %13128 = vmatpush1.msra.mxu0 %v12971_v8 }
 0x8de   :  { %13145 = vmatprep.subr.mxu0 %v18524_v50 }
 0x8df   :  { %13146 = vmatpush2.msra.mxu0 %v12994_v25 }
 0x8e0   :  { %13147 = vmatprep.subr.mxu0 %v18524_v50 }
 0x8e1   :  { %13148 = vmatpush2.msra.mxu0 %v12993_v17 }
 0x8e2   :  { %13149 = vmatprep.subr.mxu0 %v18524_v50 }
 0x8e3   :  { %13150 = vmatpush2.msra.mxu0 %v12992_v38 }
 0x8e4   :  { %13151 = vmatprep.subr.mxu0 %v18524_v50 }
 0x8e5   :  { %13152 = vmatpush2.msra.mxu0 %v12991_v11 }
 0x8e6   :  { %13153 = vmatprep.subr.mxu0 %v18524_v50 }
 0x8e7   :  { %13154 = vmatpush2.msra.mxu0 %v12990_v62 }
 0x8e8   :  { %13155 = vmatprep.subr.mxu0 %v18524_v50 }
 0x8e9   :  { %13156 = vmatpush2.msra.mxu0 %v12989_v46 }
 0x8ea   :  { %13157 = vmatprep.subr.mxu0 %v18524_v50  ;;  %v13588_v40 = vpop.f32.mrf.mxu1 }
 0x8eb   :  { %13158 = vmatpush2.msra.mxu0 %v12988_v45 }
 0x8ec   :  { %13159 = vmatprep.subr.mxu0 %v18524_v50  ;;  %v13589_v27 = vpop.f32.mrf.mxu1 }
 0x8ed   :  { %13160 = vmatpush2.msra.mxu0 %v12987_v63  ;;  %v13590_v30 = vadd.f32 %v13589_v27, %v13588_v40 }
 0x8ee   :  { %13162 = vmatmul.mubr.f32.vlgmr.msra.gmra.mxu0 %v13020_v16 }
 0x909   :  { %v12243_v0 = vpop.f32.mrf.mxu0 }
 0x90a   :  { %v12244_v61 = vadd.f32 %v13555_v60, %v12243_v0 }
 0x90b   :  { %v12245_v5 = vpop.f32.mrf.mxu0 }
 0x90c   :  { %v12247_v26 = vadd.f32 %v12244_v61, %v18225_v24 }
 0x91c   :  { %v12473_v22 = vpop.f32.mrf.mxu1 }
 0x91d   :  { %v12474_v48 = vadd.f32 %v13590_v30, %v12473_v22 }
 0x91e   :  { %v12475_v36 = vpop.f32.mrf.mxu1 }
 0x91f   :  { %v12477_v31 = vadd.f32 %v12474_v48, %v12247_v26 }
 0x92b   :  { %v13623_v7 = vpop.f32.mrf.mxu0 }
 0x92d   :  { %v13624_v59 = vpop.f32.mrf.mxu0 }
 0x92e   :  { %v13625_v49 = vadd.f32 %v13624_v59, %v13623_v7 }
 0x93e   :  { %v13658_v54 = vpop.f32.mrf.mxu1 }
 0x940   :  { %v13659_v9 = vpop.f32.mrf.mxu1 }
 0x941   :  { %v13660_v34 = vadd.f32 %v13659_v9, %v13658_v54 }
 0x95d   :  { %v12703_v21 = vpop.f32.mrf.mxu0 }
 0x95e   :  { %v12704_v4 = vadd.f32 %v13625_v49, %v12703_v21 }
 0x95f   :  { %v12705_v32 = vpop.f32.mrf.mxu0 }
 0x960   :  { %v12707_v14 = vadd.f32 %v12704_v4, %v12477_v31 }
 0x970   :  { %v12933_v10 = vpop.f32.mrf.mxu1 }
 0x971   :  { %v12934_v37 = vadd.f32 %v13660_v34, %v12933_v10 }
 0x972   :  { %v12935_v44 = vpop.f32.mrf.mxu1 }
 0x973   :  { %v12937_v20 = vadd.f32 %v12934_v37, %v12707_v14 }
 0x97e   :  { %v13693_v57 = vpop.f32.mrf.mxu0 }
 0x980   :  { %v13694_v24 = vpop.f32.mrf.mxu0 }
 0x981   :  { %v13695_v3 = vadd.f32 %v13694_v24, %v13693_v57 }
 0x9ae   :  { %v13163_v56 = vpop.f32.mrf.mxu0 }
 0x9af   :  { %v13164_v15 = vadd.f32 %v13695_v3, %v13163_v56 }
 0x9b0   :  { %v13165_v29 = vpop.f32.mrf.mxu0 }
 0x9b1   :  { %v13167_v50 = vadd.f32 %v13164_v15, %v12937_v20 }
 0x9b3   :  { %v13175_v52 = vadd.f32 %v13449_v1, %v13167_v50 }
 0x9b5   :  { %v13176_v55 = vmax.f32 %v13175_v52, 0.0 }
 0x9b7   :  { %13746 = vmatmul.mubr.f32.vlgmr.msra.gmra.mxu1 %v13176_v55 }
 0xa77   :  { %v13266_v23 = vpop.f32.mrf.mxu1 }
 0xa78   :  { %v13267_v8 = vadd.f32 %v13450_v18, %v13266_v23 }
 0xa79   :  { %v13747_v60 = vpop.f32.mrf.mxu1 }
 0xa7a   :  { %13270 = vst [vmem:[#allocation18] sm:$0x3] %v13267_v8 }
 0xa7b   :  { %14664 = shalt.err (!%p14661_p2)
}
 0xa7c   :  { %13280 = dma.vmem_to_hbm [thread:$0]  %s13278_s20, 32, %s18276_s9, [#allocation6]  }
 0xa7d   :  { %14683 = dma.done.wait [#allocation6], 32  }
 0xa7e   :  { %14684 = vsyncadd [#allocation6], 4294967264 }
 0xa7f   :  { %13284 = vsyncpa [#allocation5], 1 }
 0xa80   :  { %13285 = vsyncpa [#allocation8], 1 }
 0xa81   :  { %13286 = vsyncpa [#allocation11], 1 }
 0xa82   :  { %13287 = vsyncpa [#allocation14], 1 }
 0xa83   :  { %13288 = vsyncpa [#allocation17], 1 }
 0xa84   :  { %13289 = vsyncpa [#allocation6], 1 }

</bundles_post_ra>
